<compile_context>
chip_gen: v6e
topology: v6e:2x2x1
jax: 0.10.0
libtpu: 0.0.40
codegen_flags: <defaults>
</compile_context>

<pallas_src>
import math

import numpy as np
import jax
import jax.numpy as jnp
from jax.experimental import pallas as pl
from jax.experimental.pallas import tpu as pltpu

LEAK = 0.2
BN_EPS = 1e-5
POOL = 6
POOL_COLS = 128          # pooled features padded to a lane-dense 128 columns


def _round_up(v, m):
    return (v + m - 1) // m * m


# ---------------------------------------------------------------------------
# Kernel 1: conv blocks + stride/pool selection (one image per grid step)
# ---------------------------------------------------------------------------
def _make_conv_kernel(n_blocks, wp_list):
    """wp_list[i] = padded row width of block i's input grid (static)."""

    def kernel(*refs):
        it = iter(refs)
        x_ref = next(it)                       # (1, Cin0p, Lp0) padded flat image
        mask_ref = next(it)                    # (1, Lp0)        interior mask
        conv = [(next(it), next(it)) for _ in range(n_blocks)]   # (W9, bias)
        trans = [next(it) for _ in range(n_blocks - 1)]
        o_ref = next(it)                       # (1, C_last, POOL_COLS)

        act = x_ref[0]                         # (Cin_p, Lp) f32, zero pad ring
        for i in range(n_blocks):
            w9_ref, bi_ref = conv[i]
            wp = wp_list[i]
            L = act.shape[1]

            # 3x3 'same' conv: 9 rolled copies (XLU) stacked along the
            # contraction axis (sublane-aligned) -> ONE MXU matmul per block.
            taps = []
            for dh in (-1, 0, 1):
                for dw in (-1, 0, 1):
                    off = dh * wp + dw
                    taps.append(act if off == 0
                                else pltpu.roll(act, shift=(-off) % L, axis=1))
            x9 = jnp.concatenate(taps, axis=0)                   # (9*Cin_p, L)

            # conv (+ folded eval-mode BN scale) + bias + LeakyReLU(0.2)
            y = jnp.dot(w9_ref[...], x9,
                        preferred_element_type=jnp.float32) + bi_ref[...]
            y = jnp.maximum(y, LEAK * y)

            if i == 0:
                act = y * mask_ref[...]        # stride 1: re-zero the pad ring
            else:
                # stride-2 subsample + re-pad (last block: also the fused
                # AdaptiveAvgPool2d((6,6))) as one selection-matrix matmul.
                act = jnp.dot(y.astype(jnp.bfloat16), trans[i - 1][...],
                              preferred_element_type=jnp.float32)

        o_ref[0] = act                         # (C_last, POOL_COLS) pooled feats

    return kernel


# ---------------------------------------------------------------------------
# Kernel 2: fc1 + LeakyReLU + fc2 for the whole batch at once
# ---------------------------------------------------------------------------
def _fc_kernel(x_ref, w1_ref, b1_ref, w2_ref, b2_ref, o_ref):
    h = jnp.dot(x_ref[...], w1_ref[...],
                preferred_element_type=jnp.float32) + b1_ref[...]
    h = jnp.maximum(h, LEAK * h)                                 # LeakyReLU(0.2)
    o_ref[...] = jnp.dot(h, w2_ref[...],
                         preferred_element_type=jnp.float32) + b2_ref[...]


# ---------------------------------------------------------------------------
# Host-side constant builders (deterministic numpy, built once)
# ---------------------------------------------------------------------------
def _interior_mask(hw, lp_flat):
    h, w = hw
    m = np.zeros((h + 2, w + 2), np.float32)
    m[1:1 + h, 1:1 + w] = 1.0
    out = np.zeros((1, lp_flat), np.float32)
    out[0, :m.size] = m.reshape(-1)
    return out


def _stride_select_matrix(in_hw, out_hw, stride, lp_src, lp_dst):
    """Picks the stride-`stride` conv outputs out of the full-resolution padded
    grid and drops them into the interior of the next block's padded grid."""
    wp_src, wp_dst = in_hw[1] + 2, out_hw[1] + 2
    t = np.zeros((lp_src, lp_dst), np.float32)
    for oh in range(out_hw[0]):
        for ow in range(out_hw[1]):
            t[(stride * oh + 1) * wp_src + (stride * ow + 1),
              (oh + 1) * wp_dst + (ow + 1)] = 1.0
    return t


def _stride_pool_matrix(in_hw, out_hw, stride, pool, lp_src, cols):
    """Stride-`stride` subsample of the last conv fused with the (divisible)
    AdaptiveAvgPool2d((pool, pool)); output columns are in (h, w) flatten
    order, lane-padded to `cols`."""
    assert out_hw[0] % pool == 0 and out_hw[1] % pool == 0, \
        "only the divisible adaptive-pool case is supported"
    # TODO(synk): non-divisible adaptive-pool bin boundaries are not handled.
    fh, fw = out_hw[0] // pool, out_hw[1] // pool
    wp_src = in_hw[1] + 2
    p = np.zeros((lp_src, cols), np.float32)
    for oh in range(out_hw[0]):
        for ow in range(out_hw[1]):
            p[(stride * oh + 1) * wp_src + (stride * ow + 1),
              (oh // fh) * pool + (ow // fw)] = 1.0 / (fh * fw)
    return p


# ---------------------------------------------------------------------------
# Full forward pass
# ---------------------------------------------------------------------------
def discriminator_forward(params, imgs_nchw):
    imgs = jnp.asarray(imgs_nchw, jnp.float32)
    n, cin0, h, w = imgs.shape
    convs, strides = params["convs"], params["strides"]
    n_blocks = len(convs)
    assert n_blocks >= 2

    # static shape bookkeeping ------------------------------------------------
    in_hw = [(h, w)]
    for s in strides:                       # 'same' padding: out = ceil(in / s)
        ih, iw = in_hw[-1]
        in_hw.append((-(-ih // s), -(-iw // s)))
    lp = [_round_up((ih + 2) * (iw + 2), 128) for ih, iw in in_hw[:n_blocks]]
    wp_list = [iw + 2 for _, iw in in_hw[:n_blocks]]
    c_last = convs[-1]["w"].shape[0]
    fc = params["b1"].shape[0]
    assert params["w1"].shape == (c_last * POOL * POOL, fc)
    assert params["w2"].shape[0] == fc      # reference hard-codes fc2 = Linear(1024, 1)
    for blk in convs[:-1]:                  # tile-aligned tap stacking
        assert blk["w"].shape[0] % 8 == 0, \
            "intermediate channel counts must be multiples of 8"

    # conv-call operands --------------------------------------------------------
    args, specs = [], []

    def _add(a, spec):
        args.append(a)
        specs.append(spec)

    def _const(a):                           # weight stays resident across the grid
        nd = a.ndim
        return pl.BlockSpec(a.shape, lambda nn, _nd=nd: (0,) * _nd)

    # image -> channel-padded (to 8), zero-ring-padded, lane-flattened input
    cin0_p = _round_up(cin0, 8)
    xf = jnp.pad(imgs, ((0, 0), (0, cin0_p - cin0), (1, 1), (1, 1)))
    xf = xf.reshape(n, cin0_p, -1)
    xf = jnp.pad(xf, ((0, 0), (0, 0), (0, lp[0] - xf.shape[-1])))
    _add(xf, pl.BlockSpec((1, cin0_p, lp[0]), lambda nn: (nn, 0, 0)))
    m0 = jnp.asarray(_interior_mask(in_hw[0], lp[0]))
    _add(m0, _const(m0))

    # conv taps stacked along the contraction axis + folded eval-mode BN
    for bi, blk in enumerate(convs):
        wconv = blk["w"]                                   # (Cout, Cin, K, K)
        cout, cin, k, _ = wconv.shape
        cin_p = cin0_p if bi == 0 else cin
        scale = blk["gamma"] / jnp.sqrt(blk["run_var"] + BN_EPS)
        bias = blk["beta"] + (blk["conv_b"] - blk["run_mean"]) * scale
        w9 = jnp.transpose(wconv, (0, 2, 3, 1))            # (Cout, K, K, Cin)
        w9 = jnp.pad(w9, ((0, 0), (0, 0), (0, 0), (0, cin_p - cin)))
        w9 = (w9.reshape(cout, k * k * cin_p) * scale[:, None]).astype(jnp.float32)
        b9 = bias.reshape(cout, 1).astype(jnp.float32)
        _add(w9, _const(w9))
        _add(b9, _const(b9))

    # fused stride-2 / pooling selection matrices (entries 0/1/0.25: exact bf16)
    for i in range(1, n_blocks):
        if i < n_blocks - 1:
            t = _stride_select_matrix(in_hw[i], in_hw[i + 1], strides[i],
                                      lp[i], lp[i + 1])
        else:
            t = _stride_pool_matrix(in_hw[i], in_hw[i + 1], strides[i],
                                    POOL, lp[i], POOL_COLS)
        tb = jnp.asarray(t, jnp.bfloat16)
        _add(tb, _const(tb))

    feats = pl.pallas_call(
        _make_conv_kernel(n_blocks, wp_list),
        out_shape=jax.ShapeDtypeStruct((n, c_last, POOL_COLS), jnp.float32),
        grid=(n,),
        in_specs=specs,
        out_specs=pl.BlockSpec((1, c_last, POOL_COLS), lambda nn: (nn, 0, 0)),
        compiler_params=pltpu.CompilerParams(
            dimension_semantics=("parallel",),
            vmem_limit_bytes=32 * 1024 * 1024,
        ),
    )(*args)

    # torch flatten order (C, h, w); only the first POOL*POOL columns are real.
    x_fc = feats[:, :, :POOL * POOL].reshape(n, c_last * POOL * POOL)

    # fc1 + LeakyReLU + fc2, whole batch in one call (amortises the
    # weight-push-bound fc1 matmul over the batch).
    w1 = params["w1"].astype(jnp.float32)                 # (feat, fc)
    b1 = params["b1"].reshape(1, fc).astype(jnp.float32)
    w2 = params["w2"].astype(jnp.float32)                 # (fc, 1)
    b2 = params["b2"].reshape(1, 1).astype(jnp.float32)

    def _full(a):
        nd = a.ndim
        return pl.BlockSpec(a.shape, lambda _nd=nd: (0,) * _nd)

    logits = pl.pallas_call(
        _fc_kernel,
        out_shape=jax.ShapeDtypeStruct((n, 1), jnp.float32),
        in_specs=[_full(a) for a in (x_fc, w1, b1, w2, b2)],
        out_specs=pl.BlockSpec((n, 1), lambda: (0, 0)),
        compiler_params=pltpu.CompilerParams(
            vmem_limit_bytes=16 * 1024 * 1024,
        ),
    )(x_fc, w1, b1, w2, b2)
    return logits


# ---------------------------------------------------------------------------
# Parameter construction (deterministic, synthetic, PyTorch-shaped)
# ---------------------------------------------------------------------------
def init_params(key, kernel_size=3, n_channels=8, n_blocks=3, fc_size=1024):
    convs, strides = [], []
    in_ch, out_ch = 3, 3
    for i in range(n_blocks):
        out_ch = (n_channels if i == 0 else in_ch * 2) if i % 2 == 0 else in_ch
        stride = 1 if i == 0 else 2
        key, kw_, kb_, kg_, kt_ = jax.random.split(key, 5)
        bound = 1.0 / math.sqrt(in_ch * kernel_size * kernel_size)
        convs.append({
            # PyTorch Conv2d weight layout (Cout, Cin, K, K) + bias.
            "w": jax.random.uniform(kw_, (out_ch, in_ch, kernel_size, kernel_size),
                                    jnp.float32, -bound, bound),
            "conv_b": jax.random.uniform(kb_, (out_ch,), jnp.float32, -bound, bound),
            # BatchNorm is attached to every block (see fidelity notes above);
            # PyTorch-default running stats (mean 0, var 1).
            "gamma": 1.0 + 0.1 * jax.random.normal(kg_, (out_ch,), jnp.float32),
            "beta": 0.1 * jax.random.normal(kt_, (out_ch,), jnp.float32),
            "run_mean": jnp.zeros((out_ch,), jnp.float32),
            "run_var": jnp.ones((out_ch,), jnp.float32),
        })
        strides.append(stride)
        in_ch = out_ch

    feat = out_ch * POOL * POOL
    key, k1, k2, k3, k4 = jax.random.split(key, 5)
    b1d, b2d = 1.0 / math.sqrt(feat), 1.0 / math.sqrt(1024)
    return {
        "convs": convs, "strides": strides,
        # fc layers stored as (in_features, out_features): y = x @ w + b.
        "w1": jax.random.uniform(k1, (feat, fc_size), jnp.float32, -b1d, b1d),
        "b1": jax.random.uniform(k2, (fc_size,), jnp.float32, -b1d, b1d),
        "w2": jax.random.uniform(k3, (1024, 1), jnp.float32, -b2d, b2d),
        "b2": jax.random.uniform(k4, (1,), jnp.float32, -b2d, b2d),
    }


if __name__ == "__main__":
    key = jax.random.PRNGKey(0)
    pkey, xkey = jax.random.split(key)

    # Small config consistent with the module: kernel_size=3, n_channels=8,
    # n_blocks=3, fc_size=1024 (fc2 input is hard-coded to 1024 in the
    # reference).  Input: batch=2, 3 channels, 48x48 spatial (pool-divisible).
    params = init_params(pkey, kernel_size=3, n_channels=8, n_blocks=3,
                         fc_size=1024)
    imgs = jax.random.normal(xkey, (2, 3, 48, 48), jnp.float32)

    logits = discriminator_forward(params, imgs)
    jax.block_until_ready(logits)
    assert logits.shape == (2, 1) and logits.dtype == jnp.float32
    print("KERNEL_OK")
</pallas_src>

<mosaic_0001>
module attributes {stable_mosaic.version = 11 : i64} {
  func.func @kernel(%arg0: i32, %arg1: memref<1x8x2560xf32, #tpu.memory_space<vmem>>, %arg2: memref<1x2560xf32, #tpu.memory_space<vmem>>, %arg3: memref<8x72xf32, #tpu.memory_space<vmem>>, %arg4: memref<8x1xf32, #tpu.memory_space<vmem>>, %arg5: memref<8x72xf32, #tpu.memory_space<vmem>>, %arg6: memref<8x1xf32, #tpu.memory_space<vmem>>, %arg7: memref<16x72xf32, #tpu.memory_space<vmem>>, %arg8: memref<16x1xf32, #tpu.memory_space<vmem>>, %arg9: memref<2560x768xbf16, #tpu.memory_space<vmem>>, %arg10: memref<768x128xbf16, #tpu.memory_space<vmem>>, %arg11: memref<1x16x128xf32, #tpu.memory_space<vmem>>) attributes {dimension_semantics = [#tpu.dimension_semantics<parallel>], iteration_bounds = array<i64: 2>, scalar_prefetch = 0 : i64, scratch_operands = 0 : i64, tpu.core_type = #tpu.core_type<tc>, window_params = [{transform_indices = @transform_0, window_bounds = array<i64: 1, 8, 2560>}, {pipeline_mode = #tpu.pipeline_mode<synchronous>, transform_indices = @transform_1, window_bounds = array<i64: 1, 2560>}, {pipeline_mode = #tpu.pipeline_mode<synchronous>, transform_indices = @transform_2, window_bounds = array<i64: 8, 72>}, {pipeline_mode = #tpu.pipeline_mode<synchronous>, transform_indices = @transform_3, window_bounds = array<i64: 8, 1>}, {pipeline_mode = #tpu.pipeline_mode<synchronous>, transform_indices = @transform_4, window_bounds = array<i64: 8, 72>}, {pipeline_mode = #tpu.pipeline_mode<synchronous>, transform_indices = @transform_5, window_bounds = array<i64: 8, 1>}, {pipeline_mode = #tpu.pipeline_mode<synchronous>, transform_indices = @transform_6, window_bounds = array<i64: 16, 72>}, {pipeline_mode = #tpu.pipeline_mode<synchronous>, transform_indices = @transform_7, window_bounds = array<i64: 16, 1>}, {pipeline_mode = #tpu.pipeline_mode<synchronous>, transform_indices = @transform_8, window_bounds = array<i64: 2560, 768>}, {pipeline_mode = #tpu.pipeline_mode<synchronous>, transform_indices = @transform_9, window_bounds = array<i64: 768, 128>}, {transform_indices = @transform_10, window_bounds = array<i64: 1, 16, 128>}]} {
    %c0 = arith.constant 0 : index
    %c0_0 = arith.constant 0 : index
    %c0_1 = arith.constant 0 : index
    %0 = vector.load %arg1[%c0, %c0_0, %c0_1] : memref<1x8x2560xf32, #tpu.memory_space<vmem>>, vector<1x8x2560xf32>
    %1 = vector.shape_cast %0 : vector<1x8x2560xf32> to vector<8x2560xf32>
    %c51_i32 = arith.constant 51 : i32
    %2 = tpu.dynamic_rotate %1 by %c51_i32 dim 1 : vector<8x2560xf32>, i32 -> vector<8x2560xf32>
    %c50_i32 = arith.constant 50 : i32
    %3 = tpu.dynamic_rotate %1 by %c50_i32 dim 1 : vector<8x2560xf32>, i32 -> vector<8x2560xf32>
    %c49_i32 = arith.constant 49 : i32
    %4 = tpu.dynamic_rotate %1 by %c49_i32 dim 1 : vector<8x2560xf32>, i32 -> vector<8x2560xf32>
    %c1_i32 = arith.constant 1 : i32
    %5 = tpu.dynamic_rotate %1 by %c1_i32 dim 1 : vector<8x2560xf32>, i32 -> vector<8x2560xf32>
    %c2559_i32 = arith.constant 2559 : i32
    %6 = tpu.dynamic_rotate %1 by %c2559_i32 dim 1 : vector<8x2560xf32>, i32 -> vector<8x2560xf32>
    %c2511_i32 = arith.constant 2511 : i32
    %7 = tpu.dynamic_rotate %1 by %c2511_i32 dim 1 : vector<8x2560xf32>, i32 -> vector<8x2560xf32>
    %c2510_i32 = arith.constant 2510 : i32
    %8 = tpu.dynamic_rotate %1 by %c2510_i32 dim 1 : vector<8x2560xf32>, i32 -> vector<8x2560xf32>
    %c2509_i32 = arith.constant 2509 : i32
    %9 = tpu.dynamic_rotate %1 by %c2509_i32 dim 1 : vector<8x2560xf32>, i32 -> vector<8x2560xf32>
    %10 = tpu.concatenate %2, %3, %4, %5, %1, %6, %7, %8, %9 in 0 : vector<8x2560xf32>, vector<8x2560xf32>, vector<8x2560xf32>, vector<8x2560xf32>, vector<8x2560xf32>, vector<8x2560xf32>, vector<8x2560xf32>, vector<8x2560xf32>, vector<8x2560xf32> -> vector<72x2560xf32>
    %c0_2 = arith.constant 0 : index
    %c0_3 = arith.constant 0 : index
    %11 = vector.load %arg3[%c0_2, %c0_3] : memref<8x72xf32, #tpu.memory_space<vmem>>, vector<8x72xf32>
    %cst = arith.constant dense<0.000000e+00> : vector<8x2560xf32>
    %12 = tpu.matmul %11, %10, %cst {dimension_numbers = #tpu.dot_dimension_numbers<[1], [0], [0], [1], [0, 0, 1, 1], [], []>} : vector<8x72xf32>, vector<72x2560xf32>, vector<8x2560xf32> -> vector<8x2560xf32>
    %c0_4 = arith.constant 0 : index
    %c0_5 = arith.constant 0 : index
    %13 = vector.load %arg4[%c0_4, %c0_5] : memref<8x1xf32, #tpu.memory_space<vmem>>, vector<8x1xf32>
    %14 = vector.broadcast %13 : vector<8x1xf32> to vector<8x2560xf32>
    %15 = arith.addf %12, %14 : vector<8x2560xf32>
    %cst_6 = arith.constant 2.000000e-01 : f32
    %16 = vector.broadcast %cst_6 : f32 to vector<8x2560xf32>
    %17 = arith.mulf %16, %15 : vector<8x2560xf32>
    %18 = arith.maximumf %15, %17 : vector<8x2560xf32>
    %c0_7 = arith.constant 0 : index
    %c0_8 = arith.constant 0 : index
    %19 = vector.load %arg2[%c0_7, %c0_8] : memref<1x2560xf32, #tpu.memory_space<vmem>>, vector<1x2560xf32>
    %20 = vector.broadcast %19 : vector<1x2560xf32> to vector<8x2560xf32>
    %21 = arith.mulf %18, %20 : vector<8x2560xf32>
    %c51_i32_9 = arith.constant 51 : i32
    %22 = tpu.dynamic_rotate %21 by %c51_i32_9 dim 1 : vector<8x2560xf32>, i32 -> vector<8x2560xf32>
    %c50_i32_10 = arith.constant 50 : i32
    %23 = tpu.dynamic_rotate %21 by %c50_i32_10 dim 1 : vector<8x2560xf32>, i32 -> vector<8x2560xf32>
    %c49_i32_11 = arith.constant 49 : i32
    %24 = tpu.dynamic_rotate %21 by %c49_i32_11 dim 1 : vector<8x2560xf32>, i32 -> vector<8x2560xf32>
    %c1_i32_12 = arith.constant 1 : i32
    %25 = tpu.dynamic_rotate %21 by %c1_i32_12 dim 1 : vector<8x2560xf32>, i32 -> vector<8x2560xf32>
    %c2559_i32_13 = arith.constant 2559 : i32
    %26 = tpu.dynamic_rotate %21 by %c2559_i32_13 dim 1 : vector<8x2560xf32>, i32 -> vector<8x2560xf32>
    %c2511_i32_14 = arith.constant 2511 : i32
    %27 = tpu.dynamic_rotate %21 by %c2511_i32_14 dim 1 : vector<8x2560xf32>, i32 -> vector<8x2560xf32>
    %c2510_i32_15 = arith.constant 2510 : i32
    %28 = tpu.dynamic_rotate %21 by %c2510_i32_15 dim 1 : vector<8x2560xf32>, i32 -> vector<8x2560xf32>
    %c2509_i32_16 = arith.constant 2509 : i32
    %29 = tpu.dynamic_rotate %21 by %c2509_i32_16 dim 1 : vector<8x2560xf32>, i32 -> vector<8x2560xf32>
    %30 = tpu.concatenate %22, %23, %24, %25, %21, %26, %27, %28, %29 in 0 : vector<8x2560xf32>, vector<8x2560xf32>, vector<8x2560xf32>, vector<8x2560xf32>, vector<8x2560xf32>, vector<8x2560xf32>, vector<8x2560xf32>, vector<8x2560xf32>, vector<8x2560xf32> -> vector<72x2560xf32>
    %c0_17 = arith.constant 0 : index
    %c0_18 = arith.constant 0 : index
    %31 = vector.load %arg5[%c0_17, %c0_18] : memref<8x72xf32, #tpu.memory_space<vmem>>, vector<8x72xf32>
    %cst_19 = arith.constant dense<0.000000e+00> : vector<8x2560xf32>
    %32 = tpu.matmul %31, %30, %cst_19 {dimension_numbers = #tpu.dot_dimension_numbers<[1], [0], [0], [1], [0, 0, 1, 1], [], []>} : vector<8x72xf32>, vector<72x2560xf32>, vector<8x2560xf32> -> vector<8x2560xf32>
    %c0_20 = arith.constant 0 : index
    %c0_21 = arith.constant 0 : index
    %33 = vector.load %arg6[%c0_20, %c0_21] : memref<8x1xf32, #tpu.memory_space<vmem>>, vector<8x1xf32>
    %34 = vector.broadcast %33 : vector<8x1xf32> to vector<8x2560xf32>
    %35 = arith.addf %32, %34 : vector<8x2560xf32>
    %cst_22 = arith.constant 2.000000e-01 : f32
    %36 = vector.broadcast %cst_22 : f32 to vector<8x2560xf32>
    %37 = arith.mulf %36, %35 : vector<8x2560xf32>
    %38 = arith.maximumf %35, %37 : vector<8x2560xf32>
    %39 = arith.truncf %38 : vector<8x2560xf32> to vector<8x2560xbf16>
    %c0_23 = arith.constant 0 : index
    %c0_24 = arith.constant 0 : index
    %40 = vector.load %arg9[%c0_23, %c0_24] : memref<2560x768xbf16, #tpu.memory_space<vmem>>, vector<2560x768xbf16>
    %cst_25 = arith.constant dense<0.000000e+00> : vector<8x768xf32>
    %41 = tpu.matmul %39, %40, %cst_25 {dimension_numbers = #tpu.dot_dimension_numbers<[1], [0], [0], [1], [0, 0, 1, 1], [], []>} : vector<8x2560xbf16>, vector<2560x768xbf16>, vector<8x768xf32> -> vector<8x768xf32>
    %c27_i32 = arith.constant 27 : i32
    %42 = tpu.dynamic_rotate %41 by %c27_i32 dim 1 : vector<8x768xf32>, i32 -> vector<8x768xf32>
    %c26_i32 = arith.constant 26 : i32
    %43 = tpu.dynamic_rotate %41 by %c26_i32 dim 1 : vector<8x768xf32>, i32 -> vector<8x768xf32>
    %c25_i32 = arith.constant 25 : i32
    %44 = tpu.dynamic_rotate %41 by %c25_i32 dim 1 : vector<8x768xf32>, i32 -> vector<8x768xf32>
    %c1_i32_26 = arith.constant 1 : i32
    %45 = tpu.dynamic_rotate %41 by %c1_i32_26 dim 1 : vector<8x768xf32>, i32 -> vector<8x768xf32>
    %c767_i32 = arith.constant 767 : i32
    %46 = tpu.dynamic_rotate %41 by %c767_i32 dim 1 : vector<8x768xf32>, i32 -> vector<8x768xf32>
    %c743_i32 = arith.constant 743 : i32
    %47 = tpu.dynamic_rotate %41 by %c743_i32 dim 1 : vector<8x768xf32>, i32 -> vector<8x768xf32>
    %c742_i32 = arith.constant 742 : i32
    %48 = tpu.dynamic_rotate %41 by %c742_i32 dim 1 : vector<8x768xf32>, i32 -> vector<8x768xf32>
    %c741_i32 = arith.constant 741 : i32
    %49 = tpu.dynamic_rotate %41 by %c741_i32 dim 1 : vector<8x768xf32>, i32 -> vector<8x768xf32>
    %50 = tpu.concatenate %42, %43, %44, %45, %41, %46, %47, %48, %49 in 0 : vector<8x768xf32>, vector<8x768xf32>, vector<8x768xf32>, vector<8x768xf32>, vector<8x768xf32>, vector<8x768xf32>, vector<8x768xf32>, vector<8x768xf32>, vector<8x768xf32> -> vector<72x768xf32>
    %c0_27 = arith.constant 0 : index
    %c0_28 = arith.constant 0 : index
    %51 = vector.load %arg7[%c0_27, %c0_28] : memref<16x72xf32, #tpu.memory_space<vmem>>, vector<16x72xf32>
    %cst_29 = arith.constant dense<0.000000e+00> : vector<16x768xf32>
    %52 = tpu.matmul %51, %50, %cst_29 {dimension_numbers = #tpu.dot_dimension_numbers<[1], [0], [0], [1], [0, 0, 1, 1], [], []>} : vector<16x72xf32>, vector<72x768xf32>, vector<16x768xf32> -> vector<16x768xf32>
    %c0_30 = arith.constant 0 : index
    %c0_31 = arith.constant 0 : index
    %53 = vector.load %arg8[%c0_30, %c0_31] : memref<16x1xf32, #tpu.memory_space<vmem>>, vector<16x1xf32>
    %54 = vector.broadcast %53 : vector<16x1xf32> to vector<16x768xf32>
    %55 = arith.addf %52, %54 : vector<16x768xf32>
    %cst_32 = arith.constant 2.000000e-01 : f32
    %56 = vector.broadcast %cst_32 : f32 to vector<16x768xf32>
    %57 = arith.mulf %56, %55 : vector<16x768xf32>
    %58 = arith.maximumf %55, %57 : vector<16x768xf32>
    %59 = arith.truncf %58 : vector<16x768xf32> to vector<16x768xbf16>
    %c0_33 = arith.constant 0 : index
    %c0_34 = arith.constant 0 : index
    %60 = vector.load %arg10[%c0_33, %c0_34] : memref<768x128xbf16, #tpu.memory_space<vmem>>, vector<768x128xbf16>
    %cst_35 = arith.constant dense<0.000000e+00> : vector<16x128xf32>
    %61 = tpu.matmul %59, %60, %cst_35 {dimension_numbers = #tpu.dot_dimension_numbers<[1], [0], [0], [1], [0, 0, 1, 1], [], []>} : vector<16x768xbf16>, vector<768x128xbf16>, vector<16x128xf32> -> vector<16x128xf32>
    %c0_36 = arith.constant 0 : index
    %c0_37 = arith.constant 0 : index
    %c0_38 = arith.constant 0 : index
    %62 = vector.load %arg11[%c0_36, %c0_37, %c0_38] : memref<1x16x128xf32, #tpu.memory_space<vmem>>, vector<1x16x128xf32>
    %63 = vector.shape_cast %62 : vector<1x16x128xf32> to vector<16x128xf32>
    %64 = vector.shape_cast %61 : vector<16x128xf32> to vector<1x16x128xf32>
    tpu.vector_store %arg11[%c0_36, %c0_37, %c0_38], %64 {strides = array<i32>} : memref<1x16x128xf32, #tpu.memory_space<vmem>>, vector<1x16x128xf32>,
    return
  }
  func.func @transform_0(%arg0: i32) -> (i32, i32, i32) {
    %c0_i32 = arith.constant 0 : i32
    %c0_i32_0 = arith.constant 0 : i32
    %c0_i32_1 = arith.constant 0 : i32
    return %arg0, %c0_i32, %c0_i32_0 : i32, i32, i32
  }
  func.func @transform_1(%arg0: i32) -> (i32, i32) {
    %c0_i32 = arith.constant 0 : i32
    %c0_i32_0 = arith.constant 0 : i32
    %c0_i32_1 = arith.constant 0 : i32
    return %c0_i32, %c0_i32_0 : i32, i32
  }
  func.func @transform_2(%arg0: i32) -> (i32, i32) {
    %c0_i32 = arith.constant 0 : i32
    %c0_i32_0 = arith.constant 0 : i32
    %c0_i32_1 = arith.constant 0 : i32
    return %c0_i32, %c0_i32_0 : i32, i32
  }
  func.func @transform_3(%arg0: i32) -> (i32, i32) {
    %c0_i32 = arith.constant 0 : i32
    %c0_i32_0 = arith.constant 0 : i32
    %c0_i32_1 = arith.constant 0 : i32
    return %c0_i32, %c0_i32_0 : i32, i32
  }
  func.func @transform_4(%arg0: i32) -> (i32, i32) {
    %c0_i32 = arith.constant 0 : i32
    %c0_i32_0 = arith.constant 0 : i32
    %c0_i32_1 = arith.constant 0 : i32
    return %c0_i32, %c0_i32_0 : i32, i32
  }
  func.func @transform_5(%arg0: i32) -> (i32, i32) {
    %c0_i32 = arith.constant 0 : i32
    %c0_i32_0 = arith.constant 0 : i32
    %c0_i32_1 = arith.constant 0 : i32
    return %c0_i32, %c0_i32_0 : i32, i32
  }
  func.func @transform_6(%arg0: i32) -> (i32, i32) {
    %c0_i32 = arith.constant 0 : i32
    %c0_i32_0 = arith.constant 0 : i32
    %c0_i32_1 = arith.constant 0 : i32
    return %c0_i32, %c0_i32_0 : i32, i32
  }
  func.func @transform_7(%arg0: i32) -> (i32, i32) {
    %c0_i32 = arith.constant 0 : i32
    %c0_i32_0 = arith.constant 0 : i32
    %c0_i32_1 = arith.constant 0 : i32
    return %c0_i32, %c0_i32_0 : i32, i32
  }
  func.func @transform_8(%arg0: i32) -> (i32, i32) {
    %c0_i32 = arith.constant 0 : i32
    %c0_i32_0 = arith.constant 0 : i32
    %c0_i32_1 = arith.constant 0 : i32
    return %c0_i32, %c0_i32_0 : i32, i32
  }
  func.func @transform_9(%arg0: i32) -> (i32, i32) {
    %c0_i32 = arith.constant 0 : i32
    %c0_i32_0 = arith.constant 0 : i32
    %c0_i32_1 = arith.constant 0 : i32
    return %c0_i32, %c0_i32_0 : i32, i32
  }
  func.func @transform_10(%arg0: i32) -> (i32, i32, i32) {
    %c0_i32 = arith.constant 0 : i32
    %c0_i32_0 = arith.constant 0 : i32
    %c0_i32_1 = arith.constant 0 : i32
    return %arg0, %c0_i32, %c0_i32_0 : i32, i32, i32
  }
}

</mosaic_0001>

<bundles_post_ra>
// kernel: tpu_custom_call.1
= control target key start
LH: loop header
LB: loop body
LE: loop exit
PB: predicated region body
PF: predicated region fallthrough
CT: control target
= control target key end

     0   :  { %s17204_s0 = inlined_call_operand.hbm [shape: f32[2,8,2560], index: 0, kind: input, shape index: {}]   ;;  %s17205_s1 = inlined_call_operand.hbm [shape: f32[1,2560], index: 1, kind: input, shape index: {}]   ;;  %s17206_s2 = inlined_call_operand.hbm [shape: f32[8,72], index: 2, kind: input, shape index: {}]   ;;  %s17207_s3 = inlined_call_operand.vmem [shape: f32[8,1], index: 3, kind: input, shape index: {}]   ;;  %s17208_s4 = inlined_call_operand.hbm [shape: f32[8,72], index: 4, kind: input, shape index: {}]   ;;  %s17209_s5 = inlined_call_operand.vmem [shape: f32[8,1], index: 5, kind: input, shape index: {}]   ;;  %s17210_s6 = inlined_call_operand.hbm [shape: f32[16,72], index: 6, kind: input, shape index: {}]   ;;  %s17211_s7 = inlined_call_operand.vmem [shape: f32[16,1], index: 7, kind: input, shape index: {}]   ;;  %s17212_s8 = inlined_call_operand.hbm [shape: bf16[2560,768], index: 8, kind: input, shape index: {}]   ;;  %s17213_s9 = inlined_call_operand.hbm [shape: bf16[768,128], index: 9, kind: input, shape index: {}]   ;;  %s17214_s10 = inlined_call_operand.hbm [shape: f32[2,16,128], index: 10, kind: output, shape index: {}]  }
   0x1   :  { %17233 = sst [smem:[#allocation31_spill]] %s17205_s1 }
   0x2   :  { %17234 = sst [smem:[#allocation32_spill]] %s17206_s2 }
   0x3   :  { %17235 = sst [smem:[#allocation33_spill]] %s17208_s4 }
   0x4   :  { %17236 = sst [smem:[#allocation34_spill]] %s17210_s6 }
   0x5   :  { %17237 = sst [smem:[#allocation35_spill]] %s17212_s8 }
   0x6   :  { %15 = vsyncpa [#allocation3], 0 }
   0x7   :  { %17 = vsyncpa [#allocation3 + $0x1], 0 }
   0x8   :  { %18 = vsyncpa [#allocation6], 0 }
   0x9   :  { %19 = vsyncpa [#allocation9], 0 }
   0xa   :  { %20 = vsyncpa [#allocation12], 0 }
   0xb   :  { %21 = vsyncpa [#allocation4], 0 }
   0xc   :  { %23 = vsyncpa [#allocation4 + $0x1], 0  ;;  %s14312_s13 = smov 0   ;;  %s14314_s14 = smov 0  }
   0xd   :  { %s14316_s15 = smov 0   ;;  %s14318_s16 = smov 0  }
   0xe LB: > { %s14225_s17 = smov [#allocation5]   ;;  %s14333_s19 = sadd.s32 4294967295, %s14223_s16   ;;  %s14223_s16 = sphi %s14318_s16, %s17289_s16   ;;  %s14219_s15 = sphi %s14316_s15, %s17288_s15   ;;  %s14215_s14 = sphi %s14314_s14, %s17287_s14   ;;  %s14211_s13 = sphi %s14312_s13, %s17286_s13  }
   0xf   : > { %s288_s18 = sshll.u32 %s14225_s17, 4  ;;  %p11190_p0 = scmp.ge.s32.totalorder %s14223_s16, 1  ;;  %s289_s18 = int_to_ptr.vmem [resolvable:$true] %s288_s18 }
  0x10   : > { %p17215_p1 = scmp.eq.s32.totalorder %s14333_s19, 0  ;;  %p275_p2 = scmp.lt.s32.totalorder %s14223_s16, 3 }
  0x11   : > { %s14226_s21 = smov [#allocation8]   ;;  %s14227_s23 = smov [#allocation11]  }
  0x12   : > { %p14338_p3 = pnand %p11190_p0, %p275_p2  ;;  %s313_s22 = sshll.u32 %s14226_s21, 4  ;;  %s314_s22 = int_to_ptr.vmem [resolvable:$true] %s313_s22 }
  0x13   : > { %s342_s24 = sshll.u32 %s14227_s23, 4  ;;  %s13974_s27 = scalar_lea.vmem %s289_s18, 320  ;;  %s14351_s24 = int_to_ptr.vmem [resolvable:$true] %s342_s24 }
  0x14   : > { %s17238_s20 = scalar_select %p14338_p3, 1, 0 }
  0x15   : > { %p12344_p5 = pneg %p14338_p3  ;;  %p13975_p8 = scmp.ne.s32.totalorder %s289_s18, %s13974_s27 }
  0x16   : > { %p13982_p11 = scmp.lt.s32.totalorder %s289_s18, %s289_s18  ;;  %p13983_p12 = scmp.lt.s32.totalorder %s13974_s27, %s13974_s27 }
  0x17   : > { %p14347_p6 = pnand %p12344_p5, %p17215_p1 }
  0x18   : > { %p13984_p13 = por %p13983_p12, %p13982_p11 }
  0x19   : > { %p14355_p7 = pneg %p14347_p6 }
  0x1b   : > { %p13977_p9 = pnand %p13975_p8, %p14355_p7 }
  0x1d   : > { %p13978_p10 = pneg %p13977_p9 }
  0x1f   : > { %p13985_p0 = pnand %p13984_p13, %p13978_p10 }
  0x21   : > { %13988 = shalt.err (!%p13985_p0)
}
  0x22   : > { %s17241_s1 = sld [smem:[#allocation31_spill]]  ;;  %s14000_s30 = scalar_lea.vmem %s314_s22, 128 }
  0x23   : > { %p14001_p2 = scmp.ne.s32.totalorder %s314_s22, %s14000_s30  ;;  %p14008_p1 = scmp.lt.s32.totalorder %s314_s22, %s314_s22 }
  0x24   : > { %p14009_p8 = scmp.lt.s32.totalorder %s14000_s30, %s14000_s30 }
  0x25   : > { %p14003_p5 = pnand %p14001_p2, %p14355_p7 }
  0x26   : > { %p14010_p9 = por %p14009_p8, %p14008_p1 }
  0x27   : > { %p14004_p4 = pneg %p14003_p5 }
  0x28   : > { %12347 = dma.hbm_to_vmem [thread:$0]  (!%p14347_p6), %s17241_s1, 320, %s289_s18, [#allocation6]  }
  0x29   : > { %p14011_p3 = pnand %p14010_p9, %p14004_p4 }
  0x2b   : > { %14014 = shalt.err (!%p14011_p3)
}
  0x2c   : > { %s17242_s4 = sld [smem:[#allocation33_spill]]  ;;  %s14026_s17 = scalar_lea.vmem %s14351_s24, 122880 }
  0x2d   : > { %p14027_p10 = scmp.ne.s32.totalorder %s14351_s24, %s14026_s17  ;;  %p14034_p13 = scmp.lt.s32.totalorder %s14351_s24, %s14351_s24 }
  0x2e   : > { %p14035_p1 = scmp.lt.s32.totalorder %s14026_s17, %s14026_s17 }
  0x2f   : > { %p14029_p11 = pnand %p14027_p10, %p14355_p7 }
  0x30   : > { %p14036_p4 = por %p14035_p1, %p14034_p13 }
  0x31   : > { %p14030_p12 = pneg %p14029_p11 }
  0x32   : > { %12353 = dma.hbm_to_vmem [thread:$0]  (!%p14347_p6), %s17242_s4, 128, %s314_s22, [#allocation9]  }
  0x33   : > { %p14037_p3 = pnand %p14036_p4, %p14030_p12 }
  0x35   : > { %14040 = shalt.err (!%p14037_p3)
}
  0x36   : > { %s14228_s18 = smov 384   ;;  %s14229_s21 = smov 24  }
  0x37   : > { %s17243_s8 = sld [smem:[#allocation35_spill]]  ;;  %s14230_s22 = smov [#allocation7]  }
  0x38   : > { %s299_s28 = sshll.u32 %s14230_s22, 4  ;;  %s14231_s29 = smov [#allocation10]   ;;  %s300_s28 = int_to_ptr.vmem [resolvable:$true] %s299_s28 }
  0x39   : > { %s326_s30 = sshll.u32 %s14231_s29, 4  ;;  %s14052_s11 = scalar_lea.vmem %s300_s28, 128  ;;  %s327_s30 = int_to_ptr.vmem [resolvable:$true] %s326_s30 }
  0x3a   : > { %p14053_p0 = scmp.ne.s32.totalorder %s300_s28, %s14052_s11  ;;  %p14060_p8 = scmp.lt.s32.totalorder %s300_s28, %s300_s28 }
  0x3b   : > { %p14061_p9 = scmp.lt.s32.totalorder %s14052_s11, %s14052_s11 }
  0x3c   : > { %p14055_p2 = pnand %p14053_p0, %p14355_p7 }
  0x3d   : > { %12359 = dma.hbm_to_vmem [thread:$0]  (!%p14347_p6), %s17243_s8, 122880, %s14351_s24, [#allocation12], %s14228_s18, %s14228_s18, %s14229_s21  }
  0x3e   : > { %p14056_p5 = pneg %p14055_p2  ;;  %p14062_p10 = por %p14061_p9, %p14060_p8 }
  0x40   : > { %p14063_p11 = pnand %p14062_p10, %p14056_p5 }
  0x42   : > { %14066 = shalt.err (!%p14063_p11)
}
  0x43   : > { %s17244_s2 = sld [smem:[#allocation32_spill]]  ;;  %s14078_s24 = scalar_lea.vmem %s327_s30, 256 }
  0x44   : > { %p14079_p12 = scmp.ne.s32.totalorder %s327_s30, %s14078_s24  ;;  %p14086_p4 = scmp.lt.s32.totalorder %s327_s30, %s327_s30 }
  0x45   : > { %p14087_p3 = scmp.lt.s32.totalorder %s14078_s24, %s14078_s24 }
  0x46   : > { %p14081_p13 = pnand %p14079_p12, %p14355_p7 }
  0x47   : > { %p14088_p0 = por %p14087_p3, %p14086_p4 }
  0x48   : > { %p14082_p1 = pneg %p14081_p13 }
  0x49   : > { %12350 = dma.hbm_to_vmem [thread:$0]  (!%p14347_p6), %s17244_s2, 128, %s300_s28, [#allocation6]  }
  0x4a   : > { %p14089_p2 = pnand %p14088_p0, %p14082_p1 }
  0x4c   : > { %14092 = shalt.err (!%p14089_p2)
}
  0x4d   : > { %s14232_s18 = smov 128   ;;  %s14233_s21 = smov 8  }
  0x4e   : > { %s17245_s6 = sld [smem:[#allocation34_spill]]  ;;  %s14234_s22 = smov [#allocation13]  }
  0x4f   : > { %s355_s28 = sshll.u32 %s14234_s22, 4  ;;  %s356_s28 = int_to_ptr.vmem [resolvable:$true] %s355_s28 }
  0x50   : > { %s14104_s29 = scalar_lea.vmem %s356_s28, 6144  ;;  %p14112_p10 = scmp.lt.s32.totalorder %s356_s28, %s356_s28 }
  0x51   : > { %p14105_p5 = scmp.ne.s32.totalorder %s356_s28, %s14104_s29  ;;  %p14113_p11 = scmp.lt.s32.totalorder %s14104_s29, %s14104_s29 }
  0x53   : > { %p14107_p8 = pnand %p14105_p5, %p14355_p7  ;;  %p14114_p12 = por %p14113_p11, %p14112_p10 }
  0x54   : > { %12356 = dma.hbm_to_vmem [thread:$0]  (!%p14347_p6), %s17245_s6, 256, %s327_s30, [#allocation9], %s14232_s18, %s14232_s18, %s14233_s21  }
  0x55   : > { %p14108_p9 = pneg %p14107_p8 }
  0x57   : > { %p14115_p13 = pnand %p14114_p12, %p14108_p9 }
  0x59   : > { %14118 = shalt.err (!%p14115_p13)
}
  0x5a   : > { %s14235_s11 = smov 64   ;;  %s14236_s26 = smov 4  }
  0x5b   : > { %12362 = dma.hbm_to_vmem [thread:$0]  (!%p14347_p6), %s17213_s9, 6144, %s356_s28, [#allocation12], %s14235_s11, %s14235_s11, %s14236_s26  }
  0x5c   : > { %s11189_s17 = sadd.s32 4294967294, %s14223_s16   ;;  %s14408_s24 = sadd.s32 1, %s14223_s16  }
  0x5d   : > { %s33_s18 = ssub.s32 %s14223_s16, %s14408_s24  ;;  %s36_s21 = sadd.s32 1, %s14219_s15 }
  0x5e   : > { %p34_p7 = scmp.eq.s32.totalorder %s33_s18, 0  ;;  %p43_p1 = scmp.ne.s32.totalorder %s14219_s15, %s14215_s14 }
  0x5f   : > { %p44_p4 = scmp.eq.s32.totalorder %s14223_s16, 0  ;;  %p49_p3 = scmp.ne.s32.totalorder %s14215_s14, %s14211_s13 }
  0x60   : > { %s14419_s23 = scalar_select %p34_p7, %s14219_s15, %s36_s21  }
  0x61   : > { %p45_p0 = por %p44_p4, %p43_p1  ;;  %p17246_p2 = scmp.eq.s32.totalorder %s14333_s19, 0 }
  0x62   : > { %p262_p6 = scmp.eq.s32.totalorder %s14333_s19, 1  ;;  %p268_p8 = scmp.eq.s32.totalorder %s11189_s17, 1 }
  0x63   : > { %p14423_p5 = por %p17246_p2, %p49_p3  ;;  %p12377_p9 = scmp.lt.s32.totalorder %s14223_s16, 2 }
  0x64   : > { %s369_s27 = sand.u32 1, %s14219_s15   ;;  %p14430_p10 = por %p262_p6, %p43_p1 }
  0x65   : > { %s17247_s25 = scalar_select %p14423_p5, 1, 0 }
  0x66   : > { %s17248_s22 = scalar_select %p14430_p10, 1, 0 }
  0x67   : > { %p14434_p11 = por %p268_p8, %p49_p3  ;;  %s12313_s29 = smul.u32 160, %s369_s27 }
  0x68   : > { %s12314_s11 = smul.u32 2560, %s14223_s16  ;;  %p14439_p12 = pnand %p12377_p9, %p45_p0 }
  0x69   : > { %s17249_s28 = scalar_select %p14434_p11, 1, 0 }
  0x6a   : > { %s14446_s17 = scalar_lea.hbm %s17204_s0, %s12314_s11  ;;  %s373_s18 = scalar_lea.vmem [#allocation2], %s12313_s29 }
  0x6b   : > { %s381_s21 = sshll.u32 %s373_s18, 4  ;;  %s370_s1 = scalar_lea.sflag [#allocation3], %s369_s27  ;;  %s382_s21 = int_to_ptr.vmem [resolvable:$true] %s381_s21 }
  0x6c   : > { %s14119_s2 = scalar_lea.hbm %s14446_s17, 2560  ;;  %p14121_p7 = pneg %p14439_p12 }
  0x6d   : > { %p14120_p13 = scmp.ne.s32.totalorder %s14446_s17, %s14119_s2  ;;  %s14124_s30 = scalar_lea.hbm %s17204_s0, 5120 }
  0x6e   : > { %p14125_p3 = scmp.lt.s32.totalorder %s14446_s17, %s17204_s0  ;;  %p14126_p0 = scmp.lt.s32.totalorder %s14124_s30, %s14119_s2 }
  0x6f   : > { %p14122_p1 = pnand %p14121_p7, %p14120_p13 }
  0x70   : > { %p14127_p2 = por %p14126_p0, %p14125_p3 }
  0x71   : > { %p14123_p4 = pneg %p14122_p1 }
  0x73   : > { %p14128_p6 = pnand %p14127_p2, %p14123_p4 }
  0x75   : > { %14131 = shalt.err (!%p14128_p6)
}
  0x76   : > { %s14132_s29 = scalar_lea.vmem %s382_s21, 2560  ;;  %s14237_s27 = smov [#allocation2]  }
  0x77   : > { %p14133_p8 = scmp.ne.s32.totalorder %s382_s21, %s14132_s29  ;;  %s14137_s18 = sshll.u32 %s14237_s27, 4  ;;  %s14138_s18 = int_to_ptr.vmem [resolvable:$false] %s14137_s18 }
  0x78   : > { %s14139_s8 = scalar_lea.vmem %s14138_s18, 5120  ;;  %p14140_p13 = scmp.lt.s32.totalorder %s382_s21, %s14138_s18 }
  0x79   : > { %p14135_p9 = pnand %p14133_p8, %p14121_p7  ;;  %p14141_p1 = scmp.lt.s32.totalorder %s14139_s8, %s14132_s29 }
  0x7b   : > { %p14136_p11 = pneg %p14135_p9  ;;  %p14142_p10 = por %p14141_p1, %p14140_p13 }
  0x7d   : > { %p14143_p5 = pnand %p14142_p10, %p14136_p11 }
  0x7f   : > { %14146 = shalt.err (!%p14143_p5)
}
  0x80   : > { %12366 = dma.hbm_to_vmem [thread:$0]  (!%p14439_p12), %s14446_s17, 2560, %s382_s21, %s370_s1  }
  0x81   : > { %p17251_p4 = scmp.ne.s32.totalorder %s17238_s20, 0 }
  0x83   : > { %390 = sbr.rel (%p17251_p4) target bundleno = 2873 (0xb39), region = 60 }
  0x88   : > { %s14465_s2 = sand.u32 1, %s14215_s14   ;;  %p17252_p7 = scmp.ne.s32.totalorder %s17247_s25, 0 }
  0x89   : > { %s12315_s4 = smul.u32 160, %s14465_s2  ;;  %s393_s6 = scalar_lea.sflag [#allocation3], %s14465_s2 }
  0x8b   : > { %s14469_s30 = scalar_lea.vmem [#allocation2], %s12315_s4 }
  0x8c   : > { %14190 = dma.done.wait (%p17252_p7), %s393_s6, 2560  }
  0x8d   : > { %14192 = vsyncadd (%p17252_p7), %s393_s6, 4294964736  ;;  %p17253_p5 = scmp.eq.s32.totalorder %s14333_s19, 0 }
  0x8f   : > { %14194 = dma.done.wait (%p17253_p5), [#allocation6], 448   ;;  %p17254_p10 = pmov %p17253_p5 }
  0x90   : > { %p17255_p11 = pmov %p17253_p5 }
  0x91   : > { %14196 = vsyncadd (%p17254_p10), [#allocation6], 4294966848 }
  0x92   : > { %14198 = dma.done.wait (%p17255_p11), [#allocation9], 384   ;;  %p17256_p12 = pmov %p17253_p5 }
  0x93   : > { %p17257_p3 = pmov %p17253_p5 }
  0x94   : > { %14200 = vsyncadd (%p17256_p12), [#allocation9], 4294966912 }
  0x95   : > { %14202 = dma.done.wait (%p17257_p3), [#allocation12], 129024   ;;  %p17258_p0 = pmov %p17257_p3 }
  0x96   : > { %v461_v0 = vld [vmem:[%s14469_s30 + $0x18] sm:$0xff]  ;;  %v460_v1 = vld [vmem:[%s14469_s30 + $0x10] sm:$0xff]  ;;  %s14238_s1 = smov 77   ;;  %v462_v2 = vld [vmem:[%s14469_s30 + $0x20] sm:$0xff]  ;;  %s14239_s8 = smov 78   ;;  %v17220_v4 = vmov 0.0   ;;  %v17219_v12 = vlaneseq }
  0x97   : > { %14204 = vsyncadd (%p17258_p0), [#allocation12], 4294838272  ;;  %913 = vrot.lane.b32.xlu0 %v461_v0, %s14238_s1  ;;  %911 = vrot.lane.b32.xlu1 %v460_v1, %s14238_s1  ;;  %s14240_s20 = smov 79   ;;  %s14241_s25 = smov 127   ;;  %v14503_v3 = vld [vmem:[%s14469_s30 + $0x8] sm:$0xff]  ;;  %v466_v5 = vld [vmem:[%s14469_s30 + $0x40] sm:$0xff] }
  0x98   : > { %s14242_s26 = smov 1   ;;  %s14243_s17 = smov 49   ;;  %1114 = vmatprep.mubr.f32.mxu1 %v17220_v4  ;;  %1043 = vmatprep.mubr.f32.mxu0 %v17220_v4  ;;  %v465_v6 = vld [vmem:[%s14469_s30 + $0x38] sm:$0xff]  ;;  %v464_v7 = vld [vmem:[%s14469_s30 + $0x30] sm:$0xff]  ;;  %v463_v8 = vld [vmem:[%s14469_s30 + $0x28] sm:$0xff]  ;;  %v14576_v13 = vand.u32 127, %v17219_v12 }
  0x99   : > { %s14244_s21 = smov 50   ;;  %s14246_s12 = smov 51   ;;  %v470_v9 = vld [vmem:[%s14469_s30 + $0x60] sm:$0xff]  ;;  %v14551_v10 = vld [vmem:[%s14469_s30 + $0x58] sm:$0xff]  ;;  %v14556_v11 = vld [vmem:[%s14469_s30 + $0x50] sm:$0xff]  ;;  %vm975_vm8 = vcmask 588800  }
  0x9a   : > { %vm947_vm0 = vcmp.lt.s32.totalorder %v14576_v13, 77  ;;  %vm886_vm1 = vcmp.lt.s32.totalorder %v14576_v13, 78  ;;  %v14596_v20 = vld [vmem:[%s14469_s30 + $0x48] sm:$0xff]  ;;  %vm825_vm2 = vcmp.lt.s32.totalorder %v14576_v13, 79  ;;  %v14623_v28 = vld [vmem:[%s14469_s30] sm:$0xff]  ;;  %vm764_vm3 = vcmp.lt.s32.totalorder %v14576_v13, 127 }
  0x9b   : > { %915 = vrot.lane.b32.xlu0 %v462_v2, %s14238_s1  ;;  %852 = vrot.lane.b32.xlu1 %v461_v0, %s14239_s8  ;;  %vm703_vm4 = vcmp.lt.s32.totalorder %v14576_v13, 1  ;;  %v13937_v37 = vld [vmem:[%s14469_s30 + $0x18] sm:$0xff]  ;;  %v13938_v39 = vld [vmem:[%s14469_s30 + $0x10] sm:$0xff]  ;;  %vm642_vm5 = vcmp.lt.s32.totalorder %v14576_v13, 49  ;;  %vm581_vm6 = vcmp.lt.s32.totalorder %v14576_v13, 50  ;;  %vm520_vm7 = vcmp.lt.s32.totalorder %v14576_v13, 51 }
  0x9c   : > { %v14703_v54 = vld [vmem:[%s14469_s30 + $0x80] sm:$0xff]  ;;  %v14709_v55 = vld [vmem:[%s14469_s30 + $0x78] sm:$0xff]  ;;  %v13939_v56 = vld [vmem:[%s14469_s30 + $0x8] sm:$0xff]  ;;  %s14248_s4 = smov 102   ;;  %s14249_s6 = smov 101   ;;  %vm10248_vm9 = vcmp.lt.s32.totalorder %v14576_v13, 101 }
  0x9d   : > { %v14713_v57 = vld [vmem:[#allocation7] sm:$0xff]  ;;  %vm10229_vm10 = vcmp.lt.s32.totalorder %v14576_v13, 102  ;;  %vm10210_vm11 = vcmp.lt.s32.totalorder %v14576_v13, 103  ;;  %vm10155_vm12 = vcmp.lt.s32.totalorder %v14576_v13, 25  ;;  %vm10136_vm13 = vcmp.lt.s32.totalorder %v14576_v13, 26  ;;  %s12246_s27 = sshll.u32 %s14333_s19, 8 }
  0x9e   : > { %v14728_v62 = vld [vmem:[%s14469_s30 + $0x70] sm:$0xff]  ;;  %vm10117_vm14 = vcmp.lt.s32.totalorder %v14576_v13, 27  ;;  %p17283_p6 = scmp.ne.s32.totalorder %s17248_s22, 0  ;;  %s14254_s19 = smov [#allocation14]  }
  0x9f   : > { %854 = vrot.lane.b32.xlu0 %v462_v2, %s14239_s8  ;;  %850 = vrot.lane.b32.xlu1 %v460_v1, %s14239_s8  ;;  %v13895_v13 = vld [vmem:[#allocation13 + $0x60] sm:$0xff]  }
  0xa3   : > { %791 = vrot.lane.b32.xlu0 %v461_v0, %s14240_s20  ;;  %793 = vrot.lane.b32.xlu1 %v462_v2, %s14240_s20 }
  0xa7   : > { %789 = vrot.lane.b32.xlu0 %v460_v1, %s14240_s20  ;;  %730 = vrot.lane.b32.xlu1 %v461_v0, %s14241_s25 }
  0xab   : > { %732 = vrot.lane.b32.xlu0 %v462_v2, %s14241_s25  ;;  %728 = vrot.lane.b32.xlu1 %v460_v1, %s14241_s25 }
  0xaf   : > { %667 = vrot.lane.b32.xlu0 %v460_v1, %s14242_s26  ;;  %669 = vrot.lane.b32.xlu1 %v461_v0, %s14242_s26 }
  0xb3   : > { %606 = vrot.lane.b32.xlu1 %v460_v1, %s14243_s17  ;;  %665 = vrot.lane.b32.xlu0 %v14503_v3, %s14242_s26 }
  0xb7   : > { %604 = vrot.lane.b32.xlu1 %v14503_v3, %s14243_s17  ;;  %608 = vrot.lane.b32.xlu0 %v461_v0, %s14243_s17 }
  0xbb   : > { %547 = vrot.lane.b32.xlu1 %v461_v0, %s14244_s21  ;;  %545 = vrot.lane.b32.xlu0 %v460_v1, %s14244_s21 }
  0xbf   : > { %482 = vrot.lane.b32.xlu1 %v460_v1, %s14246_s12  ;;  %543 = vrot.lane.b32.xlu0 %v14503_v3, %s14244_s21 }
  0xc3   : > { %480 = vrot.lane.b32.xlu1 %v14503_v3, %s14246_s12  ;;  %484 = vrot.lane.b32.xlu0 %v461_v0, %s14246_s12 }
  0xc7   : > { %923 = vrot.lane.b32.xlu1 %v466_v5, %s14238_s1  ;;  %921 = vrot.lane.b32.xlu0 %v465_v6, %s14238_s1 }
  0xcb   : > { %860 = vrot.lane.b32.xlu1 %v465_v6, %s14239_s8  ;;  %919 = vrot.lane.b32.xlu0 %v464_v7, %s14238_s1 }
  0xcf   : > { %858 = vrot.lane.b32.xlu1 %v464_v7, %s14239_s8  ;;  %862 = vrot.lane.b32.xlu0 %v466_v5, %s14239_s8 }
  0xd3   : > { %801 = vrot.lane.b32.xlu1 %v466_v5, %s14240_s20  ;;  %799 = vrot.lane.b32.xlu0 %v465_v6, %s14240_s20 }
  0xd7   : > { %738 = vrot.lane.b32.xlu1 %v465_v6, %s14241_s25  ;;  %797 = vrot.lane.b32.xlu0 %v464_v7, %s14240_s20 }
  0xdb   : > { %736 = vrot.lane.b32.xlu1 %v464_v7, %s14241_s25  ;;  %740 = vrot.lane.b32.xlu0 %v466_v5, %s14241_s25 }
  0xdf   : > { %677 = vrot.lane.b32.xlu1 %v465_v6, %s14242_s26  ;;  %675 = vrot.lane.b32.xlu0 %v464_v7, %s14242_s26 }
  0xe3   : > { %614 = vrot.lane.b32.xlu1 %v464_v7, %s14243_s17  ;;  %673 = vrot.lane.b32.xlu0 %v463_v8, %s14242_s26 }
  0xe7   : > { %612 = vrot.lane.b32.xlu1 %v463_v8, %s14243_s17  ;;  %616 = vrot.lane.b32.xlu0 %v465_v6, %s14243_s17 }
  0xeb   : > { %555 = vrot.lane.b32.xlu1 %v465_v6, %s14244_s21  ;;  %553 = vrot.lane.b32.xlu0 %v464_v7, %s14244_s21 }
  0xef   : > { %490 = vrot.lane.b32.xlu1 %v464_v7, %s14246_s12  ;;  %551 = vrot.lane.b32.xlu0 %v463_v8, %s14244_s21 }
  0xf3   : > { %488 = vrot.lane.b32.xlu1 %v463_v8, %s14246_s12  ;;  %492 = vrot.lane.b32.xlu0 %v465_v6, %s14246_s12  ;;  %v14750_v6 = vld [vmem:[%s14469_s30 + $0x98] sm:$0xff] }
  0xf7   : > { %931 = vrot.lane.b32.xlu1 %v470_v9, %s14238_s1  ;;  %929 = vrot.lane.b32.xlu0 %v14551_v10, %s14238_s1 }
  0xfb   : > { %868 = vrot.lane.b32.xlu1 %v14551_v10, %s14239_s8  ;;  %927 = vrot.lane.b32.xlu0 %v14556_v11, %s14238_s1 }
  0xff   : > { %866 = vrot.lane.b32.xlu1 %v14556_v11, %s14239_s8  ;;  %870 = vrot.lane.b32.xlu0 %v470_v9, %s14239_s8 }
 0x103   : > { %809 = vrot.lane.b32.xlu1 %v470_v9, %s14240_s20  ;;  %807 = vrot.lane.b32.xlu0 %v14551_v10, %s14240_s20 }
 0x107   : > { %746 = vrot.lane.b32.xlu1 %v14551_v10, %s14241_s25  ;;  %805 = vrot.lane.b32.xlu0 %v14556_v11, %s14240_s20 }
 0x109   : > { %v914_v14 = vpop.permute.xlu0 %913  ;;  %v14578_v15 = vpop.permute.xlu1 %911 }
 0x10a   : > { %v964_v19 = vsel %vm947_vm0, %v14578_v15, %v914_v14 }
 0x10b   : > { %744 = vrot.lane.b32.xlu1 %v14556_v11, %s14241_s25  ;;  %748 = vrot.lane.b32.xlu0 %v470_v9, %s14241_s25 }
 0x10d   : > { %v14584_v16 = vpop.permute.xlu0 %915  ;;  %v853_v17 = vpop.permute.xlu1 %852 }
 0x10e   : > { %v963_v18 = vsel %vm947_vm0, %v914_v14, %v14584_v16 }
 0x10f   : > { %1064 = vmatprep.subr.mxu1 %v963_v18  ;;  %685 = vrot.lane.b32.xlu1 %v14551_v10, %s14242_s26 }
 0x110   : > { %683 = vrot.lane.b32.xlu0 %v14556_v11, %s14242_s26  ;;  %1065 = vmatpush1.msra.mxu1 %v964_v19 }
 0x111   : > { %v14600_v21 = vpop.permute.xlu0 %854  ;;  %v14602_v22 = vpop.permute.xlu1 %850 }
 0x112   : > { %v902_v23 = vsel %vm886_vm1, %v853_v17, %v14600_v21  ;;  %v903_v24 = vsel %vm886_vm1, %v14602_v22, %v853_v17 }
 0x113   : > { %1066 = vmatprep.subr.mxu1 %v902_v23  ;;  %909 = vrot.lane.b32.xlu1 %v14503_v3, %s14238_s1 }
 0x114   : > { %681 = vrot.lane.b32.xlu0 %v14596_v20, %s14242_s26  ;;  %1067 = vmatpush1.msra.mxu1 %v903_v24 }
 0x115   : > { %v792_v25 = vpop.permute.xlu0 %791  ;;  %v14615_v26 = vpop.permute.xlu1 %793 }
 0x116   : > { %v841_v27 = vsel %vm825_vm2, %v792_v25, %v14615_v26 }
 0x117   : > { %1068 = vmatprep.subr.mxu1 %v841_v27  ;;  %624 = vrot.lane.b32.xlu1 %v14551_v10, %s14243_s17 }
 0x118   : > { %622 = vrot.lane.b32.xlu0 %v14556_v11, %s14243_s17 }
 0x119   : > { %v14627_v29 = vpop.permute.xlu0 %789  ;;  %v731_v30 = vpop.permute.xlu1 %730 }
 0x11a   : > { %v842_v31 = vsel %vm825_vm2, %v14627_v29, %v792_v25 }
 0x11b   : > { %1069 = vmatpush1.msra.mxu1 %v842_v31  ;;  %620 = vrot.lane.b32.xlu1 %v14596_v20, %s14243_s17  ;;  %v13940_v31 = vld [vmem:[%s14469_s30 + $0x38] sm:$0xff] }
 0x11c   : > { %907 = vrot.lane.b32.xlu0 %v14623_v28, %s14238_s1 }
 0x11d   : > { %v14637_v32 = vpop.permute.xlu0 %732  ;;  %v14639_v33 = vpop.permute.xlu1 %728 }
 0x11e   : > { %v780_v34 = vsel %vm764_vm3, %v731_v30, %v14637_v32  ;;  %v781_v35 = vsel %vm764_vm3, %v14639_v33, %v731_v30 }
 0x11f   : > { %1070 = vmatprep.subr.mxu1 %v780_v34  ;;  %561 = vrot.lane.b32.xlu1 %v14556_v11, %s14244_s21 }
 0x120   : > { %848 = vrot.lane.b32.xlu0 %v14503_v3, %s14239_s8  ;;  %1071 = vmatpush1.msra.mxu1 %v781_v35  ;;  %v13941_v35 = vld [vmem:[%s14469_s30 + $0x30] sm:$0xff] }
 0x121   : > { %v668_v36 = vpop.permute.xlu0 %667  ;;  %1072 = vmatprep.subr.mxu1 %v13937_v37  ;;  %v14653_v38 = vpop.permute.xlu1 %669 }
 0x122   : > { %1073 = vmatpush1.msra.mxu1 %v13938_v39  ;;  %v720_v40 = vsel %vm703_vm4, %v668_v36, %v14653_v38 }
 0x123   : > { %1074 = vmatprep.subr.mxu1 %v720_v40  ;;  %846 = vrot.lane.b32.xlu1 %v14623_v28, %s14239_s8 }
 0x124   : > { %563 = vrot.lane.b32.xlu0 %v14551_v10, %s14244_s21 }
 0x125   : > { %v607_v41 = vpop.permute.xlu1 %606  ;;  %v14663_v42 = vpop.permute.xlu0 %665 }
 0x126   : > { %v721_v43 = vsel %vm703_vm4, %v14663_v42, %v668_v36 }
 0x127   : > { %1075 = vmatpush1.msra.mxu1 %v721_v43  ;;  %787 = vrot.lane.b32.xlu1 %v14503_v3, %s14240_s20 }
 0x128   : > { %559 = vrot.lane.b32.xlu0 %v14596_v20, %s14244_s21 }
 0x129   : > { %v14673_v44 = vpop.permute.xlu1 %604  ;;  %v14675_v45 = vpop.permute.xlu0 %608 }
 0x12a   : > { %v659_v46 = vsel %vm642_vm5, %v607_v41, %v14675_v45  ;;  %v660_v47 = vsel %vm642_vm5, %v14673_v44, %v607_v41 }
 0x12b   : > { %1076 = vmatprep.subr.mxu1 %v659_v46  ;;  %500 = vrot.lane.b32.xlu1 %v14551_v10, %s14246_s12 }
 0x12c   : > { %498 = vrot.lane.b32.xlu0 %v14556_v11, %s14246_s12  ;;  %1077 = vmatpush1.msra.mxu1 %v660_v47 }
 0x12d   : > { %v14688_v48 = vpop.permute.xlu1 %547  ;;  %v546_v49 = vpop.permute.xlu0 %545 }
 0x12e   : > { %v598_v50 = vsel %vm581_vm6, %v546_v49, %v14688_v48 }
 0x12f   : > { %1078 = vmatprep.subr.mxu1 %v598_v50  ;;  %496 = vrot.lane.b32.xlu1 %v14596_v20, %s14246_s12 }
 0x130   : > { %785 = vrot.lane.b32.xlu0 %v14623_v28, %s14240_s20 }
 0x131   : > { %v483_v51 = vpop.permute.xlu1 %482  ;;  %v14697_v52 = vpop.permute.xlu0 %543 }
 0x132   : > { %v599_v53 = vsel %vm581_vm6, %v14697_v52, %v546_v49 }
 0x133   : > { %1079 = vmatpush1.msra.mxu1 %v599_v53  ;;  %724 = vrot.lane.b32.xlu1 %v14623_v28, %s14241_s25  ;;  %v14844_v53 = vld [vmem:[%s14469_s30 + $0x68] sm:$0xff] }
 0x134   : > { %726 = vrot.lane.b32.xlu0 %v13939_v56, %s14241_s25 }
 0x135   : > { %v14715_v58 = vpop.permute.xlu1 %480  ;;  %v14717_v59 = vpop.permute.xlu0 %484 }
 0x136   : > { %v537_v60 = vsel %vm520_vm7, %v483_v51, %v14717_v59  ;;  %v538_v61 = vsel %vm520_vm7, %v14715_v58, %v483_v51 }
 0x137   : > { %1080 = vmatprep.subr.mxu1 %v537_v60  ;;  %939 = vrot.lane.b32.xlu1 %v14703_v54, %s14238_s1  ;;  %v13942_v60 = vld [vmem:[%s14469_s30 + $0x28] sm:$0xff] }
 0x138   : > { %937 = vrot.lane.b32.xlu0 %v14709_v55, %s14238_s1  ;;  %1081 = vmatpush1.msra.mxu1 %v538_v61 }
 0x139   : > { %v14732_v63 = vpop.permute.xlu1 %923  ;;  %v922_v0 = vpop.permute.xlu0 %921  ;;  %11208 = vmatmul.mubr.msk.f32.vlgmr.msra.gmra.mxu1 %vm975_vm8, %v14713_v57 }
 0x13a   : > { %v959_v1 = vsel %vm947_vm0, %v922_v0, %v14732_v63  ;;  %1256 = vmatprep.mubr.f32.mxu1 %v17220_v4 }
 0x13b   : > { %1206 = vmatprep.subr.mxu1 %v959_v1  ;;  %876 = vrot.lane.b32.xlu1 %v14709_v55, %s14239_s8 }
 0x13c   : > { %935 = vrot.lane.b32.xlu0 %v14728_v62, %s14238_s1 }
 0x13d   : > { %v861_v2 = vpop.permute.xlu1 %860  ;;  %v14744_v3 = vpop.permute.xlu0 %919 }
 0x13e   : > { %v960_v5 = vsel %vm947_vm0, %v14744_v3, %v922_v0 }
 0x13f   : > { %1207 = vmatpush1.msra.mxu1 %v960_v5  ;;  %663 = vrot.lane.b32.xlu1 %v14623_v28, %s14242_s26 }
 0x140   : > { %878 = vrot.lane.b32.xlu0 %v14703_v54, %s14239_s8 }
 0x141   : > { %v14756_v7 = vpop.permute.xlu1 %858  ;;  %v14758_v8 = vpop.permute.xlu0 %862 }
 0x142   : > { %v898_v9 = vsel %vm886_vm1, %v861_v2, %v14758_v8  ;;  %v899_v10 = vsel %vm886_vm1, %v14756_v7, %v861_v2 }
 0x143   : > { %1208 = vmatprep.subr.mxu1 %v898_v9  ;;  %701 = vrot.lane.b32.xlu1 %v14750_v6, %s14242_s26 }
 0x144   : > { %874 = vrot.lane.b32.xlu0 %v14728_v62, %s14239_s8  ;;  %1209 = vmatpush1.msra.mxu1 %v899_v10 }
 0x145   : > { %v14770_v11 = vpop.permute.xlu1 %801  ;;  %v800_v14 = vpop.permute.xlu0 %799 }
 0x146   : > { %v837_v17 = vsel %vm825_vm2, %v800_v14, %v14770_v11 }
 0x147   : > { %1210 = vmatprep.subr.mxu1 %v837_v17  ;;  %817 = vrot.lane.b32.xlu1 %v14703_v54, %s14240_s20 }
 0x148   : > { %815 = vrot.lane.b32.xlu0 %v14709_v55, %s14240_s20 }
 0x149   : > { %v739_v18 = vpop.permute.xlu1 %738  ;;  %v14779_v19 = vpop.permute.xlu0 %797 }
 0x14a   : > { %v838_v20 = vsel %vm825_vm2, %v14779_v19, %v800_v14 }
 0x14b   : > { %1211 = vmatpush1.msra.mxu1 %v838_v20  ;;  %813 = vrot.lane.b32.xlu1 %v14728_v62, %s14240_s20 }
 0x14c   : > { %602 = vrot.lane.b32.xlu0 %v14623_v28, %s14243_s17 }
 0x14d   : > { %v14788_v23 = vpop.permute.xlu1 %736  ;;  %v14790_v24 = vpop.permute.xlu0 %740 }
 0x14e   : > { %v776_v25 = vsel %vm764_vm3, %v739_v18, %v14790_v24  ;;  %v777_v27 = vsel %vm764_vm3, %v14788_v23, %v739_v18 }
 0x14f   : > { %1212 = vmatprep.subr.mxu1 %v776_v25  ;;  %754 = vrot.lane.b32.xlu1 %v14709_v55, %s14241_s25 }
 0x150   : > { %640 = vrot.lane.b32.xlu0 %v14750_v6, %s14243_s17  ;;  %1213 = vmatpush1.msra.mxu1 %v777_v27 }
 0x151   : > { %v14802_v30 = vpop.permute.xlu1 %677  ;;  %1214 = vmatprep.subr.mxu1 %v13940_v31  ;;  %v676_v34 = vpop.permute.xlu0 %675 }
 0x152   : > { %1215 = vmatpush1.msra.mxu1 %v13941_v35  ;;  %v716_v36 = vsel %vm703_vm4, %v676_v34, %v14802_v30 }
 0x153   : > { %1216 = vmatprep.subr.mxu1 %v716_v36  ;;  %541 = vrot.lane.b32.xlu1 %v14623_v28, %s14244_s21 }
 0x154   : > { %756 = vrot.lane.b32.xlu0 %v14703_v54, %s14241_s25 }
 0x155   : > { %v615_v37 = vpop.permute.xlu1 %614  ;;  %v14813_v39 = vpop.permute.xlu0 %673 }
 0x156   : > { %v717_v40 = vsel %vm703_vm4, %v14813_v39, %v676_v34 }
 0x157   : > { %1217 = vmatpush1.msra.mxu1 %v717_v40  ;;  %579 = vrot.lane.b32.xlu1 %v14750_v6, %s14244_s21 }
 0x158   : > { %752 = vrot.lane.b32.xlu0 %v14728_v62, %s14241_s25 }
 0x159   : > { %v14822_v41 = vpop.permute.xlu1 %612  ;;  %v14824_v43 = vpop.permute.xlu0 %616 }
 0x15a   : > { %v655_v46 = vsel %vm642_vm5, %v615_v37, %v14824_v43  ;;  %v656_v47 = vsel %vm642_vm5, %v14822_v41, %v615_v37 }
 0x15b   : > { %1218 = vmatprep.subr.mxu1 %v655_v46  ;;  %516 = vrot.lane.b32.xlu1 %v14750_v6, %s14246_s12  ;;  %v14919_v46 = vld [vmem:[%s14469_s30 + $0x90] sm:$0xff] }
 0x15c   : > { %478 = vrot.lane.b32.xlu0 %v14623_v28, %s14246_s12  ;;  %1219 = vmatpush1.msra.mxu1 %v656_v47 }
 0x15d   : > { %v14836_v49 = vpop.permute.xlu1 %555  ;;  %v554_v50 = vpop.permute.xlu0 %553 }
 0x15e   : > { %v594_v51 = vsel %vm581_vm6, %v554_v50, %v14836_v49 }
 0x15f   : > { %1220 = vmatprep.subr.mxu1 %v594_v51  ;;  %693 = vrot.lane.b32.xlu1 %v14709_v55, %s14242_s26 }
 0x160   : > { %691 = vrot.lane.b32.xlu0 %v14728_v62, %s14242_s26 }
 0x161   : > { %v491_v54 = vpop.permute.xlu1 %490  ;;  %v14848_v56 = vpop.permute.xlu0 %551 }
 0x162   : > { %v595_v28 = vsel %vm581_vm6, %v14848_v56, %v554_v50 }
 0x163   : > { %1221 = vmatpush1.msra.mxu1 %v595_v28  ;;  %917 = vrot.lane.b32.xlu1 %v13942_v60, %s14238_s1 }
 0x164   : > { %689 = vrot.lane.b32.xlu0 %v14844_v53, %s14242_s26 }
 0x165   : > { %v14857_v61 = vpop.permute.xlu1 %488  ;;  %v14859_v0 = vpop.permute.xlu0 %492 }
 0x166   : > { %v533_v1 = vsel %vm520_vm7, %v491_v54, %v14859_v0  ;;  %v534_v2 = vsel %vm520_vm7, %v14857_v61, %v491_v54  ;;  %v13943_v54 = vld [vmem:[%s14469_s30 + $0x58] sm:$0xff] }
 0x167   : > { %1222 = vmatprep.subr.mxu1 %v533_v1  ;;  %632 = vrot.lane.b32.xlu1 %v14709_v55, %s14243_s17 }
 0x168   : > { %630 = vrot.lane.b32.xlu0 %v14728_v62, %s14243_s17  ;;  %1223 = vmatpush1.msra.mxu1 %v534_v2  ;;  %v13945_v2 = vld [vmem:[%s14469_s30 + $0x20] sm:$0xff] }
 0x169   : > { %v14871_v5 = vpop.permute.xlu1 %931  ;;  %v930_v9 = vpop.permute.xlu0 %929  ;;  %11210 = vmatmul.mubr.msk.f32.vlgmr.msra.gmra.mxu1 %vm975_vm8, %v14713_v57 }
 0x16a   : > { %v955_v10 = vsel %vm947_vm0, %v930_v9, %v14871_v5  ;;  %1398 = vmatprep.mubr.f32.mxu1 %v17220_v4 }
 0x16b   : > { %1348 = vmatprep.subr.mxu1 %v955_v10  ;;  %856 = vrot.lane.b32.xlu1 %v13942_v60, %s14239_s8 }
 0x16c   : > { %628 = vrot.lane.b32.xlu0 %v14844_v53, %s14243_s17 }
 0x16d   : > { %v869_v14 = vpop.permute.xlu1 %868  ;;  %v14882_v17 = vpop.permute.xlu0 %927 }
 0x16e   : > { %v956_v18 = vsel %vm947_vm0, %v14882_v17, %v930_v9 }
 0x16f   : > { %1349 = vmatpush1.msra.mxu1 %v956_v18  ;;  %571 = vrot.lane.b32.xlu1 %v14709_v55, %s14244_s21 }
 0x170   : > { %569 = vrot.lane.b32.xlu0 %v14728_v62, %s14244_s21 }
 0x171   : > { %v14891_v57 = vpop.permute.xlu1 %866  ;;  %v14893_v20 = vpop.permute.xlu0 %870 }
 0x172   : > { %v894_v25 = vsel %vm886_vm1, %v869_v14, %v14893_v20  ;;  %v895_v27 = vsel %vm886_vm1, %v14891_v57, %v869_v14 }
 0x173   : > { %1350 = vmatprep.subr.mxu1 %v894_v25  ;;  %795 = vrot.lane.b32.xlu1 %v13942_v60, %s14240_s20 }
 0x174   : > { %567 = vrot.lane.b32.xlu0 %v14844_v53, %s14244_s21  ;;  %1351 = vmatpush1.msra.mxu1 %v895_v27 }
 0x175   : > { %v14904_v31 = vpop.permute.xlu1 %809  ;;  %v808_v34 = vpop.permute.xlu0 %807 }
 0x176   : > { %v833_v35 = vsel %vm825_vm2, %v808_v34, %v14904_v31 }
 0x177   : > { %1352 = vmatprep.subr.mxu1 %v833_v35  ;;  %508 = vrot.lane.b32.xlu1 %v14709_v55, %s14246_s12 }
 0x178   : > { %506 = vrot.lane.b32.xlu0 %v14728_v62, %s14246_s12 }
 0x179   : > { %v747_v36 = vpop.permute.xlu1 %746  ;;  %v14913_v37 = vpop.permute.xlu0 %805 }
 0x17a   : > { %v834_v40 = vsel %vm825_vm2, %v14913_v37, %v808_v34 }
 0x17b   : > { %1353 = vmatpush1.msra.mxu1 %v834_v40  ;;  %734 = vrot.lane.b32.xlu1 %v13942_v60, %s14241_s25  ;;  %v13944_v60 = vld [vmem:[%s14469_s30 + $0x50] sm:$0xff] }
 0x17c   : > { %504 = vrot.lane.b32.xlu0 %v14844_v53, %s14246_s12 }
 0x17d   : > { %v14924_v55 = vpop.permute.xlu1 %744  ;;  %v14926_v62 = vpop.permute.xlu0 %748 }
 0x17e   : > { %v772_v47 = vsel %vm764_vm3, %v747_v36, %v14926_v62  ;;  %v773_v50 = vsel %vm764_vm3, %v14924_v55, %v747_v36 }
 0x17f   : > { %1354 = vmatprep.subr.mxu1 %v772_v47  ;;  %943 = vrot.lane.b32.xlu1 %v14919_v46, %s14238_s1 }
 0x180   : > { %945 = vrot.lane.b32.xlu0 %v14750_v6, %s14238_s1  ;;  %1355 = vmatpush1.msra.mxu1 %v773_v50  ;;  %v14247_v50 = vmov 0  }
 0x181   : > { %v14938_v51 = vpop.permute.xlu1 %685  ;;  %1356 = vmatprep.subr.mxu1 %v13943_v54  ;;  %12447 = vset.pattern.permute.xlu0 %v14247_v50 }
 0x182   : > { %17259 = vst [vmem:[#allocation20_spill] sm:$0xff] %v14938_v51  ;;  %v684_v28 = vpop.permute.xlu0 %683  ;;  %1357 = vmatpush1.msra.mxu1 %v13944_v60  ;;  %12448 = vset.pattern.permute.xlu1 %v14247_v50 }
 0x183   : > { %v712_v1 = vsel %vm703_vm4, %v684_v28, %v14938_v51  ;;  %671 = vrot.lane.b32.xlu1 %v13945_v2, %s14242_s26 }
 0x184   : > { %1358 = vmatprep.subr.mxu1 %v712_v1  ;;  %884 = vrot.lane.b32.xlu0 %v14750_v6, %s14239_s8 }
 0x185   : > { %v910_v9 = vpop.permute.xlu1 %909 }
 0x186   : > { %v14949_v10 = vpop.permute.xlu0 %681  ;;  %v965_v14 = vsel %vm947_vm0, %v910_v9, %v14578_v15 }
 0x187   : > { %993 = vmatprep.subr.mxu0 %v965_v14  ;;  %v713_v18 = vsel %vm703_vm4, %v14949_v10, %v684_v28  ;;  %823 = vrot.lane.b32.xlu1 %v14750_v6, %s14240_s20  ;;  %v14983_v28 = vld [vmem:[%s14469_s30 + $0x88] sm:$0xff] }
 0x188   : > { %1359 = vmatpush1.msra.mxu1 %v713_v18  ;;  %882 = vrot.lane.b32.xlu0 %v14919_v46, %s14239_s8 }
 0x189   : > { %v14961_v25 = vpop.permute.xlu1 %624 }
 0x18a   : > { %17260 = vst [vmem:[#allocation21_spill] sm:$0xff] %v14961_v25  ;;  %v623_v27 = vpop.permute.xlu0 %622 }
 0x18b   : > { %v651_v34 = vsel %vm642_vm5, %v623_v27, %v14961_v25  ;;  %821 = vrot.lane.b32.xlu1 %v14919_v46, %s14240_s20 }
 0x18c   : > { %1360 = vmatprep.subr.mxu1 %v651_v34  ;;  %610 = vrot.lane.b32.xlu0 %v13945_v2, %s14243_s17 }
 0x18d   : > { %v14969_v15 = vpop.permute.xlu1 %620 }
 0x18e   : > { %v14971_v35 = vpop.permute.xlu0 %907  ;;  %v652_v36 = vsel %vm642_vm5, %v14969_v15, %v623_v27 }
 0x18f   : > { %1361 = vmatpush1.msra.mxu1 %v652_v36  ;;  %549 = vrot.lane.b32.xlu1 %v13945_v2, %s14244_s21  ;;  %v966_v40 = vsel %vm947_vm0, %v14971_v35, %v910_v9 }
 0x190   : > { %762 = vrot.lane.b32.xlu0 %v14750_v6, %s14241_s25  ;;  %994 = vmatpush1.msra.mxu0 %v966_v40 }
 0x191   : > { %v562_v47 = vpop.permute.xlu1 %561 }
 0x192   : > { %v849_v54 = vpop.permute.xlu0 %848 }
 0x193   : > { %486 = vrot.lane.b32.xlu1 %v13945_v2, %s14246_s12  ;;  %v904_v60 = vsel %vm886_vm1, %v849_v54, %v14602_v22 }
 0x194   : > { %760 = vrot.lane.b32.xlu0 %v14919_v46, %s14241_s25  ;;  %995 = vmatprep.subr.mxu0 %v904_v60 }
 0x195   : > { %v14991_v1 = vpop.permute.xlu1 %846 }
 0x196   : > { %v14993_v6 = vpop.permute.xlu0 %563  ;;  %v905_v9 = vsel %vm886_vm1, %v14991_v1, %v849_v54 }
 0x197   : > { %17261 = vst [vmem:[#allocation22_spill] sm:$0xff] %v14993_v6  ;;  %697 = vrot.lane.b32.xlu1 %v14983_v28, %s14242_s26  ;;  %996 = vmatpush1.msra.mxu0 %v905_v9  ;;  %v590_v22 = vsel %vm581_vm6, %v562_v47, %v14993_v6  ;;  %v15042_v9 = vld [vmem:[#allocation7] sm:$0xff] }
 0x198   : > { %699 = vrot.lane.b32.xlu0 %v14919_v46, %s14242_s26  ;;  %1362 = vmatprep.subr.mxu1 %v590_v22  ;;  %v13953_v6 = vld [vmem:[%s14469_s30 + $0x70] sm:$0xff] }
 0x199   : > { %v788_v2 = vpop.permute.xlu1 %787 }
 0x19a   : > { %v15005_v14 = vpop.permute.xlu0 %559  ;;  %v843_v18 = vsel %vm825_vm2, %v788_v2, %v14627_v29 }
 0x19b   : > { %636 = vrot.lane.b32.xlu1 %v14983_v28, %s14243_s17  ;;  %997 = vmatprep.subr.mxu0 %v843_v18  ;;  %v591_v27 = vsel %vm581_vm6, %v15005_v14, %v562_v47  ;;  %v15048_v18 = vld [vmem:[%s14469_s30 + $0x48] sm:$0xff] }
 0x19c   : > { %638 = vrot.lane.b32.xlu0 %v14919_v46, %s14243_s17  ;;  %1363 = vmatpush1.msra.mxu1 %v591_v27 }
 0x19d   : > { %v15017_v34 = vpop.permute.xlu1 %500 }
 0x19e   : > { %17262 = vst [vmem:[#allocation23_spill] sm:$0xff] %v15017_v34  ;;  %v499_v36 = vpop.permute.xlu0 %498 }
 0x19f   : > { %575 = vrot.lane.b32.xlu1 %v14983_v28, %s14244_s21  ;;  %v529_v29 = vsel %vm520_vm7, %v499_v36, %v15017_v34 }
 0x1a0   : > { %577 = vrot.lane.b32.xlu0 %v14919_v46, %s14244_s21  ;;  %1364 = vmatprep.subr.mxu1 %v529_v29  ;;  %v13948_v29 = vld [vmem:[%s14469_s30 + $0x8] sm:$0xff] }
 0x1a1   : > { %v15026_v40 = vpop.permute.xlu1 %496 }
 0x1a2   : > { %v15028_v47 = vpop.permute.xlu0 %785  ;;  %v530_v50 = vsel %vm520_vm7, %v15026_v40, %v499_v36 }
 0x1a3   : > { %512 = vrot.lane.b32.xlu1 %v14983_v28, %s14246_s12  ;;  %v844_v54 = vsel %vm825_vm2, %v15028_v47, %v788_v2  ;;  %1365 = vmatpush1.msra.mxu1 %v530_v50  ;;  %v13949_v50 = vld [vmem:[%s14469_s30] sm:$0xff] }
 0x1a4   : > { %514 = vrot.lane.b32.xlu0 %v14919_v46, %s14246_s12  ;;  %998 = vmatpush1.msra.mxu0 %v844_v54 }
 0x1a5   : > { %v15040_v60 = vpop.permute.xlu1 %724  ;;  %11212 = vmatmul.mubr.msk.f32.vlgmr.msra.gmra.mxu1 %vm975_vm8, %v15042_v9 }
 0x1a6   : > { %v727_v22 = vpop.permute.xlu0 %726  ;;  %1540 = vmatprep.mubr.f32.mxu1 %v17220_v4 }
 0x1a7   : > { %864 = vrot.lane.b32.xlu1 %v15048_v18, %s14239_s8  ;;  %v782_v46 = vsel %vm764_vm3, %v727_v22, %v14639_v33  ;;  %v783_v2 = vsel %vm764_vm3, %v15040_v60, %v727_v22 }
 0x1a8   : > { %925 = vrot.lane.b32.xlu0 %v15048_v18, %s14238_s1  ;;  %999 = vmatprep.subr.mxu0 %v782_v46  ;;  %v15074_v46 = vld [vmem:[%s14469_s30 + $0x40] sm:$0xff] }
 0x1a9   : > { %1000 = vmatpush1.msra.mxu0 %v783_v2  ;;  %v15060_v27 = vpop.permute.xlu1 %939 }
 0x1aa   : > { %17263 = vst [vmem:[#allocation24_spill] sm:$0xff] %v15060_v27  ;;  %v938_v36 = vpop.permute.xlu0 %937  ;;  %1001 = vmatprep.subr.mxu0 %v13948_v29 }
 0x1ab   : > { %742 = vrot.lane.b32.xlu1 %v15048_v18, %s14241_s25  ;;  %v951_v33 = vsel %vm947_vm0, %v938_v36, %v15060_v27  ;;  %1002 = vmatpush1.msra.mxu0 %v13949_v50 }
 0x1ac   : > { %803 = vrot.lane.b32.xlu0 %v15048_v18, %s14240_s20  ;;  %1490 = vmatprep.subr.mxu1 %v951_v33 }
 0x1ad   : > { %v877_v54 = vpop.permute.xlu1 %876 }
 0x1ae   : > { %v15071_v22 = vpop.permute.xlu0 %935 }
 0x1af   : > { %618 = vrot.lane.b32.xlu1 %v15074_v46, %s14243_s17  ;;  %v952_v2 = vsel %vm947_vm0, %v15071_v22, %v938_v36 }
 0x1b0   : > { %679 = vrot.lane.b32.xlu0 %v15074_v46, %s14242_s26  ;;  %1491 = vmatpush1.msra.mxu1 %v952_v2 }
 0x1b1   : > { %v664_v29 = vpop.permute.xlu1 %663 }
 0x1b2   : > { %v15083_v50 = vpop.permute.xlu0 %878  ;;  %v722_v33 = vsel %vm703_vm4, %v664_v29, %v14663_v42 }
 0x1b3   : > { %17264 = vst [vmem:[#allocation25_spill] sm:$0xff] %v15083_v50  ;;  %494 = vrot.lane.b32.xlu1 %v15074_v46, %s14246_s12  ;;  %1003 = vmatprep.subr.mxu0 %v722_v33  ;;  %v890_v12 = vsel %vm886_vm1, %v877_v54, %v15083_v50  ;;  %v15124_v50 = vld [vmem:[%s14469_s30 + $0x60] sm:$0xff] }
 0x1b4   : > { %557 = vrot.lane.b32.xlu0 %v15074_v46, %s14244_s21  ;;  %1492 = vmatprep.subr.mxu1 %v890_v12  ;;  %17266 = vst [vmem:[#allocation27_spill] sm:$0xff] %v15124_v50 }
 0x1b5   : > { %v15095_v36 = vpop.permute.xlu1 %701 }
 0x1b6   : > { %v15097_v2 = vpop.permute.xlu0 %874  ;;  %v723_v42 = vsel %vm703_vm4, %v15095_v36, %v664_v29 }
 0x1b7   : > { %872 = vrot.lane.b32.xlu1 %v14844_v53, %s14239_s8  ;;  %1004 = vmatpush1.msra.mxu0 %v723_v42  ;;  %v891_v33 = vsel %vm886_vm1, %v15097_v2, %v877_v54 }
 0x1b8   : > { %933 = vrot.lane.b32.xlu0 %v14844_v53, %s14238_s1  ;;  %1493 = vmatpush1.msra.mxu1 %v891_v33 }
 0x1b9   : > { %v15109_v12 = vpop.permute.xlu1 %817 }
 0x1ba   : > { %17265 = vst [vmem:[#allocation26_spill] sm:$0xff] %v15109_v12  ;;  %v816_v4 = vpop.permute.xlu0 %815 }
 0x1bb   : > { %750 = vrot.lane.b32.xlu1 %v14844_v53, %s14241_s25  ;;  %v829_v29 = vsel %vm825_vm2, %v816_v4, %v15109_v12 }
 0x1bc   : > { %811 = vrot.lane.b32.xlu0 %v14844_v53, %s14240_s20  ;;  %1494 = vmatprep.subr.mxu1 %v829_v29 }
 0x1bd   : > { %v15118_v42 = vpop.permute.xlu1 %813 }
 0x1be   : > { %v603_v54 = vpop.permute.xlu0 %602  ;;  %v830_v33 = vsel %vm825_vm2, %v15118_v42, %v816_v4 }
 0x1bf   : > { %626 = vrot.lane.b32.xlu1 %v15124_v50, %s14243_s17  ;;  %v661_v12 = vsel %vm642_vm5, %v603_v54, %v14673_v44  ;;  %1495 = vmatpush1.msra.mxu1 %v830_v33 }
 0x1c0   : > { %687 = vrot.lane.b32.xlu0 %v15124_v50, %s14242_s26  ;;  %1005 = vmatprep.subr.mxu0 %v661_v12 }
 0x1c1   : > { %v755_v53 = vpop.permute.xlu1 %754 }
 0x1c2   : > { %v15133_v29 = vpop.permute.xlu0 %640 }
 0x1c3   : > { %502 = vrot.lane.b32.xlu1 %v15124_v50, %s14246_s12  ;;  %v662_v4 = vsel %vm642_vm5, %v15133_v29, %v603_v54 }
 0x1c4   : > { %565 = vrot.lane.b32.xlu0 %v15124_v50, %s14244_s21  ;;  %1006 = vmatpush1.msra.mxu0 %v662_v4 }
 0x1c5   : > { %v542_v44 = vpop.permute.xlu1 %541 }
 0x1c6   : > { %v15142_v33 = vpop.permute.xlu0 %756  ;;  %v600_v12 = vsel %vm581_vm6, %v542_v44, %v14697_v52 }
 0x1c7   : > { %17267 = vst [vmem:[#allocation28_spill] sm:$0xff] %v15142_v33  ;;  %880 = vrot.lane.b32.xlu1 %v14983_v28, %s14239_s8  ;;  %1007 = vmatprep.subr.mxu0 %v600_v12  ;;  %v768_v54 = vsel %vm764_vm3, %v755_v53, %v15142_v33  ;;  %v13952_v33 = vld [vmem:[%s14469_s30 + $0x78] sm:$0xff] }
 0x1c8   : > { %941 = vrot.lane.b32.xlu0 %v14983_v28, %s14238_s1  ;;  %1496 = vmatprep.subr.mxu1 %v768_v54 }
 0x1c9   : > { %v15154_v4 = vpop.permute.xlu1 %579 }
 0x1ca   : > { %v15156_v27 = vpop.permute.xlu0 %752  ;;  %v601_v52 = vsel %vm581_vm6, %v15154_v4, %v542_v44  ;;  %v15173_v44 = vld [vmem:[%s14469_s30 + $0x80] sm:$0xff] }
 0x1cb   : > { %758 = vrot.lane.b32.xlu1 %v14983_v28, %s14241_s25  ;;  %1008 = vmatpush1.msra.mxu0 %v601_v52  ;;  %v769_v12 = vsel %vm764_vm3, %v15156_v27, %v755_v53  ;;  %17268 = vst [vmem:[#allocation29_spill] sm:$0xff] %v15173_v44  ;;  %v17270_v52 = vmov 0.0  }
 0x1cc   : > { %819 = vrot.lane.b32.xlu0 %v14983_v28, %s14240_s20  ;;  %1497 = vmatpush1.msra.mxu1 %v769_v12 }
 0x1cd   : > { %v15168_v54 = vpop.permute.xlu1 %516  ;;  %1498 = vmatprep.subr.mxu1 %v13952_v33 }
 0x1ce   : > { %v479_v34 = vpop.permute.xlu0 %478  ;;  %1499 = vmatpush1.msra.mxu1 %v13953_v6 }
 0x1cf   : > { %634 = vrot.lane.b32.xlu1 %v15173_v44, %s14243_s17  ;;  %v539_v53 = vsel %vm520_vm7, %v479_v34, %v14715_v58  ;;  %v540_v28 = vsel %vm520_vm7, %v15168_v54, %v479_v34  ;;  %v969_v34 = vld [vmem:[%s17207_s3] sm:$0xff] }
 0x1d0   : > { %695 = vrot.lane.b32.xlu0 %v15173_v44, %s14242_s26  ;;  %1009 = vmatprep.subr.mxu0 %v539_v53 }
 0x1d1   : > { %1010 = vmatpush1.msra.mxu0 %v540_v28  ;;  %v15185_v33 = vpop.permute.xlu1 %693 }
 0x1d2   : > { %17269 = vst [vmem:[#allocation30_spill] sm:$0xff] %v15185_v33  ;;  %11207 = vmatmul.mubr.msk.f32.vlgmr.msra.gmra.mxu0 %vm975_vm8, %v15042_v9  ;;  %v692_v6 = vpop.permute.xlu0 %691 }
 0x1d3   : > { %510 = vrot.lane.b32.xlu1 %v15173_v44, %s14246_s12  ;;  %v708_v58 = vsel %vm703_vm4, %v692_v6, %v15185_v33  ;;  %1185 = vmatprep.mubr.f32.mxu0 %v17270_v52 }
 0x1d4   : > { %573 = vrot.lane.b32.xlu0 %v15173_v44, %s14244_s21  ;;  %1500 = vmatprep.subr.mxu1 %v708_v58 }
 0x1d5   : > { %v918_v12 = vpop.permute.xlu1 %917 }
 0x1d6   : > { %v15200_v53 = vpop.permute.xlu0 %689  ;;  %v961_v28 = vsel %vm947_vm0, %v918_v12, %v14744_v3  ;;  %v962_v33 = vsel %vm947_vm0, %v14584_v16, %v918_v12 }
 0x1d7   : > { %1135 = vmatprep.subr.mxu0 %v961_v28  ;;  %v709_v58 = vsel %vm703_vm4, %v15200_v53, %v692_v6 }
 0x1d8   : > { %1501 = vmatpush1.msra.mxu1 %v709_v58  ;;  %1136 = vmatpush1.msra.mxu0 %v962_v33 }
 0x1d9   : > { %v15211_v44 = vpop.permute.xlu1 %632  ;;  %972 = vperm.xlu0 %12447, %v969_v34  }
 0x1da   : > { %v631_v25 = vpop.permute.xlu0 %630 }
 0x1db   : > { %v647_v51 = vsel %vm642_vm5, %v631_v25, %v15211_v44 }
 0x1dc   : > { %1502 = vmatprep.subr.mxu1 %v647_v51 }
 0x1dd   : > { %v857_v3 = vpop.permute.xlu1 %856 }
 0x1de   : > { %v15216_v50 = vpop.permute.xlu0 %628  ;;  %v900_v16 = vsel %vm886_vm1, %v857_v3, %v14756_v7  ;;  %v901_v33 = vsel %vm886_vm1, %v14600_v21, %v857_v3 }
 0x1df   : > { %1137 = vmatprep.subr.mxu0 %v900_v16  ;;  %v648_v6 = vsel %vm642_vm5, %v15216_v50, %v631_v25 }
 0x1e0   : > { %1503 = vmatpush1.msra.mxu1 %v648_v6  ;;  %1138 = vmatpush1.msra.mxu0 %v901_v33 }
 0x1e1   : > { %v15227_v34 = vpop.permute.xlu1 %571 }
 0x1e2   : > { %v570_v51 = vpop.permute.xlu0 %569 }
 0x1e3   : > { %v586_v12 = vsel %vm581_vm6, %v570_v51, %v15227_v34 }
 0x1e4   : > { %1504 = vmatprep.subr.mxu1 %v586_v12 }
 0x1e5   : > { %v796_v7 = vpop.permute.xlu1 %795 }
 0x1e6   : > { %v15232_v28 = vpop.permute.xlu0 %567  ;;  %v839_v21 = vsel %vm825_vm2, %v796_v7, %v14779_v19  ;;  %v840_v25 = vsel %vm825_vm2, %v14615_v26, %v796_v7 }
 0x1e7   : > { %1139 = vmatprep.subr.mxu0 %v839_v21  ;;  %v587_v58 = vsel %vm581_vm6, %v15232_v28, %v570_v51  ;;  %v13955_v21 = vld [vmem:[%s14469_s30 + $0x28] sm:$0xff] }
 0x1e8   : > { %1505 = vmatpush1.msra.mxu1 %v587_v58  ;;  %1140 = vmatpush1.msra.mxu0 %v840_v25 }
 0x1e9   : > { %v15243_v3 = vpop.permute.xlu1 %508 }
 0x1ea   : > { %v507_v16 = vpop.permute.xlu0 %506 }
 0x1eb   : > { %v525_v19 = vsel %vm520_vm7, %v507_v16, %v15243_v3 }
 0x1ec   : > { %1506 = vmatprep.subr.mxu1 %v525_v19 }
 0x1ed   : > { %v735_v33 = vpop.permute.xlu1 %734 }
 0x1ee   : > { %v15248_v6 = vpop.permute.xlu0 %504  ;;  %v778_v26 = vsel %vm764_vm3, %v735_v33, %v14788_v23  ;;  %v779_v51 = vsel %vm764_vm3, %v14637_v32, %v735_v33  ;;  %v13956_v23 = vld [vmem:[%s14469_s30 + $0x20] sm:$0xff] }
 0x1ef   : > { %1141 = vmatprep.subr.mxu0 %v778_v26  ;;  %v526_v12 = vsel %vm520_vm7, %v15248_v6, %v507_v16 }
 0x1f0   : > { %1507 = vmatpush1.msra.mxu1 %v526_v12  ;;  %1142 = vmatpush1.msra.mxu0 %v779_v51 }
 0x1f1   : > { %11214 = vmatmul.mubr.msk.f32.vlgmr.msra.gmra.mxu1 %vm975_vm8, %v15042_v9  ;;  %v15261_v7 = vpop.permute.xlu1 %943  ;;  %1143 = vmatprep.subr.mxu0 %v13955_v21 }
 0x1f2   : > { %v946_v25 = vpop.permute.xlu0 %945  ;;  %1144 = vmatpush1.msra.mxu0 %v13956_v23  ;;  %1682 = vmatprep.mubr.f32.mxu1 %v17270_v52 }
 0x1f3   : > { %v967_v32 = vsel %vm947_vm0, %v946_v25, %v14971_v35  ;;  %v948_v58 = vsel %vm947_vm0, %v15261_v7, %v946_v25 }
 0x1f4   : > { %1632 = vmatprep.subr.mxu1 %v967_v32 }
 0x1f5   : > { %1633 = vmatpush1.msra.mxu1 %v948_v58  ;;  %v672_v16 = vpop.permute.xlu1 %671 }
 0x1f6   : > { %v885_v19 = vpop.permute.xlu0 %884  ;;  %v718_v33 = vsel %vm703_vm4, %v672_v16, %v14813_v39  ;;  %v719_v26 = vsel %vm703_vm4, %v14653_v38, %v672_v16 }
 0x1f7   : > { %1145 = vmatprep.subr.mxu0 %v718_v33  ;;  %v906_v35 = vsel %vm886_vm1, %v885_v19, %v14991_v1 }
 0x1f8   : > { %1634 = vmatprep.subr.mxu1 %v906_v35  ;;  %1146 = vmatpush1.msra.mxu0 %v719_v26  ;;  %v13957_v35 = vld [vmem:[%s14469_s30 + $0x98] sm:$0xff] }
 0x1f9   : > { %v824_v51 = vpop.permute.xlu1 %823 }
 0x1fa   : > { %v15281_v12 = vpop.permute.xlu0 %882  ;;  %v845_v21 = vsel %vm825_vm2, %v824_v51, %v15028_v47 }
 0x1fb   : > { %v887_v39 = vsel %vm886_vm1, %v15281_v12, %v885_v19 }
 0x1fc   : > { %1635 = vmatpush1.msra.mxu1 %v887_v39 }
 0x1fd   : > { %1636 = vmatprep.subr.mxu1 %v845_v21  ;;  %v15289_v38 = vpop.permute.xlu1 %821 }
 0x1fe   : > { %v611_v25 = vpop.permute.xlu0 %610  ;;  %v826_v1 = vsel %vm825_vm2, %v15289_v38, %v824_v51 }
 0x1ff   : > { %v657_v23 = vsel %vm642_vm5, %v611_v25, %v14822_v41  ;;  %1637 = vmatpush1.msra.mxu1 %v826_v1  ;;  %v658_v47 = vsel %vm642_vm5, %v14675_v45, %v611_v25 }
 0x200   : > { %1147 = vmatprep.subr.mxu0 %v657_v23 }
 0x201   : > { %1148 = vmatpush1.msra.mxu0 %v658_v47  ;;  %v550_v32 = vpop.permute.xlu1 %549 }
 0x202   : > { %v763_v58 = vpop.permute.xlu0 %762  ;;  %v596_v16 = vsel %vm581_vm6, %v550_v32, %v14848_v56  ;;  %v597_v19 = vsel %vm581_vm6, %v14688_v48, %v550_v32 }
 0x203   : > { %1149 = vmatprep.subr.mxu0 %v596_v16  ;;  %v784_v41 = vsel %vm764_vm3, %v763_v58, %v15040_v60 }
 0x204   : > { %1638 = vmatprep.subr.mxu1 %v784_v41  ;;  %1150 = vmatpush1.msra.mxu0 %v597_v19 }
 0x205   : > { %v487_v45 = vpop.permute.xlu1 %486 }
 0x206   : > { %v15309_v33 = vpop.permute.xlu0 %760  ;;  %v535_v56 = vsel %vm520_vm7, %v487_v45, %v14857_v61  ;;  %v536_v26 = vsel %vm520_vm7, %v14717_v59, %v487_v45  ;;  %v13958_v61 = vld [vmem:[%s14469_s30 + $0x90] sm:$0xff] }
 0x207   : > { %1151 = vmatprep.subr.mxu0 %v535_v56  ;;  %v765_v48 = vsel %vm764_vm3, %v15309_v33, %v763_v58 }
 0x208   : > { %1152 = vmatpush1.msra.mxu0 %v536_v26  ;;  %1639 = vmatpush1.msra.mxu1 %v765_v48 }
 0x209   : > { %v15320_v60 = vpop.permute.xlu1 %697  ;;  %11209 = vmatmul.mubr.msk.f32.vlgmr.msra.gmra.mxu0 %vm975_vm8, %v15042_v9  ;;  %1640 = vmatprep.subr.mxu1 %v13957_v35  ;;  %v17271_v35 = vlaneseq }
 0x20a   : > { %v700_v51 = vpop.permute.xlu0 %699  ;;  %1641 = vmatpush1.msra.mxu1 %v13958_v61  ;;  %1327 = vmatprep.mubr.f32.mxu0 %v17270_v52 }
 0x20b   : > { %v704_v59 = vsel %vm703_vm4, %v700_v51, %v15095_v36  ;;  %v705_v21 = vsel %vm703_vm4, %v15320_v60, %v700_v51 }
 0x20c   : > { %1642 = vmatprep.subr.mxu1 %v704_v59 }
 0x20d   : > { %v15333_v39 = vpop.permute.xlu1 %636  ;;  %1643 = vmatpush1.msra.mxu1 %v705_v21  ;;  %v15383_v21 = vld [vmem:[#allocation5] sm:$0xff] }
 0x20e   : > { %v639_v25 = vpop.permute.xlu0 %638 }
 0x20f   : > { %v643_v1 = vsel %vm642_vm5, %v639_v25, %v15133_v29  ;;  %v644_v23 = vsel %vm642_vm5, %v15333_v39, %v639_v25 }
 0x210   : > { %1644 = vmatprep.subr.mxu1 %v643_v1 }
 0x211   : > { %v15341_v47 = vpop.permute.xlu1 %575  ;;  %1645 = vmatpush1.msra.mxu1 %v644_v23 }
 0x212   : > { %v578_v36 = vpop.permute.xlu0 %577 }
 0x213   : > { %v582_v32 = vsel %vm581_vm6, %v578_v36, %v15154_v4  ;;  %v583_v58 = vsel %vm581_vm6, %v15341_v47, %v578_v36 }
 0x214   : > { %1646 = vmatprep.subr.mxu1 %v582_v32 }
 0x215   : > { %v15349_v16 = vpop.permute.xlu1 %512  ;;  %1647 = vmatpush1.msra.mxu1 %v583_v58 }
 0x216   : > { %v515_v29 = vpop.permute.xlu0 %514 }
 0x217   : > { %v521_v19 = vsel %vm520_vm7, %v515_v29, %v15168_v54  ;;  %v522_v41 = vsel %vm520_vm7, %v15349_v16, %v515_v29 }
 0x218   : > { %1648 = vmatprep.subr.mxu1 %v521_v19 }
 0x219   : > { %1649 = vmatpush1.msra.mxu1 %v522_v41  ;;  %v865_v4 = vpop.permute.xlu1 %864  ;;  %v15430_v41 = vld [vmem:[#allocation7] sm:$0xff] }
 0x21a   : > { %11216 = vmatmul.mubr.msk.f32.vlgmr.msra.gmra.mxu1 %vm975_vm8, %v15042_v9  ;;  %v926_v45 = vpop.permute.xlu0 %925  ;;  %v896_v48 = vsel %vm886_vm1, %v865_v4, %v14891_v57  ;;  %v15370_v9 = vshrl.u32 %v17271_v35, 7  ;;  %v17273_v35 = vld [vmem:[#allocation20_spill] sm:$0xff] }
 0x21b   : > { %v957_v56 = vsel %vm947_vm0, %v926_v45, %v14882_v17  ;;  %v958_v26 = vsel %vm947_vm0, %v14732_v63, %v926_v45  ;;  %2480 = vmatprep.mubr.f32.mxu1 %v17270_v52  ;;  %v897_v17 = vsel %vm886_vm1, %v14758_v8, %v865_v4 }
 0x21c   : > { %1277 = vmatprep.subr.mxu0 %v957_v56  ;;  %v1761_v57 = vsub.s32 6, %v15370_v9  ;;  %v1765_v59 = vsub.s32 7, %v15370_v9 }
 0x21d   : > { %1278 = vmatpush1.msra.mxu0 %v958_v26  ;;  %v743_v54 = vpop.permute.xlu1 %742 }
 0x21e   : > { %1279 = vmatprep.subr.mxu0 %v896_v48  ;;  %v804_v51 = vpop.permute.xlu0 %803  ;;  %v774_v8 = vsel %vm764_vm3, %v743_v54, %v14924_v55  ;;  %v775_v23 = vsel %vm764_vm3, %v14790_v24, %v743_v54  ;;  %v13960_v54 = vld [vmem:[%s14469_s30 + $0x68] sm:$0xff] }
 0x21f   : > { %1280 = vmatpush1.msra.mxu0 %v897_v17  ;;  %v835_v63 = vsel %vm825_vm2, %v804_v51, %v14913_v37  ;;  %v836_v61 = vsel %vm825_vm2, %v14770_v11, %v804_v51  ;;  %v15391_v37 = vrot.slane %v15383_v21, %v1761_v57  ;;  %v15396_v11 = vrot.slane %v15383_v21, %v1765_v59  ;;  %v17272_v48 = vld [vmem:[#allocation27_spill] sm:$0xff] }
 0x220   : > { %1281 = vmatprep.subr.mxu0 %v835_v63  ;;  %v17274_v63 = vld [vmem:[#allocation21_spill] sm:$0xff] }
 0x221   : > { %1282 = vmatpush1.msra.mxu0 %v836_v61  ;;  %v619_v25 = vpop.permute.xlu1 %618 }
 0x222   : > { %1283 = vmatprep.subr.mxu0 %v774_v8  ;;  %v680_v1 = vpop.permute.xlu0 %679  ;;  %v653_v24 = vsel %vm642_vm5, %v619_v25, %v14969_v15 }
 0x223   : > { %1284 = vmatpush1.msra.mxu0 %v775_v23  ;;  %v714_v36 = vsel %vm703_vm4, %v680_v1, %v14949_v10  ;;  %v715_v58 = vsel %vm703_vm4, %v14802_v30, %v680_v1  ;;  %v17276_v23 = vld [vmem:[#allocation23_spill] sm:$0xff] }
 0x224   : > { %1285 = vmatprep.subr.mxu0 %v15048_v18  ;;  %v654_v18 = vsel %vm642_vm5, %v14824_v43, %v619_v25  ;;  %v17275_v25 = vld [vmem:[#allocation22_spill] sm:$0xff] }
 0x225   : > { %1286 = vmatpush1.msra.mxu0 %v15074_v46  ;;  %v495_v55 = vpop.permute.xlu1 %494 }
 0x226   : > { %1287 = vmatprep.subr.mxu0 %v714_v36  ;;  %v558_v32 = vpop.permute.xlu0 %557  ;;  %v531_v15 = vsel %vm520_vm7, %v495_v55, %v15026_v40  ;;  %v532_v43 = vsel %vm520_vm7, %v14859_v0, %v495_v55 }
 0x227   : > { %1288 = vmatpush1.msra.mxu0 %v715_v58  ;;  %v592_v10 = vsel %vm581_vm6, %v558_v32, %v15005_v14  ;;  %v593_v30 = vsel %vm581_vm6, %v14836_v49, %v558_v32  ;;  %v17277_v32 = vld [vmem:[#allocation24_spill] sm:$0xff] }
 0x228   : > { %1289 = vmatprep.subr.mxu0 %v653_v24  ;;  %v17278_v24 = vld [vmem:[#allocation25_spill] sm:$0xff] }
 0x229   : > { %1290 = vmatpush1.msra.mxu0 %v654_v18  ;;  %v873_v46 = vpop.permute.xlu1 %872 }
 0x22a   : > { %1291 = vmatprep.subr.mxu0 %v592_v10  ;;  %v934_v29 = vpop.permute.xlu0 %933  ;;  %v892_v0 = vsel %vm886_vm1, %v873_v46, %v15097_v2  ;;  %v17279_v10 = vld [vmem:[#allocation26_spill] sm:$0xff] }
 0x22b   : > { %1292 = vmatpush1.msra.mxu0 %v593_v30  ;;  %v953_v14 = vsel %vm947_vm0, %v934_v29, %v15071_v22  ;;  %v954_v40 = vsel %vm947_vm0, %v14871_v5, %v934_v29  ;;  %v893_v22 = vsel %vm886_vm1, %v14893_v20, %v873_v46 }
 0x22c   : > { %1293 = vmatprep.subr.mxu0 %v531_v15  ;;  %v17280_v15 = vld [vmem:[#allocation28_spill] sm:$0xff] }
 0x22d   : > { %1294 = vmatpush1.msra.mxu0 %v532_v43  ;;  %v751_v19 = vpop.permute.xlu1 %750 }
 0x22e   : > { %11211 = vmatmul.mubr.msk.f32.vlgmr.msra.gmra.mxu0 %vm975_vm8, %v15430_v41  ;;  %1419 = vmatprep.subr.mxu0 %v953_v14  ;;  %v812_v49 = vpop.permute.xlu0 %811  ;;  %v770_v56 = vsel %vm764_vm3, %v751_v19, %v15156_v27  ;;  %v771_v20 = vsel %vm764_vm3, %v14926_v62, %v751_v19  ;;  %v13961_v19 = vld [vmem:[%s14469_s30 + $0x88] sm:$0xff]  ;;  %s14250_s30 = smov 103  }
 0x22f   : > { %1420 = vmatpush1.msra.mxu0 %v954_v40  ;;  %1469 = vmatprep.mubr.f32.mxu0 %v17270_v52  ;;  %v831_v45 = vsel %vm825_vm2, %v812_v49, %v15118_v42  ;;  %v832_v2 = vsel %vm825_vm2, %v14904_v31, %v812_v49  ;;  %v17282_v40 = vld [vmem:[#allocation30_spill] sm:$0xff] }
 0x230   : > { %1421 = vmatprep.subr.mxu0 %v892_v0 }
 0x231   : > { %1422 = vmatpush1.msra.mxu0 %v893_v22  ;;  %v627_v4 = vpop.permute.xlu1 %626 }
 0x232   : > { %1423 = vmatprep.subr.mxu0 %v831_v45  ;;  %v688_v5 = vpop.permute.xlu0 %687  ;;  %v649_v62 = vsel %vm642_vm5, %v627_v4, %v15216_v50  ;;  %v650_v61 = vsel %vm642_vm5, %v17274_v63, %v627_v4  ;;  %v1753_v45 = vsub.s32 4, %v15370_v9 }
 0x233   : > { %1424 = vmatpush1.msra.mxu0 %v832_v2  ;;  %v710_v31 = vsel %vm703_vm4, %v688_v5, %v15200_v53  ;;  %v711_v27 = vsel %vm703_vm4, %v17273_v35, %v688_v5  ;;  %v1757_v2 = vsub.s32 5, %v15370_v9 }
 0x234   : > { %1425 = vmatprep.subr.mxu0 %v770_v56  ;;  %v15550_v56 = vsub.s32 2, %v15370_v9 }
 0x235   : > { %1426 = vmatpush1.msra.mxu0 %v771_v20  ;;  %v503_v26 = vpop.permute.xlu1 %502 }
 0x236   : > { %1427 = vmatprep.subr.mxu0 %v13960_v54  ;;  %v566_v42 = vpop.permute.xlu0 %565  ;;  %v527_v50 = vsel %vm520_vm7, %v503_v26, %v15248_v6  ;;  %v528_v55 = vsel %vm520_vm7, %v17276_v23, %v503_v26 }
 0x237   : > { %1428 = vmatpush1.msra.mxu0 %v17272_v48  ;;  %v588_v53 = vsel %vm581_vm6, %v566_v42, %v15232_v28  ;;  %v589_v8 = vsel %vm581_vm6, %v17275_v25, %v566_v42 }
 0x238   : > { %1429 = vmatprep.subr.mxu0 %v710_v31 }
 0x239   : > { %1430 = vmatpush1.msra.mxu0 %v711_v27  ;;  %v881_v51 = vpop.permute.xlu1 %880 }
 0x23a   : > { %1431 = vmatprep.subr.mxu0 %v649_v62  ;;  %v942_v17 = vpop.permute.xlu0 %941  ;;  %v888_v58 = vsel %vm886_vm1, %v881_v51, %v15281_v12 }
 0x23b   : > { %1432 = vmatpush1.msra.mxu0 %v650_v61  ;;  %v949_v28 = vsel %vm947_vm0, %v942_v17, %v15261_v7  ;;  %v950_v6 = vsel %vm947_vm0, %v17277_v32, %v942_v17  ;;  %v889_v7 = vsel %vm886_vm1, %v17278_v24, %v881_v51 }
 0x23c   : > { %1433 = vmatprep.subr.mxu0 %v588_v53  ;;  %v15570_v53 = vsub.s32 1, %v15370_v9 }
 0x23d   : > { %1434 = vmatpush1.msra.mxu0 %v589_v8  ;;  %v759_v36 = vpop.permute.xlu1 %758 }
 0x23e   : > { %1435 = vmatprep.subr.mxu0 %v527_v50  ;;  %v820_v1 = vpop.permute.xlu0 %819  ;;  %v766_v12 = vsel %vm764_vm3, %v759_v36, %v15309_v33  ;;  %v767_v43 = vsel %vm764_vm3, %v17280_v15, %v759_v36  ;;  %v15584_v36 = vsub.s32 3, %v15370_v9 }
 0x23f   : > { %1436 = vmatpush1.msra.mxu0 %v528_v55  ;;  %v827_v18 = vsel %vm825_vm2, %v820_v1, %v15289_v38  ;;  %v828_v29 = vsel %vm825_vm2, %v17279_v10, %v820_v1  ;;  %v17281_v38 = vld [vmem:[#allocation29_spill] sm:$0xff]  ;;  %v1742_v1 = vrot.slane %v15383_v21, %v15570_v53 }
 0x240   : > { %11213 = vmatmul.mubr.msk.f32.vlgmr.msra.gmra.mxu0 %vm975_vm8, %v15430_v41  ;;  %1561 = vmatprep.subr.mxu0 %v949_v28 }
 0x241   : > { %1562 = vmatpush1.msra.mxu0 %v950_v6  ;;  %1611 = vmatprep.mubr.f32.mxu0 %v17270_v52  ;;  %v635_v30 = vpop.permute.xlu1 %634  ;;  %v1750_v6 = vrot.slane %v15383_v21, %v15584_v36 }
 0x242   : > { %1563 = vmatprep.subr.mxu0 %v888_v58  ;;  %v696_v46 = vpop.permute.xlu0 %695  ;;  %v645_v0 = vsel %vm642_vm5, %v635_v30, %v15333_v39  ;;  %v646_v4 = vsel %vm642_vm5, %v15211_v44, %v635_v30  ;;  %v15536_v44 = vrot.slane %v15383_v21, %v1753_v45 }
 0x243   : > { %1564 = vmatpush1.msra.mxu0 %v889_v7  ;;  %v706_v14 = vsel %vm703_vm4, %v696_v46, %v15320_v60  ;;  %v707_v33 = vsel %vm703_vm4, %v17282_v40, %v696_v46 }
 0x244   : > { %1565 = vmatprep.subr.mxu0 %v827_v18 }
 0x245   : > { %1566 = vmatpush1.msra.mxu0 %v828_v29  ;;  %v511_v22 = vpop.permute.xlu1 %510  ;;  %v15615_v29 = vld [vmem:[#allocation5 + $0x8] sm:$0xff] }
 0x246   : > { %1567 = vmatprep.subr.mxu0 %v766_v12  ;;  %v574_v49 = vpop.permute.xlu0 %573  ;;  %v523_v39 = vsel %vm520_vm7, %v511_v22, %v15349_v16  ;;  %v1116_v16 = vpop.f32.mrf.mxu1  ;;  %v1794_v15 = vrot.slane %v15615_v29, %v1761_v57 }
 0x247   : > { %1568 = vmatpush1.msra.mxu0 %v767_v43  ;;  %v584_v60 = vsel %vm581_vm6, %v574_v49, %v15341_v47  ;;  %v585_v5 = vsel %vm581_vm6, %v15227_v34, %v574_v49  ;;  %v524_v47 = vsel %vm520_vm7, %v15243_v3, %v511_v22  ;;  %v15545_v34 = vrot.slane %v15383_v21, %v1757_v2 }
 0x248   : > { %1569 = vmatprep.subr.mxu0 %v13961_v19  ;;  %v1746_v3 = vrot.slane %v15383_v21, %v15550_v56  ;;  %v1118_v8 = vpop.f32.mrf.mxu1 }
 0x249   : > { %1570 = vmatpush1.msra.mxu0 %v17281_v38 }
 0x24a   : > { %1571 = vmatprep.subr.mxu0 %v706_v14  ;;  %v1258_v58 = vpop.f32.mrf.mxu1  ;;  %v1798_v14 = vrot.slane %v15615_v29, %v1765_v59 }
 0x24b   : > { %1572 = vmatpush1.msra.mxu0 %v707_v33 }
 0x24c   : > { %1573 = vmatprep.subr.mxu0 %v645_v0  ;;  %v1260_v7 = vpop.f32.mrf.mxu1 }
 0x24d   : > { %1574 = vmatpush1.msra.mxu0 %v646_v4 }
 0x24e   : > { %1575 = vmatprep.subr.mxu0 %v584_v60 }
 0x24f   : > { %1576 = vmatpush1.msra.mxu0 %v585_v5  ;;  %v15646_v5 = vld [vmem:[#allocation5 + $0x10] sm:$0xf] }
 0x250   : > { %1577 = vmatprep.subr.mxu0 %v523_v39 }
 0x251   : > { %1578 = vmatpush1.msra.mxu0 %v524_v47  ;;  %v1810_v47 = vrot.slane %v15646_v5, %v15550_v56 }
 0x252   : > { %11215 = vmatmul.mubr.msk.f32.vlgmr.msra.gmra.mxu0 %vm975_vm8, %v15430_v41  ;;  %v15563_v41 = vsub.s32 0, %v15370_v9 }
 0x253   : > { %2409 = vmatprep.mubr.f32.mxu0 %v17270_v52 }
 0x254   : > { %v15553_v20 = vpop.permute.xlu0 %972  ;;  %v1738_v51 = vrot.slane %v15383_v21, %v15563_v41 }
 0x255   : > { %v1117_v26 = vadd.f32 %v1116_v16, %v15553_v20  ;;  %v1119_v23 = vadd.f32 %v1118_v8, %v15553_v20 }
 0x257   : > { %v1691_v54 = vmul.f32 0.2, %v1117_v26  ;;  %v1692_v28 = vmul.f32 0.2, %v1119_v23 }
 0x259   : > { %v1711_v42 = vmax.f32 %v1117_v26, %v1691_v54  ;;  %v1712_v32 = vmax.f32 %v1119_v23, %v1692_v28  ;;  %v1259_v54 = vadd.f32 %v1258_v58, %v15553_v20 }
 0x25b   : > { %v15558_v48 = vmul.f32 %v1746_v3, %v1711_v42  ;;  %v15596_v24 = vmul.f32 %v1750_v6, %v1712_v32 }
 0x25d   : > { %2279 = vrot.lane.b32.xlu1 %v15558_v48, %s14238_s1 }
 0x265   : > { %v15602_v18 = vpop.f32.mrf.mxu1 }
 0x267   : > { %v15608_v21 = vpop.f32.mrf.mxu1 }
 0x292   : > { %v1045_v31 = vpop.f32.mrf.mxu0 }
 0x293   : > { %v1046_v35 = vadd.f32 %v1045_v31, %v15553_v20  ;;  %v1695_v31 = vmul.f32 0.2, %v1259_v54 }
 0x294   : > { %v1047_v27 = vpop.f32.mrf.mxu0 }
 0x295   : > { %v1689_v62 = vmul.f32 0.2, %v1046_v35  ;;  %v1048_v17 = vadd.f32 %v1047_v27, %v15553_v20 }
 0x297   : > { %v1709_v63 = vmax.f32 %v1046_v35, %v1689_v62  ;;  %v1690_v61 = vmul.f32 0.2, %v1048_v17  ;;  %v1715_v62 = vmax.f32 %v1259_v54, %v1695_v31 }
 0x299   : > { %v15572_v25 = vmul.f32 %v1738_v51, %v1709_v63  ;;  %v1710_v50 = vmax.f32 %v1048_v17, %v1690_v61  ;;  %v1261_v51 = vadd.f32 %v1260_v7, %v15553_v20  ;;  %v15690_v61 = vmul.f32 %v15391_v37, %v1715_v62 }
 0x29a   : > { %v1770_v37 = vrot.slane %v15615_v29, %v15563_v41 }
 0x29b   : > { %2215 = vrot.lane.b32.xlu1 %v15572_v25, %s14239_s8  ;;  %2275 = vrot.lane.b32.xlu0 %v15572_v25, %s14238_s1  ;;  %v15581_v55 = vmul.f32 %v1742_v1, %v1710_v50  ;;  %v1696_v8 = vmul.f32 0.2, %v1261_v51 }
 0x29d   : > { %v1716_v28 = vmax.f32 %v1261_v51, %v1696_v8  ;;  %v1401_v51 = vadd.f32 %v15602_v18, %v15553_v20  ;;  %v1778_v18 = vrot.slane %v15615_v29, %v15550_v56 }
 0x29f   : > { %2159 = vrot.lane.b32.xlu1 %v15558_v48, %s14240_s20  ;;  %2219 = vrot.lane.b32.xlu0 %v15558_v48, %s14239_s8 }
 0x2a3   : > { %2277 = vrot.lane.b32.xlu1 %v15581_v55, %s14238_s1  ;;  %2155 = vrot.lane.b32.xlu0 %v15572_v25, %s14240_s20 }
 0x2a7   : > { %2217 = vrot.lane.b32.xlu1 %v15581_v55, %s14239_s8  ;;  %2157 = vrot.lane.b32.xlu0 %v15581_v55, %s14240_s20 }
 0x2ab   : > { %2281 = vrot.lane.b32.xlu1 %v15596_v24, %s14238_s1  ;;  %2221 = vrot.lane.b32.xlu0 %v15596_v24, %s14239_s8 }
 0x2af   : > { %2097 = vrot.lane.b32.xlu1 %v15581_v55, %s14241_s25  ;;  %2099 = vrot.lane.b32.xlu0 %v15558_v48, %s14241_s25 }
 0x2b1   : > { %v1542_v46 = vpop.f32.mrf.mxu1 }
 0x2b2   : > { %v1543_v10 = vadd.f32 %v1542_v46, %v15553_v20 }
 0x2b3   : > { %v1544_v12 = vpop.f32.mrf.mxu1  ;;  %2161 = vrot.lane.b32.xlu1 %v15596_v24, %s14240_s20  ;;  %2101 = vrot.lane.b32.xlu0 %v15596_v24, %s14241_s25 }
 0x2b4   : > { %v1703_v30 = vmul.f32 0.2, %v1543_v10  ;;  %v1545_v43 = vadd.f32 %v1544_v12, %v15553_v20 }
 0x2b6   : > { %v1723_v19 = vmax.f32 %v1543_v10, %v1703_v30  ;;  %v1704_v38 = vmul.f32 0.2, %v1545_v43  ;;  %v1814_v10 = vrot.slane %v15646_v5, %v15584_v36 }
 0x2b7   : > { %2095 = vrot.lane.b32.xlu1 %v15572_v25, %s14241_s25 }
 0x2b8   : > { %v15630_v49 = vmul.f32 %v1794_v15, %v1723_v19  ;;  %v1724_v40 = vmax.f32 %v1545_v43, %v1704_v38 }
 0x2ba   : > { %v15632_v33 = vmul.f32 %v1798_v14, %v1724_v40 }
 0x2c9   : > { %v1187_v0 = vpop.f32.mrf.mxu0 }
 0x2ca   : > { %v1188_v22 = vadd.f32 %v1187_v0, %v15553_v20 }
 0x2cb   : > { %v1189_v3 = vpop.f32.mrf.mxu0 }
 0x2cc   : > { %v1693_v57 = vmul.f32 0.2, %v1188_v22  ;;  %v1190_v42 = vadd.f32 %v1189_v3, %v15553_v20 }
 0x2ce   : > { %v1713_v4 = vmax.f32 %v1188_v22, %v1693_v57  ;;  %v1694_v35 = vmul.f32 0.2, %v1190_v42 }
 0x2d0   : > { %v15636_v60 = vmul.f32 %v15536_v44, %v1713_v4  ;;  %v1714_v17 = vmax.f32 %v1190_v42, %v1694_v35 }
 0x2d2   : > { %2223 = vrot.lane.b32.xlu1 %v15636_v60, %s14239_s8  ;;  %2283 = vrot.lane.b32.xlu0 %v15636_v60, %s14238_s1  ;;  %v15693_v50 = vmul.f32 %v15545_v34, %v1714_v17  ;;  %v15707_v34 = vmul.f32 %v15396_v11, %v1716_v28  ;;  %v15721_v11 = vpop.permute.xlu1 %2279 }
 0x2d6   : > { %2103 = vrot.lane.b32.xlu1 %v15636_v60, %s14241_s25  ;;  %2163 = vrot.lane.b32.xlu0 %v15636_v60, %s14240_s20 }
 0x2da   : > { %v1684_v59 = vpop.f32.mrf.mxu1  ;;  %2037 = vrot.lane.b32.xlu1 %v15581_v55, %s14242_s26  ;;  %2035 = vrot.lane.b32.xlu0 %v15572_v25, %s14242_s26 }
 0x2db   : > { %v1685_v39 = vadd.f32 %v1684_v59, %v15553_v20 }
 0x2dc   : > { %v1686_v23 = vpop.f32.mrf.mxu1 }
 0x2dd   : > { %v1707_v44 = vmul.f32 0.2, %v1685_v39  ;;  %v1687_v32 = vadd.f32 %v1686_v23, %v15553_v20  ;;  %v1774_v23 = vrot.slane %v15615_v29, %v15570_v53 }
 0x2de   : > { %1975 = vrot.lane.b32.xlu1 %v15572_v25, %s14243_s17  ;;  %1977 = vrot.lane.b32.xlu0 %v15581_v55, %s14243_s17 }
 0x2df   : > { %v1727_v16 = vmax.f32 %v1685_v39, %v1707_v44  ;;  %v1708_v58 = vmul.f32 0.2, %v1687_v32 }
 0x2e1   : > { %v15659_v26 = vmul.f32 %v1810_v47, %v1727_v16  ;;  %v1728_v46 = vmax.f32 %v1687_v32, %v1708_v58  ;;  %v1403_v32 = vadd.f32 %v15608_v21, %v15553_v20 }
 0x2e2   : > { %2039 = vrot.lane.b32.xlu1 %v15558_v48, %s14242_s26  ;;  %2041 = vrot.lane.b32.xlu0 %v15596_v24, %s14242_s26 }
 0x2e3   : > { %v15723_v12 = vmul.f32 %v1814_v10, %v1728_v46  ;;  %v1700_v46 = vmul.f32 0.2, %v1403_v32  ;;  %v1786_v10 = vrot.slane %v15615_v29, %v1753_v45 }
 0x2e6   : > { %1917 = vrot.lane.b32.xlu1 %v15581_v55, %s14244_s21  ;;  %1915 = vrot.lane.b32.xlu0 %v15572_v25, %s14244_s21 }
 0x2ea   : > { %1981 = vrot.lane.b32.xlu1 %v15596_v24, %s14243_s17  ;;  %1979 = vrot.lane.b32.xlu0 %v15558_v48, %s14243_s17 }
 0x2ee   : > { %1855 = vrot.lane.b32.xlu1 %v15572_v25, %s14246_s12  ;;  %1857 = vrot.lane.b32.xlu0 %v15581_v55, %s14246_s12  ;;  %v1329_v27 = vpop.f32.mrf.mxu0 }
 0x2ef   : > { %v1330_v63 = vadd.f32 %v1329_v27, %v15553_v20 }
 0x2f0   : > { %v1331_v62 = vpop.f32.mrf.mxu0 }
 0x2f1   : > { %v1697_v1 = vmul.f32 0.2, %v1330_v63 }
 0x2f2   : > { %1919 = vrot.lane.b32.xlu1 %v15558_v48, %s14244_s21  ;;  %1921 = vrot.lane.b32.xlu0 %v15596_v24, %s14244_s21 }
 0x2f3   : > { %v1717_v6 = vmax.f32 %v1330_v63, %v1697_v1 }
 0x2f5   : > { %v15709_v7 = vmul.f32 %v1770_v37, %v1717_v6 }
 0x2f6   : > { %1861 = vrot.lane.b32.xlu1 %v15596_v24, %s14246_s12  ;;  %1859 = vrot.lane.b32.xlu0 %v15558_v48, %s14246_s12 }
 0x2fa   : > { %2287 = vrot.lane.b32.xlu1 %v15690_v61, %s14238_s1  ;;  %2285 = vrot.lane.b32.xlu0 %v15693_v50, %s14238_s1 }
 0x2fe   : > { %2227 = vrot.lane.b32.xlu1 %v15690_v61, %s14239_s8  ;;  %2225 = vrot.lane.b32.xlu0 %v15693_v50, %s14239_s8 }
 0x300   : > { %v1471_v63 = vpop.f32.mrf.mxu0 }
 0x301   : > { %v1472_v28 = vadd.f32 %v1471_v63, %v15553_v20 }
 0x302   : > { %2291 = vrot.lane.b32.xlu1 %v15709_v7, %s14238_s1  ;;  %2289 = vrot.lane.b32.xlu0 %v15707_v34, %s14238_s1 }
 0x303   : > { %v1701_v56 = vmul.f32 0.2, %v1472_v28 }
 0x305   : > { %v1721_v21 = vmax.f32 %v1472_v28, %v1701_v56 }
 0x306   : > { %2167 = vrot.lane.b32.xlu1 %v15690_v61, %s14240_s20  ;;  %2165 = vrot.lane.b32.xlu0 %v15693_v50, %s14240_s20 }
 0x30a   : > { %2013 = vrot.lane.b32.xlu1 %v15723_v12, %s14243_s17  ;;  %2073 = vrot.lane.b32.xlu0 %v15723_v12, %s14242_s26 }
 0x30d   : > { %v15729_v30 = vpop.permute.xlu1 %2215  ;;  %v15731_v15 = vpop.permute.xlu0 %2275 }
 0x30e   : > { %1893 = vrot.lane.b32.xlu1 %v15723_v12, %s14246_s12  ;;  %1953 = vrot.lane.b32.xlu0 %v15723_v12, %s14244_s21 }
 0x311   : > { %v15737_v43 = vpop.permute.xlu1 %2159  ;;  %v15739_v19 = vpop.permute.xlu0 %2219 }
 0x312   : > { %2231 = vrot.lane.b32.xlu1 %v15709_v7, %s14239_s8  ;;  %2229 = vrot.lane.b32.xlu0 %v15707_v34, %s14239_s8 }
 0x315   : > { %v2278_v38 = vpop.permute.xlu1 %2277  ;;  %v15745_v14 = vpop.permute.xlu0 %2155 }
 0x316   : > { %2107 = vrot.lane.b32.xlu1 %v15690_v61, %s14241_s25  ;;  %2105 = vrot.lane.b32.xlu0 %v15693_v50, %s14241_s25  ;;  %v2332_v40 = vsel %vm947_vm0, %v2278_v38, %v15721_v11  ;;  %v2333_v0 = vsel %vm947_vm0, %v15731_v15, %v2278_v38 }
 0x317   : > { %2359 = vmatprep.subr.mxu0 %v2332_v40 }
 0x318   : > { %2360 = vmatpush1.msra.mxu0 %v2333_v0  ;;  %v1720_v0 = vmax.f32 %v1403_v32, %v1700_v46 }
 0x319   : > { %v2218_v22 = vpop.permute.xlu1 %2217  ;;  %v2158_v57 = vpop.permute.xlu0 %2157 }
 0x31a   : > { %2171 = vrot.lane.b32.xlu1 %v15709_v7, %s14240_s20  ;;  %2169 = vrot.lane.b32.xlu0 %v15707_v34, %s14240_s20  ;;  %v2272_v4 = vsel %vm886_vm1, %v2218_v22, %v15739_v19  ;;  %v2273_v59 = vsel %vm886_vm1, %v15729_v30, %v2218_v22  ;;  %v2212_v39 = vsel %vm825_vm2, %v2158_v57, %v15737_v43 }
 0x31b   : > { %2361 = vmatprep.subr.mxu0 %v2272_v4  ;;  %v2213_v44 = vsel %vm825_vm2, %v15745_v14, %v2158_v57  ;;  %v1782_v22 = vrot.slane %v15615_v29, %v15584_v36  ;;  %v15862_v4 = vmul.f32 %v1786_v10, %v1721_v21 }
 0x31c   : > { %2362 = vmatpush1.msra.mxu0 %v2273_v59 }
 0x31d   : > { %v2282_v47 = vpop.permute.xlu1 %2281  ;;  %v15773_v16 = vpop.permute.xlu0 %2221  ;;  %2363 = vmatprep.subr.mxu0 %v2212_v39 }
 0x31e   : > { %2111 = vrot.lane.b32.xlu1 %v15709_v7, %s14241_s25  ;;  %2109 = vrot.lane.b32.xlu0 %v15707_v34, %s14241_s25  ;;  %v2331_v45 = vsel %vm947_vm0, %v15721_v11, %v2282_v47  ;;  %v2271_v11 = vsel %vm886_vm1, %v15739_v19, %v15773_v16 }
 0x31f   : > { %2364 = vmatpush1.msra.mxu0 %v2213_v44  ;;  %v15872_v44 = vmul.f32 %v1782_v22, %v1720_v0  ;;  %v15974_v22 = vld [vmem:[#allocation8] sm:$0xff] }
 0x321   : > { %v2098_v3 = vpop.permute.xlu1 %2097  ;;  %v15779_v54 = vpop.permute.xlu0 %2099 }
 0x322   : > { %2045 = vrot.lane.b32.xlu1 %v15693_v50, %s14242_s26  ;;  %2043 = vrot.lane.b32.xlu0 %v15636_v60, %s14242_s26  ;;  %v2152_v42 = vsel %vm764_vm3, %v2098_v3, %v15779_v54 }
 0x323   : > { %2365 = vmatprep.subr.mxu0 %v2152_v42 }
 0x325   : > { %v15788_v31 = vpop.permute.xlu1 %2161  ;;  %v2102_v58 = vpop.permute.xlu0 %2101 }
 0x326   : > { %1985 = vrot.lane.b32.xlu1 %v15693_v50, %s14243_s17  ;;  %1983 = vrot.lane.b32.xlu0 %v15636_v60, %s14243_s17 }
 0x329   : > { %v15794_v35 = vpop.permute.xlu1 %2095 }
 0x32a   : > { %2049 = vrot.lane.b32.xlu1 %v15707_v34, %s14242_s26  ;;  %2047 = vrot.lane.b32.xlu0 %v15690_v61, %s14242_s26  ;;  %v2153_v27 = vsel %vm764_vm3, %v15794_v35, %v2098_v3  ;;  %v2211_v3 = vsel %vm825_vm2, %v15737_v43, %v15788_v31 }
 0x32b   : > { %2366 = vmatpush1.msra.mxu0 %v2153_v27  ;;  %v2151_v27 = vsel %vm764_vm3, %v15779_v54, %v2102_v58 }
 0x32c   : > { %2367 = vmatprep.subr.mxu0 %v15581_v55  ;;  %v1332_v55 = vadd.f32 %v1331_v62, %v15553_v20 }
 0x32d   : > { %2368 = vmatpush1.msra.mxu0 %v15572_v25  ;;  %v1699_v25 = vmul.f32 0.2, %v1401_v51 }
 0x32e   : > { %1925 = vrot.lane.b32.xlu1 %v15693_v50, %s14244_s21  ;;  %1923 = vrot.lane.b32.xlu0 %v15636_v60, %s14244_s21  ;;  %v1698_v17 = vmul.f32 0.2, %v1332_v55 }
 0x32f   : > { %v1719_v8 = vmax.f32 %v1401_v51, %v1699_v25 }
 0x330   : > { %v1718_v1 = vmax.f32 %v1332_v55, %v1698_v17 }
 0x331   : > { %v15835_v6 = vmul.f32 %v1778_v18, %v1719_v8 }
 0x332   : > { %1989 = vrot.lane.b32.xlu1 %v15707_v34, %s14243_s17  ;;  %1987 = vrot.lane.b32.xlu0 %v15690_v61, %s14243_s17  ;;  %v15837_v37 = vmul.f32 %v1774_v23, %v1718_v1 }
 0x336   : > { %1865 = vrot.lane.b32.xlu1 %v15693_v50, %s14246_s12  ;;  %1863 = vrot.lane.b32.xlu0 %v15636_v60, %s14246_s12 }
 0x33a   : > { %1929 = vrot.lane.b32.xlu1 %v15707_v34, %s14244_s21  ;;  %1927 = vrot.lane.b32.xlu0 %v15690_v61, %s14244_s21 }
 0x33e   : > { %1869 = vrot.lane.b32.xlu1 %v15707_v34, %s14246_s12  ;;  %1867 = vrot.lane.b32.xlu0 %v15690_v61, %s14246_s12 }
 0x342   : > { %2295 = vrot.lane.b32.xlu1 %v15835_v6, %s14238_s1  ;;  %2293 = vrot.lane.b32.xlu0 %v15837_v37, %s14238_s1 }
 0x344   : > { %v15846_v38 = vpop.permute.xlu1 %2223  ;;  %v15848_v40 = vpop.permute.xlu0 %2283 }
 0x345   : > { %v2330_v57 = vsel %vm947_vm0, %v2282_v47, %v15848_v40  ;;  %v2270_v36 = vsel %vm886_vm1, %v15773_v16, %v15846_v38 }
 0x346   : > { %2235 = vrot.lane.b32.xlu1 %v15835_v6, %s14239_s8  ;;  %2233 = vrot.lane.b32.xlu0 %v15837_v37, %s14239_s8 }
 0x347   : > { %2430 = vmatprep.subr.mxu1 %v2330_v57 }
 0x348   : > { %2431 = vmatpush1.msra.mxu1 %v2331_v45  ;;  %v15864_v59 = vpop.permute.xlu1 %2103  ;;  %v15870_v39 = vpop.permute.xlu0 %2163 }
 0x349   : > { %2432 = vmatprep.subr.mxu1 %v2270_v36  ;;  %v2210_v47 = vsel %vm825_vm2, %v15788_v31, %v15870_v39  ;;  %v2150_v16 = vsel %vm764_vm3, %v2102_v58, %v15864_v59 }
 0x34a   : > { %2433 = vmatpush1.msra.mxu1 %v2271_v11  ;;  %2299 = vrot.lane.b32.xlu1 %v15862_v4, %s14238_s1 }
 0x34b   : > { %2297 = vrot.lane.b32.xlu0 %v15872_v44, %s14238_s1  ;;  %2434 = vmatprep.subr.mxu1 %v2210_v47  ;;  %v1473_v47 = vpop.f32.mrf.mxu0 }
 0x34c   : > { %2435 = vmatpush1.msra.mxu1 %v2211_v3  ;;  %v2038_v19 = vpop.permute.xlu1 %2037  ;;  %v15893_v42 = vpop.permute.xlu0 %2035 }
 0x34d   : > { %2436 = vmatprep.subr.mxu1 %v2150_v16  ;;  %v2093_v62 = vsel %vm703_vm4, %v15893_v42, %v2038_v19  ;;  %v1474_v16 = vadd.f32 %v1473_v47, %v15553_v20 }
 0x34e   : > { %2437 = vmatpush1.msra.mxu1 %v2151_v27  ;;  %2175 = vrot.lane.b32.xlu1 %v15835_v6, %s14240_s20 }
 0x34f   : > { %2173 = vrot.lane.b32.xlu0 %v15837_v37, %s14240_s20  ;;  %2369 = vmatprep.subr.mxu0 %v2093_v62 }
 0x350   : > { %2438 = vmatprep.subr.mxu1 %v15596_v24  ;;  %v15906_v43 = vpop.permute.xlu1 %1975  ;;  %v15908_v31 = vpop.permute.xlu0 %1977 }
 0x351   : > { %2439 = vmatpush1.msra.mxu1 %v15558_v48 }
 0x352   : > { %2239 = vrot.lane.b32.xlu1 %v15862_v4, %s14239_s8 }
 0x353   : > { %2237 = vrot.lane.b32.xlu0 %v15872_v44, %s14239_s8 }
 0x354   : > { %v2040_v54 = vpop.permute.xlu1 %2039  ;;  %v15915_v51 = vpop.permute.xlu0 %2041 }
 0x355   : > { %v2091_v55 = vsel %vm703_vm4, %v2040_v54, %v15915_v51  ;;  %v2092_v24 = vsel %vm703_vm4, %v2038_v19, %v2040_v54 }
 0x356   : > { %2115 = vrot.lane.b32.xlu1 %v15835_v6, %s14241_s25  ;;  %2440 = vmatprep.subr.mxu1 %v2091_v55 }
 0x357   : > { %2113 = vrot.lane.b32.xlu0 %v15837_v37, %s14241_s25  ;;  %2441 = vmatpush1.msra.mxu1 %v2092_v24  ;;  %v1702_v24 = vmul.f32 0.2, %v1474_v16 }
 0x358   : > { %v15926_v48 = vpop.permute.xlu1 %1917  ;;  %v15928_v25 = vpop.permute.xlu0 %1915 }
 0x35a   : > { %2179 = vrot.lane.b32.xlu1 %v15862_v4, %s14240_s20 }
 0x35b   : > { %2177 = vrot.lane.b32.xlu0 %v15872_v44, %s14240_s20 }
 0x35c   : > { %v15934_v17 = vpop.permute.xlu1 %1981  ;;  %v1980_v63 = vpop.permute.xlu0 %1979 }
 0x35d   : > { %v2031_v18 = vsel %vm642_vm5, %v1980_v63, %v15934_v17  ;;  %v2032_v8 = vsel %vm642_vm5, %v15908_v31, %v1980_v63  ;;  %v1613_v63 = vpop.f32.mrf.mxu0 }
 0x35e   : > { %2119 = vrot.lane.b32.xlu1 %v15862_v4, %s14241_s25  ;;  %2442 = vmatprep.subr.mxu1 %v2031_v18  ;;  %v1614_v18 = vadd.f32 %v1613_v63, %v15553_v20 }
 0x35f   : > { %2117 = vrot.lane.b32.xlu0 %v15872_v44, %s14241_s25  ;;  %2443 = vmatpush1.msra.mxu1 %v2032_v8 }
 0x360   : > { %v15946_v1 = vpop.permute.xlu1 %1855  ;;  %v15948_v23 = vpop.permute.xlu0 %1857 }
 0x362   : > { %2053 = vrot.lane.b32.xlu1 %v15837_v37, %s14242_s26 }
 0x363   : > { %2051 = vrot.lane.b32.xlu0 %v15709_v7, %s14242_s26 }
 0x364   : > { %v1920_v28 = vpop.permute.xlu1 %1919  ;;  %v15954_v32 = vpop.permute.xlu0 %1921 }
 0x365   : > { %v1971_v56 = vsel %vm581_vm6, %v1920_v28, %v15954_v32  ;;  %v1972_v58 = vsel %vm581_vm6, %v15926_v48, %v1920_v28 }
 0x366   : > { %1993 = vrot.lane.b32.xlu1 %v15837_v37, %s14243_s17  ;;  %2444 = vmatprep.subr.mxu1 %v1971_v56  ;;  %v1722_v56 = vmax.f32 %v1474_v16, %v1702_v24 }
 0x367   : > { %1991 = vrot.lane.b32.xlu0 %v15709_v7, %s14243_s17  ;;  %2445 = vmatpush1.msra.mxu1 %v1972_v58  ;;  %v1790_v58 = vrot.slane %v15615_v29, %v1757_v2  ;;  %v1705_v2 = vmul.f32 0.2, %v1614_v18 }
 0x368   : > { %v15966_v46 = vpop.permute.xlu1 %1861  ;;  %v1860_v21 = vpop.permute.xlu0 %1859 }
 0x369   : > { %v1911_v10 = vsel %vm520_vm7, %v1860_v21, %v15966_v46  ;;  %v1912_v0 = vsel %vm520_vm7, %v15948_v23, %v1860_v21 }
 0x36a   : > { %2057 = vrot.lane.b32.xlu1 %v15872_v44, %s14242_s26  ;;  %2446 = vmatprep.subr.mxu1 %v1911_v10  ;;  %v2033_v10 = vsel %vm642_vm5, %v15906_v43, %v15908_v31  ;;  %v1973_v31 = vsel %vm581_vm6, %v15928_v25, %v15926_v48 }
 0x36b   : > { %2055 = vrot.lane.b32.xlu0 %v15835_v6, %s14242_s26  ;;  %2447 = vmatpush1.msra.mxu1 %v1912_v0  ;;  %v16043_v0 = vmul.f32 %v1790_v58, %v1722_v56 }
 0x36c   : > { %v2288_v57 = vpop.permute.xlu1 %2287  ;;  %v2286_v45 = vpop.permute.xlu0 %2285  ;;  %11218 = vmatmul.mubr.msk.f32.vlgmr.msra.gmra.mxu1 %vm975_vm8, %v15974_v22 }
 0x36d   : > { %2622 = vmatprep.mubr.f32.mxu1 %v17270_v52 }
 0x36e   : > { %1933 = vrot.lane.b32.xlu1 %v15837_v37, %s14244_s21 }
 0x36f   : > { %1931 = vrot.lane.b32.xlu0 %v15709_v7, %s14244_s21 }
 0x370   : > { %v2228_v36 = vpop.permute.xlu1 %2227  ;;  %v15987_v11 = vpop.permute.xlu0 %2225 }
 0x371   : > { %v2269_v24 = vsel %vm886_vm1, %v15846_v38, %v15987_v11 }
 0x372   : > { %1997 = vrot.lane.b32.xlu1 %v15872_v44, %s14243_s17 }
 0x373   : > { %1995 = vrot.lane.b32.xlu0 %v15835_v6, %s14243_s17 }
 0x374   : > { %v15993_v3 = vpop.permute.xlu1 %2291  ;;  %v2290_v19 = vpop.permute.xlu0 %2289 }
 0x375   : > { %v2326_v27 = vsel %vm947_vm0, %v2290_v19, %v15993_v3  ;;  %v2327_v62 = vsel %vm947_vm0, %v2288_v57, %v2290_v19  ;;  %v1725_v19 = vmax.f32 %v1614_v18, %v1705_v2 }
 0x376   : > { %1873 = vrot.lane.b32.xlu1 %v15837_v37, %s14246_s12  ;;  %2572 = vmatprep.subr.mxu1 %v2326_v27 }
 0x377   : > { %1871 = vrot.lane.b32.xlu0 %v15709_v7, %s14246_s12  ;;  %2573 = vmatpush1.msra.mxu1 %v2327_v62  ;;  %v2329_v62 = vsel %vm947_vm0, %v15848_v40, %v2286_v45 }
 0x378   : > { %v16005_v54 = vpop.permute.xlu1 %2167  ;;  %v2166_v55 = vpop.permute.xlu0 %2165 }
 0x379   : > { %v2208_v18 = vsel %vm825_vm2, %v2166_v55, %v16005_v54 }
 0x37a   : > { %1937 = vrot.lane.b32.xlu1 %v15872_v44, %s14244_s21 }
 0x37b   : > { %1935 = vrot.lane.b32.xlu0 %v15835_v6, %s14244_s21 }
 0x37c   : > { %v16012_v8 = vpop.permute.xlu1 %2013  ;;  %v16014_v28 = vpop.permute.xlu0 %2073 }
 0x37d   : > { %v2094_v21 = vsel %vm703_vm4, %v16014_v28, %v15893_v42  ;;  %v2034_v9 = vsel %vm642_vm5, %v16012_v8, %v15906_v43  ;;  %v1913_v43 = vsel %vm520_vm7, %v15946_v1, %v15948_v23  ;;  %v2328_v23 = vsel %vm947_vm0, %v2286_v45, %v2288_v57 }
 0x37e   : > { %1877 = vrot.lane.b32.xlu1 %v15872_v44, %s14246_s12  ;;  %2370 = vmatpush1.msra.mxu0 %v2094_v21  ;;  %v2268_v57 = vsel %vm886_vm1, %v15987_v11, %v2228_v36 }
 0x37f   : > { %1875 = vrot.lane.b32.xlu0 %v15835_v6, %s14246_s12  ;;  %2371 = vmatprep.subr.mxu0 %v2033_v10 }
 0x380   : > { %v16035_v29 = vpop.permute.xlu1 %1893  ;;  %2372 = vmatpush1.msra.mxu0 %v2034_v9  ;;  %v16037_v42 = vpop.permute.xlu0 %1953 }
 0x381   : > { %2373 = vmatprep.subr.mxu0 %v1973_v31  ;;  %v1974_v47 = vsel %vm581_vm6, %v16037_v42, %v15928_v25  ;;  %v1914_v48 = vsel %vm520_vm7, %v16035_v29, %v15946_v1  ;;  %v1802_v25 = vrot.slane %v15646_v5, %v15563_v41 }
 0x382   : > { %2303 = vrot.lane.b32.xlu1 %v15630_v49, %s14238_s1  ;;  %2374 = vmatpush1.msra.mxu0 %v1974_v47 }
 0x383   : > { %2301 = vrot.lane.b32.xlu0 %v16043_v0, %s14238_s1  ;;  %2375 = vmatprep.subr.mxu0 %v1913_v43  ;;  %v16084_v40 = vmul.f32 %v1802_v25, %v1725_v19 }
 0x384   : > { %v16063_v16 = vpop.permute.xlu1 %2231  ;;  %2376 = vmatpush1.msra.mxu0 %v1914_v48  ;;  %v2230_v27 = vpop.permute.xlu0 %2229 }
 0x385   : > { %2501 = vmatprep.subr.mxu0 %v2328_v23  ;;  %11217 = vmatmul.mubr.msk.f32.vlgmr.msra.gmra.mxu0 %vm975_vm8, %v15974_v22  ;;  %v2266_v1 = vsel %vm886_vm1, %v2230_v27, %v16063_v16  ;;  %v2267_v41 = vsel %vm886_vm1, %v2228_v36, %v2230_v27  ;;  %v2209_v36 = vsel %vm825_vm2, %v15870_v39, %v2166_v55 }
 0x386   : > { %2243 = vrot.lane.b32.xlu1 %v15630_v49, %s14239_s8  ;;  %2502 = vmatpush1.msra.mxu0 %v2329_v62 }
 0x387   : > { %2241 = vrot.lane.b32.xlu0 %v16043_v0, %s14239_s8  ;;  %2574 = vmatprep.subr.mxu1 %v2266_v1 }
 0x388   : > { %2503 = vmatprep.subr.mxu0 %v2268_v57  ;;  %2575 = vmatpush1.msra.mxu1 %v2267_v41  ;;  %v2108_v45 = vpop.permute.xlu1 %2107  ;;  %v2106_v63 = vpop.permute.xlu0 %2105 }
 0x389   : > { %2504 = vmatpush1.msra.mxu0 %v2269_v24  ;;  %v2148_v56 = vsel %vm764_vm3, %v2106_v63, %v2108_v45  ;;  %2551 = vmatprep.mubr.f32.mxu0 %v17270_v52  ;;  %v2149_v11 = vsel %vm764_vm3, %v15864_v59, %v2106_v63 }
 0x38a   : > { %2505 = vmatprep.subr.mxu0 %v2208_v18  ;;  %2307 = vrot.lane.b32.xlu1 %v16084_v40, %s14238_s1 }
 0x38b   : > { %2305 = vrot.lane.b32.xlu0 %v15632_v33, %s14238_s1  ;;  %2506 = vmatpush1.msra.mxu0 %v2209_v36 }
 0x38c   : > { %2507 = vmatprep.subr.mxu0 %v2148_v56  ;;  %v16103_v38 = vpop.permute.xlu1 %2171  ;;  %v2170_v58 = vpop.permute.xlu0 %2169 }
 0x38d   : > { %2508 = vmatpush1.msra.mxu0 %v2149_v11  ;;  %v2206_v21 = vsel %vm825_vm2, %v2170_v58, %v16103_v38  ;;  %v2207_v39 = vsel %vm825_vm2, %v16005_v54, %v2170_v58 }
 0x38e   : > { %2509 = vmatprep.subr.mxu0 %v15693_v50  ;;  %2183 = vrot.lane.b32.xlu1 %v15630_v49, %s14240_s20 }
 0x38f   : > { %2181 = vrot.lane.b32.xlu0 %v16043_v0, %s14240_s20  ;;  %2510 = vmatpush1.msra.mxu0 %v15636_v60 }
 0x390   : > { %2576 = vmatprep.subr.mxu1 %v2206_v21  ;;  %v16120_v59 = vpop.permute.xlu1 %2111  ;;  %v2110_v55 = vpop.permute.xlu0 %2109 }
 0x391   : > { %2577 = vmatpush1.msra.mxu1 %v2207_v39  ;;  %v2146_v50 = vsel %vm764_vm3, %v2110_v55, %v16120_v59  ;;  %v2147_v10 = vsel %vm764_vm3, %v2108_v45, %v2110_v55  ;;  %v1615_v55 = vpop.f32.mrf.mxu0 }
 0x392   : > { %2247 = vrot.lane.b32.xlu1 %v16084_v40, %s14239_s8  ;;  %2578 = vmatprep.subr.mxu1 %v2146_v50 }
 0x393   : > { %2245 = vrot.lane.b32.xlu0 %v15632_v33, %s14239_s8  ;;  %2579 = vmatpush1.msra.mxu1 %v2147_v10 }
 0x394   : > { %v2046_v60 = vpop.permute.xlu1 %2045  ;;  %2580 = vmatprep.subr.mxu1 %v15707_v34  ;;  %v2044_v54 = vpop.permute.xlu0 %2043 }
 0x395   : > { %2581 = vmatpush1.msra.mxu1 %v15690_v61  ;;  %v2089_v9 = vsel %vm703_vm4, %v2044_v54, %v2046_v60  ;;  %v2090_v2 = vsel %vm703_vm4, %v15915_v51, %v2044_v54 }
 0x396   : > { %2123 = vrot.lane.b32.xlu1 %v15630_v49, %s14241_s25  ;;  %2511 = vmatprep.subr.mxu0 %v2089_v9 }
 0x397   : > { %2121 = vrot.lane.b32.xlu0 %v16043_v0, %s14241_s25  ;;  %2512 = vmatpush1.msra.mxu0 %v2090_v2 }
 0x398   : > { %v1986_v31 = vpop.permute.xlu1 %1985  ;;  %v1984_v34 = vpop.permute.xlu0 %1983 }
 0x399   : > { %v2029_v61 = vsel %vm642_vm5, %v1984_v34, %v1986_v31  ;;  %v2030_v47 = vsel %vm642_vm5, %v15934_v17, %v1984_v34 }
 0x39a   : > { %2187 = vrot.lane.b32.xlu1 %v16084_v40, %s14240_s20  ;;  %2513 = vmatprep.subr.mxu0 %v2029_v61 }
 0x39b   : > { %2185 = vrot.lane.b32.xlu0 %v15632_v33, %s14240_s20  ;;  %2514 = vmatpush1.msra.mxu0 %v2030_v47 }
 0x39c   : > { %v16151_v51 = vpop.permute.xlu1 %2049  ;;  %v2048_v43 = vpop.permute.xlu0 %2047 }
 0x39d   : > { %v2087_v48 = vsel %vm703_vm4, %v2048_v43, %v16151_v51  ;;  %v2088_v19 = vsel %vm703_vm4, %v2046_v60, %v2048_v43  ;;  %v1616_v60 = vadd.f32 %v1615_v55, %v15553_v20  ;;  %v1806_v43 = vrot.slane %v15646_v5, %v15570_v53 }
 0x39e   : > { %2127 = vrot.lane.b32.xlu1 %v16084_v40, %s14241_s25  ;;  %2582 = vmatprep.subr.mxu1 %v2087_v48 }
 0x39f   : > { %2125 = vrot.lane.b32.xlu0 %v15632_v33, %s14241_s25  ;;  %2583 = vmatpush1.msra.mxu1 %v2088_v19  ;;  %v1706_v20 = vmul.f32 0.2, %v1616_v60 }
 0x3a0   : > { %v1926_v17 = vpop.permute.xlu1 %1925  ;;  %v1924_v25 = vpop.permute.xlu0 %1923 }
 0x3a1   : > { %v1969_v27 = vsel %vm581_vm6, %v1924_v25, %v1926_v17  ;;  %v1970_v23 = vsel %vm581_vm6, %v15954_v32, %v1924_v25  ;;  %v1726_v47 = vmax.f32 %v1616_v60, %v1706_v20 }
 0x3a2   : > { %2061 = vrot.lane.b32.xlu1 %v16043_v0, %s14242_s26  ;;  %2515 = vmatprep.subr.mxu0 %v1969_v27 }
 0x3a3   : > { %2059 = vrot.lane.b32.xlu0 %v15862_v4, %s14242_s26  ;;  %2516 = vmatpush1.msra.mxu0 %v1970_v23  ;;  %v16251_v25 = vmul.f32 %v1806_v43, %v1726_v47 }
 0x3a4   : > { %v16171_v62 = vpop.permute.xlu1 %1989  ;;  %v1988_v1 = vpop.permute.xlu0 %1987 }
 0x3a5   : > { %v2027_v41 = vsel %vm642_vm5, %v1988_v1, %v16171_v62  ;;  %v2028_v57 = vsel %vm642_vm5, %v1986_v31, %v1988_v1 }
 0x3a6   : > { %2001 = vrot.lane.b32.xlu1 %v16043_v0, %s14243_s17  ;;  %2584 = vmatprep.subr.mxu1 %v2027_v41 }
 0x3a7   : > { %1999 = vrot.lane.b32.xlu0 %v15862_v4, %s14243_s17  ;;  %2585 = vmatpush1.msra.mxu1 %v2028_v57 }
 0x3a8   : > { %v1866_v32 = vpop.permute.xlu1 %1865  ;;  %v1864_v45 = vpop.permute.xlu0 %1863 }
 0x3a9   : > { %v1909_v24 = vsel %vm520_vm7, %v1864_v45, %v1866_v32  ;;  %v1910_v63 = vsel %vm520_vm7, %v15966_v46, %v1864_v45 }
 0x3aa   : > { %2065 = vrot.lane.b32.xlu1 %v15632_v33, %s14242_s26  ;;  %2517 = vmatprep.subr.mxu0 %v1909_v24 }
 0x3ab   : > { %2063 = vrot.lane.b32.xlu0 %v15630_v49, %s14242_s26  ;;  %2518 = vmatpush1.msra.mxu0 %v1910_v63 }
 0x3ac   : > { %v16191_v18 = vpop.permute.xlu1 %1929  ;;  %11219 = vmatmul.mubr.msk.f32.vlgmr.msra.gmra.mxu0 %vm975_vm8, %v15974_v22  ;;  %v1928_v56 = vpop.permute.xlu0 %1927 }
 0x3ad   : > { %v1967_v36 = vsel %vm581_vm6, %v1928_v56, %v16191_v18  ;;  %v1968_v46 = vsel %vm581_vm6, %v1926_v17, %v1928_v56  ;;  %2693 = vmatprep.mubr.f32.mxu0 %v17270_v52 }
 0x3ae   : > { %1941 = vrot.lane.b32.xlu1 %v16043_v0, %s14244_s21  ;;  %2586 = vmatprep.subr.mxu1 %v1967_v36 }
 0x3af   : > { %1939 = vrot.lane.b32.xlu0 %v15862_v4, %s14244_s21  ;;  %2587 = vmatpush1.msra.mxu1 %v1968_v46 }
 0x3b0   : > { %v16205_v11 = vpop.permute.xlu1 %1869  ;;  %v1868_v58 = vpop.permute.xlu0 %1867 }
 0x3b1   : > { %v1907_v21 = vsel %vm520_vm7, %v1868_v58, %v16205_v11  ;;  %v1908_v39 = vsel %vm520_vm7, %v1866_v32, %v1868_v58 }
 0x3b2   : > { %2005 = vrot.lane.b32.xlu1 %v15632_v33, %s14243_s17  ;;  %2588 = vmatprep.subr.mxu1 %v1907_v21 }
 0x3b3   : > { %2003 = vrot.lane.b32.xlu0 %v15630_v49, %s14243_s17  ;;  %2589 = vmatpush1.msra.mxu1 %v1908_v39 }
 0x3b4   : > { %v2296_v50 = vpop.permute.xlu1 %2295  ;;  %11220 = vmatmul.mubr.msk.f32.vlgmr.msra.gmra.mxu1 %vm975_vm8, %v15974_v22  ;;  %v2294_v10 = vpop.permute.xlu0 %2293 }
 0x3b5   : > { %v2324_v54 = vsel %vm947_vm0, %v2294_v10, %v2296_v50  ;;  %v2325_v9 = vsel %vm947_vm0, %v15993_v3, %v2294_v10  ;;  %2764 = vmatprep.mubr.f32.mxu1 %v17270_v52 }
 0x3b6   : > { %1881 = vrot.lane.b32.xlu1 %v16043_v0, %s14246_s12  ;;  %2643 = vmatprep.subr.mxu0 %v2324_v54 }
 0x3b7   : > { %1879 = vrot.lane.b32.xlu0 %v15862_v4, %s14246_s12  ;;  %2644 = vmatpush1.msra.mxu0 %v2325_v9 }
 0x3b8   : > { %v2236_v2 = vpop.permute.xlu1 %2235  ;;  %v2234_v31 = vpop.permute.xlu0 %2233 }
 0x3b9   : > { %v2264_v34 = vsel %vm886_vm1, %v2234_v31, %v2236_v2  ;;  %v2265_v3 = vsel %vm886_vm1, %v16063_v16, %v2234_v31 }
 0x3ba   : > { %1945 = vrot.lane.b32.xlu1 %v15632_v33, %s14244_s21  ;;  %2645 = vmatprep.subr.mxu0 %v2264_v34 }
 0x3bb   : > { %1943 = vrot.lane.b32.xlu0 %v15630_v49, %s14244_s21  ;;  %2646 = vmatpush1.msra.mxu0 %v2265_v3 }
 0x3bc   : > { %v16238_v61 = vpop.permute.xlu1 %2299 }
 0x3bd   : > { %v2298_v48 = vpop.permute.xlu0 %2297 }
 0x3be   : > { %1885 = vrot.lane.b32.xlu1 %v15632_v33, %s14246_s12  ;;  %v2322_v16 = vsel %vm947_vm0, %v2298_v48, %v16238_v61  ;;  %v2323_v19 = vsel %vm947_vm0, %v2296_v50, %v2298_v48 }
 0x3bf   : > { %1883 = vrot.lane.b32.xlu0 %v15630_v49, %s14246_s12  ;;  %2714 = vmatprep.subr.mxu1 %v2322_v16 }
 0x3c0   : > { %2715 = vmatpush1.msra.mxu1 %v2323_v19  ;;  %v2176_v17 = vpop.permute.xlu1 %2175 }
 0x3c1   : > { %v2174_v53 = vpop.permute.xlu0 %2173 }
 0x3c2   : > { %2311 = vrot.lane.b32.xlu1 %v15659_v26, %s14238_s1  ;;  %v2204_v5 = vsel %vm825_vm2, %v2174_v53, %v2176_v17  ;;  %v2205_v27 = vsel %vm825_vm2, %v16103_v38, %v2174_v53 }
 0x3c3   : > { %2309 = vrot.lane.b32.xlu0 %v16251_v25, %s14238_s1  ;;  %2647 = vmatprep.subr.mxu0 %v2204_v5 }
 0x3c4   : > { %2648 = vmatpush1.msra.mxu0 %v2205_v27  ;;  %v16262_v23 = vpop.permute.xlu1 %2239 }
 0x3c5   : > { %v2238_v1 = vpop.permute.xlu0 %2237 }
 0x3c6   : > { %2251 = vrot.lane.b32.xlu1 %v15659_v26, %s14239_s8  ;;  %v2262_v41 = vsel %vm886_vm1, %v2238_v1, %v16262_v23  ;;  %v2263_v57 = vsel %vm886_vm1, %v2236_v2, %v2238_v1 }
 0x3c7   : > { %2249 = vrot.lane.b32.xlu0 %v16251_v25, %s14239_s8  ;;  %2716 = vmatprep.subr.mxu1 %v2262_v41  ;;  %v2336_v41 = vld [vmem:[%s17209_s5] sm:$0xff] }
 0x3c8   : > { %2717 = vmatpush1.msra.mxu1 %v2263_v57  ;;  %v2116_v38 = vpop.permute.xlu1 %2115 }
 0x3c9   : > { %v2114_v32 = vpop.permute.xlu0 %2113 }
 0x3ca   : > { %2189 = vrot.lane.b32.xlu1 %v16251_v25, %s14240_s20  ;;  %v2144_v45 = vsel %vm764_vm3, %v2114_v32, %v2116_v38  ;;  %v2145_v24 = vsel %vm764_vm3, %v16120_v59, %v2114_v32 }
 0x3cb   : > { %2313 = vrot.lane.b32.xlu0 %v15723_v12, %s14238_s1  ;;  %2649 = vmatprep.subr.mxu0 %v2144_v45  ;;  %s14251_s1 = smov 25  }
 0x3cc   : > { %2650 = vmatpush1.msra.mxu0 %v2145_v24  ;;  %v16282_v63 = vpop.permute.xlu1 %2179 }
 0x3cd   : > { %2651 = vmatprep.subr.mxu0 %v15837_v37  ;;  %v2178_v56 = vpop.permute.xlu0 %2177 }
 0x3ce   : > { %2652 = vmatpush1.msra.mxu0 %v15709_v7  ;;  %2253 = vrot.lane.b32.xlu1 %v15723_v12, %s14239_s8  ;;  %v2202_v36 = vsel %vm825_vm2, %v2178_v56, %v16282_v63  ;;  %v2203_v59 = vsel %vm825_vm2, %v2176_v17, %v2178_v56  ;;  %s14252_s8 = smov 27  }
 0x3cf   : > { %2191 = vrot.lane.b32.xlu0 %v15659_v26, %s14240_s20  ;;  %2718 = vmatprep.subr.mxu1 %v2202_v36 }
 0x3d0   : > { %2719 = vmatpush1.msra.mxu1 %v2203_v59  ;;  %v16295_v46 = vpop.permute.xlu1 %2119 }
 0x3d1   : > { %v2118_v37 = vpop.permute.xlu0 %2117 }
 0x3d2   : > { %2131 = vrot.lane.b32.xlu1 %v15659_v26, %s14241_s25  ;;  %v2142_v7 = vsel %vm764_vm3, %v2118_v37, %v16295_v46  ;;  %v2143_v58 = vsel %vm764_vm3, %v2116_v38, %v2118_v37 }
 0x3d3   : > { %2129 = vrot.lane.b32.xlu0 %v16251_v25, %s14241_s25  ;;  %2720 = vmatprep.subr.mxu1 %v2142_v7 }
 0x3d4   : > { %2721 = vmatpush1.msra.mxu1 %v2143_v58  ;;  %v2054_v21 = vpop.permute.xlu1 %2053 }
 0x3d5   : > { %2722 = vmatprep.subr.mxu1 %v15872_v44  ;;  %v2052_v39 = vpop.permute.xlu0 %2051 }
 0x3d6   : > { %2723 = vmatpush1.msra.mxu1 %v15835_v6  ;;  %2133 = vrot.lane.b32.xlu1 %v15723_v12, %s14241_s25  ;;  %v2085_v55 = vsel %vm703_vm4, %v2052_v39, %v2054_v21  ;;  %v2086_v50 = vsel %vm703_vm4, %v16151_v51, %v2052_v39 }
 0x3d7   : > { %2193 = vrot.lane.b32.xlu0 %v15723_v12, %s14240_s20  ;;  %2653 = vmatprep.subr.mxu0 %v2085_v55  ;;  %s14253_s20 = smov 26  }
 0x3d8   : > { %2654 = vmatpush1.msra.mxu0 %v2086_v50  ;;  %v1994_v10 = vpop.permute.xlu1 %1993 }
 0x3d9   : > { %v1992_v44 = vpop.permute.xlu0 %1991 }
 0x3da   : > { %2069 = vrot.lane.b32.xlu1 %v16251_v25, %s14242_s26  ;;  %v2025_v6 = vsel %vm642_vm5, %v1992_v44, %v1994_v10  ;;  %v2026_v60 = vsel %vm642_vm5, %v16171_v62, %v1992_v44 }
 0x3db   : > { %2067 = vrot.lane.b32.xlu0 %v16084_v40, %s14242_s26  ;;  %2655 = vmatprep.subr.mxu0 %v2025_v6 }
 0x3dc   : > { %2656 = vmatpush1.msra.mxu0 %v2026_v60  ;;  %v16326_v51 = vpop.permute.xlu1 %2057 }
 0x3dd   : > { %v2056_v54 = vpop.permute.xlu0 %2055 }
 0x3de   : > { %2009 = vrot.lane.b32.xlu1 %v16251_v25, %s14243_s17  ;;  %v2083_v9 = vsel %vm703_vm4, %v2056_v54, %v16326_v51  ;;  %v2084_v2 = vsel %vm703_vm4, %v2054_v21, %v2056_v54 }
 0x3df   : > { %2007 = vrot.lane.b32.xlu0 %v16084_v40, %s14243_s17  ;;  %2724 = vmatprep.subr.mxu1 %v2083_v9 }
 0x3e0   : > { %2725 = vmatpush1.msra.mxu1 %v2084_v2  ;;  %v1934_v62 = vpop.permute.xlu1 %1933 }
 0x3e1   : > { %v1932_v31 = vpop.permute.xlu0 %1931 }
 0x3e2   : > { %1947 = vrot.lane.b32.xlu1 %v16084_v40, %s14244_s21  ;;  %v1965_v20 = vsel %vm581_vm6, %v1932_v31, %v1934_v62  ;;  %v1966_v34 = vsel %vm581_vm6, %v16191_v18, %v1932_v31 }
 0x3e3   : > { %2071 = vrot.lane.b32.xlu0 %v15659_v26, %s14242_s26  ;;  %2657 = vmatprep.subr.mxu0 %v1965_v20 }
 0x3e4   : > { %2658 = vmatpush1.msra.mxu0 %v1966_v34  ;;  %v16346_v3 = vpop.permute.xlu1 %1997 }
 0x3e5   : > { %v1996_v47 = vpop.permute.xlu0 %1995 }
 0x3e6   : > { %2011 = vrot.lane.b32.xlu1 %v15659_v26, %s14243_s17  ;;  %v2023_v43 = vsel %vm642_vm5, %v1996_v47, %v16346_v3  ;;  %v2024_v48 = vsel %vm642_vm5, %v1994_v10, %v1996_v47 }
 0x3e7   : > { %1949 = vrot.lane.b32.xlu0 %v16251_v25, %s14244_s21  ;;  %2726 = vmatprep.subr.mxu1 %v2023_v43 }
 0x3e8   : > { %2727 = vmatpush1.msra.mxu1 %v2024_v48  ;;  %v1874_v18 = vpop.permute.xlu1 %1873 }
 0x3e9   : > { %v1872_v16 = vpop.permute.xlu0 %1871 }
 0x3ea   : > { %1889 = vrot.lane.b32.xlu1 %v16251_v25, %s14246_s12  ;;  %v1905_v19 = vsel %vm520_vm7, %v1872_v16, %v1874_v18  ;;  %v1906_v17 = vsel %vm520_vm7, %v16205_v11, %v1872_v16 }
 0x3eb   : > { %1887 = vrot.lane.b32.xlu0 %v16084_v40, %s14246_s12  ;;  %2659 = vmatprep.subr.mxu0 %v1905_v19 }
 0x3ec   : > { %2660 = vmatpush1.msra.mxu0 %v1906_v17  ;;  %v16366_v53 = vpop.permute.xlu1 %1937 }
 0x3ed   : > { %11221 = vmatmul.mubr.msk.f32.vlgmr.msra.gmra.mxu0 %vm975_vm8, %v15974_v22  ;;  %v1936_v5 = vpop.permute.xlu0 %1935 }
 0x3ee   : > { %1891 = vrot.lane.b32.xlu1 %v15659_v26, %s14246_s12  ;;  %v1963_v27 = vsel %vm581_vm6, %v1936_v5, %v16366_v53  ;;  %v1964_v11 = vsel %vm581_vm6, %v1934_v62, %v1936_v5  ;;  %2835 = vmatprep.mubr.f32.mxu0 %v17270_v52  ;;  %s11206_s12 = sshll.u32 %s14465_s2, 4 }
 0x3ef   : > { %1951 = vrot.lane.b32.xlu0 %v15659_v26, %s14244_s21  ;;  %2728 = vmatprep.subr.mxu1 %v1963_v27  ;;  %s456_s11 = scalar_lea.vmem [#allocation14], %s11206_s12 }
 0x3f0   : > { %2729 = vmatpush1.msra.mxu1 %v1964_v11  ;;  %v16380_v1 = vpop.permute.xlu1 %1877  ;;  %s11059_s29 = sshll.u32 %s456_s11, 4  ;;  %s17156_s29 = int_to_ptr.vmem [resolvable:$true] %s11059_s29 }
 0x3f1   : > { %v1876_v57 = vpop.permute.xlu0 %1875 }
 0x3f2   : > { %v1903_v38 = vsel %vm520_vm7, %v1876_v57, %v16380_v1  ;;  %v1904_v32 = vsel %vm520_vm7, %v1874_v18, %v1876_v57 }
 0x3f3   : > { %2339 = vperm.xlu0 %12447, %v2336_v41   ;;  %2730 = vmatprep.subr.mxu1 %v1903_v38 }
 0x3f4   : > { %2731 = vmatpush1.msra.mxu1 %v1904_v32  ;;  %v2304_v45 = vpop.permute.xlu1 %2303 }
 0x3f5   : > { %11222 = vmatmul.mubr.msk.f32.vlgmr.msra.gmra.mxu1 %vm975_vm8, %v15974_v22  ;;  %v2302_v24 = vpop.permute.xlu0 %2301 }
 0x3f6   : > { %v2320_v56 = vsel %vm947_vm0, %v2302_v24, %v2304_v45  ;;  %v2321_v36 = vsel %vm947_vm0, %v16238_v61, %v2302_v24  ;;  %2906 = vmatprep.mubr.f32.mxu1 %v17270_v52 }
 0x3f7   : > { %2785 = vmatprep.subr.mxu0 %v2320_v56 }
 0x3f8   : > { %2786 = vmatpush1.msra.mxu0 %v2321_v36  ;;  %v2244_v59 = vpop.permute.xlu1 %2243 }
 0x3f9   : > { %v2242_v37 = vpop.permute.xlu0 %2241 }
 0x3fa   : > { %v2260_v7 = vsel %vm886_vm1, %v2242_v37, %v2244_v59  ;;  %v2261_v58 = vsel %vm886_vm1, %v16262_v23, %v2242_v37 }
 0x3fb   : > { %2787 = vmatprep.subr.mxu0 %v2260_v7 }
 0x3fc   : > { %2788 = vmatpush1.msra.mxu0 %v2261_v58  ;;  %v16403_v21 = vpop.permute.xlu1 %2307 }
 0x3fd   : > { %v2306_v39 = vpop.permute.xlu0 %2305 }
 0x3fe   : > { %v2318_v61 = vsel %vm947_vm0, %v2306_v39, %v16403_v21  ;;  %v2319_v55 = vsel %vm947_vm0, %v2304_v45, %v2306_v39 }
 0x3ff   : > { %2856 = vmatprep.subr.mxu1 %v2318_v61 }
 0x400   : > { %2857 = vmatpush1.msra.mxu1 %v2319_v55  ;;  %v2184_v50 = vpop.permute.xlu1 %2183 }
 0x401   : > { %v2182_v10 = vpop.permute.xlu0 %2181 }
 0x402   : > { %v2200_v44 = vsel %vm825_vm2, %v2182_v10, %v2184_v50  ;;  %v2201_v23 = vsel %vm825_vm2, %v16282_v63, %v2182_v10 }
 0x403   : > { %2789 = vmatprep.subr.mxu0 %v2200_v44 }
 0x404   : > { %2790 = vmatpush1.msra.mxu0 %v2201_v23  ;;  %v16415_v6 = vpop.permute.xlu1 %2247 }
 0x405   : > { %v2246_v60 = vpop.permute.xlu0 %2245 }
 0x406   : > { %v2258_v54 = vsel %vm886_vm1, %v2246_v60, %v16415_v6  ;;  %v2259_v9 = vsel %vm886_vm1, %v2244_v59, %v2246_v60 }
 0x407   : > { %2858 = vmatprep.subr.mxu1 %v2258_v54 }
 0x408   : > { %2859 = vmatpush1.msra.mxu1 %v2259_v9  ;;  %v2124_v2 = vpop.permute.xlu1 %2123 }
 0x409   : > { %v2122_v62 = vpop.permute.xlu0 %2121 }
 0x40a   : > { %v2141_v63 = vsel %vm764_vm3, %v16295_v46, %v2122_v62  ;;  %v2140_v31 = vsel %vm764_vm3, %v2122_v62, %v2124_v2 }
 0x40b   : > { %2791 = vmatprep.subr.mxu0 %v2140_v31 }
 0x40c   : > { %2792 = vmatpush1.msra.mxu0 %v2141_v63  ;;  %v16427_v20 = vpop.permute.xlu1 %2187 }
 0x40d   : > { %2793 = vmatprep.subr.mxu0 %v16043_v0  ;;  %v2186_v34 = vpop.permute.xlu0 %2185 }
 0x40e   : > { %v2199_v47 = vsel %vm825_vm2, %v2184_v50, %v2186_v34  ;;  %2794 = vmatpush1.msra.mxu0 %v15862_v4  ;;  %v2198_v43 = vsel %vm825_vm2, %v2186_v34, %v16427_v20 }
 0x40f   : > { %2860 = vmatprep.subr.mxu1 %v2198_v43 }
 0x410   : > { %2861 = vmatpush1.msra.mxu1 %v2199_v47  ;;  %v16436_v46 = vpop.permute.xlu1 %2127 }
 0x411   : > { %v2126_v48 = vpop.permute.xlu0 %2125 }
 0x412   : > { %v2139_v18 = vsel %vm764_vm3, %v2124_v2, %v2126_v48  ;;  %v2138_v0 = vsel %vm764_vm3, %v2126_v48, %v16436_v46 }
 0x413   : > { %2862 = vmatprep.subr.mxu1 %v2138_v0 }
 0x414   : > { %2863 = vmatpush1.msra.mxu1 %v2139_v18  ;;  %v2062_v16 = vpop.permute.xlu1 %2061 }
 0x415   : > { %2864 = vmatprep.subr.mxu1 %v15632_v33  ;;  %v2060_v4 = vpop.permute.xlu0 %2059 }
 0x416   : > { %v2082_v19 = vsel %vm703_vm4, %v16326_v51, %v2060_v4  ;;  %2865 = vmatpush1.msra.mxu1 %v15630_v49  ;;  %v2081_v17 = vsel %vm703_vm4, %v2060_v4, %v2062_v16 }
 0x417   : > { %2795 = vmatprep.subr.mxu0 %v2081_v17 }
 0x418   : > { %2796 = vmatpush1.msra.mxu0 %v2082_v19  ;;  %v2002_v5 = vpop.permute.xlu1 %2001 }
 0x419   : > { %v2000_v27 = vpop.permute.xlu0 %1999 }
 0x41a   : > { %v2022_v11 = vsel %vm642_vm5, %v16346_v3, %v2000_v27  ;;  %v2021_v33 = vsel %vm642_vm5, %v2000_v27, %v2002_v5 }
 0x41b   : > { %2797 = vmatprep.subr.mxu0 %v2021_v33 }
 0x41c   : > { %2798 = vmatpush1.msra.mxu0 %v2022_v11  ;;  %v16455_v41 = vpop.permute.xlu1 %2065 }
 0x41d   : > { %v2064_v51 = vpop.permute.xlu0 %2063 }
 0x41e   : > { %v2080_v49 = vsel %vm703_vm4, %v2062_v16, %v2064_v51  ;;  %v2079_v57 = vsel %vm703_vm4, %v2064_v51, %v16455_v41 }
 0x41f   : > { %2866 = vmatprep.subr.mxu1 %v2079_v57 }
 0x420   : > { %2867 = vmatpush1.msra.mxu1 %v2080_v49  ;;  %v1942_v38 = vpop.permute.xlu1 %1941 }
 0x421   : > { %v1940_v32 = vpop.permute.xlu0 %1939 }
 0x422   : > { %v1962_v3 = vsel %vm581_vm6, %v16366_v53, %v1940_v32  ;;  %v1961_v45 = vsel %vm581_vm6, %v1940_v32, %v1942_v38 }
 0x423   : > { %2799 = vmatprep.subr.mxu0 %v1961_v45 }
 0x424   : > { %2800 = vmatpush1.msra.mxu0 %v1962_v3  ;;  %v16467_v24 = vpop.permute.xlu1 %2005 }
 0x425   : > { %v2004_v56 = vpop.permute.xlu0 %2003 }
 0x426   : > { %v2020_v36 = vsel %vm642_vm5, %v2002_v5, %v2004_v56  ;;  %v2019_v59 = vsel %vm642_vm5, %v2004_v56, %v16467_v24 }
 0x427   : > { %2868 = vmatprep.subr.mxu1 %v2019_v59 }
 0x428   : > { %2869 = vmatpush1.msra.mxu1 %v2020_v36  ;;  %v1882_v37 = vpop.permute.xlu1 %1881 }
 0x429   : > { %v1880_v7 = vpop.permute.xlu0 %1879 }
 0x42a   : > { %v1902_v53 = vsel %vm520_vm7, %v16380_v1, %v1880_v7  ;;  %v1901_v58 = vsel %vm520_vm7, %v1880_v7, %v1882_v37 }
 0x42b   : > { %2801 = vmatprep.subr.mxu0 %v1901_v58 }
 0x42c   : > { %2802 = vmatpush1.msra.mxu0 %v1902_v53  ;;  %v16479_v39 = vpop.permute.xlu1 %1945  ;;  %v12451_v53 = vld [vmem:[#allocation11 + $0x154] ss:$24 sps:$4 sm:$0xff]  }
 0x42d   : > { %11223 = vmatmul.mubr.msk.f32.vlgmr.msra.gmra.mxu0 %vm975_vm8, %v15974_v22  ;;  %v1944_v61 = vpop.permute.xlu0 %1943 }
 0x42e   : > { %v1960_v55 = vsel %vm581_vm6, %v1942_v38, %v1944_v61  ;;  %v1959_v50 = vsel %vm581_vm6, %v1944_v61, %v16479_v39  ;;  %2977 = vmatprep.mubr.f32.mxu0 %v17270_v52  ;;  %v12449_v61 = vld [vmem:[#allocation11 + $0x150] ss:$24 sps:$4 sm:$0xff]  }
 0x42f   : > { %2870 = vmatprep.subr.mxu1 %v1959_v50 }
 0x430   : > { %2871 = vmatpush1.msra.mxu1 %v1960_v55  ;;  %v16489_v1 = vpop.permute.xlu1 %1885  ;;  %v12454_v55 = vld [vmem:[#allocation11 + $0x124] ss:$24 sps:$4 sm:$0xff]  }
 0x431   : > { %v1884_v10 = vpop.permute.xlu0 %1883 }
 0x432   : > { %v1900_v44 = vsel %vm520_vm7, %v1882_v37, %v1884_v10  ;;  %v1899_v23 = vsel %vm520_vm7, %v1884_v10, %v16489_v1 }
 0x433   : > { %2872 = vmatprep.subr.mxu1 %v1899_v23  ;;  %v12457_v23 = vld [vmem:[#allocation11 + $0x454] ss:$24 sps:$4 sm:$0xff]  }
 0x434   : > { %2873 = vmatpush1.msra.mxu1 %v1900_v44  ;;  %v2312_v60 = vpop.permute.xlu1 %2311  ;;  %v12452_v44 = vld [vmem:[#allocation11 + $0x120] ss:$24 sps:$4 sm:$0xff]  }
 0x435   : > { %11224 = vmatmul.mubr.msk.f32.vlgmr.msra.gmra.mxu1 %vm975_vm8, %v15974_v22  ;;  %v2310_v54 = vpop.permute.xlu0 %2309 }
 0x436   : > { %v2317_v9 = vsel %vm947_vm0, %v16403_v21, %v2310_v54  ;;  %v2316_v2 = vsel %vm947_vm0, %v2310_v54, %v2312_v60  ;;  %3048 = vmatprep.mubr.f32.mxu1 %v17270_v52  ;;  %v12460_v54 = vld [vmem:[#allocation11 + $0xf4] ss:$24 sps:$4 sm:$0xff]  }
 0x437   : > { %2927 = vmatprep.subr.mxu0 %v2316_v2  ;;  %v12463_v2 = vld [vmem:[#allocation11 + $0x424] ss:$24 sps:$4 sm:$0xff]  }
 0x438   : > { %2928 = vmatpush1.msra.mxu0 %v2317_v9  ;;  %v2252_v62 = vpop.permute.xlu1 %2251 }
 0x439   : > { %v2250_v63 = vpop.permute.xlu0 %2249 }
 0x43a   : > { %v2257_v31 = vsel %vm886_vm1, %v16415_v6, %v2250_v63  ;;  %v2256_v34 = vsel %vm886_vm1, %v2250_v63, %v2252_v62  ;;  %v12466_v63 = vld [vmem:[#allocation11 + $0xc4] ss:$24 sps:$4 sm:$0xff]  }
 0x43b   : > { %2929 = vmatprep.subr.mxu0 %v2256_v34  ;;  %v16586_v34 = vpop.f32.mrf.mxu1 }
 0x43c   : > { %2930 = vmatpush1.msra.mxu0 %v2257_v31  ;;  %v2190_v47 = vpop.permute.xlu1 %2189  ;;  %v12461_v31 = vld [vmem:[#allocation11 + $0x420] ss:$24 sps:$4 sm:$0xff]  }
 0x43d   : > { %v2314_v21 = vpop.permute.xlu0 %2313  ;;  %v2197_v19 = vsel %vm825_vm2, %v16427_v20, %v2190_v47 }
 0x43e   : > { %v2315_v43 = vsel %vm947_vm0, %v2312_v60, %v2314_v21  ;;  %v2334_v48 = vsel %vm947_vm0, %v2314_v21, %v15731_v15  ;;  %v12464_v21 = vld [vmem:[#allocation11 + $0xc0] ss:$24 sps:$4 sm:$0xff]  }
 0x43f   : > { %2998 = vmatprep.subr.mxu1 %v2334_v48  ;;  %v2484_v48 = vpop.f32.mrf.mxu1 }
 0x440   : > { %2999 = vmatpush1.msra.mxu1 %v2315_v43  ;;  %v2254_v18 = vpop.permute.xlu1 %2253  ;;  %v12472_v43 = vld [vmem:[#allocation11 + $0x94] ss:$24 sps:$4 sm:$0xff]  }
 0x441   : > { %v2255_v6 = vsel %vm886_vm1, %v2252_v62, %v2254_v18  ;;  %v2192_v0 = vpop.permute.xlu0 %2191  ;;  %v2274_v16 = vsel %vm886_vm1, %v2254_v18, %v15729_v30  ;;  %v12458_v62 = vld [vmem:[#allocation11 + $0xf0] ss:$24 sps:$4 sm:$0xff]  }
 0x442   : > { %v2196_v4 = vsel %vm825_vm2, %v2190_v47, %v2192_v0  ;;  %3000 = vmatprep.subr.mxu1 %v2274_v16  ;;  %v12467_v18 = vld [vmem:[#allocation11 + $0x3f0] ss:$24 sps:$4 sm:$0xff]  }
 0x443   : > { %2931 = vmatprep.subr.mxu0 %v2196_v4  ;;  %3001 = vmatpush1.msra.mxu1 %v2255_v6  ;;  %v12475_v6 = vld [vmem:[#allocation11 + $0x3c4] ss:$24 sps:$4 sm:$0xff]   ;;  %v12470_v4 = vld [vmem:[#allocation11 + $0x90] ss:$24 sps:$4 sm:$0xff]  }
 0x444   : > { %2932 = vmatpush1.msra.mxu0 %v2197_v19  ;;  %v2132_v15 = vpop.permute.xlu1 %2131  ;;  %v12478_v19 = vld [vmem:[#allocation11 + $0x64] ss:$24 sps:$4 sm:$0xff]  }
 0x445   : > { %v2130_v17 = vpop.permute.xlu0 %2129  ;;  %v16588_v47 = vpop.f32.mrf.mxu0 }
 0x446   : > { %v2137_v5 = vsel %vm764_vm3, %v16436_v46, %v2130_v17  ;;  %v2136_v30 = vsel %vm764_vm3, %v2130_v17, %v2132_v15 }
 0x447   : > { %2933 = vmatprep.subr.mxu0 %v2136_v30 }
 0x448   : > { %2934 = vmatpush1.msra.mxu0 %v2137_v5  ;;  %v2134_v27 = vpop.permute.xlu1 %2133  ;;  %v12473_v5 = vld [vmem:[#allocation11 + $0x3c0] ss:$24 sps:$4 sm:$0xff]  }
 0x449   : > { %2935 = vmatprep.subr.mxu0 %v16251_v25  ;;  %v2194_v11 = vpop.permute.xlu0 %2193  ;;  %v2154_v51 = vsel %vm764_vm3, %v2134_v27, %v15794_v35  ;;  %v2135_v25 = vsel %vm764_vm3, %v2132_v15, %v2134_v27  ;;  %v12481_v27 = vld [vmem:[#allocation11 + $0x394] ss:$24 sps:$4 sm:$0xff]  }
 0x44a   : > { %v2195_v20 = vsel %vm825_vm2, %v2192_v0, %v2194_v11  ;;  %2936 = vmatpush1.msra.mxu0 %v16084_v40  ;;  %v2214_v33 = vsel %vm825_vm2, %v2194_v11, %v15745_v14  ;;  %v2413_v0 = vpop.f32.mrf.mxu0 }
 0x44b   : > { %3002 = vmatprep.subr.mxu1 %v2214_v33 }
 0x44c   : > { %3003 = vmatpush1.msra.mxu1 %v2195_v20  ;;  %v2070_v46 = vpop.permute.xlu1 %2069  ;;  %v12476_v20 = vld [vmem:[#allocation11 + $0x60] ss:$24 sps:$4 sm:$0xff]  }
 0x44d   : > { %3004 = vmatprep.subr.mxu1 %v2154_v51  ;;  %v2068_v49 = vpop.permute.xlu0 %2067  ;;  %v12479_v51 = vld [vmem:[#allocation11 + $0x390] ss:$24 sps:$4 sm:$0xff]  }
 0x44e   : > { %v2078_v40 = vsel %vm703_vm4, %v16455_v41, %v2068_v49  ;;  %3005 = vmatpush1.msra.mxu1 %v2135_v25  ;;  %v2077_v14 = vsel %vm703_vm4, %v2068_v49, %v2070_v46  ;;  %v12484_v25 = vld [vmem:[#allocation11 + $0x34] ss:$24 sps:$4 sm:$0xff]  }
 0x44f   : > { %2937 = vmatprep.subr.mxu0 %v2077_v14  ;;  %3006 = vmatprep.subr.mxu1 %v15723_v12  ;;  %v12487_v14 = vld [vmem:[#allocation11 + $0x364] ss:$24 sps:$4 sm:$0xff]  }
 0x450   : > { %2938 = vmatpush1.msra.mxu0 %v2078_v40  ;;  %3007 = vmatpush1.msra.mxu1 %v15659_v26  ;;  %v2010_v35 = vpop.permute.xlu1 %2009 }
 0x451   : > { %v2008_v57 = vpop.permute.xlu0 %2007 }
 0x452   : > { %v2018_v38 = vsel %vm642_vm5, %v16467_v24, %v2008_v57  ;;  %v2017_v32 = vsel %vm642_vm5, %v2008_v57, %v2010_v35  ;;  %v12490_v57 = vld [vmem:[#allocation11 + $0x4] ss:$24 sps:$4 sm:$0xff]  }
 0x453   : > { %2939 = vmatprep.subr.mxu0 %v2017_v32  ;;  %v12493_v32 = vld [vmem:[#allocation11 + $0x334] ss:$24 sps:$4 sm:$0xff]  }
 0x454   : > { %2940 = vmatpush1.msra.mxu0 %v2018_v38  ;;  %v1948_v41 = vpop.permute.xlu1 %1947  ;;  %v12485_v38 = vld [vmem:[#allocation11 + $0x360] ss:$24 sps:$4 sm:$0xff]  }
 0x455   : > { %v2072_v3 = vpop.permute.xlu0 %2071  ;;  %v1958_v37 = vsel %vm581_vm6, %v16479_v39, %v1948_v41 }
 0x456   : > { %v2076_v45 = vsel %vm703_vm4, %v2070_v46, %v2072_v3  ;;  %v2075_v26 = vsel %vm703_vm4, %v2072_v3, %v16014_v28  ;;  %v12496_v3 = vld [vmem:[#allocation11 + $0x2d4] ss:$24 sps:$4 sm:$0xff]  }
 0x457   : > { %3008 = vmatprep.subr.mxu1 %v2075_v26  ;;  %v12499_v26 = vld [vmem:[#allocation11 + $0x304] ss:$24 sps:$4 sm:$0xff]  }
 0x458   : > { %3009 = vmatpush1.msra.mxu1 %v2076_v45  ;;  %v2012_v12 = vpop.permute.xlu1 %2011  ;;  %v12491_v45 = vld [vmem:[#allocation11 + $0x330] ss:$24 sps:$4 sm:$0xff]  }
 0x459   : > { %v2016_v24 = vsel %vm642_vm5, %v2010_v35, %v2012_v12  ;;  %v1950_v56 = vpop.permute.xlu0 %1949  ;;  %v2015_v36 = vsel %vm642_vm5, %v2012_v12, %v16012_v8  ;;  %v12482_v35 = vld [vmem:[#allocation11 + $0x30] ss:$24 sps:$4 sm:$0xff]  }
 0x45a   : > { %v1957_v59 = vsel %vm581_vm6, %v1948_v41, %v1950_v56  ;;  %3010 = vmatprep.subr.mxu1 %v2015_v36  ;;  %v12488_v41 = vld [vmem:[#allocation11] ss:$24 sps:$4 sm:$0xff]   ;;  %v12494_v12 = vld [vmem:[#allocation11 + $0x2d0] ss:$24 sps:$4 sm:$0xff]   ;;  %v12505_v36 = vld [vmem:[#allocation11 + $0x5d4] ss:$24 sps:$4 sm:$0xff]  }
 0x45b   : > { %2941 = vmatprep.subr.mxu0 %v1957_v59  ;;  %3011 = vmatpush1.msra.mxu1 %v2016_v24  ;;  %v12502_v24 = vld [vmem:[#allocation11 + $0x2a4] ss:$24 sps:$4 sm:$0xff]   ;;  %v12500_v59 = vld [vmem:[#allocation11 + $0x2a0] ss:$24 sps:$4 sm:$0xff]  }
 0x45c   : > { %2942 = vmatpush1.msra.mxu0 %v1958_v37  ;;  %v1890_v28 = vpop.permute.xlu1 %1889  ;;  %v12508_v37 = vld [vmem:[#allocation11 + $0x274] ss:$24 sps:$4 sm:$0xff]  }
 0x45d   : > { %v1888_v7 = vpop.permute.xlu0 %1887 }
 0x45e   : > { %v1898_v58 = vsel %vm520_vm7, %v16489_v1, %v1888_v7  ;;  %v1897_v8 = vsel %vm520_vm7, %v1888_v7, %v1890_v28  ;;  %v12511_v7 = vld [vmem:[#allocation11 + $0x5a4] ss:$24 sps:$4 sm:$0xff]  }
 0x45f   : > { %2943 = vmatprep.subr.mxu0 %v1897_v8  ;;  %v12509_v8 = vld [vmem:[#allocation11 + $0x5a0] ss:$24 sps:$4 sm:$0xff]  }
 0x460   : > { %2944 = vmatpush1.msra.mxu0 %v1898_v58  ;;  %v1892_v50 = vpop.permute.xlu1 %1891  ;;  %v12514_v58 = vld [vmem:[#allocation11 + $0x244] ss:$24 sps:$4 sm:$0xff]  }
 0x461   : > { %11225 = vmatmul.mubr.msk.f32.vlgmr.msra.gmra.mxu0 %vm975_vm8, %v15974_v22  ;;  %8875 = vmatprep.subr.bf16.mxu0 %v12451_v53  ;;  %v1952_v39 = vpop.permute.xlu0 %1951  ;;  %v1895_v60 = vsel %vm520_vm7, %v1892_v50, %v16035_v29  ;;  %v12455_v22 = vld [vmem:[#allocation11 + $0x450] ss:$24 sps:$4 sm:$0xff]   ;;  %v1896_v9 = vsel %vm520_vm7, %v1890_v28, %v1892_v50  ;;  %v12469_v29 = vld [vmem:[#allocation11 + $0x3f4] ss:$24 sps:$4 sm:$0xff]  }
 0x462   : > { %v1956_v10 = vsel %vm581_vm6, %v1950_v56, %v1952_v39  ;;  %8876 = vmatpush1.bf16.msra.mxu0 %v12449_v61  ;;  %v1955_v1 = vsel %vm581_vm6, %v1952_v39, %v16037_v42  ;;  %v13962_v42 = vld [vmem:[#allocation8] sm:$0xff]  ;;  %v12497_v56 = vld [vmem:[#allocation11 + $0x300] ss:$24 sps:$4 sm:$0xff]  }
 0x463   : > { %3012 = vmatprep.subr.mxu1 %v1955_v1  ;;  %8877 = vmatprep.subr.bf16.mxu0 %v12454_v55  ;;  %v12503_v28 = vld [vmem:[#allocation11 + $0x5d0] ss:$24 sps:$4 sm:$0xff]   ;;  %v12517_v61 = vld [vmem:[#allocation11 + $0x574] ss:$24 sps:$4 sm:$0xff]   ;;  %v12512_v55 = vld [vmem:[#allocation11 + $0x240] ss:$24 sps:$4 sm:$0xff]  }
 0x464   : > { %3013 = vmatpush1.msra.mxu1 %v1956_v10  ;;  %v12506_v53 = vld [vmem:[#allocation11 + $0x270] ss:$24 sps:$4 sm:$0xff]   ;;  %v12520_v50 = vld [vmem:[#allocation11 + $0x214] ss:$24 sps:$4 sm:$0xff]   ;;  %v12523_v1 = vld [vmem:[#allocation11 + $0x544] ss:$24 sps:$4 sm:$0xff]  }
 0x465   : > { %3014 = vmatprep.subr.mxu1 %v1895_v60  ;;  %v12515_v39 = vld [vmem:[#allocation11 + $0x570] ss:$24 sps:$4 sm:$0xff]   ;;  %v12521_v60 = vld [vmem:[#allocation11 + $0x540] ss:$24 sps:$4 sm:$0xff]  }
 0x466   : > { %3015 = vmatpush1.msra.mxu1 %v1896_v9  ;;  %8878 = vmatpush1.bf16.msra.mxu0 %v12452_v44  ;;  %v12518_v44 = vld [vmem:[#allocation11 + $0x210] ss:$24 sps:$4 sm:$0xff]   ;;  %v12524_v9 = vld [vmem:[#allocation11 + $0x1e0] ss:$24 sps:$4 sm:$0xff]  }
 0x467   : > { %11226 = vmatmul.mubr.msk.f32.vlgmr.msra.gmra.mxu1 %vm975_vm8, %v13962_v42  ;;  %8916 = vmatprep.subr.bf16.mxu1 %v12457_v23  ;;  %v12526_v23 = vld [vmem:[#allocation11 + $0x1e4] ss:$24 sps:$4 sm:$0xff]  }
 0x468   : > { %8917 = vmatpush1.bf16.msra.mxu1 %v12455_v22  ;;  %8879 = vmatprep.subr.bf16.mxu0 %v12460_v54  ;;  %v12529_v54 = vld [vmem:[#allocation11 + $0x514] ss:$24 sps:$4 sm:$0xff]  }
 0x469   : > { %8918 = vmatprep.subr.bf16.mxu1 %v12463_v2 }
 0x46a   : > { %8880 = vmatpush1.bf16.msra.mxu0 %v12458_v62  ;;  %v12532_v62 = vld [vmem:[#allocation11 + $0x1b4] ss:$24 sps:$4 sm:$0xff]  }
 0x46b   : > { %8881 = vmatprep.subr.bf16.mxu0 %v12466_v63 }
 0x46c   : > { %8919 = vmatpush1.bf16.msra.mxu1 %v12461_v31  ;;  %v16600_v10 = vpop.f32.mrf.mxu0  ;;  %v12527_v31 = vld [vmem:[#allocation11 + $0x510] ss:$24 sps:$4 sm:$0xff]  }
 0x46d   : > { %8920 = vmatprep.subr.bf16.mxu1 %v12469_v29  ;;  %v12535_v29 = vld [vmem:[#allocation11 + $0x4e4] ss:$24 sps:$4 sm:$0xff]  }
 0x46e   : > { %8882 = vmatpush1.bf16.msra.mxu0 %v12464_v21  ;;  %v16590_v16 = vpop.permute.xlu0 %2339  ;;  %v2555_v22 = vpop.f32.mrf.mxu0  ;;  %v12530_v21 = vld [vmem:[#allocation11 + $0x1b0] ss:$24 sps:$4 sm:$0xff]  }
 0x46f   : > { %8883 = vmatprep.subr.bf16.mxu0 %v12472_v43  ;;  %v2414_v15 = vadd.f32 %v2413_v0, %v16590_v16  ;;  %v2485_v17 = vadd.f32 %v2484_v48, %v16590_v16  ;;  %v2412_v42 = vadd.f32 %v16588_v47, %v16590_v16  ;;  %v2556_v63 = vadd.f32 %v2555_v22, %v16590_v16  ;;  %v12538_v48 = vld [vmem:[#allocation11 + $0x184] ss:$24 sps:$4 sm:$0xff]   ;;  %v12533_v0 = vld [vmem:[#allocation11 + $0x4e0] ss:$24 sps:$4 sm:$0xff]  }
 0x470   : > { %8921 = vmatpush1.bf16.msra.mxu1 %v12467_v18  ;;  %v2483_v47 = vadd.f32 %v16586_v34, %v16590_v16  ;;  %v12550_v34 = vld [vmem:[#allocation11 + $0x724] ss:$24 sps:$4 sm:$0xff]   ;;  %v12581_v22 = vld [vmem:[#allocation11 + $0x960] ss:$24 sps:$4 sm:$0xff]  }
 0x471   : > { %8922 = vmatprep.subr.bf16.mxu1 %v12475_v6  ;;  %v3056_v30 = vmul.f32 0.2, %v2414_v15  ;;  %v3058_v11 = vmul.f32 0.2, %v2485_v17  ;;  %v3055_v18 = vmul.f32 0.2, %v2412_v42 }
 0x472   : > { %8884 = vmatpush1.bf16.msra.mxu0 %v12470_v4  ;;  %v3060_v6 = vmul.f32 0.2, %v2556_v63  ;;  %v12541_v4 = vld [vmem:[#allocation11 + $0x4b4] ss:$24 sps:$4 sm:$0xff]  }
 0x473   : > { %8885 = vmatprep.subr.bf16.mxu0 %v12478_v19  ;;  %v3076_v33 = vmax.f32 %v2414_v15, %v3056_v30  ;;  %v3078_v46 = vmax.f32 %v2485_v17, %v3058_v11  ;;  %v12536_v15 = vld [vmem:[#allocation11 + $0x180] ss:$24 sps:$4 sm:$0xff]   ;;  %v3075_v17 = vmax.f32 %v2412_v42, %v3055_v18  ;;  %v12547_v11 = vld [vmem:[#allocation11 + $0x484] ss:$24 sps:$4 sm:$0xff]   ;;  %v12587_v42 = vld [vmem:[#allocation11 + $0x930] ss:$24 sps:$4 sm:$0xff]  }
 0x474   : > { %8923 = vmatpush1.bf16.msra.mxu1 %v12473_v5  ;;  %v16602_v2 = vpop.f32.mrf.mxu1  ;;  %v12544_v5 = vld [vmem:[#allocation11 + $0x754] ss:$24 sps:$4 sm:$0xff]   ;;  %v3080_v30 = vmax.f32 %v2556_v63, %v3060_v6  ;;  %v12595_v63 = vld [vmem:[#allocation11 + $0x904] ss:$24 sps:$4 sm:$0xff]   ;;  %v12599_v6 = vld [vmem:[#allocation11 + $0xbd0] ss:$24 sps:$4 sm:$0xff]  }
 0x475   : > { %v16594_v49 = vpack.c.bf16 %v3076_v33, %v3076_v33  ;;  %8924 = vmatprep.subr.bf16.mxu1 %v12481_v27  ;;  %v16596_v40 = vpack.c.bf16 %v3078_v46, %v3078_v46  ;;  %v12539_v27 = vld [vmem:[#allocation11 + $0x4b0] ss:$24 sps:$4 sm:$0xff]   ;;  %v12604_v18 = vld [vmem:[#allocation11 + $0x874] ss:$24 sps:$4 sm:$0xff]  }
 0x476   : > { %8886 = vmatpush1.bf16.msra.mxu0 %v12476_v20  ;;  %v2626_v43 = vpop.f32.mrf.mxu1  ;;  %v3057_v20 = vmul.f32 0.2, %v2483_v47  ;;  %v12542_v46 = vld [vmem:[#allocation11 + $0x750] ss:$24 sps:$4 sm:$0xff]  }
 0x477   : > { %8907 = vmatprep.mubr.bf16.mxu0 %v16594_v49  ;;  %8948 = vmatprep.mubr.bf16.mxu1 %v16596_v40  ;;  %v2627_v19 = vadd.f32 %v2626_v43, %v16590_v16  ;;  %v12601_v43 = vld [vmem:[#allocation11 + $0xbd4] ss:$24 sps:$4 sm:$0xff]  }
 0x478   : > { %8925 = vmatpush1.bf16.msra.mxu1 %v12479_v51  ;;  %8887 = vmatprep.subr.bf16.mxu0 %v12484_v25  ;;  %v16610_v51 = vpack.c.bf16 %v3075_v17, %v3075_v17  ;;  %v16612_v25 = vpack.c.bf16 %v3080_v30, %v3080_v30  ;;  %v12608_v17 = vld [vmem:[#allocation11 + $0x840] ss:$24 sps:$4 sm:$0xff]   ;;  %v12611_v30 = vld [vmem:[#allocation11 + $0xb70] ss:$24 sps:$4 sm:$0xff]  }
 0x479   : > { %8926 = vmatprep.subr.bf16.mxu1 %v12487_v14  ;;  %v3062_v33 = vmul.f32 0.2, %v2627_v19  ;;  %v12545_v14 = vld [vmem:[#allocation11 + $0x480] ss:$24 sps:$4 sm:$0xff]  }
 0x47a   : > { %8888 = vmatpush1.bf16.msra.mxu0 %v12482_v35  ;;  %v3077_v35 = vmax.f32 %v2483_v47, %v3057_v20  ;;  %v12610_v47 = vld [vmem:[#allocation11 + $0x844] ss:$24 sps:$4 sm:$0xff]   ;;  %v12614_v20 = vld [vmem:[#allocation11 + $0x810] ss:$24 sps:$4 sm:$0xff]  }
 0x47b   : > { %8889 = vmatprep.subr.bf16.mxu0 %v12490_v57  ;;  %v12553_v57 = vld [vmem:[#allocation11 + $0xa54] ss:$24 sps:$4 sm:$0xff]  }
 0x47c   : > { %8927 = vmatpush1.bf16.msra.mxu1 %v12485_v38  ;;  %v3082_v38 = vmax.f32 %v2627_v19, %v3062_v33  ;;  %v12605_v19 = vld [vmem:[#allocation11 + $0xba0] ss:$24 sps:$4 sm:$0xff]   ;;  %v12622_v33 = vld [vmem:[#allocation11 + $0x7e4] ss:$24 sps:$4 sm:$0xff]  }
 0x47d   : > { %8928 = vmatprep.subr.bf16.mxu1 %v12493_v32  ;;  %v12548_v32 = vld [vmem:[#allocation11 + $0x720] ss:$24 sps:$4 sm:$0xff]  }
 0x47e   : > { %8890 = vmatpush1.bf16.msra.mxu0 %v12488_v41  ;;  %v12556_v41 = vld [vmem:[#allocation11 + $0x6f4] ss:$24 sps:$4 sm:$0xff]  }
 0x47f   : > { %8891 = vmatprep.subr.bf16.mxu0 %v12496_v3  ;;  %v12551_v3 = vld [vmem:[#allocation11 + $0xa50] ss:$24 sps:$4 sm:$0xff]  }
 0x480   : > { %8929 = vmatpush1.bf16.msra.mxu1 %v12491_v45  ;;  %v16616_v45 = vpack.c.bf16 %v3077_v35, %v3077_v35  ;;  %v12620_v35 = vld [vmem:[#allocation11 + $0x7e0] ss:$24 sps:$4 sm:$0xff]  }
 0x481   : > { %8930 = vmatprep.subr.bf16.mxu1 %v12499_v26  ;;  %v12559_v26 = vld [vmem:[#allocation11 + $0xa24] ss:$24 sps:$4 sm:$0xff]  }
 0x482   : > { %8892 = vmatpush2.bf16.msra.mxu0 %v12494_v12  ;;  %v16618_v12 = vpack.c.bf16 %v3082_v38, %v3082_v38  ;;  %v12628_v38 = vld [vmem:[#allocation11 + $0x7b4] ss:$24 sps:$4 sm:$0xff]  }
 0x483   : > { %8893 = vmatprep.subr.bf16.mxu0 %v12502_v24  ;;  %v12554_v24 = vld [vmem:[#allocation11 + $0x6f0] ss:$24 sps:$4 sm:$0xff]  }
 0x484   : > { %8931 = vmatpush1.bf16.msra.mxu1 %v12497_v56  ;;  %v12562_v56 = vld [vmem:[#allocation11 + $0x6c4] ss:$24 sps:$4 sm:$0xff]  }
 0x485   : > { %8932 = vmatprep.subr.bf16.mxu1 %v12505_v36  ;;  %v12557_v36 = vld [vmem:[#allocation11 + $0xa20] ss:$24 sps:$4 sm:$0xff]  }
 0x486   : > { %8894 = vmatpush2.bf16.msra.mxu0 %v12500_v59  ;;  %v12565_v59 = vld [vmem:[#allocation11 + $0x9f4] ss:$24 sps:$4 sm:$0xff]  }
 0x487   : > { %8895 = vmatprep.subr.bf16.mxu0 %v12508_v37  ;;  %v12560_v37 = vld [vmem:[#allocation11 + $0x6c0] ss:$24 sps:$4 sm:$0xff]  }
 0x488   : > { %8933 = vmatpush2.bf16.msra.mxu1 %v12503_v28  ;;  %v12568_v28 = vld [vmem:[#allocation11 + $0x694] ss:$24 sps:$4 sm:$0xff]  }
 0x489   : > { %8934 = vmatprep.subr.bf16.mxu1 %v12511_v7  ;;  %v12563_v7 = vld [vmem:[#allocation11 + $0x9f0] ss:$24 sps:$4 sm:$0xff]  }
 0x48a   : > { %8896 = vmatpush2.bf16.msra.mxu0 %v12506_v53  ;;  %v12571_v53 = vld [vmem:[#allocation11 + $0x9c4] ss:$24 sps:$4 sm:$0xff]  }
 0x48b   : > { %8897 = vmatprep.subr.bf16.mxu0 %v12514_v58  ;;  %v12566_v58 = vld [vmem:[#allocation11 + $0x690] ss:$24 sps:$4 sm:$0xff]  }
 0x48c   : > { %8935 = vmatpush2.bf16.msra.mxu1 %v12509_v8  ;;  %v12574_v8 = vld [vmem:[#allocation11 + $0x664] ss:$24 sps:$4 sm:$0xff]  }
 0x48d   : > { %8936 = vmatprep.subr.bf16.mxu1 %v12517_v61  ;;  %v12569_v61 = vld [vmem:[#allocation11 + $0x9c0] ss:$24 sps:$4 sm:$0xff]  }
 0x48e   : > { %8898 = vmatpush2.bf16.msra.mxu0 %v12512_v55  ;;  %v12577_v55 = vld [vmem:[#allocation11 + $0x994] ss:$24 sps:$4 sm:$0xff]  }
 0x48f   : > { %8899 = vmatprep.subr.bf16.mxu0 %v12520_v50  ;;  %v12572_v50 = vld [vmem:[#allocation11 + $0x660] ss:$24 sps:$4 sm:$0xff]  }
 0x490   : > { %8937 = vmatpush2.bf16.msra.mxu1 %v12515_v39  ;;  %v12580_v39 = vld [vmem:[#allocation11 + $0x634] ss:$24 sps:$4 sm:$0xff]  }
 0x491   : > { %8938 = vmatprep.subr.bf16.mxu1 %v12523_v1  ;;  %v12575_v1 = vld [vmem:[#allocation11 + $0x990] ss:$24 sps:$4 sm:$0xff]  }
 0x492   : > { %8900 = vmatpush2.bf16.msra.mxu0 %v12518_v44  ;;  %v12583_v44 = vld [vmem:[#allocation11 + $0x964] ss:$24 sps:$4 sm:$0xff]  }
 0x493   : > { %8901 = vmatprep.subr.bf16.mxu0 %v12526_v23  ;;  %v12578_v23 = vld [vmem:[#allocation11 + $0x630] ss:$24 sps:$4 sm:$0xff]  }
 0x494   : > { %8939 = vmatpush2.bf16.msra.mxu1 %v12521_v60  ;;  %v12586_v60 = vld [vmem:[#allocation11 + $0x604] ss:$24 sps:$4 sm:$0xff]  }
 0x495   : > { %8940 = vmatprep.subr.bf16.mxu1 %v12529_v54  ;;  %v12589_v54 = vld [vmem:[#allocation11 + $0x934] ss:$24 sps:$4 sm:$0xff]  }
 0x496   : > { %8902 = vmatpush2.bf16.msra.mxu0 %v12524_v9  ;;  %v12584_v9 = vld [vmem:[#allocation11 + $0x600] ss:$24 sps:$4 sm:$0xff]  }
 0x497   : > { %8903 = vmatprep.subr.bf16.mxu0 %v12532_v62  ;;  %v12592_v62 = vld [vmem:[#allocation11 + $0x8d4] ss:$24 sps:$4 sm:$0xff]  }
 0x498   : > { %8941 = vmatpush2.bf16.msra.mxu1 %v12527_v31  ;;  %v12590_v31 = vld [vmem:[#allocation11 + $0x8d0] ss:$24 sps:$4 sm:$0xff]  }
 0x499   : > { %8942 = vmatprep.subr.bf16.mxu1 %v12535_v29  ;;  %v12598_v29 = vld [vmem:[#allocation11 + $0x8a4] ss:$24 sps:$4 sm:$0xff]  }
 0x49a   : > { %8904 = vmatpush2.bf16.msra.mxu0 %v12530_v21  ;;  %v12593_v21 = vld [vmem:[#allocation11 + $0x900] ss:$24 sps:$4 sm:$0xff]  }
 0x49b   : > { %8905 = vmatprep.subr.bf16.mxu0 %v12538_v48  ;;  %v12596_v48 = vld [vmem:[#allocation11 + $0x8a0] ss:$24 sps:$4 sm:$0xff]  }
 0x49c   : > { %8943 = vmatpush2.bf16.msra.mxu1 %v12533_v0  ;;  %v12607_v0 = vld [vmem:[#allocation11 + $0xba4] ss:$24 sps:$4 sm:$0xff]  }
 0x49d   : > { %8944 = vmatprep.subr.bf16.mxu1 %v12541_v4  ;;  %v12602_v4 = vld [vmem:[#allocation11 + $0x870] ss:$24 sps:$4 sm:$0xff]  }
 0x49e   : > { %8906 = vmatpush2.bf16.msra.mxu0 %v12536_v15  ;;  %v12613_v15 = vld [vmem:[#allocation11 + $0xb74] ss:$24 sps:$4 sm:$0xff]  }
 0x49f   : > { %8957 = vmatprep.subr.bf16.mxu0 %v12544_v5  ;;  %v12616_v5 = vld [vmem:[#allocation11 + $0x814] ss:$24 sps:$4 sm:$0xff]  }
 0x4a0   : > { %8945 = vmatpush2.bf16.msra.mxu1 %v12539_v27 }
 0x4a1   : > { %8908 = vmatmul.mubr.bf16.vlgmr.msra.gmra.mxu0 %v16610_v51  ;;  %8946 = vmatprep.subr.bf16.mxu1 %v12547_v11  ;;  %v12619_v11 = vld [vmem:[#allocation11 + $0xb44] ss:$24 sps:$4 sm:$0xff]  }
 0x4a2   : > { %8958 = vmatpush1.bf16.msra.mxu0 %v12542_v46  ;;  %8989 = vmatprep.mubr.bf16.mxu0 %v16612_v25  ;;  %v12617_v46 = vld [vmem:[#allocation11 + $0xb40] ss:$24 sps:$4 sm:$0xff]  }
 0x4a3   : > { %8959 = vmatprep.subr.bf16.mxu0 %v12550_v34 }
 0x4a4   : > { %8947 = vmatpush2.bf16.msra.mxu1 %v12545_v14  ;;  %v12625_v14 = vld [vmem:[#allocation11 + $0xb14] ss:$24 sps:$4 sm:$0xff]  }
 0x4a5   : > { %8998 = vmatprep.subr.bf16.mxu1 %v12553_v57 }
 0x4a6   : > { %8960 = vmatpush1.bf16.msra.mxu0 %v12548_v32  ;;  %v2554_v32 = vadd.f32 %v16600_v10, %v16590_v16  ;;  %v12637_v10 = vld [vmem:[#allocation11 + $0xab4] ss:$24 sps:$4 sm:$0xff]  }
 0x4a7   : > { %8949 = vmatmul.mubr.bf16.vlgmr.msra.gmra.mxu1 %v16616_v45  ;;  %8961 = vmatprep.subr.bf16.mxu0 %v12556_v41 }
 0x4a8   : > { %8999 = vmatpush1.bf16.msra.mxu1 %v12551_v3  ;;  %9030 = vmatprep.mubr.bf16.mxu1 %v16618_v12  ;;  %v12623_v3 = vld [vmem:[#allocation11 + $0xb10] ss:$24 sps:$4 sm:$0xff]  }
 0x4a9   : > { %9000 = vmatprep.subr.bf16.mxu1 %v12559_v26  ;;  %v12631_v26 = vld [vmem:[#allocation11 + $0xae4] ss:$24 sps:$4 sm:$0xff]  }
 0x4aa   : > { %8962 = vmatpush1.bf16.msra.mxu0 %v12554_v24  ;;  %v12626_v24 = vld [vmem:[#allocation11 + $0x7b0] ss:$24 sps:$4 sm:$0xff]  }
 0x4ab   : > { %8963 = vmatprep.subr.bf16.mxu0 %v12562_v56 }
 0x4ac   : > { %9001 = vmatpush1.bf16.msra.mxu1 %v12557_v36  ;;  %v12634_v36 = vld [vmem:[#allocation11 + $0x784] ss:$24 sps:$4 sm:$0xff]  }
 0x4ad   : > { %9002 = vmatprep.subr.bf16.mxu1 %v12565_v59  ;;  %v16622_v27 = vpop.f32.mrf.mxu0  ;;  %v3059_v59 = vmul.f32 0.2, %v2554_v32 }
 0x4ae   : > { %8964 = vmatpush1.bf16.msra.mxu0 %v12560_v37 }
 0x4af   : > { %8965 = vmatprep.subr.bf16.mxu0 %v12568_v28  ;;  %v2697_v34 = vpop.f32.mrf.mxu0  ;;  %v12629_v28 = vld [vmem:[#allocation11 + $0xae0] ss:$24 sps:$4 sm:$0xff]  }
 0x4b0   : > { %9003 = vmatpush1.bf16.msra.mxu1 %v12563_v7  ;;  %v2698_v41 = vadd.f32 %v2697_v34, %v16590_v16  ;;  %v2625_v7 = vadd.f32 %v16602_v2, %v16590_v16  ;;  %v12646_v2 = vld [vmem:[#allocation11 + $0xd24] ss:$24 sps:$4 sm:$0xff]   ;;  %v12671_v34 = vld [vmem:[#allocation11 + $0xf90] ss:$24 sps:$4 sm:$0xff]  }
 0x4b1   : > { %9004 = vmatprep.subr.bf16.mxu1 %v12571_v53 }
 0x4b2   : > { %8966 = vmatpush1.bf16.msra.mxu0 %v12566_v58  ;;  %v3064_v37 = vmul.f32 0.2, %v2698_v41  ;;  %v12632_v58 = vld [vmem:[#allocation11 + $0x780] ss:$24 sps:$4 sm:$0xff]  }
 0x4b3   : > { %8967 = vmatprep.subr.bf16.mxu0 %v12574_v8  ;;  %v3079_v8 = vmax.f32 %v2554_v32, %v3059_v59  ;;  %v12677_v32 = vld [vmem:[#allocation11 + $0xf60] ss:$24 sps:$4 sm:$0xff]   ;;  %v12694_v59 = vld [vmem:[#allocation11 + $0xea4] ss:$24 sps:$4 sm:$0xff]  }
 0x4b4   : > { %9005 = vmatpush1.bf16.msra.mxu1 %v12569_v61  ;;  %v12640_v61 = vld [vmem:[#allocation11 + $0xd54] ss:$24 sps:$4 sm:$0xff]  }
 0x4b5   : > { %9006 = vmatprep.subr.bf16.mxu1 %v12577_v55  ;;  %v16624_v57 = vpop.f32.mrf.mxu1  ;;  %v3084_v55 = vmax.f32 %v2698_v41, %v3064_v37  ;;  %v12685_v41 = vld [vmem:[#allocation11 + $0xf34] ss:$24 sps:$4 sm:$0xff]   ;;  %v12689_v37 = vld [vmem:[#allocation11 + $0xf00] ss:$24 sps:$4 sm:$0xff]  }
 0x4b6   : > { %8968 = vmatpush1.bf16.msra.mxu0 %v12572_v50  ;;  %v12635_v50 = vld [vmem:[#allocation11 + $0xab0] ss:$24 sps:$4 sm:$0xff]  }
 0x4b7   : > { %8969 = vmatprep.subr.bf16.mxu0 %v12580_v39  ;;  %v2768_v56 = vpop.f32.mrf.mxu1  ;;  %v3061_v39 = vmul.f32 0.2, %v2625_v7 }
 0x4b8   : > { %9007 = vmatpush1.bf16.msra.mxu1 %v12575_v1  ;;  %v2769_v53 = vadd.f32 %v2768_v56, %v16590_v16  ;;  %v12643_v1 = vld [vmem:[#allocation11 + $0xa84] ss:$24 sps:$4 sm:$0xff]  }
 0x4b9   : > { %9008 = vmatprep.subr.bf16.mxu1 %v12583_v44  ;;  %v12691_v56 = vld [vmem:[#allocation11 + $0xf04] ss:$24 sps:$4 sm:$0xff]  }
 0x4ba   : > { %8970 = vmatpush1.bf16.msra.mxu0 %v12578_v23  ;;  %v3066_v44 = vmul.f32 0.2, %v2769_v53  ;;  %v12638_v23 = vld [vmem:[#allocation11 + $0xd50] ss:$24 sps:$4 sm:$0xff]  }
 0x4bb   : > { %8971 = vmatprep.subr.bf16.mxu0 %v12586_v60  ;;  %v16632_v60 = vpack.c.bf16 %v3079_v8, %v3079_v8  ;;  %v12698_v8 = vld [vmem:[#allocation11 + $0xe70] ss:$24 sps:$4 sm:$0xff]  }
 0x4bc   : > { %9009 = vmatpush1.bf16.msra.mxu1 %v12581_v22  ;;  %v16634_v22 = vpack.c.bf16 %v3084_v55, %v3084_v55  ;;  %v12701_v55 = vld [vmem:[#allocation11 + $0x11a0] ss:$24 sps:$4 sm:$0xff]  }
 0x4bd   : > { %9010 = vmatprep.subr.bf16.mxu1 %v12589_v54  ;;  %v12641_v54 = vld [vmem:[#allocation11 + $0xa80] ss:$24 sps:$4 sm:$0xff]  }
 0x4be   : > { %8972 = vmatpush1.bf16.msra.mxu0 %v12584_v9  ;;  %v3081_v9 = vmax.f32 %v2625_v7, %v3061_v39  ;;  %v12692_v7 = vld [vmem:[#allocation11 + $0xea0] ss:$24 sps:$4 sm:$0xff]  }
 0x4bf   : > { %8973 = vmatprep.subr.bf16.mxu0 %v12592_v62  ;;  %v12649_v62 = vld [vmem:[#allocation11 + $0x1054] ss:$24 sps:$4 sm:$0xff]   ;;  %v12704_v39 = vld [vmem:[#allocation11 + $0xe40] ss:$24 sps:$4 sm:$0xff]  }
 0x4c0   : > { %9011 = vmatpush1.bf16.msra.mxu1 %v12587_v42  ;;  %v3086_v42 = vmax.f32 %v2769_v53, %v3066_v44  ;;  %v12695_v53 = vld [vmem:[#allocation11 + $0x11d0] ss:$24 sps:$4 sm:$0xff]  }
 0x4c1   : > { %9012 = vmatprep.subr.bf16.mxu1 %v12595_v63  ;;  %v12644_v63 = vld [vmem:[#allocation11 + $0xd20] ss:$24 sps:$4 sm:$0xff]   ;;  %v12707_v44 = vld [vmem:[#allocation11 + $0x1170] ss:$24 sps:$4 sm:$0xff]  }
 0x4c2   : > { %8974 = vmatpush2.bf16.msra.mxu0 %v12590_v31  ;;  %v12652_v31 = vld [vmem:[#allocation11 + $0xcf4] ss:$24 sps:$4 sm:$0xff]  }
 0x4c3   : > { %8975 = vmatprep.subr.bf16.mxu0 %v12598_v29  ;;  %v12647_v29 = vld [vmem:[#allocation11 + $0x1050] ss:$24 sps:$4 sm:$0xff]  }
 0x4c4   : > { %9013 = vmatpush1.bf16.msra.mxu1 %v12593_v21  ;;  %v16638_v21 = vpack.c.bf16 %v3081_v9, %v3081_v9  ;;  %v12718_v9 = vld [vmem:[#allocation11 + $0xde4] ss:$24 sps:$4 sm:$0xff]  }
 0x4c5   : > { %9014 = vmatprep.subr.bf16.mxu1 %v12601_v43  ;;  %v12655_v43 = vld [vmem:[#allocation11 + $0x1024] ss:$24 sps:$4 sm:$0xff]  }
 0x4c6   : > { %8976 = vmatpush2.bf16.msra.mxu0 %v12596_v48  ;;  %v16640_v48 = vpack.c.bf16 %v3086_v42, %v3086_v42 }
 0x4c7   : > { %8977 = vmatprep.subr.bf16.mxu0 %v12604_v18  ;;  %v12650_v18 = vld [vmem:[#allocation11 + $0xcf0] ss:$24 sps:$4 sm:$0xff]  }
 0x4c8   : > { %9015 = vmatpush2.bf16.msra.mxu1 %v12599_v6  ;;  %v12658_v6 = vld [vmem:[#allocation11 + $0xcc4] ss:$24 sps:$4 sm:$0xff]  }
 0x4c9   : > { %9016 = vmatprep.subr.bf16.mxu1 %v12607_v0  ;;  %v12653_v0 = vld [vmem:[#allocation11 + $0x1020] ss:$24 sps:$4 sm:$0xff]  }
 0x4ca   : > { %8978 = vmatpush2.bf16.msra.mxu0 %v12602_v4  ;;  %v12661_v4 = vld [vmem:[#allocation11 + $0xff4] ss:$24 sps:$4 sm:$0xff]  }
 0x4cb   : > { %8979 = vmatprep.subr.bf16.mxu0 %v12610_v47  ;;  %v12656_v47 = vld [vmem:[#allocation11 + $0xcc0] ss:$24 sps:$4 sm:$0xff]  }
 0x4cc   : > { %9017 = vmatpush2.bf16.msra.mxu1 %v12605_v19  ;;  %v12664_v19 = vld [vmem:[#allocation11 + $0xc94] ss:$24 sps:$4 sm:$0xff]  }
 0x4cd   : > { %9018 = vmatprep.subr.bf16.mxu1 %v12613_v15  ;;  %v12659_v15 = vld [vmem:[#allocation11 + $0xff0] ss:$24 sps:$4 sm:$0xff]  }
 0x4ce   : > { %8980 = vmatpush2.bf16.msra.mxu0 %v12608_v17  ;;  %v12667_v17 = vld [vmem:[#allocation11 + $0xfc4] ss:$24 sps:$4 sm:$0xff]  }
 0x4cf   : > { %8981 = vmatprep.subr.bf16.mxu0 %v12616_v5  ;;  %v12662_v5 = vld [vmem:[#allocation11 + $0xc90] ss:$24 sps:$4 sm:$0xff]  }
 0x4d0   : > { %9019 = vmatpush2.bf16.msra.mxu1 %v12611_v30  ;;  %v12670_v30 = vld [vmem:[#allocation11 + $0xc64] ss:$24 sps:$4 sm:$0xff]  }
 0x4d1   : > { %9020 = vmatprep.subr.bf16.mxu1 %v12619_v11  ;;  %v12665_v11 = vld [vmem:[#allocation11 + $0xfc0] ss:$24 sps:$4 sm:$0xff]  }
 0x4d2   : > { %8982 = vmatpush2.bf16.msra.mxu0 %v12614_v20  ;;  %v12673_v20 = vld [vmem:[#allocation11 + $0xf94] ss:$24 sps:$4 sm:$0xff]  }
 0x4d3   : > { %8983 = vmatprep.subr.bf16.mxu0 %v12622_v33  ;;  %v12668_v33 = vld [vmem:[#allocation11 + $0xc60] ss:$24 sps:$4 sm:$0xff]  }
 0x4d4   : > { %9021 = vmatpush2.bf16.msra.mxu1 %v12617_v46  ;;  %v12676_v46 = vld [vmem:[#allocation11 + $0xc34] ss:$24 sps:$4 sm:$0xff]  }
 0x4d5   : > { %9022 = vmatprep.subr.bf16.mxu1 %v12625_v14  ;;  %v12679_v14 = vld [vmem:[#allocation11 + $0xf64] ss:$24 sps:$4 sm:$0xff]  }
 0x4d6   : > { %8984 = vmatpush2.bf16.msra.mxu0 %v12620_v35  ;;  %v12674_v35 = vld [vmem:[#allocation11 + $0xc30] ss:$24 sps:$4 sm:$0xff]  }
 0x4d7   : > { %8985 = vmatprep.subr.bf16.mxu0 %v12628_v38  ;;  %v12682_v38 = vld [vmem:[#allocation11 + $0xc04] ss:$24 sps:$4 sm:$0xff]  }
 0x4d8   : > { %9023 = vmatpush2.bf16.msra.mxu1 %v12623_v3  ;;  %v12680_v3 = vld [vmem:[#allocation11 + $0xc00] ss:$24 sps:$4 sm:$0xff]  }
 0x4d9   : > { %9024 = vmatprep.subr.bf16.mxu1 %v12631_v26  ;;  %v12688_v26 = vld [vmem:[#allocation11 + $0xed4] ss:$24 sps:$4 sm:$0xff]  }
 0x4da   : > { %8986 = vmatpush2.bf16.msra.mxu0 %v12626_v24  ;;  %v12683_v24 = vld [vmem:[#allocation11 + $0xf30] ss:$24 sps:$4 sm:$0xff]  }
 0x4db   : > { %8987 = vmatprep.subr.bf16.mxu0 %v12634_v36  ;;  %v12686_v36 = vld [vmem:[#allocation11 + $0xed0] ss:$24 sps:$4 sm:$0xff]  }
 0x4dc   : > { %9025 = vmatpush2.bf16.msra.mxu1 %v12629_v28  ;;  %v12697_v28 = vld [vmem:[#allocation11 + $0x11d4] ss:$24 sps:$4 sm:$0xff]  }
 0x4dd   : > { %9026 = vmatprep.subr.bf16.mxu1 %v12637_v10  ;;  %v12700_v10 = vld [vmem:[#allocation11 + $0xe74] ss:$24 sps:$4 sm:$0xff]  }
 0x4de   : > { %8988 = vmatpush2.bf16.msra.mxu0 %v12632_v58  ;;  %v12703_v58 = vld [vmem:[#allocation11 + $0x11a4] ss:$24 sps:$4 sm:$0xff]  }
 0x4df   : > { %9039 = vmatprep.subr.bf16.mxu0 %v12640_v61  ;;  %v12706_v61 = vld [vmem:[#allocation11 + $0xe44] ss:$24 sps:$4 sm:$0xff]  }
 0x4e0   : > { %9027 = vmatpush2.bf16.msra.mxu1 %v12635_v50  ;;  %v12709_v50 = vld [vmem:[#allocation11 + $0x1174] ss:$24 sps:$4 sm:$0xff]  }
 0x4e1   : > { %8990 = vmatmul.mubr.bf16.vlgmr.msra.gmra.mxu0 %v16632_v60  ;;  %9028 = vmatprep.subr.bf16.mxu1 %v12643_v1  ;;  %v12712_v1 = vld [vmem:[#allocation11 + $0xe14] ss:$24 sps:$4 sm:$0xff]  }
 0x4e2   : > { %9040 = vmatpush1.bf16.msra.mxu0 %v12638_v23  ;;  %9071 = vmatprep.mubr.bf16.mxu0 %v16634_v22 }
 0x4e3   : > { %9041 = vmatprep.subr.bf16.mxu0 %v12646_v2  ;;  %v12715_v2 = vld [vmem:[#allocation11 + $0x1144] ss:$24 sps:$4 sm:$0xff]  }
 0x4e4   : > { %9029 = vmatpush2.bf16.msra.mxu1 %v12641_v54  ;;  %v12710_v54 = vld [vmem:[#allocation11 + $0xe10] ss:$24 sps:$4 sm:$0xff]  }
 0x4e5   : > { %9080 = vmatprep.subr.bf16.mxu1 %v12649_v62  ;;  %v12713_v62 = vld [vmem:[#allocation11 + $0x1140] ss:$24 sps:$4 sm:$0xff]  }
 0x4e6   : > { %9042 = vmatpush1.bf16.msra.mxu0 %v12644_v63  ;;  %v12721_v63 = vld [vmem:[#allocation11 + $0x1114] ss:$24 sps:$4 sm:$0xff]  }
 0x4e7   : > { %9031 = vmatmul.mubr.bf16.vlgmr.msra.gmra.mxu1 %v16638_v21  ;;  %9043 = vmatprep.subr.bf16.mxu0 %v12652_v31  ;;  %v12716_v31 = vld [vmem:[#allocation11 + $0xde0] ss:$24 sps:$4 sm:$0xff]  }
 0x4e8   : > { %9081 = vmatpush1.bf16.msra.mxu1 %v12647_v29  ;;  %9112 = vmatprep.mubr.bf16.mxu1 %v16640_v48  ;;  %v2696_v29 = vadd.f32 %v16622_v27, %v16590_v16  ;;  %v2767_v27 = vadd.f32 %v16624_v57, %v16590_v16  ;;  %v12742_v57 = vld [vmem:[#allocation11 + $0x1324] ss:$24 sps:$4 sm:$0xff]  }
 0x4e9   : > { %9082 = vmatprep.subr.bf16.mxu1 %v12655_v43 }
 0x4ea   : > { %9044 = vmatpush1.bf16.msra.mxu0 %v12650_v18  ;;  %v12724_v18 = vld [vmem:[#allocation11 + $0xdb4] ss:$24 sps:$4 sm:$0xff]  }
 0x4eb   : > { %9045 = vmatprep.subr.bf16.mxu0 %v12658_v6 }
 0x4ec   : > { %9083 = vmatpush1.bf16.msra.mxu1 %v12653_v0  ;;  %v12719_v0 = vld [vmem:[#allocation11 + $0x1110] ss:$24 sps:$4 sm:$0xff]  }
 0x4ed   : > { %9084 = vmatprep.subr.bf16.mxu1 %v12661_v4  ;;  %v16644_v23 = vpop.f32.mrf.mxu0  ;;  %v12727_v4 = vld [vmem:[#allocation11 + $0x10e4] ss:$24 sps:$4 sm:$0xff]  }
 0x4ee   : > { %9046 = vmatpush1.bf16.msra.mxu0 %v12656_v47  ;;  %v12722_v47 = vld [vmem:[#allocation11 + $0xdb0] ss:$24 sps:$4 sm:$0xff]  }
 0x4ef   : > { %9047 = vmatprep.subr.bf16.mxu0 %v12664_v19  ;;  %v2839_v42 = vpop.f32.mrf.mxu0  ;;  %v3063_v19 = vmul.f32 0.2, %v2696_v29 }
 0x4f0   : > { %9085 = vmatpush1.bf16.msra.mxu1 %v12659_v15  ;;  %v2840_v6 = vadd.f32 %v2839_v42, %v16590_v16  ;;  %v12761_v42 = vld [vmem:[#allocation11 + $0x15c0] ss:$24 sps:$4 sm:$0xff]  }
 0x4f1   : > { %9086 = vmatprep.subr.bf16.mxu1 %v12667_v17  ;;  %v12730_v17 = vld [vmem:[#allocation11 + $0xd84] ss:$24 sps:$4 sm:$0xff]  }
 0x4f2   : > { %9048 = vmatpush1.bf16.msra.mxu0 %v12662_v5  ;;  %v3068_v5 = vmul.f32 0.2, %v2840_v6 }
 0x4f3   : > { %9049 = vmatprep.subr.bf16.mxu0 %v12670_v30  ;;  %v12725_v30 = vld [vmem:[#allocation11 + $0x10e0] ss:$24 sps:$4 sm:$0xff]  }
 0x4f4   : > { %9087 = vmatpush1.bf16.msra.mxu1 %v12665_v11  ;;  %v12733_v11 = vld [vmem:[#allocation11 + $0x10b4] ss:$24 sps:$4 sm:$0xff]  }
 0x4f5   : > { %9088 = vmatprep.subr.bf16.mxu1 %v12673_v20  ;;  %v16648_v43 = vpop.f32.mrf.mxu1 }
 0x4f6   : > { %9050 = vmatpush1.bf16.msra.mxu0 %v12668_v33  ;;  %v12728_v33 = vld [vmem:[#allocation11 + $0xd80] ss:$24 sps:$4 sm:$0xff]  }
 0x4f7   : > { %9051 = vmatprep.subr.bf16.mxu0 %v12676_v46  ;;  %v2910_v15 = vpop.f32.mrf.mxu1  ;;  %v3083_v46 = vmax.f32 %v2696_v29, %v3063_v19  ;;  %v12772_v29 = vld [vmem:[#allocation11 + $0x1234] ss:$24 sps:$4 sm:$0xff]  }
 0x4f8   : > { %9089 = vmatpush1.bf16.msra.mxu1 %v12671_v34  ;;  %v2911_v20 = vadd.f32 %v2910_v15, %v16590_v16  ;;  %v12736_v34 = vld [vmem:[#allocation11 + $0x1354] ss:$24 sps:$4 sm:$0xff]   ;;  %v12776_v15 = vld [vmem:[#allocation11 + $0x1200] ss:$24 sps:$4 sm:$0xff]  }
 0x4f9   : > { %9090 = vmatprep.subr.bf16.mxu1 %v12679_v14  ;;  %v3088_v14 = vmax.f32 %v2840_v6, %v3068_v5  ;;  %v12775_v6 = vld [vmem:[#allocation11 + $0x1564] ss:$24 sps:$4 sm:$0xff]   ;;  %v12781_v19 = vld [vmem:[#allocation11 + $0x1534] ss:$24 sps:$4 sm:$0xff]   ;;  %v12779_v5 = vld [vmem:[#allocation11 + $0x1530] ss:$24 sps:$4 sm:$0xff]  }
 0x4fa   : > { %9052 = vmatpush1.bf16.msra.mxu0 %v12674_v35  ;;  %v12731_v35 = vld [vmem:[#allocation11 + $0x10b0] ss:$24 sps:$4 sm:$0xff]  }
 0x4fb   : > { %9053 = vmatprep.subr.bf16.mxu0 %v12682_v38  ;;  %v3065_v38 = vmul.f32 0.2, %v2767_v27 }
 0x4fc   : > { %9091 = vmatpush1.bf16.msra.mxu1 %v12677_v32  ;;  %v12739_v32 = vld [vmem:[#allocation11 + $0x1084] ss:$24 sps:$4 sm:$0xff]  }
 0x4fd   : > { %9092 = vmatprep.subr.bf16.mxu1 %v12685_v41  ;;  %v3070_v41 = vmul.f32 0.2, %v2911_v20 }
 0x4fe   : > { %9054 = vmatpush1.bf16.msra.mxu0 %v12680_v3  ;;  %v12734_v3 = vld [vmem:[#allocation11 + $0x1350] ss:$24 sps:$4 sm:$0xff]  }
 0x4ff   : > { %9055 = vmatprep.subr.bf16.mxu0 %v12688_v26  ;;  %v16654_v26 = vpack.c.bf16 %v3083_v46, %v3083_v46  ;;  %v12788_v46 = vld [vmem:[#allocation11 + $0x14a0] ss:$24 sps:$4 sm:$0xff]  }
 0x500   : > { %9093 = vmatpush1.bf16.msra.mxu1 %v12683_v24  ;;  %v16656_v24 = vpack.c.bf16 %v3088_v14, %v3088_v14  ;;  %v12791_v14 = vld [vmem:[#allocation11 + $0x17d0] ss:$24 sps:$4 sm:$0xff]  }
 0x501   : > { %9094 = vmatprep.subr.bf16.mxu1 %v12691_v56  ;;  %v12737_v56 = vld [vmem:[#allocation11 + $0x1080] ss:$24 sps:$4 sm:$0xff]  }
 0x502   : > { %9056 = vmatpush2.bf16.msra.mxu0 %v12686_v36  ;;  %v3085_v36 = vmax.f32 %v2767_v27, %v3065_v38  ;;  %v12782_v27 = vld [vmem:[#allocation11 + $0x14d0] ss:$24 sps:$4 sm:$0xff]  }
 0x503   : > { %9057 = vmatprep.subr.bf16.mxu0 %v12694_v59  ;;  %v12745_v59 = vld [vmem:[#allocation11 + $0x1654] ss:$24 sps:$4 sm:$0xff]   ;;  %v12794_v38 = vld [vmem:[#allocation11 + $0x1470] ss:$24 sps:$4 sm:$0xff]  }
 0x504   : > { %9095 = vmatpush1.bf16.msra.mxu1 %v12689_v37  ;;  %v3090_v37 = vmax.f32 %v2911_v20, %v3070_v41  ;;  %v12785_v20 = vld [vmem:[#allocation11 + $0x1500] ss:$24 sps:$4 sm:$0xff]  }
 0x505   : > { %9096 = vmatprep.subr.bf16.mxu1 %v12697_v28  ;;  %v12740_v28 = vld [vmem:[#allocation11 + $0x1320] ss:$24 sps:$4 sm:$0xff]  }
 0x506   : > { %9058 = vmatpush2.bf16.msra.mxu0 %v12692_v7  ;;  %v12748_v7 = vld [vmem:[#allocation11 + $0x12f4] ss:$24 sps:$4 sm:$0xff]   ;;  %v12797_v41 = vld [vmem:[#allocation11 + $0x17a0] ss:$24 sps:$4 sm:$0xff]  }
 0x507   : > { %9059 = vmatprep.subr.bf16.mxu0 %v12700_v10  ;;  %v12743_v10 = vld [vmem:[#allocation11 + $0x1650] ss:$24 sps:$4 sm:$0xff]  }
 0x508   : > { %9097 = vmatpush2.bf16.msra.mxu1 %v12695_v53  ;;  %v16660_v53 = vpack.c.bf16 %v3085_v36, %v3085_v36  ;;  %v12803_v36 = vld [vmem:[#allocation11 + $0x1770] ss:$24 sps:$4 sm:$0xff]  }
 0x509   : > { %9098 = vmatprep.subr.bf16.mxu1 %v12703_v58  ;;  %v12751_v58 = vld [vmem:[#allocation11 + $0x1624] ss:$24 sps:$4 sm:$0xff]  }
 0x50a   : > { %9060 = vmatpush2.bf16.msra.mxu0 %v12698_v8  ;;  %v16662_v8 = vpack.c.bf16 %v3090_v37, %v3090_v37  ;;  %v12811_v37 = vld [vmem:[#allocation11 + $0x1744] ss:$24 sps:$4 sm:$0xff]  }
 0x50b   : > { %9061 = vmatprep.subr.bf16.mxu0 %v12706_v61  ;;  %v12746_v61 = vld [vmem:[#allocation11 + $0x12f0] ss:$24 sps:$4 sm:$0xff]  }
 0x50c   : > { %9099 = vmatpush2.bf16.msra.mxu1 %v12701_v55  ;;  %v12754_v55 = vld [vmem:[#allocation11 + $0x12c4] ss:$24 sps:$4 sm:$0xff]  }
 0x50d   : > { %9100 = vmatprep.subr.bf16.mxu1 %v12709_v50  ;;  %v12749_v50 = vld [vmem:[#allocation11 + $0x1620] ss:$24 sps:$4 sm:$0xff]  }
 0x50e   : > { %9062 = vmatpush2.bf16.msra.mxu0 %v12704_v39  ;;  %v12757_v39 = vld [vmem:[#allocation11 + $0x15f4] ss:$24 sps:$4 sm:$0xff]  }
 0x50f   : > { %9063 = vmatprep.subr.bf16.mxu0 %v12712_v1  ;;  %v12752_v1 = vld [vmem:[#allocation11 + $0x12c0] ss:$24 sps:$4 sm:$0xff]  }
 0x510   : > { %9101 = vmatpush2.bf16.msra.mxu1 %v12707_v44  ;;  %v12760_v44 = vld [vmem:[#allocation11 + $0x1294] ss:$24 sps:$4 sm:$0xff]  }
 0x511   : > { %9102 = vmatprep.subr.bf16.mxu1 %v12715_v2  ;;  %v12755_v2 = vld [vmem:[#allocation11 + $0x15f0] ss:$24 sps:$4 sm:$0xff]  }
 0x512   : > { %9064 = vmatpush2.bf16.msra.mxu0 %v12710_v54  ;;  %v12763_v54 = vld [vmem:[#allocation11 + $0x15c4] ss:$24 sps:$4 sm:$0xff]  }
 0x513   : > { %9065 = vmatprep.subr.bf16.mxu0 %v12718_v9  ;;  %v12758_v9 = vld [vmem:[#allocation11 + $0x1290] ss:$24 sps:$4 sm:$0xff]  }
 0x514   : > { %9103 = vmatpush2.bf16.msra.mxu1 %v12713_v62  ;;  %v12766_v62 = vld [vmem:[#allocation11 + $0x1264] ss:$24 sps:$4 sm:$0xff]  }
 0x515   : > { %9104 = vmatprep.subr.bf16.mxu1 %v12721_v63  ;;  %v12769_v63 = vld [vmem:[#allocation11 + $0x1594] ss:$24 sps:$4 sm:$0xff]  }
 0x516   : > { %9066 = vmatpush2.bf16.msra.mxu0 %v12716_v31  ;;  %v12764_v31 = vld [vmem:[#allocation11 + $0x1260] ss:$24 sps:$4 sm:$0xff]  }
 0x517   : > { %9067 = vmatprep.subr.bf16.mxu0 %v12724_v18  ;;  %v12767_v18 = vld [vmem:[#allocation11 + $0x1590] ss:$24 sps:$4 sm:$0xff]  }
 0x518   : > { %9105 = vmatpush2.bf16.msra.mxu1 %v12719_v0  ;;  %v12770_v0 = vld [vmem:[#allocation11 + $0x1230] ss:$24 sps:$4 sm:$0xff]  }
 0x519   : > { %9106 = vmatprep.subr.bf16.mxu1 %v12727_v4  ;;  %v12778_v4 = vld [vmem:[#allocation11 + $0x1204] ss:$24 sps:$4 sm:$0xff]  }
 0x51a   : > { %9068 = vmatpush2.bf16.msra.mxu0 %v12722_v47  ;;  %v12773_v47 = vld [vmem:[#allocation11 + $0x1560] ss:$24 sps:$4 sm:$0xff]  }
 0x51b   : > { %9069 = vmatprep.subr.bf16.mxu0 %v12730_v17  ;;  %v12784_v17 = vld [vmem:[#allocation11 + $0x14d4] ss:$24 sps:$4 sm:$0xff]  }
 0x51c   : > { %9107 = vmatpush2.bf16.msra.mxu1 %v12725_v30  ;;  %v12787_v30 = vld [vmem:[#allocation11 + $0x1504] ss:$24 sps:$4 sm:$0xff]  }
 0x51d   : > { %9108 = vmatprep.subr.bf16.mxu1 %v12733_v11  ;;  %v12790_v11 = vld [vmem:[#allocation11 + $0x14a4] ss:$24 sps:$4 sm:$0xff]  }
 0x51e   : > { %9070 = vmatpush2.bf16.msra.mxu0 %v12728_v33  ;;  %v12793_v33 = vld [vmem:[#allocation11 + $0x17d4] ss:$24 sps:$4 sm:$0xff]  }
 0x51f   : > { %9121 = vmatprep.subr.bf16.mxu0 %v12736_v34  ;;  %v12796_v34 = vld [vmem:[#allocation11 + $0x1474] ss:$24 sps:$4 sm:$0xff]  }
 0x520   : > { %9109 = vmatpush2.bf16.msra.mxu1 %v12731_v35  ;;  %v12799_v35 = vld [vmem:[#allocation11 + $0x17a4] ss:$24 sps:$4 sm:$0xff]  }
 0x521   : > { %9072 = vmatmul.mubr.bf16.vlgmr.msra.gmra.mxu0 %v16654_v26  ;;  %9110 = vmatprep.subr.bf16.mxu1 %v12739_v32  ;;  %v12802_v32 = vld [vmem:[#allocation11 + $0x1444] ss:$24 sps:$4 sm:$0xff]  }
 0x522   : > { %9122 = vmatpush1.bf16.msra.mxu0 %v12734_v3  ;;  %9153 = vmatprep.mubr.bf16.mxu0 %v16656_v24  ;;  %v12805_v3 = vld [vmem:[#allocation11 + $0x1774] ss:$24 sps:$4 sm:$0xff]  }
 0x523   : > { %9123 = vmatprep.subr.bf16.mxu0 %v12742_v57  ;;  %v12800_v57 = vld [vmem:[#allocation11 + $0x1440] ss:$24 sps:$4 sm:$0xff]  }
 0x524   : > { %9111 = vmatpush2.bf16.msra.mxu1 %v12737_v56  ;;  %v12808_v56 = vld [vmem:[#allocation11 + $0x1414] ss:$24 sps:$4 sm:$0xff]  }
 0x525   : > { %9162 = vmatprep.subr.bf16.mxu1 %v12745_v59  ;;  %v16666_v59 = vpop.f32.mrf.mxu0 }
 0x526   : > { %9124 = vmatpush1.bf16.msra.mxu0 %v12740_v28  ;;  %v12806_v28 = vld [vmem:[#allocation11 + $0x1410] ss:$24 sps:$4 sm:$0xff]  }
 0x527   : > { %9113 = vmatmul.mubr.bf16.vlgmr.msra.gmra.mxu1 %v16660_v53  ;;  %9125 = vmatprep.subr.bf16.mxu0 %v12748_v7  ;;  %v12814_v7 = vld [vmem:[#allocation11 + $0x13e4] ss:$24 sps:$4 sm:$0xff]  }
 0x528   : > { %9163 = vmatpush1.bf16.msra.mxu1 %v12743_v10  ;;  %9194 = vmatprep.mubr.bf16.mxu1 %v16662_v8  ;;  %v12809_v10 = vld [vmem:[#allocation11 + $0x1740] ss:$24 sps:$4 sm:$0xff]  }
 0x529   : > { %9164 = vmatprep.subr.bf16.mxu1 %v12751_v58  ;;  %v2981_v58 = vpop.f32.mrf.mxu0 }
 0x52a   : > { %9126 = vmatpush1.bf16.msra.mxu0 %v12746_v61  ;;  %v12817_v61 = vld [vmem:[#allocation11 + $0x1714] ss:$24 sps:$4 sm:$0xff]  }
 0x52b   : > { %9127 = vmatprep.subr.bf16.mxu0 %v12754_v55  ;;  %v12812_v55 = vld [vmem:[#allocation11 + $0x13e0] ss:$24 sps:$4 sm:$0xff]  }
 0x52c   : > { %9165 = vmatpush1.bf16.msra.mxu1 %v12749_v50  ;;  %v2838_v50 = vadd.f32 %v16644_v23, %v16590_v16  ;;  %v2909_v23 = vadd.f32 %v16648_v43, %v16590_v16  ;;  %v12838_v43 = vld [vmem:[#allocation11 + $0x1924] ss:$24 sps:$4 sm:$0xff]  }
 0x52d   : > { %9166 = vmatprep.subr.bf16.mxu1 %v12757_v39  ;;  %v16670_v39 = vpop.f32.mrf.mxu1 }
 0x52e   : > { %9128 = vmatpush1.bf16.msra.mxu0 %v12752_v1  ;;  %v12820_v1 = vld [vmem:[#allocation11 + $0x13b4] ss:$24 sps:$4 sm:$0xff]  }
 0x52f   : > { %9129 = vmatprep.subr.bf16.mxu0 %v12760_v44  ;;  %v2982_v44 = vadd.f32 %v2981_v58, %v16590_v16  ;;  %v12850_v58 = vld [vmem:[#allocation11 + $0x18c4] ss:$24 sps:$4 sm:$0xff]  }
 0x530   : > { %9167 = vmatpush1.bf16.msra.mxu1 %v12755_v2  ;;  %v12815_v2 = vld [vmem:[#allocation11 + $0x1710] ss:$24 sps:$4 sm:$0xff]  }
 0x531   : > { %9168 = vmatprep.subr.bf16.mxu1 %v12763_v54  ;;  %v12823_v54 = vld [vmem:[#allocation11 + $0x16e4] ss:$24 sps:$4 sm:$0xff]  }
 0x532   : > { %9130 = vmatpush1.bf16.msra.mxu0 %v12758_v9  ;;  %v12818_v9 = vld [vmem:[#allocation11 + $0x13b0] ss:$24 sps:$4 sm:$0xff]  }
 0x533   : > { %9131 = vmatprep.subr.bf16.mxu0 %v12766_v62  ;;  %v3067_v62 = vmul.f32 0.2, %v2838_v50 }
 0x534   : > { %9169 = vmatpush1.bf16.msra.mxu1 %v12761_v42  ;;  %v3052_v42 = vpop.f32.mrf.mxu1 }
 0x535   : > { %9170 = vmatprep.subr.bf16.mxu1 %v12769_v63  ;;  %v12826_v63 = vld [vmem:[#allocation11 + $0x1384] ss:$24 sps:$4 sm:$0xff]  }
 0x536   : > { %9132 = vmatpush1.bf16.msra.mxu0 %v12764_v31  ;;  %v3072_v31 = vmul.f32 0.2, %v2982_v44 }
 0x537   : > { %9133 = vmatprep.subr.bf16.mxu0 %v12772_v29  ;;  %v12821_v29 = vld [vmem:[#allocation11 + $0x16e0] ss:$24 sps:$4 sm:$0xff]  }
 0x538   : > { %9171 = vmatpush1.bf16.msra.mxu1 %v12767_v18  ;;  %v12829_v18 = vld [vmem:[#allocation11 + $0x16b4] ss:$24 sps:$4 sm:$0xff]  }
 0x539   : > { %9172 = vmatprep.subr.bf16.mxu1 %v12775_v6  ;;  %v3053_v6 = vadd.f32 %v3052_v42, %v16590_v16 }
 0x53a   : > { %9134 = vmatpush1.bf16.msra.mxu0 %v12770_v0  ;;  %v12824_v0 = vld [vmem:[#allocation11 + $0x1380] ss:$24 sps:$4 sm:$0xff]  }
 0x53b   : > { %9135 = vmatprep.subr.bf16.mxu0 %v12778_v4  ;;  %v3087_v4 = vmax.f32 %v2838_v50, %v3067_v62  ;;  %v12851_v62 = vld [vmem:[#allocation11 + $0x1bf0] ss:$24 sps:$4 sm:$0xff]  }
 0x53c   : > { %9173 = vmatpush1.bf16.msra.mxu1 %v12773_v47  ;;  %v12832_v47 = vld [vmem:[#allocation11 + $0x1954] ss:$24 sps:$4 sm:$0xff]  }
 0x53d   : > { %9174 = vmatprep.subr.bf16.mxu1 %v12781_v19  ;;  %v3092_v19 = vmax.f32 %v2982_v44, %v3072_v31  ;;  %v12854_v31 = vld [vmem:[#allocation11 + $0x1890] ss:$24 sps:$4 sm:$0xff]  }
 0x53e   : > { %9136 = vmatpush1.bf16.msra.mxu0 %v12776_v15  ;;  %v12827_v15 = vld [vmem:[#allocation11 + $0x16b0] ss:$24 sps:$4 sm:$0xff]  }
 0x53f   : > { %9137 = vmatprep.subr.bf16.mxu0 %v12784_v17  ;;  %v3069_v17 = vmul.f32 0.2, %v2909_v23 }
 0x540   : > { %9175 = vmatpush1.bf16.msra.mxu1 %v12779_v5  ;;  %v12835_v5 = vld [vmem:[#allocation11 + $0x1684] ss:$24 sps:$4 sm:$0xff]  }
 0x541   : > { %9176 = vmatprep.subr.bf16.mxu1 %v12787_v30  ;;  %v3074_v30 = vmul.f32 0.2, %v3053_v6 }
 0x542   : > { %9138 = vmatpush2.bf16.msra.mxu0 %v12782_v27  ;;  %v12830_v27 = vld [vmem:[#allocation11 + $0x1950] ss:$24 sps:$4 sm:$0xff]  }
 0x543   : > { %9139 = vmatprep.subr.bf16.mxu0 %v12790_v11  ;;  %v16676_v11 = vpack.c.bf16 %v3087_v4, %v3087_v4  ;;  %v12863_v4 = vld [vmem:[#allocation11 + $0x1b90] ss:$24 sps:$4 sm:$0xff]  }
 0x544   : > { %9177 = vmatpush1.bf16.msra.mxu1 %v12785_v20  ;;  %v16678_v20 = vpack.c.bf16 %v3092_v19, %v3092_v19  ;;  %v12866_v19 = vld [vmem:[#allocation11 + $0x1830] ss:$24 sps:$4 sm:$0xff]  }
 0x545   : > { %9178 = vmatprep.subr.bf16.mxu1 %v12793_v33  ;;  %v12833_v33 = vld [vmem:[#allocation11 + $0x1680] ss:$24 sps:$4 sm:$0xff]  }
 0x546   : > { %9140 = vmatpush2.bf16.msra.mxu0 %v12788_v46  ;;  %v3089_v46 = vmax.f32 %v2909_v23, %v3069_v17  ;;  %v12857_v23 = vld [vmem:[#allocation11 + $0x1bc0] ss:$24 sps:$4 sm:$0xff]  }
 0x547   : > { %9141 = vmatprep.subr.bf16.mxu0 %v12796_v34  ;;  %v12869_v17 = vld [vmem:[#allocation11 + $0x1b60] ss:$24 sps:$4 sm:$0xff]  }
 0x548   : > { %9179 = vmatpush2.bf16.msra.mxu1 %v12791_v14  ;;  %v12841_v14 = vld [vmem:[#allocation11 + $0x1c54] ss:$24 sps:$4 sm:$0xff]  }
 0x549   : > { %9180 = vmatprep.subr.bf16.mxu1 %v12799_v35  ;;  %v3094_v35 = vmax.f32 %v3053_v6, %v3074_v30  ;;  %v12860_v6 = vld [vmem:[#allocation11 + $0x1860] ss:$24 sps:$4 sm:$0xff]  }
 0x54a   : > { %9142 = vmatpush2.bf16.msra.mxu0 %v12794_v38  ;;  %v12836_v38 = vld [vmem:[#allocation11 + $0x1920] ss:$24 sps:$4 sm:$0xff]  }
 0x54b   : > { %9143 = vmatprep.subr.bf16.mxu0 %v12802_v32  ;;  %v12872_v30 = vld [vmem:[#allocation11 + $0x1800] ss:$24 sps:$4 sm:$0xff]  }
 0x54c   : > { %9181 = vmatpush2.bf16.msra.mxu1 %v12797_v41  ;;  %v12844_v41 = vld [vmem:[#allocation11 + $0x18f4] ss:$24 sps:$4 sm:$0xff]  }
 0x54d   : > { %9182 = vmatprep.subr.bf16.mxu1 %v12805_v3  ;;  %v12839_v3 = vld [vmem:[#allocation11 + $0x1c50] ss:$24 sps:$4 sm:$0xff]  }
 0x54e   : > { %9144 = vmatpush2.bf16.msra.mxu0 %v12800_v57  ;;  %v16682_v57 = vpack.c.bf16 %v3089_v46, %v3089_v46  ;;  %v12878_v46 = vld [vmem:[#allocation11 + $0x1ad0] ss:$24 sps:$4 sm:$0xff]  }
 0x54f   : > { %9145 = vmatprep.subr.bf16.mxu0 %v12808_v56 }
 0x550   : > { %9183 = vmatpush2.bf16.msra.mxu1 %v12803_v36  ;;  %v12847_v36 = vld [vmem:[#allocation11 + $0x1c24] ss:$24 sps:$4 sm:$0xff]  }
 0x551   : > { %9184 = vmatprep.subr.bf16.mxu1 %v12811_v37  ;;  %v16684_v37 = vpack.c.bf16 %v3094_v35, %v3094_v35  ;;  %v12889_v35 = vld [vmem:[#allocation11 + $0x1dd4] ss:$24 sps:$4 sm:$0xff]  }
 0x552   : > { %9146 = vmatpush2.bf16.msra.mxu0 %v12806_v28  ;;  %v12842_v28 = vld [vmem:[#allocation11 + $0x18f0] ss:$24 sps:$4 sm:$0xff]  }
 0x553   : > { %9147 = vmatprep.subr.bf16.mxu0 %v12814_v7 }
 0x554   : > { %9185 = vmatpush2.bf16.msra.mxu1 %v12809_v10 }
 0x555   : > { %9186 = vmatprep.subr.bf16.mxu1 %v12817_v61 }
 0x556   : > { %9148 = vmatpush2.bf16.msra.mxu0 %v12812_v55  ;;  %v12845_v55 = vld [vmem:[#allocation11 + $0x1c20] ss:$24 sps:$4 sm:$0xff]  }
 0x557   : > { %9149 = vmatprep.subr.bf16.mxu0 %v12820_v1  ;;  %v12853_v1 = vld [vmem:[#allocation11 + $0x1bf4] ss:$24 sps:$4 sm:$0xff]  }
 0x558   : > { %9187 = vmatpush2.bf16.msra.mxu1 %v12815_v2  ;;  %v12848_v2 = vld [vmem:[#allocation11 + $0x18c0] ss:$24 sps:$4 sm:$0xff]  }
 0x559   : > { %9188 = vmatprep.subr.bf16.mxu1 %v12823_v54 }
 0x55a   : > { %9150 = vmatpush2.bf16.msra.mxu0 %v12818_v9  ;;  %v12856_v9 = vld [vmem:[#allocation11 + $0x1894] ss:$24 sps:$4 sm:$0xff]  }
 0x55b   : > { %9151 = vmatprep.subr.bf16.mxu0 %v12826_v63  ;;  %v12859_v63 = vld [vmem:[#allocation11 + $0x1bc4] ss:$24 sps:$4 sm:$0xff]  }
 0x55c   : > { %9189 = vmatpush2.bf16.msra.mxu1 %v12821_v29  ;;  %v12862_v29 = vld [vmem:[#allocation11 + $0x1864] ss:$24 sps:$4 sm:$0xff]  }
 0x55d   : > { %9190 = vmatprep.subr.bf16.mxu1 %v12829_v18  ;;  %v12865_v18 = vld [vmem:[#allocation11 + $0x1b94] ss:$24 sps:$4 sm:$0xff]  }
 0x55e   : > { %9152 = vmatpush2.bf16.msra.mxu0 %v12824_v0  ;;  %v12868_v0 = vld [vmem:[#allocation11 + $0x1834] ss:$24 sps:$4 sm:$0xff]  }
 0x55f   : > { %9203 = vmatprep.subr.bf16.mxu0 %v12832_v47  ;;  %v12871_v47 = vld [vmem:[#allocation11 + $0x1b64] ss:$24 sps:$4 sm:$0xff]  }
 0x560   : > { %9191 = vmatpush2.bf16.msra.mxu1 %v12827_v15  ;;  %v12874_v15 = vld [vmem:[#allocation11 + $0x1804] ss:$24 sps:$4 sm:$0xff]  }
 0x561   : > { %v8909_v34 = vpop.f32.mrf.mxu0  ;;  %9154 = vmatmul.mubr.bf16.vlgmr.msra.gmra.mxu0 %v16676_v11  ;;  %9192 = vmatprep.subr.bf16.mxu1 %v12835_v5  ;;  %v12877_v5 = vld [vmem:[#allocation11 + $0x1b34] ss:$24 sps:$4 sm:$0xff]  }
 0x562   : > { %9204 = vmatpush1.bf16.msra.mxu0 %v12830_v27  ;;  %9235 = vmatprep.mubr.bf16.mxu0 %v16678_v20  ;;  %v12880_v27 = vld [vmem:[#allocation11 + $0x1ad4] ss:$24 sps:$4 sm:$0xff]  }
 0x563   : > { %v8911_v32 = vpop.f32.mrf.mxu0  ;;  %9205 = vmatprep.subr.bf16.mxu0 %v12838_v43  ;;  %v12875_v43 = vld [vmem:[#allocation11 + $0x1b30] ss:$24 sps:$4 sm:$0xff]  }
 0x564   : > { %9193 = vmatpush2.bf16.msra.mxu1 %v12833_v33  ;;  %v12883_v33 = vld [vmem:[#allocation11 + $0x1b04] ss:$24 sps:$4 sm:$0xff]  }
 0x565   : > { %v8913_v56 = vpop.f32.mrf.mxu0  ;;  %9244 = vmatprep.subr.bf16.mxu1 %v12841_v14  ;;  %v12881_v14 = vld [vmem:[#allocation11 + $0x1b00] ss:$24 sps:$4 sm:$0xff]  }
 0x566   : > { %9206 = vmatpush1.bf16.msra.mxu0 %v12836_v38  ;;  %v12884_v38 = vld [vmem:[#allocation11 + $0x1aa0] ss:$24 sps:$4 sm:$0xff]   ;;  %v12890_v56 = vld [vmem:[#allocation11 + $0x1a70] ss:$24 sps:$4 sm:$0xff]  }
 0x567   : > { %v8914_v7 = vpop.f32.mrf.mxu0  ;;  %v8950_v10 = vpop.f32.mrf.mxu1  ;;  %9195 = vmatmul.mubr.bf16.vlgmr.msra.gmra.mxu1 %v16682_v57  ;;  %9207 = vmatprep.subr.bf16.mxu0 %v12844_v41  ;;  %v12887_v41 = vld [vmem:[#allocation11 + $0x1dd0] ss:$24 sps:$4 sm:$0xff]  }
 0x568   : > { %v16687_v61 = vadd.f32 %v8950_v10, %v8909_v34  ;;  %9245 = vmatpush1.bf16.msra.mxu1 %v12839_v3  ;;  %9276 = vmatprep.mubr.bf16.mxu1 %v16684_v37  ;;  %v12886_v34 = vld [vmem:[#allocation11 + $0x1aa4] ss:$24 sps:$4 sm:$0xff]   ;;  %v12901_v7 = vld [vmem:[#allocation11 + $0x1d74] ss:$24 sps:$4 sm:$0xff]   ;;  %v12896_v10 = vld [vmem:[#allocation11 + $0x1a40] ss:$24 sps:$4 sm:$0xff]  }
 0x569   : > { %v8952_v50 = vpop.f32.mrf.mxu1  ;;  %9246 = vmatprep.subr.bf16.mxu1 %v12847_v36  ;;  %v12895_v3 = vld [vmem:[#allocation11 + $0x1da4] ss:$24 sps:$4 sm:$0xff]  }
 0x56a   : > { %v16690_v44 = vadd.f32 %v8952_v50, %v8911_v32  ;;  %9208 = vmatpush1.bf16.msra.mxu0 %v12842_v28  ;;  %v12892_v32 = vld [vmem:[#allocation11 + $0x1a74] ss:$24 sps:$4 sm:$0xff]   ;;  %v12898_v36 = vld [vmem:[#allocation11 + $0x1a44] ss:$24 sps:$4 sm:$0xff]   ;;  %v12893_v28 = vld [vmem:[#allocation11 + $0x1da0] ss:$24 sps:$4 sm:$0xff]  }
 0x56b   : > { %v8954_v54 = vpop.f32.mrf.mxu1  ;;  %9209 = vmatprep.subr.bf16.mxu0 %v12850_v58  ;;  %v12904_v58 = vld [vmem:[#allocation11 + $0x1a14] ss:$24 sps:$4 sm:$0xff]   ;;  %v12907_v50 = vld [vmem:[#allocation11 + $0x1d44] ss:$24 sps:$4 sm:$0xff]  }
 0x56c   : > { %9247 = vmatpush1.bf16.msra.mxu1 %v12845_v55  ;;  %v12899_v55 = vld [vmem:[#allocation11 + $0x1d70] ss:$24 sps:$4 sm:$0xff]   ;;  %v12905_v54 = vld [vmem:[#allocation11 + $0x1d40] ss:$24 sps:$4 sm:$0xff]  }
 0x56d   : > { %v8955_v42 = vpop.f32.mrf.mxu1  ;;  %9248 = vmatprep.subr.bf16.mxu1 %v12853_v1  ;;  %v12902_v1 = vld [vmem:[#allocation11 + $0x1a10] ss:$24 sps:$4 sm:$0xff]  }
 0x56e   : > { %9210 = vmatpush1.bf16.msra.mxu0 %v12848_v2  ;;  %v12910_v2 = vld [vmem:[#allocation11 + $0x19e4] ss:$24 sps:$4 sm:$0xff]   ;;  %v2980_v42 = vadd.f32 %v16666_v59, %v16590_v16  ;;  %v12920_v59 = vld [vmem:[#allocation11 + $0x1980] ss:$24 sps:$4 sm:$0xff]  }
 0x56f   : > { %9211 = vmatprep.subr.bf16.mxu0 %v12856_v9  ;;  %v12913_v9 = vld [vmem:[#allocation11 + $0x1d14] ss:$24 sps:$4 sm:$0xff]  }
 0x570   : > { %9249 = vmatpush1.bf16.msra.mxu1 %v12851_v62  ;;  %v12908_v62 = vld [vmem:[#allocation11 + $0x19e0] ss:$24 sps:$4 sm:$0xff]  }
 0x571   : > { %9250 = vmatprep.subr.bf16.mxu1 %v12859_v63  ;;  %v12916_v63 = vld [vmem:[#allocation11 + $0x19b4] ss:$24 sps:$4 sm:$0xff]  }
 0x572   : > { %9212 = vmatpush1.bf16.msra.mxu0 %v12854_v31  ;;  %v12911_v31 = vld [vmem:[#allocation11 + $0x1d10] ss:$24 sps:$4 sm:$0xff]  }
 0x573   : > { %9213 = vmatprep.subr.bf16.mxu0 %v12862_v29  ;;  %v12919_v29 = vld [vmem:[#allocation11 + $0x1ce4] ss:$24 sps:$4 sm:$0xff]  }
 0x574   : > { %9251 = vmatpush1.bf16.msra.mxu1 %v12857_v23  ;;  %v12914_v23 = vld [vmem:[#allocation11 + $0x19b0] ss:$24 sps:$4 sm:$0xff]  }
 0x575   : > { %9252 = vmatprep.subr.bf16.mxu1 %v12865_v18  ;;  %v3071_v18 = vmul.f32 0.2, %v2980_v42 }
 0x576   : > { %9214 = vmatpush1.bf16.msra.mxu0 %v12860_v6  ;;  %v12922_v6 = vld [vmem:[#allocation11 + $0x1984] ss:$24 sps:$4 sm:$0xff]  }
 0x577   : > { %9215 = vmatprep.subr.bf16.mxu0 %v12868_v0  ;;  %v12917_v0 = vld [vmem:[#allocation11 + $0x1ce0] ss:$24 sps:$4 sm:$0xff]  }
 0x578   : > { %9253 = vmatpush1.bf16.msra.mxu1 %v12863_v4  ;;  %v3051_v4 = vadd.f32 %v16670_v39, %v16590_v16  ;;  %v12929_v16 = vld [vmem:[#allocation11 + $0x1c80] ss:$24 sps:$4 sm:$0xff]  }
 0x579   : > { %9254 = vmatprep.subr.bf16.mxu1 %v12871_v47  ;;  %v12925_v47 = vld [vmem:[#allocation11 + $0x1cb4] ss:$24 sps:$4 sm:$0xff]  }
 0x57a   : > { %9216 = vmatpush1.bf16.msra.mxu0 %v12866_v19  ;;  %v3091_v19 = vmax.f32 %v2980_v42, %v3071_v18  ;;  %v12947_v42 = vld [vmem:[#allocation11 + $0x3f8] ss:$24 sps:$4 sm:$0xff]   ;;  %v12953_v18 = vld [vmem:[#allocation11 + $0x3c8] ss:$24 sps:$4 sm:$0xff]  }
 0x57b   : > { %9217 = vmatprep.subr.bf16.mxu0 %v12874_v15  ;;  %v12928_v15 = vld [vmem:[#allocation11 + $0x15c] ss:$24 sps:$4 sm:$0xff]  }
 0x57c   : > { %9255 = vmatpush1.bf16.msra.mxu1 %v12869_v17  ;;  %v12923_v17 = vld [vmem:[#allocation11 + $0x1cb0] ss:$24 sps:$4 sm:$0xff]  }
 0x57d   : > { %9256 = vmatprep.subr.bf16.mxu1 %v12877_v5  ;;  %v3073_v5 = vmul.f32 0.2, %v3051_v4 }
 0x57e   : > { %9218 = vmatpush1.bf16.msra.mxu0 %v12872_v30  ;;  %v12931_v30 = vld [vmem:[#allocation11 + $0x1c84] ss:$24 sps:$4 sm:$0xff]  }
 0x57f   : > { %9219 = vmatprep.subr.bf16.mxu0 %v12880_v27  ;;  %v12926_v27 = vld [vmem:[#allocation11 + $0x158] ss:$24 sps:$4 sm:$0xff]   ;;  %v3093_v39 = vmax.f32 %v3051_v4, %v3073_v5  ;;  %v12964_v4 = vld [vmem:[#allocation11 + $0x3c] ss:$24 sps:$4 sm:$0xff]  }
 0x580   : > { %9257 = vmatpush1.bf16.msra.mxu1 %v12875_v43  ;;  %v16696_v43 = vpack.c.bf16 %v3091_v19, %v3091_v19  ;;  %v12962_v19 = vld [vmem:[#allocation11 + $0x38] ss:$24 sps:$4 sm:$0xff]   ;;  %v12973_v5 = vld [vmem:[#allocation11 + $0x33c] ss:$24 sps:$4 sm:$0xff]  }
 0x581   : > { %9258 = vmatprep.subr.bf16.mxu1 %v12883_v33  ;;  %v12934_v33 = vld [vmem:[#allocation11 + $0x12c] ss:$24 sps:$4 sm:$0xff]  }
 0x582   : > { %9220 = vmatpush2.bf16.msra.mxu0 %v12878_v46 }
 0x583   : > { %9221 = vmatprep.subr.bf16.mxu0 %v12886_v34  ;;  %v12937_v34 = vld [vmem:[#allocation11 + $0x45c] ss:$24 sps:$4 sm:$0xff]  }
 0x584   : > { %9259 = vmatpush1.bf16.msra.mxu1 %v12881_v14 }
 0x585   : > { %9260 = vmatprep.subr.bf16.mxu1 %v12889_v35  ;;  %v12932_v35 = vld [vmem:[#allocation11 + $0x128] ss:$24 sps:$4 sm:$0xff]  }
 0x586   : > { %9222 = vmatpush2.bf16.msra.mxu0 %v12884_v38 }
 0x587   : > { %9223 = vmatprep.subr.bf16.mxu0 %v12892_v32  ;;  %v12940_v32 = vld [vmem:[#allocation11 + $0xfc] ss:$24 sps:$4 sm:$0xff]  }
 0x588   : > { %9261 = vmatpush2.bf16.msra.mxu1 %v12887_v41 }
 0x589   : > { %9262 = vmatprep.subr.bf16.mxu1 %v12895_v3  ;;  %v12935_v3 = vld [vmem:[#allocation11 + $0x458] ss:$24 sps:$4 sm:$0xff]  }
 0x58a   : > { %9224 = vmatpush2.bf16.msra.mxu0 %v12890_v56  ;;  %v16702_v56 = vpack.c.bf16 %v3093_v39, %v3093_v39  ;;  %v12974_v39 = vld [vmem:[#allocation11 + $0x2d8] ss:$24 sps:$4 sm:$0xff]  }
 0x58b   : > { %9225 = vmatprep.subr.bf16.mxu0 %v12898_v36 }
 0x58c   : > { %9263 = vmatpush2.bf16.msra.mxu1 %v12893_v28  ;;  %v12943_v28 = vld [vmem:[#allocation11 + $0x42c] ss:$24 sps:$4 sm:$0xff]  }
 0x58d   : > { %9264 = vmatprep.subr.bf16.mxu1 %v12901_v7  ;;  %v12938_v7 = vld [vmem:[#allocation11 + $0xf8] ss:$24 sps:$4 sm:$0xff]  }
 0x58e   : > { %9226 = vmatpush2.bf16.msra.mxu0 %v12896_v10 }
 0x58f   : > { %9227 = vmatprep.subr.bf16.mxu0 %v12904_v58  ;;  %v12946_v58 = vld [vmem:[#allocation11 + $0xcc] ss:$24 sps:$4 sm:$0xff]  }
 0x590   : > { %9265 = vmatpush2.bf16.msra.mxu1 %v12899_v55 }
 0x591   : > { %9266 = vmatprep.subr.bf16.mxu1 %v12907_v50 }
 0x592   : > { %9228 = vmatpush2.bf16.msra.mxu0 %v12902_v1  ;;  %v12949_v1 = vld [vmem:[#allocation11 + $0x3fc] ss:$24 sps:$4 sm:$0xff]  }
 0x593   : > { %9229 = vmatprep.subr.bf16.mxu0 %v12910_v2 }
 0x594   : > { %9267 = vmatpush2.bf16.msra.mxu1 %v12905_v54  ;;  %v12944_v54 = vld [vmem:[#allocation11 + $0xc8] ss:$24 sps:$4 sm:$0xff]  }
 0x595   : > { %9268 = vmatprep.subr.bf16.mxu1 %v12913_v9 }
 0x596   : > { %9230 = vmatpush2.bf16.msra.mxu0 %v12908_v62  ;;  %v12952_v62 = vld [vmem:[#allocation11 + $0x9c] ss:$24 sps:$4 sm:$0xff]  }
 0x597   : > { %9231 = vmatprep.subr.bf16.mxu0 %v12916_v63 }
 0x598   : > { %9269 = vmatpush2.bf16.msra.mxu1 %v12911_v31  ;;  %v12955_v31 = vld [vmem:[#allocation11 + $0x3cc] ss:$24 sps:$4 sm:$0xff]  }
 0x599   : > { %9270 = vmatprep.subr.bf16.mxu1 %v12919_v29  ;;  %v12950_v29 = vld [vmem:[#allocation11 + $0x98] ss:$24 sps:$4 sm:$0xff]  }
 0x59a   : > { %9232 = vmatpush2.bf16.msra.mxu0 %v12914_v23  ;;  %v12958_v23 = vld [vmem:[#allocation11 + $0x6c] ss:$24 sps:$4 sm:$0xff]  }
 0x59b   : > { %9233 = vmatprep.subr.bf16.mxu0 %v12922_v6  ;;  %v12961_v6 = vld [vmem:[#allocation11 + $0x39c] ss:$24 sps:$4 sm:$0xff]  }
 0x59c   : > { %9271 = vmatpush2.bf16.msra.mxu1 %v12917_v0  ;;  %v12956_v0 = vld [vmem:[#allocation11 + $0x68] ss:$24 sps:$4 sm:$0xff]  }
 0x59d   : > { %9272 = vmatprep.subr.bf16.mxu1 %v12925_v47  ;;  %v12959_v47 = vld [vmem:[#allocation11 + $0x398] ss:$24 sps:$4 sm:$0xff]  }
 0x59e   : > { %9234 = vmatpush2.bf16.msra.mxu0 %v12920_v59  ;;  %v12967_v59 = vld [vmem:[#allocation11 + $0x36c] ss:$24 sps:$4 sm:$0xff]  }
 0x59f   : > { %9285 = vmatprep.subr.bf16.mxu0 %v12928_v15  ;;  %v12970_v15 = vld [vmem:[#allocation11 + $0xc] ss:$24 sps:$4 sm:$0xff]  }
 0x5a0   : > { %9273 = vmatpush2.bf16.msra.mxu1 %v12923_v17  ;;  %v12965_v17 = vld [vmem:[#allocation11 + $0x368] ss:$24 sps:$4 sm:$0xff]  }
 0x5a1   : > { %v8991_v46 = vpop.f32.mrf.mxu0  ;;  %9236 = vmatmul.mubr.bf16.vlgmr.msra.gmra.mxu0 %v16696_v43  ;;  %9274 = vmatprep.subr.bf16.mxu1 %v12931_v30  ;;  %v12968_v30 = vld [vmem:[#allocation11 + $0x8] ss:$24 sps:$4 sm:$0xff]  }
 0x5a2   : > { %v8992_v14 = vadd.f32 %v8991_v46, %v16687_v61  ;;  %9286 = vmatpush1.bf16.msra.mxu0 %v12926_v27  ;;  %9317 = vmatprep.mubr.bf16.mxu0 %v16594_v49  ;;  %v12976_v27 = vld [vmem:[#allocation11 + $0x2dc] ss:$24 sps:$4 sm:$0xff]   ;;  %v12982_v46 = vld [vmem:[#allocation11 + $0x2ac] ss:$24 sps:$4 sm:$0xff]  }
 0x5a3   : > { %v8993_v38 = vpop.f32.mrf.mxu0  ;;  %9287 = vmatprep.subr.bf16.mxu0 %v12934_v33  ;;  %v12971_v33 = vld [vmem:[#allocation11 + $0x338] ss:$24 sps:$4 sm:$0xff]  }
 0x5a4   : > { %v8994_v41 = vadd.f32 %v8993_v38, %v16690_v44  ;;  %9275 = vmatpush2.bf16.msra.mxu1 %v12929_v16  ;;  %v12941_v44 = vld [vmem:[#allocation11 + $0x428] ss:$24 sps:$4 sm:$0xff]   ;;  %v12979_v16 = vld [vmem:[#allocation11 + $0x30c] ss:$24 sps:$4 sm:$0xff]   ;;  %v12988_v38 = vld [vmem:[#allocation11 + $0x27c] ss:$24 sps:$4 sm:$0xff]  }
 0x5a5   : > { %v8995_v36 = vpop.f32.mrf.mxu0  ;;  %9326 = vmatprep.subr.bf16.mxu1 %v12937_v34  ;;  %v12977_v34 = vld [vmem:[#allocation11 + $0x308] ss:$24 sps:$4 sm:$0xff]  }
 0x5a6   : > { %9288 = vmatpush1.bf16.msra.mxu0 %v12932_v35  ;;  %v12980_v35 = vld [vmem:[#allocation11 + $0x2a8] ss:$24 sps:$4 sm:$0xff]   ;;  %v12994_v36 = vld [vmem:[#allocation11 + $0x24c] ss:$24 sps:$4 sm:$0xff]  }
 0x5a7   : > { %v8996_v10 = vpop.f32.mrf.mxu0  ;;  %v9032_v61 = vpop.f32.mrf.mxu1  ;;  %9277 = vmatmul.mubr.bf16.vlgmr.msra.gmra.mxu1 %v16702_v56  ;;  %9289 = vmatprep.subr.bf16.mxu0 %v12940_v32  ;;  %v12983_v32 = vld [vmem:[#allocation11 + $0x5d8] ss:$24 sps:$4 sm:$0xff]  }
 0x5a8   : > { %v16705_v55 = vadd.f32 %v9032_v61, %v8992_v14  ;;  %9327 = vmatpush1.bf16.msra.mxu1 %v12935_v3  ;;  %9358 = vmatprep.mubr.bf16.mxu1 %v16596_v40  ;;  %v12985_v14 = vld [vmem:[#allocation11 + $0x5dc] ss:$24 sps:$4 sm:$0xff]   ;;  %v12986_v3 = vld [vmem:[#allocation11 + $0x278] ss:$24 sps:$4 sm:$0xff]   ;;  %v12992_v10 = vld [vmem:[#allocation11 + $0x248] ss:$24 sps:$4 sm:$0xff]  }
 0x5a9   : > { %v9034_v50 = vpop.f32.mrf.mxu1  ;;  %9328 = vmatprep.subr.bf16.mxu1 %v12943_v28  ;;  %v12989_v28 = vld [vmem:[#allocation11 + $0x5a8] ss:$24 sps:$4 sm:$0xff]   ;;  %v13000_v61 = vld [vmem:[#allocation11 + $0x21c] ss:$24 sps:$4 sm:$0xff]  }
 0x5aa   : > { %v16708_v2 = vadd.f32 %v9034_v50, %v8994_v41  ;;  %9290 = vmatpush1.bf16.msra.mxu0 %v12938_v7  ;;  %v12991_v41 = vld [vmem:[#allocation11 + $0x5ac] ss:$24 sps:$4 sm:$0xff]   ;;  %v12997_v7 = vld [vmem:[#allocation11 + $0x57c] ss:$24 sps:$4 sm:$0xff]   ;;  %v12998_v50 = vld [vmem:[#allocation11 + $0x218] ss:$24 sps:$4 sm:$0xff]  }
 0x5ab   : > { %v9036_v9 = vpop.f32.mrf.mxu1  ;;  %9291 = vmatprep.subr.bf16.mxu0 %v12946_v58  ;;  %v12995_v58 = vld [vmem:[#allocation11 + $0x578] ss:$24 sps:$4 sm:$0xff]  }
 0x5ac   : > { %9329 = vmatpush1.bf16.msra.mxu1 %v12941_v44  ;;  %v13003_v44 = vld [vmem:[#allocation11 + $0x54c] ss:$24 sps:$4 sm:$0xff]   ;;  %v13009_v9 = vld [vmem:[#allocation11 + $0x51c] ss:$24 sps:$4 sm:$0xff]  }
 0x5ad   : > { %v9037_v63 = vpop.f32.mrf.mxu1  ;;  %9330 = vmatprep.subr.bf16.mxu1 %v12949_v1  ;;  %v13006_v1 = vld [vmem:[#allocation11 + $0x1ec] ss:$24 sps:$4 sm:$0xff]  }
 0x5ae   : > { %9292 = vmatpush1.bf16.msra.mxu0 %v12944_v54  ;;  %v13001_v54 = vld [vmem:[#allocation11 + $0x548] ss:$24 sps:$4 sm:$0xff]   ;;  %v13007_v63 = vld [vmem:[#allocation11 + $0x518] ss:$24 sps:$4 sm:$0xff]  }
 0x5af   : > { %9293 = vmatprep.subr.bf16.mxu0 %v12952_v62  ;;  %v13004_v62 = vld [vmem:[#allocation11 + $0x1e8] ss:$24 sps:$4 sm:$0xff]  }
 0x5b0   : > { %9331 = vmatpush1.bf16.msra.mxu1 %v12947_v42  ;;  %v13012_v42 = vld [vmem:[#allocation11 + $0x1bc] ss:$24 sps:$4 sm:$0xff]  }
 0x5b1   : > { %9332 = vmatprep.subr.bf16.mxu1 %v12955_v31  ;;  %v13015_v31 = vld [vmem:[#allocation11 + $0x4ec] ss:$24 sps:$4 sm:$0xff]  }
 0x5b2   : > { %9294 = vmatpush1.bf16.msra.mxu0 %v12950_v29  ;;  %v13010_v29 = vld [vmem:[#allocation11 + $0x1b8] ss:$24 sps:$4 sm:$0xff]  }
 0x5b3   : > { %9295 = vmatprep.subr.bf16.mxu0 %v12958_v23  ;;  %v13018_v23 = vld [vmem:[#allocation11 + $0x18c] ss:$24 sps:$4 sm:$0xff]  }
 0x5b4   : > { %9333 = vmatpush1.bf16.msra.mxu1 %v12953_v18  ;;  %v13013_v18 = vld [vmem:[#allocation11 + $0x4e8] ss:$24 sps:$4 sm:$0xff]  }
 0x5b5   : > { %9334 = vmatprep.subr.bf16.mxu1 %v12961_v6  ;;  %v13021_v6 = vld [vmem:[#allocation11 + $0x4bc] ss:$24 sps:$4 sm:$0xff]  }
 0x5b6   : > { %9296 = vmatpush1.bf16.msra.mxu0 %v12956_v0  ;;  %v13016_v0 = vld [vmem:[#allocation11 + $0x188] ss:$24 sps:$4 sm:$0xff]  }
 0x5b7   : > { %9297 = vmatprep.subr.bf16.mxu0 %v12964_v4  ;;  %v13024_v4 = vld [vmem:[#allocation11 + $0x75c] ss:$24 sps:$4 sm:$0xff]  }
 0x5b8   : > { %9335 = vmatpush1.bf16.msra.mxu1 %v12959_v47  ;;  %v13019_v47 = vld [vmem:[#allocation11 + $0x4b8] ss:$24 sps:$4 sm:$0xff]  }
 0x5b9   : > { %9336 = vmatprep.subr.bf16.mxu1 %v12967_v59  ;;  %v13027_v59 = vld [vmem:[#allocation11 + $0x48c] ss:$24 sps:$4 sm:$0xff]  }
 0x5ba   : > { %9298 = vmatpush1.bf16.msra.mxu0 %v12962_v19  ;;  %v13022_v19 = vld [vmem:[#allocation11 + $0x758] ss:$24 sps:$4 sm:$0xff]  }
 0x5bb   : > { %9299 = vmatprep.subr.bf16.mxu0 %v12970_v15  ;;  %v13030_v15 = vld [vmem:[#allocation11 + $0x72c] ss:$24 sps:$4 sm:$0xff]  }
 0x5bc   : > { %9337 = vmatpush1.bf16.msra.mxu1 %v12965_v17  ;;  %v13025_v17 = vld [vmem:[#allocation11 + $0x488] ss:$24 sps:$4 sm:$0xff]  }
 0x5bd   : > { %9338 = vmatprep.subr.bf16.mxu1 %v12973_v5 }
 0x5be   : > { %9300 = vmatpush1.bf16.msra.mxu0 %v12968_v30  ;;  %v13033_v30 = vld [vmem:[#allocation11 + $0xa5c] ss:$24 sps:$4 sm:$0xff]  }
 0x5bf   : > { %9301 = vmatprep.subr.bf16.mxu0 %v12976_v27 }
 0x5c0   : > { %9339 = vmatpush1.bf16.msra.mxu1 %v12971_v33  ;;  %v13028_v33 = vld [vmem:[#allocation11 + $0x728] ss:$24 sps:$4 sm:$0xff]  }
 0x5c1   : > { %9340 = vmatprep.subr.bf16.mxu1 %v12979_v16 }
 0x5c2   : > { %9302 = vmatpush2.bf16.msra.mxu0 %v12974_v39  ;;  %v13036_v39 = vld [vmem:[#allocation11 + $0x6fc] ss:$24 sps:$4 sm:$0xff]  }
 0x5c3   : > { %9303 = vmatprep.subr.bf16.mxu0 %v12982_v46 }
 0x5c4   : > { %9341 = vmatpush1.bf16.msra.mxu1 %v12977_v34  ;;  %v13031_v34 = vld [vmem:[#allocation11 + $0xa58] ss:$24 sps:$4 sm:$0xff]  }
 0x5c5   : > { %9342 = vmatprep.subr.bf16.mxu1 %v12985_v14 }
 0x5c6   : > { %9304 = vmatpush2.bf16.msra.mxu0 %v12980_v35  ;;  %v13039_v35 = vld [vmem:[#allocation11 + $0xa2c] ss:$24 sps:$4 sm:$0xff]  }
 0x5c7   : > { %9305 = vmatprep.subr.bf16.mxu0 %v12988_v38  ;;  %v13034_v38 = vld [vmem:[#allocation11 + $0x6f8] ss:$24 sps:$4 sm:$0xff]  }
 0x5c8   : > { %9343 = vmatpush2.bf16.msra.mxu1 %v12983_v32 }
 0x5c9   : > { %9344 = vmatprep.subr.bf16.mxu1 %v12991_v41 }
 0x5ca   : > { %9306 = vmatpush2.bf16.msra.mxu0 %v12986_v3 }
 0x5cb   : > { %9307 = vmatprep.subr.bf16.mxu0 %v12994_v36  ;;  %v13037_v36 = vld [vmem:[#allocation11 + $0xa28] ss:$24 sps:$4 sm:$0xff]  }
 0x5cc   : > { %9345 = vmatpush2.bf16.msra.mxu1 %v12989_v28  ;;  %v13045_v28 = vld [vmem:[#allocation11 + $0x9fc] ss:$24 sps:$4 sm:$0xff]  }
 0x5cd   : > { %9346 = vmatprep.subr.bf16.mxu1 %v12997_v7 }
 0x5ce   : > { %9308 = vmatpush2.bf16.msra.mxu0 %v12992_v10  ;;  %v13040_v10 = vld [vmem:[#allocation11 + $0x6c8] ss:$24 sps:$4 sm:$0xff]  }
 0x5cf   : > { %9309 = vmatprep.subr.bf16.mxu0 %v13000_v61 }
 0x5d0   : > { %9347 = vmatpush2.bf16.msra.mxu1 %v12995_v58  ;;  %v13048_v58 = vld [vmem:[#allocation11 + $0x69c] ss:$24 sps:$4 sm:$0xff]  }
 0x5d1   : > { %9348 = vmatprep.subr.bf16.mxu1 %v13003_v44  ;;  %v13043_v44 = vld [vmem:[#allocation11 + $0x9f8] ss:$24 sps:$4 sm:$0xff]  }
 0x5d2   : > { %9310 = vmatpush2.bf16.msra.mxu0 %v12998_v50 }
 0x5d3   : > { %9311 = vmatprep.subr.bf16.mxu0 %v13006_v1  ;;  %v13051_v1 = vld [vmem:[#allocation11 + $0x9cc] ss:$24 sps:$4 sm:$0xff]  }
 0x5d4   : > { %9349 = vmatpush2.bf16.msra.mxu1 %v13001_v54  ;;  %v13046_v54 = vld [vmem:[#allocation11 + $0x698] ss:$24 sps:$4 sm:$0xff]  }
 0x5d5   : > { %9350 = vmatprep.subr.bf16.mxu1 %v13009_v9  ;;  %v13054_v9 = vld [vmem:[#allocation11 + $0x66c] ss:$24 sps:$4 sm:$0xff]  }
 0x5d6   : > { %9312 = vmatpush2.bf16.msra.mxu0 %v13004_v62  ;;  %v13049_v62 = vld [vmem:[#allocation11 + $0x9c8] ss:$24 sps:$4 sm:$0xff]  }
 0x5d7   : > { %9313 = vmatprep.subr.bf16.mxu0 %v13012_v42  ;;  %v13057_v42 = vld [vmem:[#allocation11 + $0x99c] ss:$24 sps:$4 sm:$0xff]  }
 0x5d8   : > { %9351 = vmatpush2.bf16.msra.mxu1 %v13007_v63  ;;  %v13052_v63 = vld [vmem:[#allocation11 + $0x668] ss:$24 sps:$4 sm:$0xff]  }
 0x5d9   : > { %9352 = vmatprep.subr.bf16.mxu1 %v13015_v31  ;;  %v13060_v31 = vld [vmem:[#allocation11 + $0x63c] ss:$24 sps:$4 sm:$0xff]  }
 0x5da   : > { %9314 = vmatpush2.bf16.msra.mxu0 %v13010_v29  ;;  %v13055_v29 = vld [vmem:[#allocation11 + $0x998] ss:$24 sps:$4 sm:$0xff]  }
 0x5db   : > { %9315 = vmatprep.subr.bf16.mxu0 %v13018_v23  ;;  %v13063_v23 = vld [vmem:[#allocation11 + $0x96c] ss:$24 sps:$4 sm:$0xff]  }
 0x5dc   : > { %9353 = vmatpush2.bf16.msra.mxu1 %v13013_v18  ;;  %v13058_v18 = vld [vmem:[#allocation11 + $0x638] ss:$24 sps:$4 sm:$0xff]  }
 0x5dd   : > { %9354 = vmatprep.subr.bf16.mxu1 %v13021_v6  ;;  %v13066_v6 = vld [vmem:[#allocation11 + $0x60c] ss:$24 sps:$4 sm:$0xff]  }
 0x5de   : > { %9316 = vmatpush2.bf16.msra.mxu0 %v13016_v0  ;;  %v13061_v0 = vld [vmem:[#allocation11 + $0x968] ss:$24 sps:$4 sm:$0xff]  }
 0x5df   : > { %9367 = vmatprep.subr.bf16.mxu0 %v13024_v4  ;;  %v13069_v4 = vld [vmem:[#allocation11 + $0x93c] ss:$24 sps:$4 sm:$0xff]  }
 0x5e0   : > { %9355 = vmatpush2.bf16.msra.mxu1 %v13019_v47  ;;  %v13064_v47 = vld [vmem:[#allocation11 + $0x608] ss:$24 sps:$4 sm:$0xff]  }
 0x5e1   : > { %v9073_v5 = vpop.f32.mrf.mxu0  ;;  %9318 = vmatmul.mubr.bf16.vlgmr.msra.gmra.mxu0 %v16610_v51  ;;  %9356 = vmatprep.subr.bf16.mxu1 %v13027_v59  ;;  %v13072_v59 = vld [vmem:[#allocation11 + $0x8dc] ss:$24 sps:$4 sm:$0xff]  }
 0x5e2   : > { %v9074_v27 = vadd.f32 %v9073_v5, %v16705_v55  ;;  %9368 = vmatpush1.bf16.msra.mxu0 %v13022_v19  ;;  %9399 = vmatprep.mubr.bf16.mxu0 %v16612_v25  ;;  %v13042_v55 = vld [vmem:[#allocation11 + $0x6cc] ss:$24 sps:$4 sm:$0xff]   ;;  %v13067_v19 = vld [vmem:[#allocation11 + $0x938] ss:$24 sps:$4 sm:$0xff]  }
 0x5e3   : > { %v9075_v16 = vpop.f32.mrf.mxu0  ;;  %9369 = vmatprep.subr.bf16.mxu0 %v13030_v15  ;;  %v13075_v15 = vld [vmem:[#allocation11 + $0x90c] ss:$24 sps:$4 sm:$0xff]  }
 0x5e4   : > { %v9076_v46 = vadd.f32 %v9075_v16, %v16708_v2  ;;  %9357 = vmatpush2.bf16.msra.mxu1 %v13025_v17  ;;  %v13070_v17 = vld [vmem:[#allocation11 + $0x8d8] ss:$24 sps:$4 sm:$0xff]   ;;  %v13078_v5 = vld [vmem:[#allocation11 + $0x8ac] ss:$24 sps:$4 sm:$0xff]   ;;  %v13084_v16 = vld [vmem:[#allocation11 + $0x87c] ss:$24 sps:$4 sm:$0xff]  }
 0x5e5   : > { %v9077_v14 = vpop.f32.mrf.mxu0  ;;  %9408 = vmatprep.subr.bf16.mxu1 %v13033_v30  ;;  %v13073_v30 = vld [vmem:[#allocation11 + $0x908] ss:$24 sps:$4 sm:$0xff]  }
 0x5e6   : > { %9370 = vmatpush1.bf16.msra.mxu0 %v13028_v33  ;;  %v13076_v33 = vld [vmem:[#allocation11 + $0x8a8] ss:$24 sps:$4 sm:$0xff]   ;;  %v13090_v14 = vld [vmem:[#allocation11 + $0x84c] ss:$24 sps:$4 sm:$0xff]  }
 0x5e7   : > { %v9078_v32 = vpop.f32.mrf.mxu0  ;;  %v9114_v41 = vpop.f32.mrf.mxu1  ;;  %9359 = vmatmul.mubr.bf16.vlgmr.msra.gmra.mxu1 %v16616_v45  ;;  %9371 = vmatprep.subr.bf16.mxu0 %v13036_v39  ;;  %v13079_v39 = vld [vmem:[#allocation11 + $0xbd8] ss:$24 sps:$4 sm:$0xff]  }
 0x5e8   : > { %v16715_v3 = vadd.f32 %v9114_v41, %v9074_v27  ;;  %9409 = vmatpush1.bf16.msra.mxu1 %v13031_v34  ;;  %9440 = vmatprep.mubr.bf16.mxu1 %v16618_v12  ;;  %v13081_v27 = vld [vmem:[#allocation11 + $0xbdc] ss:$24 sps:$4 sm:$0xff]   ;;  %v13082_v34 = vld [vmem:[#allocation11 + $0x878] ss:$24 sps:$4 sm:$0xff]   ;;  %v13088_v32 = vld [vmem:[#allocation11 + $0x848] ss:$24 sps:$4 sm:$0xff]  }
 0x5e9   : > { %v9116_v2 = vpop.f32.mrf.mxu1  ;;  %9410 = vmatprep.subr.bf16.mxu1 %v13039_v35  ;;  %v13085_v35 = vld [vmem:[#allocation11 + $0xba8] ss:$24 sps:$4 sm:$0xff]   ;;  %v13096_v41 = vld [vmem:[#allocation11 + $0x81c] ss:$24 sps:$4 sm:$0xff]  }
 0x5ea   : > { %v16718_v7 = vadd.f32 %v9116_v2, %v9076_v46  ;;  %9372 = vmatpush1.bf16.msra.mxu0 %v13034_v38  ;;  %v13087_v46 = vld [vmem:[#allocation11 + $0xbac] ss:$24 sps:$4 sm:$0xff]   ;;  %v13093_v38 = vld [vmem:[#allocation11 + $0xb7c] ss:$24 sps:$4 sm:$0xff]   ;;  %v13094_v2 = vld [vmem:[#allocation11 + $0x818] ss:$24 sps:$4 sm:$0xff]  }
 0x5eb   : > { %v9118_v61 = vpop.f32.mrf.mxu1  ;;  %9373 = vmatprep.subr.bf16.mxu0 %v13042_v55  ;;  %v13091_v55 = vld [vmem:[#allocation11 + $0xb78] ss:$24 sps:$4 sm:$0xff]  }
 0x5ec   : > { %9411 = vmatpush1.bf16.msra.mxu1 %v13037_v36  ;;  %v13099_v36 = vld [vmem:[#allocation11 + $0xb4c] ss:$24 sps:$4 sm:$0xff]   ;;  %v13105_v61 = vld [vmem:[#allocation11 + $0xb1c] ss:$24 sps:$4 sm:$0xff]  }
 0x5ed   : > { %v9119_v50 = vpop.f32.mrf.mxu1  ;;  %9412 = vmatprep.subr.bf16.mxu1 %v13045_v28  ;;  %v13102_v28 = vld [vmem:[#allocation11 + $0x7ec] ss:$24 sps:$4 sm:$0xff]  }
 0x5ee   : > { %9374 = vmatpush1.bf16.msra.mxu0 %v13040_v10  ;;  %v13097_v10 = vld [vmem:[#allocation11 + $0xb48] ss:$24 sps:$4 sm:$0xff]   ;;  %v13103_v50 = vld [vmem:[#allocation11 + $0xb18] ss:$24 sps:$4 sm:$0xff]  }
 0x5ef   : > { %9375 = vmatprep.subr.bf16.mxu0 %v13048_v58  ;;  %v13100_v58 = vld [vmem:[#allocation11 + $0x7e8] ss:$24 sps:$4 sm:$0xff]  }
 0x5f0   : > { %9413 = vmatpush1.bf16.msra.mxu1 %v13043_v44  ;;  %v13108_v44 = vld [vmem:[#allocation11 + $0x7bc] ss:$24 sps:$4 sm:$0xff]  }
 0x5f1   : > { %9414 = vmatprep.subr.bf16.mxu1 %v13051_v1  ;;  %v13111_v1 = vld [vmem:[#allocation11 + $0xaec] ss:$24 sps:$4 sm:$0xff]  }
 0x5f2   : > { %9376 = vmatpush1.bf16.msra.mxu0 %v13046_v54  ;;  %v13106_v54 = vld [vmem:[#allocation11 + $0x7b8] ss:$24 sps:$4 sm:$0xff]  }
 0x5f3   : > { %9377 = vmatprep.subr.bf16.mxu0 %v13054_v9  ;;  %v13114_v9 = vld [vmem:[#allocation11 + $0x78c] ss:$24 sps:$4 sm:$0xff]  }
 0x5f4   : > { %9415 = vmatpush1.bf16.msra.mxu1 %v13049_v62  ;;  %v13109_v62 = vld [vmem:[#allocation11 + $0xae8] ss:$24 sps:$4 sm:$0xff]  }
 0x5f5   : > { %9416 = vmatprep.subr.bf16.mxu1 %v13057_v42  ;;  %v13117_v42 = vld [vmem:[#allocation11 + $0xabc] ss:$24 sps:$4 sm:$0xff]  }
 0x5f6   : > { %9378 = vmatpush1.bf16.msra.mxu0 %v13052_v63  ;;  %v13112_v63 = vld [vmem:[#allocation11 + $0x788] ss:$24 sps:$4 sm:$0xff]  }
 0x5f7   : > { %9379 = vmatprep.subr.bf16.mxu0 %v13060_v31  ;;  %v13120_v31 = vld [vmem:[#allocation11 + $0xd5c] ss:$24 sps:$4 sm:$0xff]  }
 0x5f8   : > { %9417 = vmatpush1.bf16.msra.mxu1 %v13055_v29  ;;  %v13115_v29 = vld [vmem:[#allocation11 + $0xab8] ss:$24 sps:$4 sm:$0xff]  }
 0x5f9   : > { %9418 = vmatprep.subr.bf16.mxu1 %v13063_v23  ;;  %v13123_v23 = vld [vmem:[#allocation11 + $0xa8c] ss:$24 sps:$4 sm:$0xff]  }
 0x5fa   : > { %9380 = vmatpush1.bf16.msra.mxu0 %v13058_v18  ;;  %v13118_v18 = vld [vmem:[#allocation11 + $0xd58] ss:$24 sps:$4 sm:$0xff]  }
 0x5fb   : > { %9381 = vmatprep.subr.bf16.mxu0 %v13066_v6  ;;  %v13126_v6 = vld [vmem:[#allocation11 + $0xd2c] ss:$24 sps:$4 sm:$0xff]  }
 0x5fc   : > { %9419 = vmatpush1.bf16.msra.mxu1 %v13061_v0  ;;  %v13121_v0 = vld [vmem:[#allocation11 + $0xa88] ss:$24 sps:$4 sm:$0xff]  }
 0x5fd   : > { %9420 = vmatprep.subr.bf16.mxu1 %v13069_v4 }
 0x5fe   : > { %9382 = vmatpush1.bf16.msra.mxu0 %v13064_v47  ;;  %v13129_v47 = vld [vmem:[#allocation11 + $0x105c] ss:$24 sps:$4 sm:$0xff]  }
 0x5ff   : > { %9383 = vmatprep.subr.bf16.mxu0 %v13072_v59 }
 0x600   : > { %9421 = vmatpush1.bf16.msra.mxu1 %v13067_v19  ;;  %v13124_v19 = vld [vmem:[#allocation11 + $0xd28] ss:$24 sps:$4 sm:$0xff]  }
 0x601   : > { %9422 = vmatprep.subr.bf16.mxu1 %v13075_v15 }
 0x602   : > { %9384 = vmatpush2.bf16.msra.mxu0 %v13070_v17  ;;  %v13132_v17 = vld [vmem:[#allocation11 + $0xcfc] ss:$24 sps:$4 sm:$0xff]  }
 0x603   : > { %9385 = vmatprep.subr.bf16.mxu0 %v13078_v5 }
 0x604   : > { %9423 = vmatpush1.bf16.msra.mxu1 %v13073_v30  ;;  %v13127_v30 = vld [vmem:[#allocation11 + $0x1058] ss:$24 sps:$4 sm:$0xff]  }
 0x605   : > { %9424 = vmatprep.subr.bf16.mxu1 %v13081_v27 }
 0x606   : > { %9386 = vmatpush2.bf16.msra.mxu0 %v13076_v33  ;;  %v13135_v33 = vld [vmem:[#allocation11 + $0x102c] ss:$24 sps:$4 sm:$0xff]  }
 0x607   : > { %9387 = vmatprep.subr.bf16.mxu0 %v13084_v16  ;;  %v13130_v16 = vld [vmem:[#allocation11 + $0xcf8] ss:$24 sps:$4 sm:$0xff]  }
 0x608   : > { %9425 = vmatpush2.bf16.msra.mxu1 %v13079_v39 }
 0x609   : > { %9426 = vmatprep.subr.bf16.mxu1 %v13087_v46 }
 0x60a   : > { %9388 = vmatpush2.bf16.msra.mxu0 %v13082_v34  ;;  %v13133_v34 = vld [vmem:[#allocation11 + $0x1028] ss:$24 sps:$4 sm:$0xff]  }
 0x60b   : > { %9389 = vmatprep.subr.bf16.mxu0 %v13090_v14 }
 0x60c   : > { %9427 = vmatpush2.bf16.msra.mxu1 %v13085_v35 }
 0x60d   : > { %9428 = vmatprep.subr.bf16.mxu1 %v13093_v38  ;;  %v13136_v38 = vld [vmem:[#allocation11 + $0xcc8] ss:$24 sps:$4 sm:$0xff]  }
 0x60e   : > { %9390 = vmatpush2.bf16.msra.mxu0 %v13088_v32 }
 0x60f   : > { %9391 = vmatprep.subr.bf16.mxu0 %v13096_v41  ;;  %v13144_v41 = vld [vmem:[#allocation11 + $0xc9c] ss:$24 sps:$4 sm:$0xff]  }
 0x610   : > { %9429 = vmatpush2.bf16.msra.mxu1 %v13091_v55  ;;  %v13139_v55 = vld [vmem:[#allocation11 + $0xff8] ss:$24 sps:$4 sm:$0xff]  }
 0x611   : > { %9430 = vmatprep.subr.bf16.mxu1 %v13099_v36 }
 0x612   : > { %9392 = vmatpush2.bf16.msra.mxu0 %v13094_v2  ;;  %v13147_v2 = vld [vmem:[#allocation11 + $0xfcc] ss:$24 sps:$4 sm:$0xff]  }
 0x613   : > { %9393 = vmatprep.subr.bf16.mxu0 %v13102_v28  ;;  %v13142_v28 = vld [vmem:[#allocation11 + $0xc98] ss:$24 sps:$4 sm:$0xff]  }
 0x614   : > { %9431 = vmatpush2.bf16.msra.mxu1 %v13097_v10  ;;  %v13150_v10 = vld [vmem:[#allocation11 + $0xc6c] ss:$24 sps:$4 sm:$0xff]  }
 0x615   : > { %9432 = vmatprep.subr.bf16.mxu1 %v13105_v61  ;;  %v13145_v61 = vld [vmem:[#allocation11 + $0xfc8] ss:$24 sps:$4 sm:$0xff]  }
 0x616   : > { %9394 = vmatpush2.bf16.msra.mxu0 %v13100_v58  ;;  %v13153_v58 = vld [vmem:[#allocation11 + $0xf9c] ss:$24 sps:$4 sm:$0xff]  }
 0x617   : > { %9395 = vmatprep.subr.bf16.mxu0 %v13108_v44  ;;  %v13148_v44 = vld [vmem:[#allocation11 + $0xc68] ss:$24 sps:$4 sm:$0xff]  }
 0x618   : > { %9433 = vmatpush2.bf16.msra.mxu1 %v13103_v50  ;;  %v13156_v50 = vld [vmem:[#allocation11 + $0xc3c] ss:$24 sps:$4 sm:$0xff]  }
 0x619   : > { %9434 = vmatprep.subr.bf16.mxu1 %v13111_v1  ;;  %v13151_v1 = vld [vmem:[#allocation11 + $0xf98] ss:$24 sps:$4 sm:$0xff]  }
 0x61a   : > { %9396 = vmatpush2.bf16.msra.mxu0 %v13106_v54  ;;  %v13159_v54 = vld [vmem:[#allocation11 + $0xf6c] ss:$24 sps:$4 sm:$0xff]  }
 0x61b   : > { %9397 = vmatprep.subr.bf16.mxu0 %v13114_v9  ;;  %v13154_v9 = vld [vmem:[#allocation11 + $0xc38] ss:$24 sps:$4 sm:$0xff]  }
 0x61c   : > { %9435 = vmatpush2.bf16.msra.mxu1 %v13109_v62  ;;  %v13162_v62 = vld [vmem:[#allocation11 + $0xc0c] ss:$24 sps:$4 sm:$0xff]  }
 0x61d   : > { %9436 = vmatprep.subr.bf16.mxu1 %v13117_v42  ;;  %v13157_v42 = vld [vmem:[#allocation11 + $0xf68] ss:$24 sps:$4 sm:$0xff]  }
 0x61e   : > { %9398 = vmatpush2.bf16.msra.mxu0 %v13112_v63  ;;  %v13165_v63 = vld [vmem:[#allocation11 + $0xf3c] ss:$24 sps:$4 sm:$0xff]  }
 0x61f   : > { %9449 = vmatprep.subr.bf16.mxu0 %v13120_v31  ;;  %v13160_v31 = vld [vmem:[#allocation11 + $0xc08] ss:$24 sps:$4 sm:$0xff]  }
 0x620   : > { %9437 = vmatpush2.bf16.msra.mxu1 %v13115_v29  ;;  %v13168_v29 = vld [vmem:[#allocation11 + $0xedc] ss:$24 sps:$4 sm:$0xff]  }
 0x621   : > { %v9155_v4 = vpop.f32.mrf.mxu0  ;;  %9400 = vmatmul.mubr.bf16.vlgmr.msra.gmra.mxu0 %v16632_v60  ;;  %9438 = vmatprep.subr.bf16.mxu1 %v13123_v23  ;;  %v13163_v23 = vld [vmem:[#allocation11 + $0xf38] ss:$24 sps:$4 sm:$0xff]  }
 0x622   : > { %v16722_v59 = vadd.f32 %v9155_v4, %v16715_v3  ;;  %9450 = vmatpush1.bf16.msra.mxu0 %v13118_v18  ;;  %9481 = vmatprep.mubr.bf16.mxu0 %v16634_v22  ;;  %v13138_v3 = vld [vmem:[#allocation11 + $0xccc] ss:$24 sps:$4 sm:$0xff]   ;;  %v13169_v4 = vld [vmem:[#allocation11 + $0xf08] ss:$24 sps:$4 sm:$0xff]  }
 0x623   : > { %v9157_v15 = vpop.f32.mrf.mxu0  ;;  %9451 = vmatprep.subr.bf16.mxu0 %v13126_v6  ;;  %v13171_v18 = vld [vmem:[#allocation11 + $0xf0c] ss:$24 sps:$4 sm:$0xff]   ;;  %v13166_v6 = vld [vmem:[#allocation11 + $0xed8] ss:$24 sps:$4 sm:$0xff]  }
 0x624   : > { %v9158_v5 = vadd.f32 %v9157_v15, %v16718_v7  ;;  %9439 = vmatpush2.bf16.msra.mxu1 %v13121_v0  ;;  %v13141_v7 = vld [vmem:[#allocation11 + $0xffc] ss:$24 sps:$4 sm:$0xff]   ;;  %v13174_v0 = vld [vmem:[#allocation11 + $0xeac] ss:$24 sps:$4 sm:$0xff]  }
 0x625   : > { %v9159_v27 = vpop.f32.mrf.mxu0  ;;  %9490 = vmatprep.subr.bf16.mxu1 %v13129_v47  ;;  %v13177_v47 = vld [vmem:[#allocation11 + $0x11dc] ss:$24 sps:$4 sm:$0xff]  }
 0x626   : > { %9452 = vmatpush1.bf16.msra.mxu0 %v13124_v19  ;;  %v13172_v19 = vld [vmem:[#allocation11 + $0xea8] ss:$24 sps:$4 sm:$0xff]   ;;  %v13180_v15 = vld [vmem:[#allocation11 + $0xe7c] ss:$24 sps:$4 sm:$0xff]   ;;  %v13186_v27 = vld [vmem:[#allocation11 + $0xe4c] ss:$24 sps:$4 sm:$0xff]  }
 0x627   : > { %v9160_v39 = vpop.f32.mrf.mxu0  ;;  %v16726_v46 = vpop.f32.mrf.mxu1  ;;  %9441 = vmatmul.mubr.bf16.vlgmr.msra.gmra.mxu1 %v16638_v21  ;;  %9453 = vmatprep.subr.bf16.mxu0 %v13132_v17  ;;  %v13175_v17 = vld [vmem:[#allocation11 + $0x11d8] ss:$24 sps:$4 sm:$0xff]  }
 0x628   : > { %9491 = vmatpush1.bf16.msra.mxu1 %v13127_v30  ;;  %9522 = vmatprep.mubr.bf16.mxu1 %v16640_v48  ;;  %v13178_v30 = vld [vmem:[#allocation11 + $0xe78] ss:$24 sps:$4 sm:$0xff]   ;;  %v13184_v39 = vld [vmem:[#allocation11 + $0xe48] ss:$24 sps:$4 sm:$0xff]  }
 0x629   : > { %v9198_v14 = vpop.f32.mrf.mxu1  ;;  %9492 = vmatprep.subr.bf16.mxu1 %v13135_v33  ;;  %v13181_v33 = vld [vmem:[#allocation11 + $0x11a8] ss:$24 sps:$4 sm:$0xff]  }
 0x62a   : > { %v16730_v35 = vadd.f32 %v9198_v14, %v9158_v5  ;;  %9454 = vmatpush1.bf16.msra.mxu0 %v13130_v16  ;;  %v13183_v5 = vld [vmem:[#allocation11 + $0x11ac] ss:$24 sps:$4 sm:$0xff]   ;;  %v13189_v16 = vld [vmem:[#allocation11 + $0x117c] ss:$24 sps:$4 sm:$0xff]  }
 0x62b   : > { %v9200_v32 = vpop.f32.mrf.mxu1  ;;  %9455 = vmatprep.subr.bf16.mxu0 %v13138_v3  ;;  %v13192_v3 = vld [vmem:[#allocation11 + $0xe1c] ss:$24 sps:$4 sm:$0xff]   ;;  %v13195_v14 = vld [vmem:[#allocation11 + $0x114c] ss:$24 sps:$4 sm:$0xff]  }
 0x62c   : > { %9493 = vmatpush1.bf16.msra.mxu1 %v13133_v34  ;;  %v13187_v34 = vld [vmem:[#allocation11 + $0x1178] ss:$24 sps:$4 sm:$0xff]   ;;  %v13193_v32 = vld [vmem:[#allocation11 + $0x1148] ss:$24 sps:$4 sm:$0xff]  }
 0x62d   : > { %v9201_v36 = vpop.f32.mrf.mxu1  ;;  %9494 = vmatprep.subr.bf16.mxu1 %v13141_v7  ;;  %v13190_v7 = vld [vmem:[#allocation11 + $0xe18] ss:$24 sps:$4 sm:$0xff]  }
 0x62e   : > { %9456 = vmatpush1.bf16.msra.mxu0 %v13136_v38  ;;  %v13198_v38 = vld [vmem:[#allocation11 + $0xdec] ss:$24 sps:$4 sm:$0xff]   ;;  %v13204_v36 = vld [vmem:[#allocation11 + $0xdbc] ss:$24 sps:$4 sm:$0xff]  }
 0x62f   : > { %9457 = vmatprep.subr.bf16.mxu0 %v13144_v41  ;;  %v13201_v41 = vld [vmem:[#allocation11 + $0x111c] ss:$24 sps:$4 sm:$0xff]  }
 0x630   : > { %9495 = vmatpush1.bf16.msra.mxu1 %v13139_v55  ;;  %v13196_v55 = vld [vmem:[#allocation11 + $0xde8] ss:$24 sps:$4 sm:$0xff]  }
 0x631   : > { %9496 = vmatprep.subr.bf16.mxu1 %v13147_v2  ;;  %v13199_v2 = vld [vmem:[#allocation11 + $0x1118] ss:$24 sps:$4 sm:$0xff]  }
 0x632   : > { %9458 = vmatpush1.bf16.msra.mxu0 %v13142_v28  ;;  %v13207_v28 = vld [vmem:[#allocation11 + $0x10ec] ss:$24 sps:$4 sm:$0xff]  }
 0x633   : > { %9459 = vmatprep.subr.bf16.mxu0 %v13150_v10  ;;  %v13202_v10 = vld [vmem:[#allocation11 + $0xdb8] ss:$24 sps:$4 sm:$0xff]  }
 0x634   : > { %9497 = vmatpush1.bf16.msra.mxu1 %v13145_v61  ;;  %v13210_v61 = vld [vmem:[#allocation11 + $0xd8c] ss:$24 sps:$4 sm:$0xff]  }
 0x635   : > { %9498 = vmatprep.subr.bf16.mxu1 %v13153_v58  ;;  %v13205_v58 = vld [vmem:[#allocation11 + $0x10e8] ss:$24 sps:$4 sm:$0xff]  }
 0x636   : > { %9460 = vmatpush1.bf16.msra.mxu0 %v13148_v44  ;;  %v13213_v44 = vld [vmem:[#allocation11 + $0x10bc] ss:$24 sps:$4 sm:$0xff]  }
 0x637   : > { %9461 = vmatprep.subr.bf16.mxu0 %v13156_v50  ;;  %v13208_v50 = vld [vmem:[#allocation11 + $0xd88] ss:$24 sps:$4 sm:$0xff]  }
 0x638   : > { %9499 = vmatpush1.bf16.msra.mxu1 %v13151_v1  ;;  %v13216_v1 = vld [vmem:[#allocation11 + $0x135c] ss:$24 sps:$4 sm:$0xff]  }
 0x639   : > { %9500 = vmatprep.subr.bf16.mxu1 %v13159_v54  ;;  %v13211_v54 = vld [vmem:[#allocation11 + $0x10b8] ss:$24 sps:$4 sm:$0xff]  }
 0x63a   : > { %9462 = vmatpush1.bf16.msra.mxu0 %v13154_v9  ;;  %v13219_v9 = vld [vmem:[#allocation11 + $0x108c] ss:$24 sps:$4 sm:$0xff]  }
 0x63b   : > { %9463 = vmatprep.subr.bf16.mxu0 %v13162_v62  ;;  %v13214_v62 = vld [vmem:[#allocation11 + $0x1358] ss:$24 sps:$4 sm:$0xff]  }
 0x63c   : > { %9501 = vmatpush1.bf16.msra.mxu1 %v13157_v42  ;;  %v13222_v42 = vld [vmem:[#allocation11 + $0x132c] ss:$24 sps:$4 sm:$0xff]  }
 0x63d   : > { %9502 = vmatprep.subr.bf16.mxu1 %v13165_v63  ;;  %v13217_v63 = vld [vmem:[#allocation11 + $0x1088] ss:$24 sps:$4 sm:$0xff]  }
 0x63e   : > { %9464 = vmatpush1.bf16.msra.mxu0 %v13160_v31 }
 0x63f   : > { %9465 = vmatprep.subr.bf16.mxu0 %v13168_v29  ;;  %v13225_v29 = vld [vmem:[#allocation11 + $0x165c] ss:$24 sps:$4 sm:$0xff]  }
 0x640   : > { %9503 = vmatpush1.bf16.msra.mxu1 %v13163_v23  ;;  %v13220_v23 = vld [vmem:[#allocation11 + $0x1328] ss:$24 sps:$4 sm:$0xff]  }
 0x641   : > { %9504 = vmatprep.subr.bf16.mxu1 %v13171_v18 }
 0x642   : > { %9466 = vmatpush2.bf16.msra.mxu0 %v13166_v6  ;;  %v13228_v6 = vld [vmem:[#allocation11 + $0x12fc] ss:$24 sps:$4 sm:$0xff]  }
 0x643   : > { %9467 = vmatprep.subr.bf16.mxu0 %v13174_v0  ;;  %v9197_v0 = vadd.f32 %v16726_v46, %v16722_v59  ;;  %v13229_v59 = vld [vmem:[#allocation11 + $0x1628] ss:$24 sps:$4 sm:$0xff]  }
 0x644   : > { %9505 = vmatpush1.bf16.msra.mxu1 %v13169_v4  ;;  %v13223_v4 = vld [vmem:[#allocation11 + $0x1658] ss:$24 sps:$4 sm:$0xff]  }
 0x645   : > { %9506 = vmatprep.subr.bf16.mxu1 %v13177_v47 }
 0x646   : > { %9468 = vmatpush2.bf16.msra.mxu0 %v13172_v19  ;;  %v13231_v19 = vld [vmem:[#allocation11 + $0x162c] ss:$24 sps:$4 sm:$0xff]  }
 0x647   : > { %9469 = vmatprep.subr.bf16.mxu0 %v13180_v15 }
 0x648   : > { %9507 = vmatpush2.bf16.msra.mxu1 %v13175_v17  ;;  %v13226_v17 = vld [vmem:[#allocation11 + $0x12f8] ss:$24 sps:$4 sm:$0xff]  }
 0x649   : > { %9508 = vmatprep.subr.bf16.mxu1 %v13183_v5 }
 0x64a   : > { %9470 = vmatpush2.bf16.msra.mxu0 %v13178_v30 }
 0x64b   : > { %9471 = vmatprep.subr.bf16.mxu0 %v13186_v27  ;;  %v13234_v27 = vld [vmem:[#allocation11 + $0x12cc] ss:$24 sps:$4 sm:$0xff]  }
 0x64c   : > { %9509 = vmatpush2.bf16.msra.mxu1 %v13181_v33 }
 0x64d   : > { %9510 = vmatprep.subr.bf16.mxu1 %v13189_v16  ;;  %v13237_v16 = vld [vmem:[#allocation11 + $0x15fc] ss:$24 sps:$4 sm:$0xff]  }
 0x64e   : > { %9472 = vmatpush2.bf16.msra.mxu0 %v13184_v39  ;;  %v13232_v39 = vld [vmem:[#allocation11 + $0x12c8] ss:$24 sps:$4 sm:$0xff]  }
 0x64f   : > { %9473 = vmatprep.subr.bf16.mxu0 %v13192_v3 }
 0x650   : > { %9511 = vmatpush2.bf16.msra.mxu1 %v13187_v34  ;;  %v13240_v34 = vld [vmem:[#allocation11 + $0x129c] ss:$24 sps:$4 sm:$0xff]  }
 0x651   : > { %9512 = vmatprep.subr.bf16.mxu1 %v13195_v14  ;;  %v13235_v14 = vld [vmem:[#allocation11 + $0x15f8] ss:$24 sps:$4 sm:$0xff]  }
 0x652   : > { %9474 = vmatpush2.bf16.msra.mxu0 %v13190_v7 }
 0x653   : > { %9475 = vmatprep.subr.bf16.mxu0 %v13198_v38  ;;  %v13243_v38 = vld [vmem:[#allocation11 + $0x15cc] ss:$24 sps:$4 sm:$0xff]  }
 0x654   : > { %9513 = vmatpush2.bf16.msra.mxu1 %v13193_v32  ;;  %v13238_v32 = vld [vmem:[#allocation11 + $0x1298] ss:$24 sps:$4 sm:$0xff]  }
 0x655   : > { %9514 = vmatprep.subr.bf16.mxu1 %v13201_v41  ;;  %v13246_v41 = vld [vmem:[#allocation11 + $0x126c] ss:$24 sps:$4 sm:$0xff]  }
 0x656   : > { %9476 = vmatpush2.bf16.msra.mxu0 %v13196_v55  ;;  %v13241_v55 = vld [vmem:[#allocation11 + $0x15c8] ss:$24 sps:$4 sm:$0xff]  }
 0x657   : > { %9477 = vmatprep.subr.bf16.mxu0 %v13204_v36  ;;  %v13249_v36 = vld [vmem:[#allocation11 + $0x159c] ss:$24 sps:$4 sm:$0xff]  }
 0x658   : > { %9515 = vmatpush2.bf16.msra.mxu1 %v13199_v2  ;;  %v13244_v2 = vld [vmem:[#allocation11 + $0x1268] ss:$24 sps:$4 sm:$0xff]  }
 0x659   : > { %9516 = vmatprep.subr.bf16.mxu1 %v13207_v28  ;;  %v13252_v28 = vld [vmem:[#allocation11 + $0x123c] ss:$24 sps:$4 sm:$0xff]  }
 0x65a   : > { %9478 = vmatpush2.bf16.msra.mxu0 %v13202_v10  ;;  %v13247_v10 = vld [vmem:[#allocation11 + $0x1598] ss:$24 sps:$4 sm:$0xff]  }
 0x65b   : > { %9479 = vmatprep.subr.bf16.mxu0 %v13210_v61  ;;  %v13255_v61 = vld [vmem:[#allocation11 + $0x156c] ss:$24 sps:$4 sm:$0xff]  }
 0x65c   : > { %9517 = vmatpush2.bf16.msra.mxu1 %v13205_v58 }
 0x65d   : > { %9518 = vmatprep.subr.bf16.mxu1 %v13213_v44  ;;  %v13250_v44 = vld [vmem:[#allocation11 + $0x1238] ss:$24 sps:$4 sm:$0xff]  }
 0x65e   : > { %9480 = vmatpush2.bf16.msra.mxu0 %v13208_v50  ;;  %v13258_v50 = vld [vmem:[#allocation11 + $0x120c] ss:$24 sps:$4 sm:$0xff]  }
 0x65f   : > { %9531 = vmatprep.subr.bf16.mxu0 %v13216_v1 }
 0x660   : > { %9519 = vmatpush2.bf16.msra.mxu1 %v13211_v54  ;;  %v13253_v54 = vld [vmem:[#allocation11 + $0x1568] ss:$24 sps:$4 sm:$0xff]  }
 0x661   : > { %v9237_v31 = vpop.f32.mrf.mxu0  ;;  %9482 = vmatmul.mubr.bf16.vlgmr.msra.gmra.mxu0 %v16654_v26  ;;  %9520 = vmatprep.subr.bf16.mxu1 %v13219_v9  ;;  %v13261_v9 = vld [vmem:[#allocation11 + $0x153c] ss:$24 sps:$4 sm:$0xff]  }
 0x662   : > { %9532 = vmatpush1.bf16.msra.mxu0 %v13214_v62  ;;  %9563 = vmatprep.mubr.bf16.mxu0 %v16656_v24  ;;  %v9238_v15 = vadd.f32 %v9237_v31, %v9197_v0  ;;  %v13264_v62 = vld [vmem:[#allocation11 + $0x14dc] ss:$24 sps:$4 sm:$0xff]   ;;  %v13262_v31 = vld [vmem:[#allocation11 + $0x14d8] ss:$24 sps:$4 sm:$0xff]  }
 0x663   : > { %v9239_v18 = vpop.f32.mrf.mxu0  ;;  %9533 = vmatprep.subr.bf16.mxu0 %v13222_v42  ;;  %v13259_v42 = vld [vmem:[#allocation11 + $0x1538] ss:$24 sps:$4 sm:$0xff]   ;;  %v13276_v0 = vld [vmem:[#allocation11 + $0x147c] ss:$24 sps:$4 sm:$0xff]  }
 0x664   : > { %9521 = vmatpush2.bf16.msra.mxu1 %v13217_v63  ;;  %v9240_v58 = vadd.f32 %v9239_v18, %v16730_v35  ;;  %v13256_v35 = vld [vmem:[#allocation11 + $0x1208] ss:$24 sps:$4 sm:$0xff]   ;;  %v13267_v63 = vld [vmem:[#allocation11 + $0x150c] ss:$24 sps:$4 sm:$0xff]   ;;  %v13273_v18 = vld [vmem:[#allocation11 + $0x17dc] ss:$24 sps:$4 sm:$0xff]  }
 0x665   : > { %v9241_v47 = vpop.f32.mrf.mxu0  ;;  %9572 = vmatprep.subr.bf16.mxu1 %v13225_v29  ;;  %v13270_v29 = vld [vmem:[#allocation11 + $0x14ac] ss:$24 sps:$4 sm:$0xff]  }
 0x666   : > { %9534 = vmatpush1.bf16.msra.mxu0 %v13220_v23  ;;  %v13265_v23 = vld [vmem:[#allocation11 + $0x1508] ss:$24 sps:$4 sm:$0xff]   ;;  %v13279_v47 = vld [vmem:[#allocation11 + $0x17ac] ss:$24 sps:$4 sm:$0xff]  }
 0x667   : > { %v9242_v5 = vpop.f32.mrf.mxu0  ;;  %v9278_v30 = vpop.f32.mrf.mxu1  ;;  %9523 = vmatmul.mubr.bf16.vlgmr.msra.gmra.mxu1 %v16660_v53  ;;  %9535 = vmatprep.subr.bf16.mxu0 %v13228_v6  ;;  %v13268_v6 = vld [vmem:[#allocation11 + $0x14a8] ss:$24 sps:$4 sm:$0xff]  }
 0x668   : > { %v16737_v33 = vadd.f32 %v9278_v30, %v9238_v15  ;;  %9573 = vmatpush1.bf16.msra.mxu1 %v13223_v4  ;;  %9604 = vmatprep.mubr.bf16.mxu1 %v16662_v8  ;;  %v13271_v4 = vld [vmem:[#allocation11 + $0x17d8] ss:$24 sps:$4 sm:$0xff]   ;;  %v13282_v15 = vld [vmem:[#allocation11 + $0x144c] ss:$24 sps:$4 sm:$0xff]   ;;  %v13285_v5 = vld [vmem:[#allocation11 + $0x177c] ss:$24 sps:$4 sm:$0xff]  }
 0x669   : > { %v9280_v46 = vpop.f32.mrf.mxu1  ;;  %9574 = vmatprep.subr.bf16.mxu1 %v13231_v19  ;;  %v13274_v19 = vld [vmem:[#allocation11 + $0x1478] ss:$24 sps:$4 sm:$0xff]   ;;  %v13280_v30 = vld [vmem:[#allocation11 + $0x1448] ss:$24 sps:$4 sm:$0xff]  }
 0x66a   : > { %9536 = vmatpush1.bf16.msra.mxu0 %v13226_v17  ;;  %10217 = vrot.lane.b32.xlu0 %v16737_v33, %s14248_s4  ;;  %v16757_v1 = vadd.f32 %v9280_v46, %v9240_v58  ;;  %v13277_v17 = vld [vmem:[#allocation11 + $0x17a8] ss:$24 sps:$4 sm:$0xff]   ;;  %v13291_v46 = vld [vmem:[#allocation11 + $0x174c] ss:$24 sps:$4 sm:$0xff]  }
 0x66b   : > { %10236 = vrot.lane.b32.xlu1 %v16737_v33, %s14249_s6  ;;  %v9282_v3 = vpop.f32.mrf.mxu1  ;;  %9537 = vmatprep.subr.bf16.mxu0 %v13234_v27  ;;  %v13288_v27 = vld [vmem:[#allocation11 + $0x141c] ss:$24 sps:$4 sm:$0xff]   ;;  %v13315_v58 = vld [vmem:[#allocation11 + $0x168c] ss:$24 sps:$4 sm:$0xff]  }
 0x66c   : > { %9575 = vmatpush1.bf16.msra.mxu1 %v13229_v59  ;;  %v13283_v59 = vld [vmem:[#allocation11 + $0x1778] ss:$24 sps:$4 sm:$0xff]   ;;  %v13289_v3 = vld [vmem:[#allocation11 + $0x1748] ss:$24 sps:$4 sm:$0xff]  }
 0x66d   : > { %v9283_v7 = vpop.f32.mrf.mxu1  ;;  %9576 = vmatprep.subr.bf16.mxu1 %v13237_v16  ;;  %v13286_v16 = vld [vmem:[#allocation11 + $0x1418] ss:$24 sps:$4 sm:$0xff]  }
 0x66e   : > { %9538 = vmatpush1.bf16.msra.mxu0 %v13232_v39  ;;  %10180 = vrot.lane.b32.xlu0 %v16737_v33, %s14241_s25  ;;  %v13294_v39 = vld [vmem:[#allocation11 + $0x13ec] ss:$24 sps:$4 sm:$0xff]   ;;  %v13300_v7 = vld [vmem:[#allocation11 + $0x13bc] ss:$24 sps:$4 sm:$0xff]  }
 0x66f   : > { %10198 = vrot.lane.b32.xlu1 %v16737_v33, %s14250_s30  ;;  %9539 = vmatprep.subr.bf16.mxu0 %v13240_v34  ;;  %v13297_v34 = vld [vmem:[#allocation11 + $0x171c] ss:$24 sps:$4 sm:$0xff]  }
 0x670   : > { %9577 = vmatpush1.bf16.msra.mxu1 %v13235_v14  ;;  %v13292_v14 = vld [vmem:[#allocation11 + $0x13e8] ss:$24 sps:$4 sm:$0xff]  }
 0x671   : > { %9578 = vmatprep.subr.bf16.mxu1 %v13243_v38  ;;  %v13295_v38 = vld [vmem:[#allocation11 + $0x1718] ss:$24 sps:$4 sm:$0xff]  }
 0x672   : > { %9540 = vmatpush1.bf16.msra.mxu0 %v13238_v32  ;;  %10143 = vrot.lane.b32.xlu0 %v16737_v33, %s14251_s1  ;;  %v13303_v32 = vld [vmem:[#allocation11 + $0x16ec] ss:$24 sps:$4 sm:$0xff]  }
 0x673   : > { %10162 = vrot.lane.b32.xlu1 %v16737_v33, %s14242_s26  ;;  %9541 = vmatprep.subr.bf16.mxu0 %v13246_v41  ;;  %v13298_v41 = vld [vmem:[#allocation11 + $0x13b8] ss:$24 sps:$4 sm:$0xff]  }
 0x674   : > { %9579 = vmatpush1.bf16.msra.mxu1 %v13241_v55  ;;  %v13306_v55 = vld [vmem:[#allocation11 + $0x138c] ss:$24 sps:$4 sm:$0xff]  }
 0x675   : > { %9580 = vmatprep.subr.bf16.mxu1 %v13249_v36  ;;  %v13301_v36 = vld [vmem:[#allocation11 + $0x16e8] ss:$24 sps:$4 sm:$0xff]  }
 0x676   : > { %9542 = vmatpush1.bf16.msra.mxu0 %v13244_v2  ;;  %10105 = vrot.lane.b32.xlu0 %v16737_v33, %s14252_s8  ;;  %v13309_v2 = vld [vmem:[#allocation11 + $0x16bc] ss:$24 sps:$4 sm:$0xff]  }
 0x677   : > { %10124 = vrot.lane.b32.xlu1 %v16737_v33, %s14253_s20  ;;  %9543 = vmatprep.subr.bf16.mxu0 %v13252_v28  ;;  %v13304_v28 = vld [vmem:[#allocation11 + $0x1388] ss:$24 sps:$4 sm:$0xff]  }
 0x678   : > { %9581 = vmatpush1.bf16.msra.mxu1 %v13247_v10  ;;  %v13312_v10 = vld [vmem:[#allocation11 + $0x195c] ss:$24 sps:$4 sm:$0xff]  }
 0x679   : > { %9582 = vmatprep.subr.bf16.mxu1 %v13255_v61  ;;  %v13307_v61 = vld [vmem:[#allocation11 + $0x16b8] ss:$24 sps:$4 sm:$0xff]  }
 0x67a   : > { %9544 = vmatpush1.bf16.msra.mxu0 %v13250_v44  ;;  %10219 = vrot.lane.b32.xlu0 %v16757_v1, %s14248_s4  ;;  %v13310_v44 = vld [vmem:[#allocation11 + $0x1958] ss:$24 sps:$4 sm:$0xff]  }
 0x67b   : > { %10238 = vrot.lane.b32.xlu1 %v16757_v1, %s14249_s6  ;;  %9545 = vmatprep.subr.bf16.mxu0 %v13258_v50  ;;  %v13318_v50 = vld [vmem:[#allocation11 + $0x192c] ss:$24 sps:$4 sm:$0xff]  }
 0x67c   : > { %9583 = vmatpush1.bf16.msra.mxu1 %v13253_v54  ;;  %v13313_v54 = vld [vmem:[#allocation11 + $0x1688] ss:$24 sps:$4 sm:$0xff]  }
 0x67d   : > { %9584 = vmatprep.subr.bf16.mxu1 %v13261_v9 }
 0x67e   : > { %9546 = vmatpush1.bf16.msra.mxu0 %v13256_v35  ;;  %10182 = vrot.lane.b32.xlu0 %v16757_v1, %s14241_s25  ;;  %v13321_v35 = vld [vmem:[#allocation11 + $0x1c5c] ss:$24 sps:$4 sm:$0xff]  }
 0x67f   : > { %10200 = vrot.lane.b32.xlu1 %v16757_v1, %s14250_s30  ;;  %9547 = vmatprep.subr.bf16.mxu0 %v13264_v62  ;;  %v13316_v62 = vld [vmem:[#allocation11 + $0x1928] ss:$24 sps:$4 sm:$0xff]  }
 0x680   : > { %9585 = vmatpush1.bf16.msra.mxu1 %v13259_v42 }
 0x681   : > { %9586 = vmatprep.subr.bf16.mxu1 %v13267_v63  ;;  %v13324_v63 = vld [vmem:[#allocation11 + $0x18fc] ss:$24 sps:$4 sm:$0xff]  }
 0x682   : > { %9548 = vmatpush2.bf16.msra.mxu0 %v13262_v31  ;;  %10164 = vrot.lane.b32.xlu0 %v16757_v1, %s14242_s26  ;;  %v13319_v31 = vld [vmem:[#allocation11 + $0x1c58] ss:$24 sps:$4 sm:$0xff]  }
 0x683   : > { %10145 = vrot.lane.b32.xlu1 %v16757_v1, %s14251_s1  ;;  %9549 = vmatprep.subr.bf16.mxu0 %v13270_v29 }
 0x684   : > { %9587 = vmatpush1.bf16.msra.mxu1 %v13265_v23  ;;  %v13327_v23 = vld [vmem:[#allocation11 + $0x1c2c] ss:$24 sps:$4 sm:$0xff]  }
 0x685   : > { %9588 = vmatprep.subr.bf16.mxu1 %v13273_v18  ;;  %v13322_v18 = vld [vmem:[#allocation11 + $0x18f8] ss:$24 sps:$4 sm:$0xff]  }
 0x686   : > { %9550 = vmatpush2.bf16.msra.mxu0 %v13268_v6  ;;  %10126 = vrot.lane.b32.xlu0 %v16757_v1, %s14253_s20 }
 0x687   : > { %10107 = vrot.lane.b32.xlu1 %v16757_v1, %s14252_s8  ;;  %9551 = vmatprep.subr.bf16.mxu0 %v13276_v0 }
 0x688   : > { %9589 = vmatpush2.bf16.msra.mxu1 %v13271_v4  ;;  %v13330_v4 = vld [vmem:[#allocation11 + $0x18cc] ss:$24 sps:$4 sm:$0xff]  }
 0x689   : > { %9590 = vmatprep.subr.bf16.mxu1 %v13279_v47 }
 0x68a   : > { %9552 = vmatpush2.bf16.msra.mxu0 %v13274_v19  ;;  %v13325_v19 = vld [vmem:[#allocation11 + $0x1c28] ss:$24 sps:$4 sm:$0xff]  }
 0x68b   : > { %9553 = vmatprep.subr.bf16.mxu0 %v13282_v15 }
 0x68c   : > { %9591 = vmatpush2.bf16.msra.mxu1 %v13277_v17  ;;  %v13333_v17 = vld [vmem:[#allocation11 + $0x1bfc] ss:$24 sps:$4 sm:$0xff]  }
 0x68d   : > { %9592 = vmatprep.subr.bf16.mxu1 %v13285_v5 }
 0x68e   : > { %9554 = vmatpush2.bf16.msra.mxu0 %v13280_v30  ;;  %v13328_v30 = vld [vmem:[#allocation11 + $0x18c8] ss:$24 sps:$4 sm:$0xff]  }
 0x68f   : > { %9555 = vmatprep.subr.bf16.mxu0 %v13288_v27 }
 0x690   : > { %9593 = vmatpush2.bf16.msra.mxu1 %v13283_v59  ;;  %v13336_v59 = vld [vmem:[#allocation11 + $0x189c] ss:$24 sps:$4 sm:$0xff]  }
 0x691   : > { %9594 = vmatprep.subr.bf16.mxu1 %v13291_v46  ;;  %v13331_v46 = vld [vmem:[#allocation11 + $0x1bf8] ss:$24 sps:$4 sm:$0xff]  }
 0x692   : > { %9556 = vmatpush2.bf16.msra.mxu0 %v13286_v16 }
 0x693   : > { %9557 = vmatprep.subr.bf16.mxu0 %v13294_v39  ;;  %v13339_v39 = vld [vmem:[#allocation11 + $0x1bcc] ss:$24 sps:$4 sm:$0xff]  }
 0x694   : > { %9595 = vmatpush2.bf16.msra.mxu1 %v13289_v3  ;;  %v13334_v3 = vld [vmem:[#allocation11 + $0x1898] ss:$24 sps:$4 sm:$0xff]  }
 0x695   : > { %9596 = vmatprep.subr.bf16.mxu1 %v13297_v34  ;;  %v13342_v34 = vld [vmem:[#allocation11 + $0x186c] ss:$24 sps:$4 sm:$0xff]  }
 0x696   : > { %9558 = vmatpush2.bf16.msra.mxu0 %v13292_v14  ;;  %v13337_v14 = vld [vmem:[#allocation11 + $0x1bc8] ss:$24 sps:$4 sm:$0xff]  }
 0x697   : > { %9559 = vmatprep.subr.bf16.mxu0 %v13300_v7  ;;  %v13345_v7 = vld [vmem:[#allocation11 + $0x1b9c] ss:$24 sps:$4 sm:$0xff]  }
 0x698   : > { %9597 = vmatpush2.bf16.msra.mxu1 %v13295_v38  ;;  %v13340_v38 = vld [vmem:[#allocation11 + $0x1868] ss:$24 sps:$4 sm:$0xff]  }
 0x699   : > { %9598 = vmatprep.subr.bf16.mxu1 %v13303_v32  ;;  %v13348_v32 = vld [vmem:[#allocation11 + $0x183c] ss:$24 sps:$4 sm:$0xff]  }
 0x69a   : > { %9560 = vmatpush2.bf16.msra.mxu0 %v13298_v41  ;;  %v13343_v41 = vld [vmem:[#allocation11 + $0x1b98] ss:$24 sps:$4 sm:$0xff]  }
 0x69b   : > { %9561 = vmatprep.subr.bf16.mxu0 %v13306_v55  ;;  %v13351_v55 = vld [vmem:[#allocation11 + $0x1b6c] ss:$24 sps:$4 sm:$0xff]  }
 0x69c   : > { %9599 = vmatpush2.bf16.msra.mxu1 %v13301_v36  ;;  %v13346_v36 = vld [vmem:[#allocation11 + $0x1838] ss:$24 sps:$4 sm:$0xff]  }
 0x69d   : > { %9600 = vmatprep.subr.bf16.mxu1 %v13309_v2  ;;  %v13354_v2 = vld [vmem:[#allocation11 + $0x180c] ss:$24 sps:$4 sm:$0xff]  }
 0x69e   : > { %9562 = vmatpush2.bf16.msra.mxu0 %v13304_v28  ;;  %v13349_v28 = vld [vmem:[#allocation11 + $0x1b68] ss:$24 sps:$4 sm:$0xff]  }
 0x69f   : > { %9613 = vmatprep.subr.bf16.mxu0 %v13312_v10  ;;  %v13357_v10 = vld [vmem:[#allocation11 + $0x1b3c] ss:$24 sps:$4 sm:$0xff]  }
 0x6a0   : > { %9601 = vmatpush2.bf16.msra.mxu1 %v13307_v61  ;;  %v13352_v61 = vld [vmem:[#allocation11 + $0x1808] ss:$24 sps:$4 sm:$0xff]  }
 0x6a1   : > { %v9319_v9 = vpop.f32.mrf.mxu0  ;;  %9564 = vmatmul.mubr.bf16.vlgmr.msra.gmra.mxu0 %v16676_v11  ;;  %9602 = vmatprep.subr.bf16.mxu1 %v13315_v58  ;;  %v13360_v58 = vld [vmem:[#allocation11 + $0x1adc] ss:$24 sps:$4 sm:$0xff]  }
 0x6a2   : > { %9614 = vmatpush1.bf16.msra.mxu0 %v13310_v44  ;;  %9645 = vmatprep.mubr.bf16.mxu0 %v16678_v20  ;;  %v13355_v44 = vld [vmem:[#allocation11 + $0x1b38] ss:$24 sps:$4 sm:$0xff]  }
 0x6a3   : > { %v9321_v42 = vpop.f32.mrf.mxu0  ;;  %9615 = vmatprep.subr.bf16.mxu0 %v13318_v50  ;;  %v13363_v50 = vld [vmem:[#allocation11 + $0x1b0c] ss:$24 sps:$4 sm:$0xff]  }
 0x6a4   : > { %9603 = vmatpush2.bf16.msra.mxu1 %v13313_v54  ;;  %v13358_v54 = vld [vmem:[#allocation11 + $0x1ad8] ss:$24 sps:$4 sm:$0xff]  }
 0x6a5   : > { %v9323_v29 = vpop.f32.mrf.mxu0  ;;  %9654 = vmatprep.subr.bf16.mxu1 %v13321_v35  ;;  %v13361_v35 = vld [vmem:[#allocation11 + $0x1b08] ss:$24 sps:$4 sm:$0xff]  }
 0x6a6   : > { %9616 = vmatpush1.bf16.msra.mxu0 %v13316_v62  ;;  %v13369_v62 = vld [vmem:[#allocation11 + $0x1ddc] ss:$24 sps:$4 sm:$0xff]   ;;  %v13375_v29 = vld [vmem:[#allocation11 + $0x1dac] ss:$24 sps:$4 sm:$0xff]  }
 0x6a7   : > { %v9324_v6 = vpop.f32.mrf.mxu0  ;;  %v9360_v0 = vpop.f32.mrf.mxu1  ;;  %9605 = vmatmul.mubr.bf16.vlgmr.msra.gmra.mxu1 %v16682_v57  ;;  %9617 = vmatprep.subr.bf16.mxu0 %v13324_v63  ;;  %v13372_v63 = vld [vmem:[#allocation11 + $0x1a7c] ss:$24 sps:$4 sm:$0xff]  }
 0x6a8   : > { %v16778_v47 = vadd.f32 %v9360_v0, %v9319_v9  ;;  %9655 = vmatpush1.bf16.msra.mxu1 %v13319_v31  ;;  %9686 = vmatprep.mubr.bf16.mxu1 %v16684_v37  ;;  %v13366_v9 = vld [vmem:[#allocation11 + $0x1aac] ss:$24 sps:$4 sm:$0xff]   ;;  %v13367_v31 = vld [vmem:[#allocation11 + $0x1dd8] ss:$24 sps:$4 sm:$0xff]   ;;  %v13373_v6 = vld [vmem:[#allocation11 + $0x1da8] ss:$24 sps:$4 sm:$0xff]  }
 0x6a9   : > { %v9362_v15 = vpop.f32.mrf.mxu1  ;;  %9656 = vmatprep.subr.bf16.mxu1 %v13327_v23  ;;  %v13370_v23 = vld [vmem:[#allocation11 + $0x1a78] ss:$24 sps:$4 sm:$0xff]   ;;  %v13381_v0 = vld [vmem:[#allocation11 + $0x1d7c] ss:$24 sps:$4 sm:$0xff]  }
 0x6aa   : > { %v16781_v5 = vadd.f32 %v9362_v15, %v9321_v42  ;;  %9618 = vmatpush1.bf16.msra.mxu0 %v13322_v18  ;;  %v13364_v42 = vld [vmem:[#allocation11 + $0x1aa8] ss:$24 sps:$4 sm:$0xff]   ;;  %v13378_v18 = vld [vmem:[#allocation11 + $0x1a4c] ss:$24 sps:$4 sm:$0xff]   ;;  %v13379_v15 = vld [vmem:[#allocation11 + $0x1d78] ss:$24 sps:$4 sm:$0xff]  }
 0x6ab   : > { %v9364_v27 = vpop.f32.mrf.mxu1  ;;  %9619 = vmatprep.subr.bf16.mxu0 %v13330_v4  ;;  %v13376_v4 = vld [vmem:[#allocation11 + $0x1a48] ss:$24 sps:$4 sm:$0xff]  }
 0x6ac   : > { %9657 = vmatpush1.bf16.msra.mxu1 %v13325_v19  ;;  %v13384_v19 = vld [vmem:[#allocation11 + $0x1a1c] ss:$24 sps:$4 sm:$0xff]   ;;  %v13390_v27 = vld [vmem:[#allocation11 + $0x19ec] ss:$24 sps:$4 sm:$0xff]  }
 0x6ad   : > { %v9365_v16 = vpop.f32.mrf.mxu1  ;;  %9658 = vmatprep.subr.bf16.mxu1 %v13333_v17  ;;  %v13387_v17 = vld [vmem:[#allocation11 + $0x1d4c] ss:$24 sps:$4 sm:$0xff]  }
 0x6ae   : > { %9620 = vmatpush1.bf16.msra.mxu0 %v13328_v30  ;;  %v13382_v30 = vld [vmem:[#allocation11 + $0x1a18] ss:$24 sps:$4 sm:$0xff]   ;;  %v13388_v16 = vld [vmem:[#allocation11 + $0x19e8] ss:$24 sps:$4 sm:$0xff]  }
 0x6af   : > { %9621 = vmatprep.subr.bf16.mxu0 %v13336_v59  ;;  %v13385_v59 = vld [vmem:[#allocation11 + $0x1d48] ss:$24 sps:$4 sm:$0xff]  }
 0x6b0   : > { %9659 = vmatpush1.bf16.msra.mxu1 %v13331_v46  ;;  %v13393_v46 = vld [vmem:[#allocation11 + $0x1d1c] ss:$24 sps:$4 sm:$0xff]  }
 0x6b1   : > { %9660 = vmatprep.subr.bf16.mxu1 %v13339_v39  ;;  %v13396_v39 = vld [vmem:[#allocation11 + $0x19bc] ss:$24 sps:$4 sm:$0xff]  }
 0x6b2   : > { %9622 = vmatpush1.bf16.msra.mxu0 %v13334_v3  ;;  %v13391_v3 = vld [vmem:[#allocation11 + $0x1d18] ss:$24 sps:$4 sm:$0xff]  }
 0x6b3   : > { %9623 = vmatprep.subr.bf16.mxu0 %v13342_v34  ;;  %v13399_v34 = vld [vmem:[#allocation11 + $0x1cec] ss:$24 sps:$4 sm:$0xff]  }
 0x6b4   : > { %9661 = vmatpush1.bf16.msra.mxu1 %v13337_v14  ;;  %v13394_v14 = vld [vmem:[#allocation11 + $0x19b8] ss:$24 sps:$4 sm:$0xff]  }
 0x6b5   : > { %9662 = vmatprep.subr.bf16.mxu1 %v13345_v7  ;;  %v13402_v7 = vld [vmem:[#allocation11 + $0x198c] ss:$24 sps:$4 sm:$0xff]  }
 0x6b6   : > { %9624 = vmatpush1.bf16.msra.mxu0 %v13340_v38  ;;  %v13397_v38 = vld [vmem:[#allocation11 + $0x1ce8] ss:$24 sps:$4 sm:$0xff]  }
 0x6b7   : > { %9625 = vmatprep.subr.bf16.mxu0 %v13348_v32  ;;  %v13405_v32 = vld [vmem:[#allocation11 + $0x1cbc] ss:$24 sps:$4 sm:$0xff]  }
 0x6b8   : > { %9663 = vmatpush1.bf16.msra.mxu1 %v13343_v41  ;;  %v13400_v41 = vld [vmem:[#allocation11 + $0x1988] ss:$24 sps:$4 sm:$0xff]  }
 0x6b9   : > { %9664 = vmatprep.subr.bf16.mxu1 %v13351_v55  ;;  %v13408_v55 = vld [vmem:[#allocation11 + $0x164] ss:$24 sps:$4 sm:$0xff]  }
 0x6ba   : > { %9626 = vmatpush1.bf16.msra.mxu0 %v13346_v36  ;;  %v13403_v36 = vld [vmem:[#allocation11 + $0x1cb8] ss:$24 sps:$4 sm:$0xff]  }
 0x6bb   : > { %9627 = vmatprep.subr.bf16.mxu0 %v13354_v2  ;;  %v13411_v2 = vld [vmem:[#allocation11 + $0x1c8c] ss:$24 sps:$4 sm:$0xff]  }
 0x6bc   : > { %9665 = vmatpush1.bf16.msra.mxu1 %v13349_v28  ;;  %v13406_v28 = vld [vmem:[#allocation11 + $0x160] ss:$24 sps:$4 sm:$0xff]  }
 0x6bd   : > { %9666 = vmatprep.subr.bf16.mxu1 %v13357_v10  ;;  %v13414_v10 = vld [vmem:[#allocation11 + $0x134] ss:$24 sps:$4 sm:$0xff]  }
 0x6be   : > { %9628 = vmatpush1.bf16.msra.mxu0 %v13352_v61  ;;  %v13409_v61 = vld [vmem:[#allocation11 + $0x1c88] ss:$24 sps:$4 sm:$0xff]  }
 0x6bf   : > { %9629 = vmatprep.subr.bf16.mxu0 %v13360_v58 }
 0x6c0   : > { %9667 = vmatpush1.bf16.msra.mxu1 %v13355_v44  ;;  %v13417_v44 = vld [vmem:[#allocation11 + $0x464] ss:$24 sps:$4 sm:$0xff]  }
 0x6c1   : > { %9668 = vmatprep.subr.bf16.mxu1 %v13363_v50 }
 0x6c2   : > { %9630 = vmatpush2.bf16.msra.mxu0 %v13358_v54  ;;  %v13412_v54 = vld [vmem:[#allocation11 + $0x130] ss:$24 sps:$4 sm:$0xff]  }
 0x6c3   : > { %9631 = vmatprep.subr.bf16.mxu0 %v13366_v9 }
 0x6c4   : > { %9669 = vmatpush1.bf16.msra.mxu1 %v13361_v35  ;;  %v13420_v35 = vld [vmem:[#allocation11 + $0x104] ss:$24 sps:$4 sm:$0xff]  }
 0x6c5   : > { %9670 = vmatprep.subr.bf16.mxu1 %v13369_v62 }
 0x6c6   : > { %9632 = vmatpush2.bf16.msra.mxu0 %v13364_v42  ;;  %v13415_v42 = vld [vmem:[#allocation11 + $0x460] ss:$24 sps:$4 sm:$0xff]  }
 0x6c7   : > { %9633 = vmatprep.subr.bf16.mxu0 %v13372_v63 }
 0x6c8   : > { %9671 = vmatpush2.bf16.msra.mxu1 %v13367_v31  ;;  %v13423_v31 = vld [vmem:[#allocation11 + $0x434] ss:$24 sps:$4 sm:$0xff]  }
 0x6c9   : > { %9672 = vmatprep.subr.bf16.mxu1 %v13375_v29  ;;  %v13418_v29 = vld [vmem:[#allocation11 + $0x100] ss:$24 sps:$4 sm:$0xff]  }
 0x6ca   : > { %9634 = vmatpush2.bf16.msra.mxu0 %v13370_v23 }
 0x6cb   : > { %9635 = vmatprep.subr.bf16.mxu0 %v13378_v18 }
 0x6cc   : > { %9673 = vmatpush2.bf16.msra.mxu1 %v13373_v6  ;;  %v13421_v6 = vld [vmem:[#allocation11 + $0x430] ss:$24 sps:$4 sm:$0xff]  }
 0x6cd   : > { %9674 = vmatprep.subr.bf16.mxu1 %v13381_v0  ;;  %v13429_v0 = vld [vmem:[#allocation11 + $0x404] ss:$24 sps:$4 sm:$0xff]  }
 0x6ce   : > { %9636 = vmatpush2.bf16.msra.mxu0 %v13376_v4 }
 0x6cf   : > { %9637 = vmatprep.subr.bf16.mxu0 %v13384_v19  ;;  %v13424_v19 = vld [vmem:[#allocation11 + $0xd0] ss:$24 sps:$4 sm:$0xff]  }
 0x6d0   : > { %9675 = vmatpush2.bf16.msra.mxu1 %v13379_v15 }
 0x6d1   : > { %9676 = vmatprep.subr.bf16.mxu1 %v13387_v17  ;;  %v13432_v17 = vld [vmem:[#allocation11 + $0xa4] ss:$24 sps:$4 sm:$0xff]  }
 0x6d2   : > { %9638 = vmatpush2.bf16.msra.mxu0 %v13382_v30  ;;  %v13427_v30 = vld [vmem:[#allocation11 + $0x400] ss:$24 sps:$4 sm:$0xff]  }
 0x6d3   : > { %9639 = vmatprep.subr.bf16.mxu0 %v13390_v27 }
 0x6d4   : > { %9677 = vmatpush2.bf16.msra.mxu1 %v13385_v59  ;;  %v13435_v59 = vld [vmem:[#allocation11 + $0x3d4] ss:$24 sps:$4 sm:$0xff]  }
 0x6d5   : > { %9678 = vmatprep.subr.bf16.mxu1 %v13393_v46  ;;  %v13430_v46 = vld [vmem:[#allocation11 + $0xa0] ss:$24 sps:$4 sm:$0xff]  }
 0x6d6   : > { %9640 = vmatpush2.bf16.msra.mxu0 %v13388_v16  ;;  %v13433_v16 = vld [vmem:[#allocation11 + $0x3d0] ss:$24 sps:$4 sm:$0xff]  }
 0x6d7   : > { %9641 = vmatprep.subr.bf16.mxu0 %v13396_v39  ;;  %v13441_v39 = vld [vmem:[#allocation11 + $0x3a4] ss:$24 sps:$4 sm:$0xff]  }
 0x6d8   : > { %9679 = vmatpush2.bf16.msra.mxu1 %v13391_v3  ;;  %v13436_v3 = vld [vmem:[#allocation11 + $0x70] ss:$24 sps:$4 sm:$0xff]  }
 0x6d9   : > { %9680 = vmatprep.subr.bf16.mxu1 %v13399_v34  ;;  %v13444_v34 = vld [vmem:[#allocation11 + $0x44] ss:$24 sps:$4 sm:$0xff]  }
 0x6da   : > { %9642 = vmatpush2.bf16.msra.mxu0 %v13394_v14  ;;  %v13439_v14 = vld [vmem:[#allocation11 + $0x3a0] ss:$24 sps:$4 sm:$0xff]  }
 0x6db   : > { %9643 = vmatprep.subr.bf16.mxu0 %v13402_v7  ;;  %v13447_v7 = vld [vmem:[#allocation11 + $0x374] ss:$24 sps:$4 sm:$0xff]  }
 0x6dc   : > { %9681 = vmatpush2.bf16.msra.mxu1 %v13397_v38  ;;  %v13442_v38 = vld [vmem:[#allocation11 + $0x40] ss:$24 sps:$4 sm:$0xff]  }
 0x6dd   : > { %9682 = vmatprep.subr.bf16.mxu1 %v13405_v32  ;;  %v13450_v32 = vld [vmem:[#allocation11 + $0x14] ss:$24 sps:$4 sm:$0xff]  }
 0x6de   : > { %9644 = vmatpush2.bf16.msra.mxu0 %v13400_v41  ;;  %v13445_v41 = vld [vmem:[#allocation11 + $0x370] ss:$24 sps:$4 sm:$0xff]  }
 0x6df   : > { %9695 = vmatprep.subr.bf16.mxu0 %v13408_v55  ;;  %v13453_v55 = vld [vmem:[#allocation11 + $0x344] ss:$24 sps:$4 sm:$0xff]  }
 0x6e0   : > { %9683 = vmatpush2.bf16.msra.mxu1 %v13403_v36  ;;  %v13448_v36 = vld [vmem:[#allocation11 + $0x10] ss:$24 sps:$4 sm:$0xff]  }
 0x6e1   : > { %v9401_v58 = vpop.f32.mrf.mxu0  ;;  %9646 = vmatmul.mubr.bf16.vlgmr.msra.gmra.mxu0 %v16696_v43  ;;  %9684 = vmatprep.subr.bf16.mxu1 %v13411_v2  ;;  %v13456_v2 = vld [vmem:[#allocation11 + $0x2e4] ss:$24 sps:$4 sm:$0xff]  }
 0x6e2   : > { %v9402_v50 = vadd.f32 %v9401_v58, %v16778_v47  ;;  %9696 = vmatpush1.bf16.msra.mxu0 %v13406_v28  ;;  %9727 = vmatprep.mubr.bf16.mxu0 %v16594_v49  ;;  %v13426_v47 = vld [vmem:[#allocation11 + $0xd4] ss:$24 sps:$4 sm:$0xff]   ;;  %v13451_v28 = vld [vmem:[#allocation11 + $0x340] ss:$24 sps:$4 sm:$0xff]  }
 0x6e3   : > { %v9403_v9 = vpop.f32.mrf.mxu0  ;;  %9697 = vmatprep.subr.bf16.mxu0 %v13414_v10  ;;  %v13459_v10 = vld [vmem:[#allocation11 + $0x314] ss:$24 sps:$4 sm:$0xff]  }
 0x6e4   : > { %v9404_v62 = vadd.f32 %v9403_v9, %v16781_v5  ;;  %9685 = vmatpush2.bf16.msra.mxu1 %v13409_v61  ;;  %v13454_v61 = vld [vmem:[#allocation11 + $0x2e0] ss:$24 sps:$4 sm:$0xff]   ;;  %v13462_v58 = vld [vmem:[#allocation11 + $0x2b4] ss:$24 sps:$4 sm:$0xff]   ;;  %v13468_v9 = vld [vmem:[#allocation11 + $0x284] ss:$24 sps:$4 sm:$0xff]  }
 0x6e5   : > { %v9405_v63 = vpop.f32.mrf.mxu0  ;;  %9736 = vmatprep.subr.bf16.mxu1 %v13417_v44  ;;  %v13457_v44 = vld [vmem:[#allocation11 + $0x310] ss:$24 sps:$4 sm:$0xff]  }
 0x6e6   : > { %9698 = vmatpush1.bf16.msra.mxu0 %v13412_v54  ;;  %v13460_v54 = vld [vmem:[#allocation11 + $0x2b0] ss:$24 sps:$4 sm:$0xff]   ;;  %v13474_v63 = vld [vmem:[#allocation11 + $0x254] ss:$24 sps:$4 sm:$0xff]  }
 0x6e7   : > { %v9406_v23 = vpop.f32.mrf.mxu0  ;;  %v9442_v18 = vpop.f32.mrf.mxu1  ;;  %9687 = vmatmul.mubr.bf16.vlgmr.msra.gmra.mxu1 %v16702_v56  ;;  %9699 = vmatprep.subr.bf16.mxu0 %v13420_v35  ;;  %v13463_v35 = vld [vmem:[#allocation11 + $0x5e0] ss:$24 sps:$4 sm:$0xff]  }
 0x6e8   : > { %v16788_v49 = vadd.f32 %v9442_v18, %v9402_v50  ;;  %9737 = vmatpush1.bf16.msra.mxu1 %v13415_v42  ;;  %9768 = vmatprep.mubr.bf16.mxu1 %v16596_v40  ;;  %v13438_v40 = vld [vmem:[#allocation11 + $0x74] ss:$24 sps:$4 sm:$0xff]   ;;  %v13465_v50 = vld [vmem:[#allocation11 + $0x5e4] ss:$24 sps:$4 sm:$0xff]   ;;  %v13466_v42 = vld [vmem:[#allocation11 + $0x280] ss:$24 sps:$4 sm:$0xff]  }
 0x6e9   : > { %v9444_v5 = vpop.f32.mrf.mxu1  ;;  %9738 = vmatprep.subr.bf16.mxu1 %v13423_v31  ;;  %v13469_v31 = vld [vmem:[#allocation11 + $0x5b0] ss:$24 sps:$4 sm:$0xff]   ;;  %v13480_v18 = vld [vmem:[#allocation11 + $0x224] ss:$24 sps:$4 sm:$0xff]  }
 0x6ea   : > { %v16791_v4 = vadd.f32 %v9444_v5, %v9404_v62  ;;  %9700 = vmatpush1.bf16.msra.mxu0 %v13418_v29  ;;  %v13471_v62 = vld [vmem:[#allocation11 + $0x5b4] ss:$24 sps:$4 sm:$0xff]   ;;  %v13477_v29 = vld [vmem:[#allocation11 + $0x584] ss:$24 sps:$4 sm:$0xff]   ;;  %v13472_v23 = vld [vmem:[#allocation11 + $0x250] ss:$24 sps:$4 sm:$0xff]  }
 0x6eb   : > { %v9446_v15 = vpop.f32.mrf.mxu1  ;;  %9701 = vmatprep.subr.bf16.mxu0 %v13426_v47  ;;  %v13475_v47 = vld [vmem:[#allocation11 + $0x580] ss:$24 sps:$4 sm:$0xff]  }
 0x6ec   : > { %9739 = vmatpush1.bf16.msra.mxu1 %v13421_v6  ;;  %v13483_v6 = vld [vmem:[#allocation11 + $0x554] ss:$24 sps:$4 sm:$0xff]   ;;  %v13478_v5 = vld [vmem:[#allocation11 + $0x220] ss:$24 sps:$4 sm:$0xff]   ;;  %v13489_v15 = vld [vmem:[#allocation11 + $0x524] ss:$24 sps:$4 sm:$0xff]  }
 0x6ed   : > { %v9447_v27 = vpop.f32.mrf.mxu1  ;;  %9740 = vmatprep.subr.bf16.mxu1 %v13429_v0  ;;  %v13486_v0 = vld [vmem:[#allocation11 + $0x1f4] ss:$24 sps:$4 sm:$0xff]  }
 0x6ee   : > { %9702 = vmatpush1.bf16.msra.mxu0 %v13424_v19  ;;  %v13481_v19 = vld [vmem:[#allocation11 + $0x550] ss:$24 sps:$4 sm:$0xff]   ;;  %v13487_v27 = vld [vmem:[#allocation11 + $0x520] ss:$24 sps:$4 sm:$0xff]  }
 0x6ef   : > { %9703 = vmatprep.subr.bf16.mxu0 %v13432_v17  ;;  %v13484_v17 = vld [vmem:[#allocation11 + $0x1f0] ss:$24 sps:$4 sm:$0xff]  }
 0x6f0   : > { %9741 = vmatpush1.bf16.msra.mxu1 %v13427_v30  ;;  %v13492_v30 = vld [vmem:[#allocation11 + $0x1c4] ss:$24 sps:$4 sm:$0xff]  }
 0x6f1   : > { %9742 = vmatprep.subr.bf16.mxu1 %v13435_v59  ;;  %v13495_v59 = vld [vmem:[#allocation11 + $0x4f4] ss:$24 sps:$4 sm:$0xff]  }
 0x6f2   : > { %9704 = vmatpush1.bf16.msra.mxu0 %v13430_v46  ;;  %v13490_v46 = vld [vmem:[#allocation11 + $0x1c0] ss:$24 sps:$4 sm:$0xff]  }
 0x6f3   : > { %9705 = vmatprep.subr.bf16.mxu0 %v13438_v40  ;;  %v13498_v40 = vld [vmem:[#allocation11 + $0x194] ss:$24 sps:$4 sm:$0xff]  }
 0x6f4   : > { %9743 = vmatpush1.bf16.msra.mxu1 %v13433_v16  ;;  %v13493_v16 = vld [vmem:[#allocation11 + $0x4f0] ss:$24 sps:$4 sm:$0xff]  }
 0x6f5   : > { %9744 = vmatprep.subr.bf16.mxu1 %v13441_v39  ;;  %v13501_v39 = vld [vmem:[#allocation11 + $0x4c4] ss:$24 sps:$4 sm:$0xff]  }
 0x6f6   : > { %9706 = vmatpush1.bf16.msra.mxu0 %v13436_v3  ;;  %v13496_v3 = vld [vmem:[#allocation11 + $0x190] ss:$24 sps:$4 sm:$0xff]  }
 0x6f7   : > { %9707 = vmatprep.subr.bf16.mxu0 %v13444_v34  ;;  %v13504_v34 = vld [vmem:[#allocation11 + $0x764] ss:$24 sps:$4 sm:$0xff]  }
 0x6f8   : > { %9745 = vmatpush1.bf16.msra.mxu1 %v13439_v14  ;;  %v13499_v14 = vld [vmem:[#allocation11 + $0x4c0] ss:$24 sps:$4 sm:$0xff]  }
 0x6f9   : > { %9746 = vmatprep.subr.bf16.mxu1 %v13447_v7  ;;  %v13507_v7 = vld [vmem:[#allocation11 + $0x494] ss:$24 sps:$4 sm:$0xff]  }
 0x6fa   : > { %9708 = vmatpush1.bf16.msra.mxu0 %v13442_v38  ;;  %v13502_v38 = vld [vmem:[#allocation11 + $0x760] ss:$24 sps:$4 sm:$0xff]  }
 0x6fb   : > { %9709 = vmatprep.subr.bf16.mxu0 %v13450_v32  ;;  %v13510_v32 = vld [vmem:[#allocation11 + $0x734] ss:$24 sps:$4 sm:$0xff]  }
 0x6fc   : > { %9747 = vmatpush1.bf16.msra.mxu1 %v13445_v41  ;;  %v13505_v41 = vld [vmem:[#allocation11 + $0x490] ss:$24 sps:$4 sm:$0xff]  }
 0x6fd   : > { %9748 = vmatprep.subr.bf16.mxu1 %v13453_v55 }
 0x6fe   : > { %9710 = vmatpush1.bf16.msra.mxu0 %v13448_v36  ;;  %v13513_v36 = vld [vmem:[#allocation11 + $0xa64] ss:$24 sps:$4 sm:$0xff]  }
 0x6ff   : > { %9711 = vmatprep.subr.bf16.mxu0 %v13456_v2 }
 0x700   : > { %9749 = vmatpush1.bf16.msra.mxu1 %v13451_v28  ;;  %v13508_v28 = vld [vmem:[#allocation11 + $0x730] ss:$24 sps:$4 sm:$0xff]  }
 0x701   : > { %9750 = vmatprep.subr.bf16.mxu1 %v13459_v10 }
 0x702   : > { %9712 = vmatpush2.bf16.msra.mxu0 %v13454_v61  ;;  %v13516_v61 = vld [vmem:[#allocation11 + $0x704] ss:$24 sps:$4 sm:$0xff]  }
 0x703   : > { %9713 = vmatprep.subr.bf16.mxu0 %v13462_v58 }
 0x704   : > { %9751 = vmatpush1.bf16.msra.mxu1 %v13457_v44  ;;  %v13511_v44 = vld [vmem:[#allocation11 + $0xa60] ss:$24 sps:$4 sm:$0xff]  }
 0x705   : > { %9752 = vmatprep.subr.bf16.mxu1 %v13465_v50 }
 0x706   : > { %9714 = vmatpush2.bf16.msra.mxu0 %v13460_v54  ;;  %v13519_v54 = vld [vmem:[#allocation11 + $0xa34] ss:$24 sps:$4 sm:$0xff]  }
 0x707   : > { %9715 = vmatprep.subr.bf16.mxu0 %v13468_v9 }
 0x708   : > { %9753 = vmatpush2.bf16.msra.mxu1 %v13463_v35 }
 0x709   : > { %9754 = vmatprep.subr.bf16.mxu1 %v13471_v62  ;;  %v13517_v62 = vld [vmem:[#allocation11 + $0xa30] ss:$24 sps:$4 sm:$0xff]  }
 0x70a   : > { %9716 = vmatpush2.bf16.msra.mxu0 %v13466_v42  ;;  %v13525_v42 = vld [vmem:[#allocation11 + $0xa04] ss:$24 sps:$4 sm:$0xff]  }
 0x70b   : > { %9717 = vmatprep.subr.bf16.mxu0 %v13474_v63 }
 0x70c   : > { %9755 = vmatpush2.bf16.msra.mxu1 %v13469_v31  ;;  %v13520_v31 = vld [vmem:[#allocation11 + $0x6d0] ss:$24 sps:$4 sm:$0xff]  }
 0x70d   : > { %9756 = vmatprep.subr.bf16.mxu1 %v13477_v29 }
 0x70e   : > { %9718 = vmatpush2.bf16.msra.mxu0 %v13472_v23  ;;  %v13528_v23 = vld [vmem:[#allocation11 + $0x6a4] ss:$24 sps:$4 sm:$0xff]  }
 0x70f   : > { %9719 = vmatprep.subr.bf16.mxu0 %v13480_v18 }
 0x710   : > { %9757 = vmatpush2.bf16.msra.mxu1 %v13475_v47  ;;  %v13531_v47 = vld [vmem:[#allocation11 + $0x9d4] ss:$24 sps:$4 sm:$0xff]  }
 0x711   : > { %9758 = vmatprep.subr.bf16.mxu1 %v13483_v6  ;;  %v13526_v6 = vld [vmem:[#allocation11 + $0x6a0] ss:$24 sps:$4 sm:$0xff]  }
 0x712   : > { %9720 = vmatpush2.bf16.msra.mxu0 %v13478_v5  ;;  %v13529_v5 = vld [vmem:[#allocation11 + $0x9d0] ss:$24 sps:$4 sm:$0xff]  }
 0x713   : > { %9721 = vmatprep.subr.bf16.mxu0 %v13486_v0  ;;  %v13537_v0 = vld [vmem:[#allocation11 + $0x9a4] ss:$24 sps:$4 sm:$0xff]  }
 0x714   : > { %9759 = vmatpush2.bf16.msra.mxu1 %v13481_v19  ;;  %v13532_v19 = vld [vmem:[#allocation11 + $0x670] ss:$24 sps:$4 sm:$0xff]  }
 0x715   : > { %9760 = vmatprep.subr.bf16.mxu1 %v13489_v15  ;;  %v13540_v15 = vld [vmem:[#allocation11 + $0x644] ss:$24 sps:$4 sm:$0xff]  }
 0x716   : > { %9722 = vmatpush2.bf16.msra.mxu0 %v13484_v17  ;;  %v13535_v17 = vld [vmem:[#allocation11 + $0x9a0] ss:$24 sps:$4 sm:$0xff]  }
 0x717   : > { %9723 = vmatprep.subr.bf16.mxu0 %v13492_v30  ;;  %v13543_v30 = vld [vmem:[#allocation11 + $0x974] ss:$24 sps:$4 sm:$0xff]  }
 0x718   : > { %9761 = vmatpush2.bf16.msra.mxu1 %v13487_v27  ;;  %v13538_v27 = vld [vmem:[#allocation11 + $0x640] ss:$24 sps:$4 sm:$0xff]  }
 0x719   : > { %9762 = vmatprep.subr.bf16.mxu1 %v13495_v59  ;;  %v13546_v59 = vld [vmem:[#allocation11 + $0x614] ss:$24 sps:$4 sm:$0xff]  }
 0x71a   : > { %9724 = vmatpush2.bf16.msra.mxu0 %v13490_v46  ;;  %v13541_v46 = vld [vmem:[#allocation11 + $0x970] ss:$24 sps:$4 sm:$0xff]  }
 0x71b   : > { %9725 = vmatprep.subr.bf16.mxu0 %v13498_v40  ;;  %v13549_v40 = vld [vmem:[#allocation11 + $0x944] ss:$24 sps:$4 sm:$0xff]  }
 0x71c   : > { %9763 = vmatpush2.bf16.msra.mxu1 %v13493_v16  ;;  %v13544_v16 = vld [vmem:[#allocation11 + $0x610] ss:$24 sps:$4 sm:$0xff]  }
 0x71d   : > { %9764 = vmatprep.subr.bf16.mxu1 %v13501_v39  ;;  %v13552_v39 = vld [vmem:[#allocation11 + $0x8e4] ss:$24 sps:$4 sm:$0xff]  }
 0x71e   : > { %9726 = vmatpush2.bf16.msra.mxu0 %v13496_v3  ;;  %v13547_v3 = vld [vmem:[#allocation11 + $0x940] ss:$24 sps:$4 sm:$0xff]  }
 0x71f   : > { %9777 = vmatprep.subr.bf16.mxu0 %v13504_v34  ;;  %v13555_v34 = vld [vmem:[#allocation11 + $0x914] ss:$24 sps:$4 sm:$0xff]  }
 0x720   : > { %9765 = vmatpush2.bf16.msra.mxu1 %v13499_v14  ;;  %v13550_v14 = vld [vmem:[#allocation11 + $0x8e0] ss:$24 sps:$4 sm:$0xff]  }
 0x721   : > { %v9483_v55 = vpop.f32.mrf.mxu0  ;;  %9728 = vmatmul.mubr.bf16.vlgmr.msra.gmra.mxu0 %v16610_v51  ;;  %9766 = vmatprep.subr.bf16.mxu1 %v13507_v7  ;;  %v13514_v51 = vld [vmem:[#allocation11 + $0x700] ss:$24 sps:$4 sm:$0xff]   ;;  %v13558_v7 = vld [vmem:[#allocation11 + $0x8b4] ss:$24 sps:$4 sm:$0xff]  }
 0x722   : > { %v9484_v2 = vadd.f32 %v9483_v55, %v16788_v49  ;;  %9778 = vmatpush1.bf16.msra.mxu0 %v13502_v38  ;;  %9809 = vmatprep.mubr.bf16.mxu0 %v16612_v25  ;;  %v13522_v49 = vld [vmem:[#allocation11 + $0x6d4] ss:$24 sps:$4 sm:$0xff]   ;;  %v13553_v38 = vld [vmem:[#allocation11 + $0x910] ss:$24 sps:$4 sm:$0xff]   ;;  %v13564_v55 = vld [vmem:[#allocation11 + $0x884] ss:$24 sps:$4 sm:$0xff]  }
 0x723   : > { %v9485_v10 = vpop.f32.mrf.mxu0  ;;  %9779 = vmatprep.subr.bf16.mxu0 %v13510_v32  ;;  %v13561_v32 = vld [vmem:[#allocation11 + $0xbe4] ss:$24 sps:$4 sm:$0xff]  }
 0x724   : > { %v9486_v58 = vadd.f32 %v9485_v10, %v16791_v4  ;;  %9767 = vmatpush2.bf16.msra.mxu1 %v13505_v41  ;;  %v13556_v41 = vld [vmem:[#allocation11 + $0x8b0] ss:$24 sps:$4 sm:$0xff]   ;;  %v13570_v10 = vld [vmem:[#allocation11 + $0x854] ss:$24 sps:$4 sm:$0xff]  }
 0x725   : > { %v9487_v50 = vpop.f32.mrf.mxu0  ;;  %9818 = vmatprep.subr.bf16.mxu1 %v13513_v36  ;;  %v13559_v36 = vld [vmem:[#allocation11 + $0xbe0] ss:$24 sps:$4 sm:$0xff]  }
 0x726   : > { %9780 = vmatpush1.bf16.msra.mxu0 %v13508_v28  ;;  %v13562_v28 = vld [vmem:[#allocation11 + $0x880] ss:$24 sps:$4 sm:$0xff]   ;;  %v13576_v50 = vld [vmem:[#allocation11 + $0x824] ss:$24 sps:$4 sm:$0xff]  }
 0x727   : > { %v9488_v9 = vpop.f32.mrf.mxu0  ;;  %v9524_v35 = vpop.f32.mrf.mxu1  ;;  %9769 = vmatmul.mubr.bf16.vlgmr.msra.gmra.mxu1 %v16616_v45  ;;  %9781 = vmatprep.subr.bf16.mxu0 %v13516_v61  ;;  %v13523_v45 = vld [vmem:[#allocation11 + $0xa00] ss:$24 sps:$4 sm:$0xff]   ;;  %v13565_v61 = vld [vmem:[#allocation11 + $0xbb0] ss:$24 sps:$4 sm:$0xff]  }
 0x728   : > { %v16798_v25 = vadd.f32 %v9524_v35, %v9484_v2  ;;  %9819 = vmatpush1.bf16.msra.mxu1 %v13511_v44  ;;  %9850 = vmatprep.mubr.bf16.mxu1 %v16618_v12  ;;  %v13534_v12 = vld [vmem:[#allocation11 + $0x674] ss:$24 sps:$4 sm:$0xff]   ;;  %v13568_v44 = vld [vmem:[#allocation11 + $0x850] ss:$24 sps:$4 sm:$0xff]   ;;  %v13574_v9 = vld [vmem:[#allocation11 + $0x820] ss:$24 sps:$4 sm:$0xff]  }
 0x729   : > { %v9526_v4 = vpop.f32.mrf.mxu1  ;;  %9820 = vmatprep.subr.bf16.mxu1 %v13519_v54  ;;  %v13567_v2 = vld [vmem:[#allocation11 + $0xbb4] ss:$24 sps:$4 sm:$0xff]   ;;  %v13571_v54 = vld [vmem:[#allocation11 + $0xb80] ss:$24 sps:$4 sm:$0xff]  }
 0x72a   : > { %v16801_v63 = vadd.f32 %v9526_v4, %v9486_v58  ;;  %9782 = vmatpush1.bf16.msra.mxu0 %v13514_v51  ;;  %v13573_v58 = vld [vmem:[#allocation11 + $0xb84] ss:$24 sps:$4 sm:$0xff]   ;;  %v13579_v51 = vld [vmem:[#allocation11 + $0xb54] ss:$24 sps:$4 sm:$0xff]   ;;  %v13580_v4 = vld [vmem:[#allocation11 + $0x7f0] ss:$24 sps:$4 sm:$0xff]  }
 0x72b   : > { %v9528_v29 = vpop.f32.mrf.mxu1  ;;  %9783 = vmatprep.subr.bf16.mxu0 %v13522_v49  ;;  %v13582_v35 = vld [vmem:[#allocation11 + $0x7f4] ss:$24 sps:$4 sm:$0xff]   ;;  %v13577_v49 = vld [vmem:[#allocation11 + $0xb50] ss:$24 sps:$4 sm:$0xff]  }
 0x72c   : > { %9821 = vmatpush1.bf16.msra.mxu1 %v13517_v62  ;;  %v13585_v62 = vld [vmem:[#allocation11 + $0xb24] ss:$24 sps:$4 sm:$0xff]   ;;  %v13591_v29 = vld [vmem:[#allocation11 + $0xaf4] ss:$24 sps:$4 sm:$0xff]  }
 0x72d   : > { %v9529_v18 = vpop.f32.mrf.mxu1  ;;  %9822 = vmatprep.subr.bf16.mxu1 %v13525_v42  ;;  %v13588_v42 = vld [vmem:[#allocation11 + $0x7c4] ss:$24 sps:$4 sm:$0xff]  }
 0x72e   : > { %9784 = vmatpush1.bf16.msra.mxu0 %v13520_v31  ;;  %v13583_v31 = vld [vmem:[#allocation11 + $0xb20] ss:$24 sps:$4 sm:$0xff]   ;;  %v13589_v18 = vld [vmem:[#allocation11 + $0xaf0] ss:$24 sps:$4 sm:$0xff]  }
 0x72f   : > { %9785 = vmatprep.subr.bf16.mxu0 %v13528_v23  ;;  %v13586_v23 = vld [vmem:[#allocation11 + $0x7c0] ss:$24 sps:$4 sm:$0xff]  }
 0x730   : > { %9823 = vmatpush1.bf16.msra.mxu1 %v13523_v45  ;;  %v13594_v45 = vld [vmem:[#allocation11 + $0x794] ss:$24 sps:$4 sm:$0xff]  }
 0x731   : > { %9824 = vmatprep.subr.bf16.mxu1 %v13531_v47  ;;  %v13597_v47 = vld [vmem:[#allocation11 + $0xac4] ss:$24 sps:$4 sm:$0xff]  }
 0x732   : > { %9786 = vmatpush1.bf16.msra.mxu0 %v13526_v6  ;;  %v13592_v6 = vld [vmem:[#allocation11 + $0x790] ss:$24 sps:$4 sm:$0xff]  }
 0x733   : > { %9787 = vmatprep.subr.bf16.mxu0 %v13534_v12  ;;  %v13600_v12 = vld [vmem:[#allocation11 + $0xd64] ss:$24 sps:$4 sm:$0xff]  }
 0x734   : > { %9825 = vmatpush1.bf16.msra.mxu1 %v13529_v5  ;;  %v13595_v5 = vld [vmem:[#allocation11 + $0xac0] ss:$24 sps:$4 sm:$0xff]  }
 0x735   : > { %9826 = vmatprep.subr.bf16.mxu1 %v13537_v0  ;;  %v13603_v0 = vld [vmem:[#allocation11 + $0xa94] ss:$24 sps:$4 sm:$0xff]  }
 0x736   : > { %9788 = vmatpush1.bf16.msra.mxu0 %v13532_v19  ;;  %v13598_v19 = vld [vmem:[#allocation11 + $0xd60] ss:$24 sps:$4 sm:$0xff]  }
 0x737   : > { %9789 = vmatprep.subr.bf16.mxu0 %v13540_v15  ;;  %v13606_v15 = vld [vmem:[#allocation11 + $0xd34] ss:$24 sps:$4 sm:$0xff]  }
 0x738   : > { %9827 = vmatpush1.bf16.msra.mxu1 %v13535_v17  ;;  %v13601_v17 = vld [vmem:[#allocation11 + $0xa90] ss:$24 sps:$4 sm:$0xff]  }
 0x739   : > { %9828 = vmatprep.subr.bf16.mxu1 %v13543_v30 }
 0x73a   : > { %9790 = vmatpush1.bf16.msra.mxu0 %v13538_v27  ;;  %v13609_v27 = vld [vmem:[#allocation11 + $0x1064] ss:$24 sps:$4 sm:$0xff]  }
 0x73b   : > { %9791 = vmatprep.subr.bf16.mxu0 %v13546_v59 }
 0x73c   : > { %9829 = vmatpush1.bf16.msra.mxu1 %v13541_v46  ;;  %v13604_v46 = vld [vmem:[#allocation11 + $0xd30] ss:$24 sps:$4 sm:$0xff]  }
 0x73d   : > { %9830 = vmatprep.subr.bf16.mxu1 %v13549_v40 }
 0x73e   : > { %9792 = vmatpush1.bf16.msra.mxu0 %v13544_v16  ;;  %v13612_v16 = vld [vmem:[#allocation11 + $0xd04] ss:$24 sps:$4 sm:$0xff]  }
 0x73f   : > { %9793 = vmatprep.subr.bf16.mxu0 %v13552_v39 }
 0x740   : > { %9831 = vmatpush1.bf16.msra.mxu1 %v13547_v3  ;;  %v13607_v3 = vld [vmem:[#allocation11 + $0x1060] ss:$24 sps:$4 sm:$0xff]  }
 0x741   : > { %9832 = vmatprep.subr.bf16.mxu1 %v13555_v34 }
 0x742   : > { %9794 = vmatpush2.bf16.msra.mxu0 %v13550_v14  ;;  %v13615_v14 = vld [vmem:[#allocation11 + $0x1034] ss:$24 sps:$4 sm:$0xff]  }
 0x743   : > { %9795 = vmatprep.subr.bf16.mxu0 %v13558_v7 }
 0x744   : > { %9833 = vmatpush1.bf16.msra.mxu1 %v13553_v38 }
 0x745   : > { %9834 = vmatprep.subr.bf16.mxu1 %v13561_v32 }
 0x746   : > { %9796 = vmatpush2.bf16.msra.mxu0 %v13556_v41 }
 0x747   : > { %9797 = vmatprep.subr.bf16.mxu0 %v13564_v55  ;;  %v13616_v55 = vld [vmem:[#allocation11 + $0xcd0] ss:$24 sps:$4 sm:$0xff]  }
 0x748   : > { %9835 = vmatpush2.bf16.msra.mxu1 %v13559_v36 }
 0x749   : > { %9836 = vmatprep.subr.bf16.mxu1 %v13567_v2  ;;  %v13624_v2 = vld [vmem:[#allocation11 + $0xca4] ss:$24 sps:$4 sm:$0xff]  }
 0x74a   : > { %9798 = vmatpush2.bf16.msra.mxu0 %v13562_v28  ;;  %v13619_v28 = vld [vmem:[#allocation11 + $0x1000] ss:$24 sps:$4 sm:$0xff]  }
 0x74b   : > { %9799 = vmatprep.subr.bf16.mxu0 %v13570_v10 }
 0x74c   : > { %9837 = vmatpush2.bf16.msra.mxu1 %v13565_v61  ;;  %v13622_v61 = vld [vmem:[#allocation11 + $0xca0] ss:$24 sps:$4 sm:$0xff]  }
 0x74d   : > { %9838 = vmatprep.subr.bf16.mxu1 %v13573_v58  ;;  %v13625_v58 = vld [vmem:[#allocation11 + $0xfd0] ss:$24 sps:$4 sm:$0xff]  }
 0x74e   : > { %9800 = vmatpush2.bf16.msra.mxu0 %v13568_v44  ;;  %v13633_v44 = vld [vmem:[#allocation11 + $0xfa4] ss:$24 sps:$4 sm:$0xff]  }
 0x74f   : > { %9801 = vmatprep.subr.bf16.mxu0 %v13576_v50  ;;  %v13628_v50 = vld [vmem:[#allocation11 + $0xc70] ss:$24 sps:$4 sm:$0xff]  }
 0x750   : > { %9839 = vmatpush2.bf16.msra.mxu1 %v13571_v54  ;;  %v13636_v54 = vld [vmem:[#allocation11 + $0xc44] ss:$24 sps:$4 sm:$0xff]  }
 0x751   : > { %9840 = vmatprep.subr.bf16.mxu1 %v13579_v51  ;;  %v13631_v51 = vld [vmem:[#allocation11 + $0xfa0] ss:$24 sps:$4 sm:$0xff]  }
 0x752   : > { %9802 = vmatpush2.bf16.msra.mxu0 %v13574_v9  ;;  %v13639_v9 = vld [vmem:[#allocation11 + $0xf74] ss:$24 sps:$4 sm:$0xff]  }
 0x753   : > { %9803 = vmatprep.subr.bf16.mxu0 %v13582_v35  ;;  %v13634_v35 = vld [vmem:[#allocation11 + $0xc40] ss:$24 sps:$4 sm:$0xff]  }
 0x754   : > { %9841 = vmatpush2.bf16.msra.mxu1 %v13577_v49  ;;  %v13642_v49 = vld [vmem:[#allocation11 + $0xc14] ss:$24 sps:$4 sm:$0xff]  }
 0x755   : > { %9842 = vmatprep.subr.bf16.mxu1 %v13585_v62  ;;  %v13637_v62 = vld [vmem:[#allocation11 + $0xf70] ss:$24 sps:$4 sm:$0xff]  }
 0x756   : > { %9804 = vmatpush2.bf16.msra.mxu0 %v13580_v4  ;;  %v13645_v4 = vld [vmem:[#allocation11 + $0xf44] ss:$24 sps:$4 sm:$0xff]  }
 0x757   : > { %9805 = vmatprep.subr.bf16.mxu0 %v13588_v42  ;;  %v13640_v42 = vld [vmem:[#allocation11 + $0xc10] ss:$24 sps:$4 sm:$0xff]  }
 0x758   : > { %9843 = vmatpush2.bf16.msra.mxu1 %v13583_v31  ;;  %v13648_v31 = vld [vmem:[#allocation11 + $0xee4] ss:$24 sps:$4 sm:$0xff]  }
 0x759   : > { %9844 = vmatprep.subr.bf16.mxu1 %v13591_v29  ;;  %v13643_v29 = vld [vmem:[#allocation11 + $0xf40] ss:$24 sps:$4 sm:$0xff]  }
 0x75a   : > { %9806 = vmatpush2.bf16.msra.mxu0 %v13586_v23  ;;  %v13651_v23 = vld [vmem:[#allocation11 + $0xf14] ss:$24 sps:$4 sm:$0xff]  }
 0x75b   : > { %9807 = vmatprep.subr.bf16.mxu0 %v13594_v45  ;;  %v13646_v45 = vld [vmem:[#allocation11 + $0xee0] ss:$24 sps:$4 sm:$0xff]  }
 0x75c   : > { %9845 = vmatpush2.bf16.msra.mxu1 %v13589_v18  ;;  %v13654_v18 = vld [vmem:[#allocation11 + $0xeb4] ss:$24 sps:$4 sm:$0xff]  }
 0x75d   : > { %9846 = vmatprep.subr.bf16.mxu1 %v13597_v47  ;;  %v13649_v47 = vld [vmem:[#allocation11 + $0xf10] ss:$24 sps:$4 sm:$0xff]  }
 0x75e   : > { %9808 = vmatpush2.bf16.msra.mxu0 %v13592_v6  ;;  %v13657_v6 = vld [vmem:[#allocation11 + $0x11e4] ss:$24 sps:$4 sm:$0xff]  }
 0x75f   : > { %9859 = vmatprep.subr.bf16.mxu0 %v13600_v12  ;;  %v13652_v12 = vld [vmem:[#allocation11 + $0xeb0] ss:$24 sps:$4 sm:$0xff]  }
 0x760   : > { %9847 = vmatpush2.bf16.msra.mxu1 %v13595_v5  ;;  %v13660_v5 = vld [vmem:[#allocation11 + $0xe84] ss:$24 sps:$4 sm:$0xff]  }
 0x761   : > { %v9565_v30 = vpop.f32.mrf.mxu0  ;;  %9810 = vmatmul.mubr.bf16.vlgmr.msra.gmra.mxu0 %v16632_v60  ;;  %9848 = vmatprep.subr.bf16.mxu1 %v13603_v0  ;;  %v13610_v60 = vld [vmem:[#allocation11 + $0xd00] ss:$24 sps:$4 sm:$0xff]  }
 0x762   : > { %v16805_v59 = vadd.f32 %v9565_v30, %v16798_v25  ;;  %9860 = vmatpush1.bf16.msra.mxu0 %v13598_v19  ;;  %9891 = vmatprep.mubr.bf16.mxu0 %v16634_v22  ;;  %v13618_v22 = vld [vmem:[#allocation11 + $0xcd4] ss:$24 sps:$4 sm:$0xff]   ;;  %v13613_v25 = vld [vmem:[#allocation11 + $0x1030] ss:$24 sps:$4 sm:$0xff]   ;;  %v13655_v0 = vld [vmem:[#allocation11 + $0x11e0] ss:$24 sps:$4 sm:$0xff]  }
 0x763   : > { %v9567_v40 = vpop.f32.mrf.mxu0  ;;  %9861 = vmatprep.subr.bf16.mxu0 %v13606_v15  ;;  %v13663_v19 = vld [vmem:[#allocation11 + $0x11b4] ss:$24 sps:$4 sm:$0xff]   ;;  %v13658_v15 = vld [vmem:[#allocation11 + $0xe80] ss:$24 sps:$4 sm:$0xff]   ;;  %v13661_v30 = vld [vmem:[#allocation11 + $0x11b0] ss:$24 sps:$4 sm:$0xff]  }
 0x764   : > { %v9568_v39 = vadd.f32 %v9567_v40, %v16801_v63  ;;  %9849 = vmatpush2.bf16.msra.mxu1 %v13601_v17  ;;  %v13621_v63 = vld [vmem:[#allocation11 + $0x1004] ss:$24 sps:$4 sm:$0xff]   ;;  %v13666_v17 = vld [vmem:[#allocation11 + $0xe54] ss:$24 sps:$4 sm:$0xff]  }
 0x765   : > { %v9569_v34 = vpop.f32.mrf.mxu0  ;;  %9900 = vmatprep.subr.bf16.mxu1 %v13609_v27  ;;  %v13669_v27 = vld [vmem:[#allocation11 + $0x1184] ss:$24 sps:$4 sm:$0xff]  }
 0x766   : > { %9862 = vmatpush1.bf16.msra.mxu0 %v13604_v46  ;;  %v13664_v46 = vld [vmem:[#allocation11 + $0xe50] ss:$24 sps:$4 sm:$0xff]   ;;  %v13672_v40 = vld [vmem:[#allocation11 + $0xe24] ss:$24 sps:$4 sm:$0xff]   ;;  %v13678_v34 = vld [vmem:[#allocation11 + $0xdf4] ss:$24 sps:$4 sm:$0xff]  }
 0x767   : > { %v9570_v7 = vpop.f32.mrf.mxu0  ;;  %v16809_v38 = vpop.f32.mrf.mxu1  ;;  %9851 = vmatmul.mubr.bf16.vlgmr.msra.gmra.mxu1 %v16638_v21  ;;  %9863 = vmatprep.subr.bf16.mxu0 %v13612_v16  ;;  %v13627_v21 = vld [vmem:[#allocation11 + $0xfd4] ss:$24 sps:$4 sm:$0xff]   ;;  %v13667_v16 = vld [vmem:[#allocation11 + $0x1180] ss:$24 sps:$4 sm:$0xff]  }
 0x768   : > { %9901 = vmatpush1.bf16.msra.mxu1 %v13607_v3  ;;  %9932 = vmatprep.mubr.bf16.mxu1 %v16640_v48  ;;  %v13630_v48 = vld [vmem:[#allocation11 + $0xc74] ss:$24 sps:$4 sm:$0xff]   ;;  %v13670_v3 = vld [vmem:[#allocation11 + $0xe20] ss:$24 sps:$4 sm:$0xff]   ;;  %v13676_v7 = vld [vmem:[#allocation11 + $0xdf0] ss:$24 sps:$4 sm:$0xff]  }
 0x769   : > { %v9608_v32 = vpop.f32.mrf.mxu1  ;;  %9902 = vmatprep.subr.bf16.mxu1 %v13615_v14  ;;  %v13673_v14 = vld [vmem:[#allocation11 + $0x1150] ss:$24 sps:$4 sm:$0xff]  }
 0x76a   : > { %v16813_v41 = vadd.f32 %v9608_v32, %v9568_v39  ;;  %9864 = vmatpush1.bf16.msra.mxu0 %v13610_v60  ;;  %v13675_v39 = vld [vmem:[#allocation11 + $0x1154] ss:$24 sps:$4 sm:$0xff]   ;;  %v13681_v60 = vld [vmem:[#allocation11 + $0x1124] ss:$24 sps:$4 sm:$0xff]  }
 0x76b   : > { %v9610_v36 = vpop.f32.mrf.mxu1  ;;  %9865 = vmatprep.subr.bf16.mxu0 %v13618_v22  ;;  %v13684_v22 = vld [vmem:[#allocation11 + $0xdc4] ss:$24 sps:$4 sm:$0xff]   ;;  %v13687_v32 = vld [vmem:[#allocation11 + $0x10f4] ss:$24 sps:$4 sm:$0xff]  }
 0x76c   : > { %9903 = vmatpush1.bf16.msra.mxu1 %v13613_v25  ;;  %v13679_v25 = vld [vmem:[#allocation11 + $0x1120] ss:$24 sps:$4 sm:$0xff]   ;;  %v13685_v36 = vld [vmem:[#allocation11 + $0x10f0] ss:$24 sps:$4 sm:$0xff]  }
 0x76d   : > { %v9611_v10 = vpop.f32.mrf.mxu1  ;;  %9904 = vmatprep.subr.bf16.mxu1 %v13621_v63  ;;  %v13682_v63 = vld [vmem:[#allocation11 + $0xdc0] ss:$24 sps:$4 sm:$0xff]  }
 0x76e   : > { %9866 = vmatpush1.bf16.msra.mxu0 %v13616_v55  ;;  %v13690_v55 = vld [vmem:[#allocation11 + $0xd94] ss:$24 sps:$4 sm:$0xff]   ;;  %v13696_v10 = vld [vmem:[#allocation11 + $0x1364] ss:$24 sps:$4 sm:$0xff]  }
 0x76f   : > { %9867 = vmatprep.subr.bf16.mxu0 %v13624_v2  ;;  %v13693_v2 = vld [vmem:[#allocation11 + $0x10c4] ss:$24 sps:$4 sm:$0xff]  }
 0x770   : > { %9905 = vmatpush1.bf16.msra.mxu1 %v13619_v28  ;;  %v13688_v28 = vld [vmem:[#allocation11 + $0xd90] ss:$24 sps:$4 sm:$0xff]  }
 0x771   : > { %9906 = vmatprep.subr.bf16.mxu1 %v13627_v21  ;;  %v13691_v21 = vld [vmem:[#allocation11 + $0x10c0] ss:$24 sps:$4 sm:$0xff]  }
 0x772   : > { %9868 = vmatpush1.bf16.msra.mxu0 %v13622_v61  ;;  %v13699_v61 = vld [vmem:[#allocation11 + $0x1094] ss:$24 sps:$4 sm:$0xff]  }
 0x773   : > { %9869 = vmatprep.subr.bf16.mxu0 %v13630_v48  ;;  %v13694_v48 = vld [vmem:[#allocation11 + $0x1360] ss:$24 sps:$4 sm:$0xff]  }
 0x774   : > { %9907 = vmatpush1.bf16.msra.mxu1 %v13625_v58  ;;  %v13702_v58 = vld [vmem:[#allocation11 + $0x1334] ss:$24 sps:$4 sm:$0xff]  }
 0x775   : > { %9908 = vmatprep.subr.bf16.mxu1 %v13633_v44  ;;  %v13697_v44 = vld [vmem:[#allocation11 + $0x1090] ss:$24 sps:$4 sm:$0xff]  }
 0x776   : > { %9870 = vmatpush1.bf16.msra.mxu0 %v13628_v50 }
 0x777   : > { %9871 = vmatprep.subr.bf16.mxu0 %v13636_v54  ;;  %v13705_v54 = vld [vmem:[#allocation11 + $0x1664] ss:$24 sps:$4 sm:$0xff]  }
 0x778   : > { %9909 = vmatpush1.bf16.msra.mxu1 %v13631_v51  ;;  %v13700_v51 = vld [vmem:[#allocation11 + $0x1330] ss:$24 sps:$4 sm:$0xff]  }
 0x779   : > { %9910 = vmatprep.subr.bf16.mxu1 %v13639_v9 }
 0x77a   : > { %9872 = vmatpush1.bf16.msra.mxu0 %v13634_v35  ;;  %v13708_v35 = vld [vmem:[#allocation11 + $0x1304] ss:$24 sps:$4 sm:$0xff]  }
 0x77b   : > { %9873 = vmatprep.subr.bf16.mxu0 %v13642_v49  ;;  %v9607_v49 = vadd.f32 %v16809_v38, %v16805_v59  ;;  %v13709_v59 = vld [vmem:[#allocation11 + $0x1630] ss:$24 sps:$4 sm:$0xff]  }
 0x77c   : > { %9911 = vmatpush1.bf16.msra.mxu1 %v13637_v62  ;;  %v13703_v62 = vld [vmem:[#allocation11 + $0x1660] ss:$24 sps:$4 sm:$0xff]  }
 0x77d   : > { %9912 = vmatprep.subr.bf16.mxu1 %v13645_v4 }
 0x77e   : > { %9874 = vmatpush1.bf16.msra.mxu0 %v13640_v42  ;;  %v13711_v42 = vld [vmem:[#allocation11 + $0x1634] ss:$24 sps:$4 sm:$0xff]  }
 0x77f   : > { %9875 = vmatprep.subr.bf16.mxu0 %v13648_v31 }
 0x780   : > { %9913 = vmatpush1.bf16.msra.mxu1 %v13643_v29 }
 0x781   : > { %9914 = vmatprep.subr.bf16.mxu1 %v13651_v23 }
 0x782   : > { %9876 = vmatpush2.bf16.msra.mxu0 %v13646_v45 }
 0x783   : > { %9877 = vmatprep.subr.bf16.mxu0 %v13654_v18  ;;  %v13717_v18 = vld [vmem:[#allocation11 + $0x1604] ss:$24 sps:$4 sm:$0xff]  }
 0x784   : > { %9915 = vmatpush1.bf16.msra.mxu1 %v13649_v47  ;;  %v13712_v47 = vld [vmem:[#allocation11 + $0x12d0] ss:$24 sps:$4 sm:$0xff]  }
 0x785   : > { %9916 = vmatprep.subr.bf16.mxu1 %v13657_v6  ;;  %v13720_v6 = vld [vmem:[#allocation11 + $0x12a4] ss:$24 sps:$4 sm:$0xff]  }
 0x786   : > { %9878 = vmatpush2.bf16.msra.mxu0 %v13652_v12  ;;  %v13715_v12 = vld [vmem:[#allocation11 + $0x1600] ss:$24 sps:$4 sm:$0xff]  }
 0x787   : > { %9879 = vmatprep.subr.bf16.mxu0 %v13660_v5 }
 0x788   : > { %9917 = vmatpush2.bf16.msra.mxu1 %v13655_v0 }
 0x789   : > { %9918 = vmatprep.subr.bf16.mxu1 %v13663_v19  ;;  %v13718_v19 = vld [vmem:[#allocation11 + $0x12a0] ss:$24 sps:$4 sm:$0xff]  }
 0x78a   : > { %9880 = vmatpush2.bf16.msra.mxu0 %v13658_v15  ;;  %v13726_v15 = vld [vmem:[#allocation11 + $0x1274] ss:$24 sps:$4 sm:$0xff]  }
 0x78b   : > { %9881 = vmatprep.subr.bf16.mxu0 %v13666_v17 }
 0x78c   : > { %9919 = vmatpush2.bf16.msra.mxu1 %v13661_v30  ;;  %v13721_v30 = vld [vmem:[#allocation11 + $0x15d0] ss:$24 sps:$4 sm:$0xff]  }
 0x78d   : > { %9920 = vmatprep.subr.bf16.mxu1 %v13669_v27  ;;  %v13729_v27 = vld [vmem:[#allocation11 + $0x15a4] ss:$24 sps:$4 sm:$0xff]  }
 0x78e   : > { %9882 = vmatpush2.bf16.msra.mxu0 %v13664_v46  ;;  %v13732_v46 = vld [vmem:[#allocation11 + $0x1244] ss:$24 sps:$4 sm:$0xff]  }
 0x78f   : > { %9883 = vmatprep.subr.bf16.mxu0 %v13672_v40  ;;  %v13727_v40 = vld [vmem:[#allocation11 + $0x15a0] ss:$24 sps:$4 sm:$0xff]  }
 0x790   : > { %9921 = vmatpush2.bf16.msra.mxu1 %v13667_v16  ;;  %v13735_v16 = vld [vmem:[#allocation11 + $0x1574] ss:$24 sps:$4 sm:$0xff]  }
 0x791   : > { %9922 = vmatprep.subr.bf16.mxu1 %v13675_v39  ;;  %v13730_v39 = vld [vmem:[#allocation11 + $0x1240] ss:$24 sps:$4 sm:$0xff]  }
 0x792   : > { %9884 = vmatpush2.bf16.msra.mxu0 %v13670_v3  ;;  %v13738_v3 = vld [vmem:[#allocation11 + $0x1214] ss:$24 sps:$4 sm:$0xff]  }
 0x793   : > { %9885 = vmatprep.subr.bf16.mxu0 %v13678_v34  ;;  %v13733_v34 = vld [vmem:[#allocation11 + $0x1570] ss:$24 sps:$4 sm:$0xff]  }
 0x794   : > { %9923 = vmatpush2.bf16.msra.mxu1 %v13673_v14  ;;  %v13741_v14 = vld [vmem:[#allocation11 + $0x1544] ss:$24 sps:$4 sm:$0xff]  }
 0x795   : > { %9924 = vmatprep.subr.bf16.mxu1 %v13681_v60  ;;  %v13736_v60 = vld [vmem:[#allocation11 + $0x1210] ss:$24 sps:$4 sm:$0xff]  }
 0x796   : > { %9886 = vmatpush2.bf16.msra.mxu0 %v13676_v7  ;;  %v13744_v7 = vld [vmem:[#allocation11 + $0x14e4] ss:$24 sps:$4 sm:$0xff]  }
 0x797   : > { %9887 = vmatprep.subr.bf16.mxu0 %v13684_v22  ;;  %v13739_v22 = vld [vmem:[#allocation11 + $0x1540] ss:$24 sps:$4 sm:$0xff]  }
 0x798   : > { %9925 = vmatpush2.bf16.msra.mxu1 %v13679_v25  ;;  %v13747_v25 = vld [vmem:[#allocation11 + $0x1514] ss:$24 sps:$4 sm:$0xff]  }
 0x799   : > { %9926 = vmatprep.subr.bf16.mxu1 %v13687_v32  ;;  %v13742_v32 = vld [vmem:[#allocation11 + $0x14e0] ss:$24 sps:$4 sm:$0xff]  }
 0x79a   : > { %9888 = vmatpush2.bf16.msra.mxu0 %v13682_v63  ;;  %v13750_v63 = vld [vmem:[#allocation11 + $0x14b4] ss:$24 sps:$4 sm:$0xff]  }
 0x79b   : > { %9889 = vmatprep.subr.bf16.mxu0 %v13690_v55  ;;  %v13745_v55 = vld [vmem:[#allocation11 + $0x1510] ss:$24 sps:$4 sm:$0xff]  }
 0x79c   : > { %9927 = vmatpush2.bf16.msra.mxu1 %v13685_v36  ;;  %v13753_v36 = vld [vmem:[#allocation11 + $0x17e4] ss:$24 sps:$4 sm:$0xff]  }
 0x79d   : > { %9928 = vmatprep.subr.bf16.mxu1 %v13693_v2  ;;  %v13748_v2 = vld [vmem:[#allocation11 + $0x14b0] ss:$24 sps:$4 sm:$0xff]  }
 0x79e   : > { %9890 = vmatpush2.bf16.msra.mxu0 %v13688_v28  ;;  %v13756_v28 = vld [vmem:[#allocation11 + $0x1484] ss:$24 sps:$4 sm:$0xff]  }
 0x79f   : > { %9941 = vmatprep.subr.bf16.mxu0 %v13696_v10  ;;  %v13751_v10 = vld [vmem:[#allocation11 + $0x17e0] ss:$24 sps:$4 sm:$0xff]  }
 0x7a0   : > { %9929 = vmatpush2.bf16.msra.mxu1 %v13691_v21  ;;  %v13759_v21 = vld [vmem:[#allocation11 + $0x17b4] ss:$24 sps:$4 sm:$0xff]  }
 0x7a1   : > { %v9647_v50 = vpop.f32.mrf.mxu0  ;;  %9892 = vmatmul.mubr.bf16.vlgmr.msra.gmra.mxu0 %v16654_v26  ;;  %9930 = vmatprep.subr.bf16.mxu1 %v13699_v61  ;;  %v13706_v26 = vld [vmem:[#allocation11 + $0x1300] ss:$24 sps:$4 sm:$0xff]  }
 0x7a2   : > { %9942 = vmatpush1.bf16.msra.mxu0 %v13694_v48  ;;  %9973 = vmatprep.mubr.bf16.mxu0 %v16656_v24  ;;  %v9648_v31 = vadd.f32 %v9647_v50, %v9607_v49  ;;  %v13714_v24 = vld [vmem:[#allocation11 + $0x12d4] ss:$24 sps:$4 sm:$0xff]   ;;  %v13754_v61 = vld [vmem:[#allocation11 + $0x1480] ss:$24 sps:$4 sm:$0xff]   ;;  %v13760_v50 = vld [vmem:[#allocation11 + $0x1450] ss:$24 sps:$4 sm:$0xff]  }
 0x7a3   : > { %v9649_v9 = vpop.f32.mrf.mxu0  ;;  %9943 = vmatprep.subr.bf16.mxu0 %v13702_v58  ;;  %v13762_v48 = vld [vmem:[#allocation11 + $0x1454] ss:$24 sps:$4 sm:$0xff]   ;;  %v13757_v58 = vld [vmem:[#allocation11 + $0x17b0] ss:$24 sps:$4 sm:$0xff]  }
 0x7a4   : > { %9931 = vmatpush2.bf16.msra.mxu1 %v13697_v44  ;;  %v9650_v0 = vadd.f32 %v9649_v9, %v16813_v41  ;;  %v13724_v41 = vld [vmem:[#allocation11 + $0x1270] ss:$24 sps:$4 sm:$0xff]   ;;  %v13765_v44 = vld [vmem:[#allocation11 + $0x1784] ss:$24 sps:$4 sm:$0xff]   ;;  %v13771_v9 = vld [vmem:[#allocation11 + $0x1754] ss:$24 sps:$4 sm:$0xff]  }
 0x7a5   : > { %v9651_v4 = vpop.f32.mrf.mxu0  ;;  %9982 = vmatprep.subr.bf16.mxu1 %v13705_v54  ;;  %v13768_v54 = vld [vmem:[#allocation11 + $0x1424] ss:$24 sps:$4 sm:$0xff]   ;;  %v13774_v49 = vld [vmem:[#allocation11 + $0x13f4] ss:$24 sps:$4 sm:$0xff]  }
 0x7a6   : > { %9944 = vmatpush1.bf16.msra.mxu0 %v13700_v51  ;;  %v13763_v51 = vld [vmem:[#allocation11 + $0x1780] ss:$24 sps:$4 sm:$0xff]   ;;  %v13777_v4 = vld [vmem:[#allocation11 + $0x1724] ss:$24 sps:$4 sm:$0xff]  }
 0x7a7   : > { %v9652_v29 = vpop.f32.mrf.mxu0  ;;  %v9688_v23 = vpop.f32.mrf.mxu1  ;;  %9933 = vmatmul.mubr.bf16.vlgmr.msra.gmra.mxu1 %v16660_v53  ;;  %9945 = vmatprep.subr.bf16.mxu0 %v13708_v35  ;;  %v13766_v35 = vld [vmem:[#allocation11 + $0x1420] ss:$24 sps:$4 sm:$0xff]  }
 0x7a8   : > { %v16820_v45 = vadd.f32 %v9688_v23, %v9648_v31  ;;  %9983 = vmatpush1.bf16.msra.mxu1 %v13703_v62  ;;  %10014 = vmatprep.mubr.bf16.mxu1 %v16662_v8  ;;  %v13723_v8 = vld [vmem:[#allocation11 + $0x15d4] ss:$24 sps:$4 sm:$0xff]   ;;  %v13769_v62 = vld [vmem:[#allocation11 + $0x1750] ss:$24 sps:$4 sm:$0xff]   ;;  %v13780_v31 = vld [vmem:[#allocation11 + $0x13c4] ss:$24 sps:$4 sm:$0xff]  }
 0x7a9   : > { %v9690_v38 = vpop.f32.mrf.mxu1  ;;  %9984 = vmatprep.subr.bf16.mxu1 %v13711_v42  ;;  %v13772_v42 = vld [vmem:[#allocation11 + $0x13f0] ss:$24 sps:$4 sm:$0xff]   ;;  %v13783_v29 = vld [vmem:[#allocation11 + $0x16f4] ss:$24 sps:$4 sm:$0xff]   ;;  %v13778_v23 = vld [vmem:[#allocation11 + $0x13c0] ss:$24 sps:$4 sm:$0xff]  }
 0x7aa   : > { %9946 = vmatpush1.bf16.msra.mxu0 %v13706_v26  ;;  %10240 = vrot.lane.b32.xlu0 %v16820_v45, %s14249_s6  ;;  %v16832_v17 = vadd.f32 %v9690_v38, %v9650_v0  ;;  %v13775_v26 = vld [vmem:[#allocation11 + $0x1720] ss:$24 sps:$4 sm:$0xff]   ;;  %v13789_v38 = vld [vmem:[#allocation11 + $0x16c4] ss:$24 sps:$4 sm:$0xff]  }
 0x7ab   : > { %10221 = vrot.lane.b32.xlu1 %v16820_v45, %s14248_s4  ;;  %v9692_v53 = vpop.f32.mrf.mxu1  ;;  %9947 = vmatprep.subr.bf16.mxu0 %v13714_v24  ;;  %v13786_v24 = vld [vmem:[#allocation11 + $0x1394] ss:$24 sps:$4 sm:$0xff]  }
 0x7ac   : > { %9985 = vmatpush1.bf16.msra.mxu1 %v13709_v59  ;;  %v13781_v59 = vld [vmem:[#allocation11 + $0x16f0] ss:$24 sps:$4 sm:$0xff]   ;;  %v13787_v53 = vld [vmem:[#allocation11 + $0x16c0] ss:$24 sps:$4 sm:$0xff]  }
 0x7ad   : > { %v9693_v5 = vpop.f32.mrf.mxu1  ;;  %9986 = vmatprep.subr.bf16.mxu1 %v13717_v18  ;;  %v13784_v18 = vld [vmem:[#allocation11 + $0x1390] ss:$24 sps:$4 sm:$0xff]  }
 0x7ae   : > { %9948 = vmatpush1.bf16.msra.mxu0 %v13712_v47  ;;  %10202 = vrot.lane.b32.xlu0 %v16820_v45, %s14250_s30  ;;  %v13792_v47 = vld [vmem:[#allocation11 + $0x1964] ss:$24 sps:$4 sm:$0xff]   ;;  %v13798_v5 = vld [vmem:[#allocation11 + $0x1934] ss:$24 sps:$4 sm:$0xff]  }
 0x7af   : > { %10184 = vrot.lane.b32.xlu1 %v16820_v45, %s14241_s25  ;;  %9949 = vmatprep.subr.bf16.mxu0 %v13720_v6  ;;  %v13795_v6 = vld [vmem:[#allocation11 + $0x1694] ss:$24 sps:$4 sm:$0xff]  }
 0x7b0   : > { %9987 = vmatpush1.bf16.msra.mxu1 %v13715_v12  ;;  %v13790_v12 = vld [vmem:[#allocation11 + $0x1960] ss:$24 sps:$4 sm:$0xff]  }
 0x7b1   : > { %9988 = vmatprep.subr.bf16.mxu1 %v13723_v8  ;;  %v13793_v8 = vld [vmem:[#allocation11 + $0x1690] ss:$24 sps:$4 sm:$0xff]  }
 0x7b2   : > { %9950 = vmatpush1.bf16.msra.mxu0 %v13718_v19  ;;  %10204 = vrot.lane.b32.xlu0 %v16832_v17, %s14250_s30  ;;  %v13801_v19 = vld [vmem:[#allocation11 + $0x1c64] ss:$24 sps:$4 sm:$0xff]  }
 0x7b3   : > { %10242 = vrot.lane.b32.xlu1 %v16832_v17, %s14249_s6  ;;  %9951 = vmatprep.subr.bf16.mxu0 %v13726_v15  ;;  %v13796_v15 = vld [vmem:[#allocation11 + $0x1930] ss:$24 sps:$4 sm:$0xff]  }
 0x7b4   : > { %9989 = vmatpush1.bf16.msra.mxu1 %v13721_v30 }
 0x7b5   : > { %9990 = vmatprep.subr.bf16.mxu1 %v13729_v27  ;;  %v13804_v27 = vld [vmem:[#allocation11 + $0x1904] ss:$24 sps:$4 sm:$0xff]  }
 0x7b6   : > { %9952 = vmatpush1.bf16.msra.mxu0 %v13724_v41  ;;  %v13799_v41 = vld [vmem:[#allocation11 + $0x1c60] ss:$24 sps:$4 sm:$0xff]  }
 0x7b7   : > { %10223 = vrot.lane.b32.xlu1 %v16832_v17, %s14248_s4  ;;  %9953 = vmatprep.subr.bf16.mxu0 %v13732_v46 }
 0x7b8   : > { %9991 = vmatpush1.bf16.msra.mxu1 %v13727_v40  ;;  %v13807_v40 = vld [vmem:[#allocation11 + $0x1c34] ss:$24 sps:$4 sm:$0xff]  }
 0x7b9   : > { %9992 = vmatprep.subr.bf16.mxu1 %v13735_v16  ;;  %v13802_v16 = vld [vmem:[#allocation11 + $0x1900] ss:$24 sps:$4 sm:$0xff]  }
 0x7ba   : > { %9954 = vmatpush1.bf16.msra.mxu0 %v13730_v39 }
 0x7bb   : > { %10186 = vrot.lane.b32.xlu1 %v16832_v17, %s14241_s25  ;;  %9955 = vmatprep.subr.bf16.mxu0 %v13738_v3 }
 0x7bc   : > { %9993 = vmatpush1.bf16.msra.mxu1 %v13733_v34 }
 0x7bd   : > { %9994 = vmatprep.subr.bf16.mxu1 %v13741_v14 }
 0x7be   : > { %9956 = vmatpush1.bf16.msra.mxu0 %v13736_v60  ;;  %v13813_v60 = vld [vmem:[#allocation11 + $0x1c04] ss:$24 sps:$4 sm:$0xff]  }
 0x7bf   : > { %9957 = vmatprep.subr.bf16.mxu0 %v13744_v7 }
 0x7c0   : > { %9995 = vmatpush1.bf16.msra.mxu1 %v13739_v22  ;;  %v13808_v22 = vld [vmem:[#allocation11 + $0x18d0] ss:$24 sps:$4 sm:$0xff]  }
 0x7c1   : > { %9996 = vmatprep.subr.bf16.mxu1 %v13747_v25 }
 0x7c2   : > { %9958 = vmatpush2.bf16.msra.mxu0 %v13742_v32  ;;  %v13816_v32 = vld [vmem:[#allocation11 + $0x18a4] ss:$24 sps:$4 sm:$0xff]  }
 0x7c3   : > { %9959 = vmatprep.subr.bf16.mxu0 %v13750_v63 }
 0x7c4   : > { %9997 = vmatpush1.bf16.msra.mxu1 %v13745_v55  ;;  %v13819_v55 = vld [vmem:[#allocation11 + $0x1bd4] ss:$24 sps:$4 sm:$0xff]  }
 0x7c5   : > { %9998 = vmatprep.subr.bf16.mxu1 %v13753_v36  ;;  %v16850_v36 = vpop.permute.xlu0 %10217 }
 0x7c6   : > { %9960 = vmatpush2.bf16.msra.mxu0 %v13748_v2  ;;  %v16852_v2 = vpop.permute.xlu1 %10236 }
 0x7c7   : > { %9961 = vmatprep.subr.bf16.mxu0 %v13756_v28  ;;  %v13822_v28 = vld [vmem:[#allocation11 + $0x1874] ss:$24 sps:$4 sm:$0xff]  }
 0x7c8   : > { %9999 = vmatpush2.bf16.msra.mxu1 %v13751_v10  ;;  %v13817_v10 = vld [vmem:[#allocation11 + $0x1bd0] ss:$24 sps:$4 sm:$0xff]  }
 0x7c9   : > { %10000 = vmatprep.subr.bf16.mxu1 %v13759_v21  ;;  %v13825_v21 = vld [vmem:[#allocation11 + $0x1ba4] ss:$24 sps:$4 sm:$0xff]  }
 0x7ca   : > { %9962 = vmatpush2.bf16.msra.mxu0 %v13754_v61  ;;  %v13820_v61 = vld [vmem:[#allocation11 + $0x1870] ss:$24 sps:$4 sm:$0xff]  }
 0x7cb   : > { %9963 = vmatprep.subr.bf16.mxu0 %v13762_v48  ;;  %v13828_v48 = vld [vmem:[#allocation11 + $0x1844] ss:$24 sps:$4 sm:$0xff]  }
 0x7cc   : > { %10001 = vmatpush2.bf16.msra.mxu1 %v13757_v58  ;;  %v16854_v58 = vpop.permute.xlu0 %10180 }
 0x7cd   : > { %10002 = vmatprep.subr.bf16.mxu1 %v13765_v44  ;;  %v13823_v44 = vld [vmem:[#allocation11 + $0x1ba0] ss:$24 sps:$4 sm:$0xff]  }
 0x7ce   : > { %9964 = vmatpush2.bf16.msra.mxu0 %v13760_v50  ;;  %v16856_v50 = vpop.permute.xlu1 %10198 }
 0x7cf   : > { %9965 = vmatprep.subr.bf16.mxu0 %v13768_v54  ;;  %v13831_v54 = vld [vmem:[#allocation11 + $0x1b74] ss:$24 sps:$4 sm:$0xff]  }
 0x7d0   : > { %10003 = vmatpush2.bf16.msra.mxu1 %v13763_v51  ;;  %v13826_v51 = vld [vmem:[#allocation11 + $0x1840] ss:$24 sps:$4 sm:$0xff]  }
 0x7d1   : > { %10004 = vmatprep.subr.bf16.mxu1 %v13771_v9  ;;  %v13834_v9 = vld [vmem:[#allocation11 + $0x1814] ss:$24 sps:$4 sm:$0xff]  }
 0x7d2   : > { %9966 = vmatpush2.bf16.msra.mxu0 %v13766_v35  ;;  %v13829_v35 = vld [vmem:[#allocation11 + $0x1b70] ss:$24 sps:$4 sm:$0xff]  }
 0x7d3   : > { %9967 = vmatprep.subr.bf16.mxu0 %v13774_v49  ;;  %v13837_v49 = vld [vmem:[#allocation11 + $0x1b44] ss:$24 sps:$4 sm:$0xff]  }
 0x7d4   : > { %10005 = vmatpush2.bf16.msra.mxu1 %v13769_v62  ;;  %v16858_v62 = vpop.permute.xlu0 %10143 }
 0x7d5   : > { %10006 = vmatprep.subr.bf16.mxu1 %v13777_v4  ;;  %v13832_v4 = vld [vmem:[#allocation11 + $0x1810] ss:$24 sps:$4 sm:$0xff]  }
 0x7d6   : > { %9968 = vmatpush2.bf16.msra.mxu0 %v13772_v42  ;;  %v16860_v42 = vpop.permute.xlu1 %10162 }
 0x7d7   : > { %9969 = vmatprep.subr.bf16.mxu0 %v13780_v31  ;;  %v13840_v31 = vld [vmem:[#allocation11 + $0x1ae4] ss:$24 sps:$4 sm:$0xff]  }
 0x7d8   : > { %10007 = vmatpush2.bf16.msra.mxu1 %v13775_v26  ;;  %v13835_v26 = vld [vmem:[#allocation11 + $0x1b40] ss:$24 sps:$4 sm:$0xff]  }
 0x7d9   : > { %10008 = vmatprep.subr.bf16.mxu1 %v13783_v29  ;;  %v13843_v29 = vld [vmem:[#allocation11 + $0x1b14] ss:$24 sps:$4 sm:$0xff]  }
 0x7da   : > { %9970 = vmatpush2.bf16.msra.mxu0 %v13778_v23  ;;  %v13838_v23 = vld [vmem:[#allocation11 + $0x1ae0] ss:$24 sps:$4 sm:$0xff]  }
 0x7db   : > { %9971 = vmatprep.subr.bf16.mxu0 %v13786_v24  ;;  %v13846_v24 = vld [vmem:[#allocation11 + $0x1ab4] ss:$24 sps:$4 sm:$0xff]  }
 0x7dc   : > { %10009 = vmatpush2.bf16.msra.mxu1 %v13781_v59  ;;  %v16862_v59 = vpop.permute.xlu0 %10105 }
 0x7dd   : > { %10010 = vmatprep.subr.bf16.mxu1 %v13789_v38  ;;  %v13841_v38 = vld [vmem:[#allocation11 + $0x1b10] ss:$24 sps:$4 sm:$0xff]  }
 0x7de   : > { %9972 = vmatpush2.bf16.msra.mxu0 %v13784_v18  ;;  %v16864_v18 = vpop.permute.xlu1 %10124 }
 0x7df   : > { %10023 = vmatprep.subr.bf16.mxu0 %v13792_v47  ;;  %v13849_v47 = vld [vmem:[#allocation11 + $0x1de4] ss:$24 sps:$4 sm:$0xff]  }
 0x7e0   : > { %10011 = vmatpush2.bf16.msra.mxu1 %v13787_v53  ;;  %v13844_v53 = vld [vmem:[#allocation11 + $0x1ab0] ss:$24 sps:$4 sm:$0xff]  }
 0x7e1   : > { %v9729_v0 = vpop.f32.mrf.mxu0  ;;  %9974 = vmatmul.mubr.bf16.vlgmr.msra.gmra.mxu0 %v16676_v11  ;;  %10012 = vmatprep.subr.bf16.mxu1 %v13795_v6  ;;  %v13810_v11 = vld [vmem:[#allocation11 + $0x18d4] ss:$24 sps:$4 sm:$0xff]   ;;  %v13852_v6 = vld [vmem:[#allocation11 + $0x1a84] ss:$24 sps:$4 sm:$0xff]  }
 0x7e2   : > { %10024 = vmatpush1.bf16.msra.mxu0 %v13790_v12  ;;  %10055 = vmatprep.mubr.bf16.mxu0 %v16678_v20  ;;  %v13805_v20 = vld [vmem:[#allocation11 + $0x1c30] ss:$24 sps:$4 sm:$0xff]   ;;  %v13847_v12 = vld [vmem:[#allocation11 + $0x1de0] ss:$24 sps:$4 sm:$0xff]  }
 0x7e3   : > { %v9731_v30 = vpop.f32.mrf.mxu0  ;;  %10025 = vmatprep.subr.bf16.mxu0 %v13798_v5  ;;  %v13855_v5 = vld [vmem:[#allocation11 + $0x1db4] ss:$24 sps:$4 sm:$0xff]  }
 0x7e4   : > { %10013 = vmatpush2.bf16.msra.mxu1 %v13793_v8  ;;  %v16866_v8 = vpop.permute.xlu0 %10219 }
 0x7e5   : > { %v9733_v46 = vpop.f32.mrf.mxu0  ;;  %10064 = vmatprep.subr.bf16.mxu1 %v13801_v19  ;;  %v10239_v19 = vpop.permute.xlu1 %10238 }
 0x7e6   : > { %10026 = vmatpush1.bf16.msra.mxu0 %v13796_v15  ;;  %v13858_v15 = vld [vmem:[#allocation11 + $0x1a54] ss:$24 sps:$4 sm:$0xff]   ;;  %v13864_v46 = vld [vmem:[#allocation11 + $0x1a24] ss:$24 sps:$4 sm:$0xff]  }
 0x7e7   : > { %v9734_v39 = vpop.f32.mrf.mxu0  ;;  %v9770_v3 = vpop.f32.mrf.mxu1  ;;  %10015 = vmatmul.mubr.bf16.vlgmr.msra.gmra.mxu1 %v16682_v57  ;;  %10027 = vmatprep.subr.bf16.mxu0 %v13804_v27  ;;  %v13811_v57 = vld [vmem:[#allocation11 + $0x1c00] ss:$24 sps:$4 sm:$0xff]   ;;  %v13861_v27 = vld [vmem:[#allocation11 + $0x1d84] ss:$24 sps:$4 sm:$0xff]  }
 0x7e8   : > { %v16845_v34 = vadd.f32 %v9770_v3, %v9729_v0  ;;  %10065 = vmatpush1.bf16.msra.mxu1 %v13799_v41  ;;  %10096 = vmatprep.mubr.bf16.mxu1 %v16684_v37  ;;  %v13814_v37 = vld [vmem:[#allocation11 + $0x18a0] ss:$24 sps:$4 sm:$0xff]   ;;  %v13856_v41 = vld [vmem:[#allocation11 + $0x1a50] ss:$24 sps:$4 sm:$0xff]   ;;  %v13867_v3 = vld [vmem:[#allocation11 + $0x1d54] ss:$24 sps:$4 sm:$0xff]  }
 0x7e9   : > { %v9772_v14 = vpop.f32.mrf.mxu1  ;;  %10066 = vmatprep.subr.bf16.mxu1 %v13807_v40  ;;  %v13850_v0 = vld [vmem:[#allocation11 + $0x1a80] ss:$24 sps:$4 sm:$0xff]   ;;  %v16868_v40 = vpop.permute.xlu0 %10182 }
 0x7ea   : > { %v16848_v7 = vadd.f32 %v9772_v14, %v9731_v30  ;;  %10028 = vmatpush1.bf16.msra.mxu0 %v13802_v16  ;;  %v13853_v30 = vld [vmem:[#allocation11 + $0x1db0] ss:$24 sps:$4 sm:$0xff]   ;;  %v13859_v16 = vld [vmem:[#allocation11 + $0x1d80] ss:$24 sps:$4 sm:$0xff]   ;;  %v16870_v39 = vpop.permute.xlu1 %10200 }
 0x7eb   : > { %v9774_v25 = vpop.f32.mrf.mxu1  ;;  %10029 = vmatprep.subr.bf16.mxu0 %v13810_v11  ;;  %v13862_v11 = vld [vmem:[#allocation11 + $0x1a20] ss:$24 sps:$4 sm:$0xff]   ;;  %v13865_v14 = vld [vmem:[#allocation11 + $0x1d50] ss:$24 sps:$4 sm:$0xff]  }
 0x7ec   : > { %10067 = vmatpush1.bf16.msra.mxu1 %v13805_v20  ;;  %v13870_v20 = vld [vmem:[#allocation11 + $0x19f4] ss:$24 sps:$4 sm:$0xff]   ;;  %v13868_v25 = vld [vmem:[#allocation11 + $0x19f0] ss:$24 sps:$4 sm:$0xff]  }
 0x7ed   : > { %v9775_v63 = vpop.f32.mrf.mxu1  ;;  %10068 = vmatprep.subr.bf16.mxu1 %v13813_v60  ;;  %v13873_v60 = vld [vmem:[#allocation11 + $0x1d24] ss:$24 sps:$4 sm:$0xff]  }
 0x7ee   : > { %10030 = vmatpush1.bf16.msra.mxu0 %v13808_v22  ;;  %v16872_v22 = vpop.permute.xlu0 %10164  ;;  %v13871_v63 = vld [vmem:[#allocation11 + $0x1d20] ss:$24 sps:$4 sm:$0xff]  }
 0x7ef   : > { %10031 = vmatprep.subr.bf16.mxu0 %v13816_v32  ;;  %v16874_v32 = vpop.permute.xlu1 %10145 }
 0x7f0   : > { %10069 = vmatpush1.bf16.msra.mxu1 %v13811_v57  ;;  %v13876_v57 = vld [vmem:[#allocation11 + $0x19c4] ss:$24 sps:$4 sm:$0xff]  }
 0x7f1   : > { %10070 = vmatprep.subr.bf16.mxu1 %v13819_v55  ;;  %v13879_v55 = vld [vmem:[#allocation11 + $0x1cf4] ss:$24 sps:$4 sm:$0xff]  }
 0x7f2   : > { %10032 = vmatpush1.bf16.msra.mxu0 %v13814_v37  ;;  %v13874_v37 = vld [vmem:[#allocation11 + $0x19c0] ss:$24 sps:$4 sm:$0xff]  }
 0x7f3   : > { %10033 = vmatprep.subr.bf16.mxu0 %v13822_v28  ;;  %v13882_v28 = vld [vmem:[#allocation11 + $0x1994] ss:$24 sps:$4 sm:$0xff]  }
 0x7f4   : > { %10071 = vmatpush1.bf16.msra.mxu1 %v13817_v10  ;;  %v16876_v10 = vpop.permute.xlu0 %10126 }
 0x7f5   : > { %10072 = vmatprep.subr.bf16.mxu1 %v13825_v21  ;;  %v13877_v21 = vld [vmem:[#allocation11 + $0x1cf0] ss:$24 sps:$4 sm:$0xff]  }
 0x7f6   : > { %10034 = vmatpush1.bf16.msra.mxu0 %v13820_v61  ;;  %v16878_v61 = vpop.permute.xlu1 %10107 }
 0x7f7   : > { %10035 = vmatprep.subr.bf16.mxu0 %v13828_v48  ;;  %v13885_v48 = vld [vmem:[#allocation11 + $0x1cc4] ss:$24 sps:$4 sm:$0xff]  }
 0x7f8   : > { %10073 = vmatpush1.bf16.msra.mxu1 %v13823_v44  ;;  %v13880_v44 = vld [vmem:[#allocation11 + $0x1990] ss:$24 sps:$4 sm:$0xff]  }
 0x7f9   : > { %10074 = vmatprep.subr.bf16.mxu1 %v13831_v54 }
 0x7fa   : > { %10036 = vmatpush1.bf16.msra.mxu0 %v13826_v51  ;;  %v13883_v51 = vld [vmem:[#allocation11 + $0x1cc0] ss:$24 sps:$4 sm:$0xff]  }
 0x7fb   : > { %10037 = vmatprep.subr.bf16.mxu0 %v13834_v9 }
 0x7fc   : > { %10075 = vmatpush1.bf16.msra.mxu1 %v13829_v35 }
 0x7fd   : > { %10076 = vmatprep.subr.bf16.mxu1 %v13837_v49  ;;  %v13888_v49 = vld [vmem:[#allocation11 + $0x1c94] ss:$24 sps:$4 sm:$0xff]  }
 0x7fe   : > { %10038 = vmatpush1.bf16.msra.mxu0 %v13832_v4  ;;  %v13886_v4 = vld [vmem:[#allocation11 + $0x1c90] ss:$24 sps:$4 sm:$0xff]  }
 0x7ff   : > { %10039 = vmatprep.subr.bf16.mxu0 %v13840_v31  ;;  %v10253_v31 = vsel %vm10248_vm9, %v16852_v2, %v10239_v19 }
 0x800   : > { %10077 = vmatpush1.bf16.msra.mxu1 %v13835_v26 }
 0x801   : > { %10078 = vmatprep.subr.bf16.mxu1 %v13843_v29 }
 0x802   : > { %10040 = vmatpush2.bf16.msra.mxu0 %v13838_v23 }
 0x803   : > { %10041 = vmatprep.subr.bf16.mxu0 %v13846_v24 }
 0x804   : > { %10079 = vmatpush1.bf16.msra.mxu1 %v13841_v38  ;;  %v10234_v38 = vsel %vm10229_vm10, %v16850_v36, %v16866_v8 }
 0x805   : > { %10080 = vmatprep.subr.bf16.mxu1 %v13849_v47 }
 0x806   : > { %10042 = vmatpush2.bf16.msra.mxu0 %v13844_v53 }
 0x807   : > { %10043 = vmatprep.subr.bf16.mxu0 %v13852_v6  ;;  %v10215_v6 = vsel %vm10210_vm11, %v16856_v50, %v16870_v39 }
 0x808   : > { %10081 = vmatpush2.bf16.msra.mxu1 %v13847_v12 }
 0x809   : > { %10082 = vmatprep.subr.bf16.mxu1 %v13855_v5  ;;  %v10196_v5 = vsel %vm764_vm3, %v16854_v58, %v16868_v40 }
 0x80a   : > { %10044 = vmatpush2.bf16.msra.mxu0 %v13850_v0 }
 0x80b   : > { %10045 = vmatprep.subr.bf16.mxu0 %v13858_v15 }
 0x80c   : > { %10083 = vmatpush2.bf16.msra.mxu1 %v13853_v30 }
 0x80d   : > { %10084 = vmatprep.subr.bf16.mxu1 %v13861_v27  ;;  %v10178_v27 = vsel %vm703_vm4, %v16860_v42, %v16872_v22 }
 0x80e   : > { %10046 = vmatpush2.bf16.msra.mxu0 %v13856_v41 }
 0x80f   : > { %10047 = vmatprep.subr.bf16.mxu0 %v13864_v46 }
 0x810   : > { %10085 = vmatpush2.bf16.msra.mxu1 %v13859_v16 }
 0x811   : > { %10086 = vmatprep.subr.bf16.mxu1 %v13867_v3 }
 0x812   : > { %10048 = vmatpush2.bf16.msra.mxu0 %v13862_v11 }
 0x813   : > { %10049 = vmatprep.subr.bf16.mxu0 %v13870_v20 }
 0x814   : > { %10087 = vmatpush2.bf16.msra.mxu1 %v13865_v14 }
 0x815   : > { %10088 = vmatprep.subr.bf16.mxu1 %v13873_v60 }
 0x816   : > { %10050 = vmatpush2.bf16.msra.mxu0 %v13868_v25 }
 0x817   : > { %10051 = vmatprep.subr.bf16.mxu0 %v13876_v57 }
 0x818   : > { %10089 = vmatpush2.bf16.msra.mxu1 %v13871_v63 }
 0x819   : > { %10090 = vmatprep.subr.bf16.mxu1 %v13879_v55 }
 0x81a   : > { %10052 = vmatpush2.bf16.msra.mxu0 %v13874_v37 }
 0x81b   : > { %10053 = vmatprep.subr.bf16.mxu0 %v13882_v28 }
 0x81c   : > { %10091 = vmatpush2.bf16.msra.mxu1 %v13877_v21  ;;  %v16881_v54 = vpop.permute.xlu0 %10240 }
 0x81d   : > { %v16883_v9 = vpop.permute.xlu1 %10221  ;;  %10092 = vmatprep.subr.bf16.mxu1 %v13885_v48  ;;  %v10252_v35 = vsel %vm10248_vm9, %v10239_v19, %v16881_v54 }
 0x81e   : > { %10054 = vmatpush2.bf16.msra.mxu0 %v13880_v44  ;;  %v10233_v24 = vsel %vm10229_vm10, %v16866_v8, %v16883_v9 }
 0x81f   : > { %10289 = vmatprep.subr.mxu0 %v10252_v35 }
 0x820   : > { %10093 = vmatpush2.bf16.msra.mxu1 %v13883_v51  ;;  %v16892_v26 = vpop.permute.xlu0 %10202 }
 0x821   : > { %v9811_v29 = vpop.f32.mrf.mxu0  ;;  %10056 = vmatmul.mubr.bf16.vlgmr.msra.gmra.mxu0 %v16696_v43  ;;  %10094 = vmatprep.subr.bf16.mxu1 %v13888_v49  ;;  %v16906_v47 = vpop.permute.xlu1 %10184 }
 0x822   : > { %v9812_v23 = vadd.f32 %v9811_v29, %v16845_v34  ;;  %10290 = vmatpush1.msra.mxu0 %v10253_v31  ;;  %10339 = vmatprep.mubr.f32.mxu0 %v17270_v52  ;;  %v10214_v34 = vsel %vm10210_vm11, %v16870_v39, %v16892_v26 }
 0x823   : > { %v9813_v43 = vpop.f32.mrf.mxu0  ;;  %10291 = vmatprep.subr.mxu0 %v10233_v24 }
 0x824   : > { %v9814_v53 = vadd.f32 %v9813_v43, %v16848_v7  ;;  %10095 = vmatpush2.bf16.msra.mxu1 %v13886_v4  ;;  %10292 = vmatpush1.msra.mxu0 %v10234_v38  ;;  %v10195_v7 = vsel %vm764_vm3, %v16868_v40, %v16906_v47 }
 0x825   : > { %v9815_v12 = vpop.f32.mrf.mxu0  ;;  %10293 = vmatprep.subr.mxu0 %v10214_v34 }
 0x826   : > { %10294 = vmatpush1.msra.mxu0 %v10215_v6 }
 0x827   : > { %v9816_v8 = vpop.f32.mrf.mxu0  ;;  %v9852_v0 = vpop.f32.mrf.mxu1  ;;  %10097 = vmatmul.mubr.bf16.vlgmr.msra.gmra.mxu1 %v16702_v56  ;;  %10295 = vmatprep.subr.mxu0 %v10195_v7 }
 0x828   : > { %v9853_v19 = vadd.f32 %v9852_v0, %v9812_v23  ;;  %10296 = vmatpush1.msra.mxu0 %v10196_v5  ;;  %10416 = vmatprep.mubr.f32.mxu1 %v17270_v52  ;;  %v10257_v8 = vld [vmem:[%s17211_s7] sm:$0xff]  ;;  %v10258_v0 = vld [vmem:[%s17211_s7 + $0x8] sm:$0xff] }
 0x829   : > { %v9854_v15 = vpop.f32.mrf.mxu1  ;;  %10297 = vmatprep.subr.mxu0 %v16757_v1 }
 0x82a   : > { %v9855_v30 = vadd.f32 %v9854_v15, %v9814_v53  ;;  %10298 = vmatpush1.msra.mxu0 %v16737_v33 }
 0x82b   : > { %v9856_v41 = vpop.f32.mrf.mxu1  ;;  %10299 = vmatprep.subr.mxu0 %v10178_v27 }
 0x82d   : > { %v9857_v46 = vpop.f32.mrf.mxu1 }
 0x861   : > { %v9893_v56 = vpop.f32.mrf.mxu0 }
 0x862   : > { %v9894_v40 = vadd.f32 %v9893_v56, %v9853_v19  ;;  %v10243_v19 = vpop.permute.xlu1 %10242 }
 0x863   : > { %v9895_v16 = vpop.f32.mrf.mxu0 }
 0x864   : > { %v9896_v39 = vadd.f32 %v9895_v16, %v9855_v30  ;;  %v10205_v30 = vpop.permute.xlu0 %10204 }
 0x865   : > { %v9897_v3 = vpop.f32.mrf.mxu0 }
 0x866   : > { %v10224_v15 = vpop.permute.xlu1 %10223 }
 0x867   : > { %v9898_v11 = vpop.f32.mrf.mxu0  ;;  %v9934_v20 = vpop.f32.mrf.mxu1 }
 0x868   : > { %v9935_v14 = vadd.f32 %v9934_v20, %v9894_v40  ;;  %v10251_v40 = vsel %vm10248_vm9, %v16881_v54, %v10243_v19  ;;  %v10232_v54 = vsel %vm10229_vm10, %v16883_v9, %v10224_v15  ;;  %v10160_v20 = vsel %vm10155_vm12, %v16858_v62, %v16874_v32 }
 0x869   : > { %v9936_v1 = vpop.f32.mrf.mxu1 }
 0x86a   : > { %v9937_v60 = vadd.f32 %v9936_v1, %v9896_v39  ;;  %v10187_v27 = vpop.permute.xlu1 %10186 }
 0x86b   : > { %v9938_v25 = vpop.f32.mrf.mxu1 }
 0x86c   : > { %v10194_v25 = vsel %vm764_vm3, %v16906_v47, %v10187_v27  ;;  %v10141_v47 = vsel %vm10136_vm13, %v16864_v18, %v16876_v10 }
 0x86d   : > { %v9939_v33 = vpop.f32.mrf.mxu1 }
 0x8a1   : > { %v9975_v57 = vpop.f32.mrf.mxu0 }
 0x8a2   : > { %v9976_v63 = vadd.f32 %v9975_v57, %v9935_v14  ;;  %v10213_v14 = vsel %vm10210_vm11, %v16892_v26, %v10205_v30 }
 0x8a3   : > { %v9977_v55 = vpop.f32.mrf.mxu0 }
 0x8a4   : > { %v9978_v37 = vadd.f32 %v9977_v55, %v9937_v60  ;;  %v17057_v55 = vld [vmem:[#allocation10] sm:$0xff] }
 0x8a5   : > { %v9979_v28 = vpop.f32.mrf.mxu0 }
 0x8a7   : > { %v9980_v21 = vpop.f32.mrf.mxu0  ;;  %v10016_v48 = vpop.f32.mrf.mxu1 }
 0x8a8   : > { %v10017_v31 = vadd.f32 %v10016_v48, %v9976_v63  ;;  %v17066_v21 = vld [vmem:[#allocation10 + $0x8] sm:$0xff] }
 0x8a9   : > { %v10018_v44 = vpop.f32.mrf.mxu1 }
 0x8aa   : > { %v10019_v43 = vadd.f32 %v10018_v44, %v9978_v37 }
 0x8ab   : > { %v10020_v51 = vpop.f32.mrf.mxu1 }
 0x8ad   : > { %v10021_v35 = vpop.f32.mrf.mxu1 }
 0x8e1   : > { %v10057_v49 = vpop.f32.mrf.mxu0 }
 0x8e2   : > { %v10058_v23 = vadd.f32 %v10057_v49, %v10017_v31 }
 0x8e3   : > { %v10059_v4 = vpop.f32.mrf.mxu0 }
 0x8e4   : > { %v10060_v6 = vadd.f32 %v10059_v4, %v10019_v43 }
 0x8e5   : > { %v10061_v29 = vpop.f32.mrf.mxu0 }
 0x8e7   : > { %v10062_v24 = vpop.f32.mrf.mxu0  ;;  %v10098_v38 = vpop.f32.mrf.mxu1 }
 0x8e8   : > { %v16933_v53 = vadd.f32 %v10098_v38, %v10058_v23 }
 0x8e9   : > { %v10100_v34 = vpop.f32.mrf.mxu1 }
 0x8ea   : > { %10244 = vrot.lane.b32.xlu0 %v16933_v53, %s14249_s6  ;;  %10206 = vrot.lane.b32.xlu1 %v16933_v53, %s14250_s30  ;;  %v16939_v7 = vadd.f32 %v10100_v34, %v10060_v6 }
 0x8eb   : > { %v10102_v12 = vpop.f32.mrf.mxu1 }
 0x8ed   : > { %v10103_v5 = vpop.f32.mrf.mxu1 }
 0x8ee   : > { %10225 = vrot.lane.b32.xlu0 %v16933_v53, %s14248_s4  ;;  %10172 = vrot.lane.b32.xlu1 %v16939_v7, %s14242_s26 }
 0x8f2   : > { %10188 = vrot.lane.b32.xlu0 %v16933_v53, %s14241_s25  ;;  %10134 = vrot.lane.b32.xlu1 %v16939_v7, %s14253_s20 }
 0x8f6   : > { %10153 = vrot.lane.b32.xlu0 %v16939_v7, %s14251_s1  ;;  %10166 = vrot.lane.b32.xlu1 %v16820_v45, %s14242_s26 }
 0x8fa   : > { %10115 = vrot.lane.b32.xlu0 %v16939_v7, %s14252_s8  ;;  %10147 = vrot.lane.b32.xlu1 %v16820_v45, %s14251_s1 }
 0x8fe   : > { %10168 = vrot.lane.b32.xlu0 %v16832_v17, %s14242_s26  ;;  %10170 = vrot.lane.b32.xlu1 %v16933_v53, %s14242_s26 }
 0x902   : > { %10149 = vrot.lane.b32.xlu0 %v16832_v17, %s14251_s1  ;;  %10246 = vrot.lane.b32.xlu1 %v16939_v7, %s14249_s6  ;;  %s17161_s6 = scalar_lea.hbm %s17214_s10, %s12246_s27 }
 0x906   : > { %10128 = vrot.lane.b32.xlu0 %v16820_v45, %s14253_s20  ;;  %10208 = vrot.lane.b32.xlu1 %v16939_v7, %s14250_s30  ;;  %s11046_s30 = scalar_lea.sflag [#allocation4], %s14465_s2 }
 0x90a   : > { %10227 = vrot.lane.b32.xlu0 %v16939_v7, %s14248_s4  ;;  %10130 = vrot.lane.b32.xlu1 %v16832_v17, %s14253_s20 }
 0x90e   : > { %10190 = vrot.lane.b32.xlu0 %v16939_v7, %s14241_s25  ;;  %10109 = vrot.lane.b32.xlu1 %v16820_v45, %s14252_s8 }
 0x912   : > { %10151 = vrot.lane.b32.xlu0 %v16933_v53, %s14251_s1  ;;  %10132 = vrot.lane.b32.xlu1 %v16933_v53, %s14253_s20  ;;  %s14147_s1 = scalar_lea.vmem %s17156_s29, 256 }
 0x913   : > { %p14148_p2 = scmp.ne.s32.totalorder %s17156_s29, %s14147_s1 }
 0x915   : > { %p14149_p8 = pnand %p14148_p2, %p17283_p6 }
 0x916   : > { %10111 = vrot.lane.b32.xlu0 %v16832_v17, %s14252_s8  ;;  %10261 = vperm.xlu1 %12448, %v10257_v8  }
 0x917   : > { %p14150_p9 = pneg %p14149_p8 }
 0x91a   : > { %10113 = vrot.lane.b32.xlu0 %v16933_v53, %s14252_s8  ;;  %s14151_s8 = sshll.u32 %s14254_s19, 4  ;;  %s14152_s8 = int_to_ptr.vmem [resolvable:$false] %s14151_s8 }
 0x91b   : > { %s14153_s20 = scalar_lea.vmem %s14152_s8, 512  ;;  %p14154_p13 = scmp.lt.s32.totalorder %s17156_s29, %s14152_s8 }
 0x91c   : > { %p14155_p1 = scmp.lt.s32.totalorder %s14153_s20, %s14147_s1 }
 0x91e   : > { %10266 = vperm.xlu0 %12447, %v10258_v0   ;;  %p14156_p4 = por %p14155_p1, %p14154_p13 }
 0x920   : > { %p14157_p7 = pnand %p14156_p4, %p14150_p9 }
 0x95c   : > { %v10245_v41 = vpop.permute.xlu0 %10244  ;;  %v16991_v46 = vpop.permute.xlu1 %10206 }
 0x95d   : > { %v10250_v56 = vsel %vm10248_vm9, %v10243_v19, %v10245_v41 }
 0x95e   : > { %10366 = vmatprep.subr.mxu1 %v10250_v56 }
 0x95f   : > { %10367 = vmatpush1.msra.mxu1 %v10251_v40  ;;  %v13891_v40 = vld [vmem:[#allocation13 + $0x70] sm:$0xff]  }
 0x960   : > { %v16999_v16 = vpop.permute.xlu0 %10225  ;;  %v17001_v39 = vpop.permute.xlu1 %10172 }
 0x961   : > { %v10179_v3 = vsel %vm703_vm4, %v17001_v39, %v16860_v42  ;;  %v10231_v11 = vsel %vm10229_vm10, %v10224_v15, %v16999_v16  ;;  %v10212_v42 = vsel %vm10210_vm11, %v10205_v30, %v16991_v46 }
 0x962   : > { %10300 = vmatpush1.msra.mxu0 %v10179_v3  ;;  %10368 = vmatprep.subr.mxu1 %v10231_v11  ;;  %v13892_v3 = vld [vmem:[#allocation13 + $0x30] sm:$0xff]   ;;  %v13893_v11 = vld [vmem:[#allocation13 + $0x68] sm:$0xff]  }
 0x963   : > { %10301 = vmatprep.subr.mxu0 %v10160_v20  ;;  %10369 = vmatpush1.msra.mxu1 %v10232_v54  ;;  %v13894_v54 = vld [vmem:[#allocation13 + $0x28] sm:$0xff]   ;;  %v13896_v20 = vld [vmem:[#allocation13 + $0x20] sm:$0xff]  }
 0x964   : > { %v17023_v1 = vpop.permute.xlu0 %10188  ;;  %10370 = vmatprep.subr.mxu1 %v10212_v42  ;;  %v17025_v9 = vpop.permute.xlu1 %10134  ;;  %v13897_v42 = vld [vmem:[#allocation13 + $0x58] sm:$0xff]  }
 0x965   : > { %10371 = vmatpush1.msra.mxu1 %v10213_v14  ;;  %v10193_v60 = vsel %vm764_vm3, %v10187_v27, %v17023_v1  ;;  %v13898_v14 = vld [vmem:[#allocation13 + $0x18] sm:$0xff]  }
 0x966   : > { %10372 = vmatprep.subr.mxu1 %v10193_v60  ;;  %v13902_v60 = vld [vmem:[#allocation13 + $0x8] sm:$0xff]  }
 0x967   : > { %10373 = vmatpush1.msra.mxu1 %v10194_v25  ;;  %v13903_v25 = vld [vmem:[#allocation13 + $0x40] sm:$0xff]  }
 0x968   : > { %v17034_v33 = vpop.permute.xlu0 %10153  ;;  %10374 = vmatprep.subr.mxu1 %v16832_v17  ;;  %v10167_v26 = vpop.permute.xlu1 %10166  ;;  %v10142_v17 = vsel %vm10136_vm13, %v17025_v9, %v16864_v18 }
 0x969   : > { %v10161_v57 = vsel %vm10155_vm12, %v17034_v33, %v16858_v62  ;;  %10375 = vmatpush1.msra.mxu1 %v16820_v45  ;;  %v10122_v45 = vsel %vm10117_vm14, %v16862_v59, %v16878_v61  ;;  %v10177_v44 = vsel %vm703_vm4, %v16872_v22, %v10167_v26 }
 0x96a   : > { %10302 = vmatpush1.msra.mxu0 %v10161_v57  ;;  %v13906_v57 = vld [vmem:[#allocation13 + $0xb8] sm:$0xff]  }
 0x96b   : > { %10303 = vmatprep.subr.mxu0 %v10141_v47  ;;  %v13907_v47 = vld [vmem:[#allocation13 + $0xf0] sm:$0xff]  }
 0x96c   : > { %v17051_v63 = vpop.permute.xlu0 %10115  ;;  %10304 = vmatpush1.msra.mxu0 %v10142_v17  ;;  %v10148_v62 = vpop.permute.xlu1 %10147  ;;  %v13908_v17 = vld [vmem:[#allocation13 + $0x178] sm:$0xff]  }
 0x96d   : > { %v10123_v37 = vsel %vm10117_vm14, %v17051_v63, %v16862_v59  ;;  %10305 = vmatprep.subr.mxu0 %v10122_v45  ;;  %v10159_v22 = vsel %vm10155_vm12, %v16874_v32, %v10148_v62  ;;  %v13913_v45 = vld [vmem:[#allocation13 + $0xa8] sm:$0xff]  }
 0x96e   : > { %10306 = vmatpush1.msra.mxu0 %v10123_v37  ;;  %v13917_v37 = vld [vmem:[#allocation13 + $0xa0] sm:$0xff]  }
 0x96f   : > { %12187 = vmatmul.mubr.msk.f32.vlgmr.msra.gmra.mxu0 %vm975_vm8, %v17057_v55 }
 0x970   : > { %v10169_v18 = vpop.permute.xlu0 %10168  ;;  %v10171_v28 = vpop.permute.xlu1 %10170  ;;  %10345 = vmatprep.mubr.f32.mxu0 %v17270_v52 }
 0x971   : > { %v10176_v48 = vsel %vm703_vm4, %v10167_v26, %v10169_v18  ;;  %v10175_v0 = vsel %vm703_vm4, %v10169_v18, %v10171_v28  ;;  %v13905_v26 = vld [vmem:[#allocation13 + $0xf8] sm:$0xff]  }
 0x972   : > { %10376 = vmatprep.subr.mxu1 %v10176_v48  ;;  %v13919_v18 = vld [vmem:[#allocation13 + $0xd8] sm:$0xff]   ;;  %v13925_v48 = vld [vmem:[#allocation13 + $0x90] sm:$0xff]  }
 0x973   : > { %12188 = vmatmul.mubr.msk.f32.gmra.mxu0 %vm975_vm8, %v17066_v21  ;;  %10377 = vmatpush1.msra.mxu1 %v10177_v44  ;;  %v13927_v44 = vld [vmem:[#allocation13 + $0xc8] sm:$0xff]  }
 0x974   : > { %v10150_v59 = vpop.permute.xlu0 %10149  ;;  %v10247_v51 = vpop.permute.xlu1 %10246  ;;  %10493 = vmatprep.mubr.f32.mxu0 %v17270_v52 }
 0x975   : > { %v10249_v35 = vsel %vm10248_vm9, %v10245_v41, %v10247_v51  ;;  %v10158_v49 = vsel %vm10155_vm12, %v10148_v62, %v10150_v59  ;;  %v10254_v4 = vsel %vm10248_vm9, %v10247_v51, %v16852_v2  ;;  %v13890_v41 = vld [vmem:[#allocation13 + $0x38] sm:$0xff]   ;;  %v13911_v62 = vld [vmem:[#allocation13 + $0xe8] sm:$0xff]   ;;  %v13931_v51 = vld [vmem:[#allocation13 + $0xc0] sm:$0xff]  }
 0x976   : > { %10378 = vmatprep.subr.mxu1 %v10158_v49  ;;  %10443 = vmatprep.subr.mxu0 %v10254_v4 }
 0x977   : > { %10379 = vmatpush1.msra.mxu1 %v10159_v22  ;;  %10444 = vmatpush1.msra.mxu0 %v10249_v35  ;;  %v13933_v35 = vld [vmem:[#allocation13 + $0x80] sm:$0xff]  }
 0x978   : > { %v10129_v31 = vpop.permute.xlu0 %10128  ;;  %v10209_v29 = vpop.permute.xlu1 %10208 }
 0x979   : > { %v10140_v32 = vsel %vm10136_vm13, %v16876_v10, %v10129_v31  ;;  %v10216_v34 = vsel %vm10210_vm11, %v10209_v29, %v16856_v50  ;;  %v10211_v6 = vsel %vm10210_vm11, %v16991_v46, %v10209_v29  ;;  %v10174_v50 = vsel %vm703_vm4, %v10171_v28, %v17001_v39  ;;  %v13921_v28 = vld [vmem:[#allocation13 + $0x98] sm:$0xff]  }
 0x97c   : > { %v10228_v23 = vpop.permute.xlu0 %10227  ;;  %v10131_v24 = vpop.permute.xlu1 %10130 }
 0x97d   : > { %v10230_v38 = vsel %vm10229_vm10, %v16999_v16, %v10228_v23  ;;  %v10139_v43 = vsel %vm10136_vm13, %v10129_v31, %v10131_v24  ;;  %v10235_v2 = vsel %vm10229_vm10, %v10228_v23, %v16850_v36 }
 0x97e   : > { %10380 = vmatprep.subr.mxu1 %v10139_v43  ;;  %10445 = vmatprep.subr.mxu0 %v10235_v2 }
 0x97f   : > { %10381 = vmatpush1.msra.mxu1 %v10140_v32  ;;  %10446 = vmatpush1.msra.mxu0 %v10230_v38 }
 0x980   : > { %v10191_v12 = vpop.permute.xlu0 %10190  ;;  %10447 = vmatprep.subr.mxu0 %v10216_v34  ;;  %v10110_v5 = vpop.permute.xlu1 %10109 }
 0x981   : > { %v10192_v36 = vsel %vm764_vm3, %v17023_v1, %v10191_v12  ;;  %10448 = vmatpush1.msra.mxu0 %v10211_v6  ;;  %v10197_v10 = vsel %vm764_vm3, %v10191_v12, %v16854_v58  ;;  %v10121_v46 = vsel %vm10117_vm14, %v16878_v61, %v10110_v5  ;;  %v13899_v1 = vld [vmem:[#allocation13 + $0x50] sm:$0xff]  }
 0x982   : > { %10449 = vmatprep.subr.mxu0 %v10197_v10 }
 0x983   : > { %10450 = vmatpush1.msra.mxu0 %v10192_v36 }
 0x984   : > { %v10152_v8 = vpop.permute.xlu0 %10151  ;;  %10451 = vmatprep.subr.mxu0 %v16939_v7  ;;  %v10133_v19 = vpop.permute.xlu1 %10132 }
 0x985   : > { %10452 = vmatpush1.msra.mxu0 %v16933_v53  ;;  %v10156_v58 = vsel %vm10155_vm12, %v10152_v8, %v17034_v33  ;;  %v10157_v15 = vsel %vm10155_vm12, %v10150_v59, %v10152_v8  ;;  %v13889_v53 = vld [vmem:[#allocation13 + $0x78] sm:$0xff]   ;;  %v10137_v27 = vsel %vm10136_vm13, %v10133_v19, %v17025_v9  ;;  %v10138_v56 = vsel %vm10136_vm13, %v10131_v24, %v10133_v19  ;;  %v13900_v9 = vld [vmem:[#allocation13 + $0x10] sm:$0xff]   ;;  %v13904_v33 = vld [vmem:[#allocation13] sm:$0xff]  }
 0x986   : > { %10453 = vmatprep.subr.mxu0 %v10174_v50  ;;  %v13929_v59 = vld [vmem:[#allocation13 + $0x88] sm:$0xff]  }
 0x987   : > { %10454 = vmatpush1.msra.mxu0 %v10175_v0  ;;  %v13910_v0 = vld [vmem:[#allocation13 + $0x138] sm:$0xff]  }
 0x988   : > { %v10112_v7 = vpop.permute.xlu0 %10111  ;;  %10455 = vmatprep.subr.mxu0 %v10156_v58  ;;  %v13912_v58 = vld [vmem:[#allocation13 + $0x170] sm:$0xff]  }
 0x989   : > { %10456 = vmatpush1.msra.mxu0 %v10157_v15  ;;  %v10120_v30 = vsel %vm10117_vm14, %v10110_v5, %v10112_v7  ;;  %v13914_v15 = vld [vmem:[#allocation13 + $0x130] sm:$0xff]  }
 0x98a   : > { %10382 = vmatprep.subr.mxu1 %v10120_v30  ;;  %10457 = vmatprep.subr.mxu0 %v10137_v27  ;;  %v13920_v30 = vld [vmem:[#allocation13 + $0x160] sm:$0xff]  }
 0x98b   : > { %10383 = vmatpush1.msra.mxu1 %v10121_v46  ;;  %10458 = vmatpush1.msra.mxu0 %v10138_v56  ;;  %v13922_v27 = vld [vmem:[#allocation13 + $0x120] sm:$0xff]   ;;  %v13926_v56 = vld [vmem:[#allocation13 + $0x118] sm:$0xff]  }
 0x98c   : > { %v10114_v16 = vpop.permute.xlu0 %10113  ;;  %12189 = vmatmul.mubr.msk.f32.vlgmr.msra.gmra.mxu1 %vm975_vm8, %v17057_v55  ;;  %12247 = vmatprep.subr.bf16.mxu1 %v13889_v53  ;;  %v13918_v53 = vld [vmem:[#allocation13 + $0x128] sm:$0xff]  }
 0x98d   : > { %v10119_v39 = vsel %vm10117_vm14, %v10112_v7, %v10114_v16  ;;  %v10118_v61 = vsel %vm10117_vm14, %v10114_v16, %v17051_v63  ;;  %10422 = vmatprep.mubr.f32.mxu1 %v17270_v52  ;;  %12248 = vmatpush3.bf16.msra.mxu1 %v13890_v41  ;;  %v13909_v63 = vld [vmem:[#allocation13 + $0xb0] sm:$0xff]   ;;  %v13916_v7 = vld [vmem:[#allocation13 + $0x168] sm:$0xff]   ;;  %v13924_v41 = vld [vmem:[#allocation13 + $0x158] sm:$0xff]  }
 0x98e   : > { %10459 = vmatprep.subr.mxu0 %v10118_v61  ;;  %12249 = vmatprep.subr.bf16.mxu1 %v13891_v40  ;;  %v13928_v40 = vld [vmem:[#allocation13 + $0x150] sm:$0xff]  }
 0x98f   : > { %10460 = vmatpush1.msra.mxu0 %v10119_v39 }
 0x990   : > { %12190 = vmatmul.mubr.msk.f32.gmra.mxu1 %vm975_vm8, %v17066_v21  ;;  %12191 = vmatmul.mubr.msk.f32.vlgmr.msra.gmra.mxu0 %vm975_vm8, %v17057_v55  ;;  %v13915_v55 = vld [vmem:[#allocation13 + $0xe0] sm:$0xff]  }
 0x991   : > { %10499 = vmatprep.mubr.f32.mxu0 %v17270_v52  ;;  %12250 = vmatpush3.bf16.msra.mxu1 %v13892_v3  ;;  %v13901_v52 = vld [vmem:[#allocation13 + $0x48] sm:$0xff]   ;;  %v10262_v4 = vpop.permute.xlu1 %10261 }
 0x992   : > { %12251 = vmatprep.subr.bf16.mxu1 %v13893_v11  ;;  %12269 = vmatprep.subr.bf16.mxu0 %v13905_v26 }
 0x993   : > { %12270 = vmatpush3.bf16.msra.mxu0 %v13906_v57  ;;  %v13934_v57 = vld [vmem:[#allocation13 + $0x108] sm:$0xff]  }
 0x994   : > { %12192 = vmatmul.mubr.msk.f32.gmra.mxu0 %vm975_vm8, %v17066_v21  ;;  %12271 = vmatprep.subr.bf16.mxu0 %v13907_v47  ;;  %v13923_v21 = vld [vmem:[#allocation13 + $0xd0] sm:$0xff]  }
 0x995   : > { %12252 = vmatpush3.bf16.msra.mxu1 %v13894_v54  ;;  %v13930_v54 = vld [vmem:[#allocation13 + $0x110] sm:$0xff]  }
 0x996   : > { %12253 = vmatprep.subr.bf16.mxu1 %v13895_v13 }
 0x997   : > { %12272 = vmatpush3.bf16.msra.mxu0 %v13909_v63  ;;  %v13935_v63 = vld [vmem:[#allocation13 + $0x140] sm:$0xff]  }
 0x998   : > { %12273 = vmatprep.subr.bf16.mxu0 %v13911_v62 }
 0x999   : > { %12254 = vmatpush3.bf16.msra.mxu1 %v13896_v20  ;;  %v17146_v29 = vpop.permute.xlu0 %10266  ;;  %v13932_v20 = vld [vmem:[#allocation13 + $0x148] sm:$0xff]  }
 0x99a   : > { %12255 = vmatprep.subr.bf16.mxu1 %v13897_v42 }
 0x99b   : > { %12274 = vmatpush3.bf16.msra.mxu0 %v13913_v45 }
 0x99c   : > { %12275 = vmatprep.subr.bf16.mxu0 %v13915_v55 }
 0x99d   : > { %12256 = vmatpush3.bf16.msra.mxu1 %v13898_v14 }
 0x99e   : > { %12257 = vmatprep.subr.bf16.mxu1 %v13899_v1 }
 0x99f   : > { %12276 = vmatpush3.bf16.msra.mxu0 %v13917_v37 }
 0x9a0   : > { %12277 = vmatprep.subr.bf16.mxu0 %v13919_v18 }
 0x9a1   : > { %12258 = vmatpush3.bf16.msra.mxu1 %v13900_v9 }
 0x9a2   : > { %12259 = vmatprep.subr.bf16.mxu1 %v13901_v52 }
 0x9a3   : > { %12278 = vmatpush3.bf16.msra.mxu0 %v13921_v28 }
 0x9a4   : > { %12279 = vmatprep.subr.bf16.mxu0 %v13923_v21 }
 0x9a5   : > { %12260 = vmatpush3.bf16.msra.mxu1 %v13902_v60 }
 0x9a6   : > { %12261 = vmatprep.subr.bf16.mxu1 %v13903_v25 }
 0x9a7   : > { %12280 = vmatpush3.bf16.msra.mxu0 %v13925_v48 }
 0x9a8   : > { %12281 = vmatprep.subr.bf16.mxu0 %v13927_v44 }
 0x9a9   : > { %12262 = vmatpush3.bf16.msra.mxu1 %v13904_v33 }
 0x9aa   : > { %12291 = vmatprep.subr.bf16.mxu1 %v13908_v17 }
 0x9ab   : > { %12282 = vmatpush3.bf16.msra.mxu0 %v13929_v59  ;;  %v13936_v59 = vld [vmem:[#allocation13 + $0x100] sm:$0xff]  }
 0x9ac   : > { %12283 = vmatprep.subr.bf16.mxu0 %v13931_v51 }
 0x9af   : > { %12284 = vmatpush3.bf16.msra.mxu0 %v13933_v35 }
 0xa2f   : > { %v10341_v49 = vpop.f32.mrf.mxu0 }
 0xa30   : > { %v10342_v23 = vadd.f32 %v10341_v49, %v10262_v4 }
 0xa31   : > { %v10343_v22 = vpop.f32.mrf.mxu0 }
 0xa32   : > { %v10344_v31 = vadd.f32 %v10343_v22, %v10262_v4  ;;  %v10506_v6 = vmul.f32 0.2, %v10342_v23 }
 0xa33   : > { %v10347_v24 = vpop.f32.mrf.mxu0 }
 0xa34   : > { %v10348_v38 = vadd.f32 %v10347_v24, %v17146_v29  ;;  %v10507_v2 = vmul.f32 0.2, %v10344_v31  ;;  %v10518_v8 = vmax.f32 %v10342_v23, %v10506_v6 }
 0xa35   : > { %v10349_v43 = vpop.f32.mrf.mxu0 }
 0xa36   : > { %v10512_v32 = vmul.f32 0.2, %v10348_v38  ;;  %v10350_v34 = vadd.f32 %v10349_v43, %v17146_v29  ;;  %v10519_v36 = vmax.f32 %v10344_v31, %v10507_v2 }
 0xa38   : > { %v10513_v12 = vmul.f32 0.2, %v10350_v34  ;;  %v10524_v5 = vmax.f32 %v10348_v38, %v10512_v32 }
 0xa3a   : > { %v10525_v10 = vmax.f32 %v10350_v34, %v10513_v12  ;;  %v10530_v19 = vpack.c.bf16 %v10524_v5, %v10518_v8 }
 0xa3c   : > { %v10531_v50 = vpack.c.bf16 %v10525_v10, %v10519_v36 }
 0xa3e   : > { %10952 = vmatprep.mubr.bf16.mxu1 %v10531_v50 }
 0xa3f   : > { %10953 = vmatmul.mubr.bf16.vlgmr.msra.gmra.mxu1 %v10530_v19 }
 0xa40   : > { %12292 = vmatpush3.bf16.msra.mxu1 %v13910_v0 }
 0xa41   : > { %12293 = vmatprep.subr.bf16.mxu1 %v13912_v58 }
 0xa44   : > { %12294 = vmatpush3.bf16.msra.mxu1 %v13914_v15 }
 0xa45   : > { %12295 = vmatprep.subr.bf16.mxu1 %v13916_v7 }
 0xa48   : > { %12296 = vmatpush3.bf16.msra.mxu1 %v13918_v53 }
 0xa49   : > { %12297 = vmatprep.subr.bf16.mxu1 %v13920_v30 }
 0xa4c   : > { %v10418_v46 = vpop.f32.mrf.mxu1  ;;  %12298 = vmatpush3.bf16.msra.mxu1 %v13922_v27 }
 0xa4d   : > { %12299 = vmatprep.subr.bf16.mxu1 %v13924_v41  ;;  %v10419_v61 = vadd.f32 %v10418_v46, %v10262_v4 }
 0xa4e   : > { %v10420_v16 = vpop.f32.mrf.mxu1 }
 0xa4f   : > { %v10421_v39 = vadd.f32 %v10420_v16, %v10262_v4  ;;  %v10508_v60 = vmul.f32 0.2, %v10419_v61 }
 0xa50   : > { %v10424_v3 = vpop.f32.mrf.mxu1  ;;  %v10495_v11 = vpop.f32.mrf.mxu0  ;;  %12300 = vmatpush3.bf16.msra.mxu1 %v13926_v56 }
 0xa51   : > { %v10425_v13 = vadd.f32 %v10424_v3, %v17146_v29  ;;  %12301 = vmatprep.subr.bf16.mxu1 %v13928_v40  ;;  %v10509_v42 = vmul.f32 0.2, %v10421_v39  ;;  %v10496_v25 = vadd.f32 %v10495_v11, %v10262_v4  ;;  %v10520_v48 = vmax.f32 %v10419_v61, %v10508_v60 }
 0xa52   : > { %v10426_v14 = vpop.f32.mrf.mxu1  ;;  %v10497_v1 = vpop.f32.mrf.mxu0 }
 0xa53   : > { %v10514_v9 = vmul.f32 0.2, %v10425_v13  ;;  %v10427_v52 = vadd.f32 %v10426_v14, %v17146_v29  ;;  %v10498_v33 = vadd.f32 %v10497_v1, %v10262_v4  ;;  %v10521_v62 = vmax.f32 %v10421_v39, %v10509_v42 }
 0xa54   : > { %v10501_v26 = vpop.f32.mrf.mxu0  ;;  %12302 = vmatpush3.bf16.msra.mxu1 %v13930_v54  ;;  %v10510_v44 = vmul.f32 0.2, %v10496_v25 }
 0xa55   : > { %v10515_v47 = vmul.f32 0.2, %v10427_v52  ;;  %v10502_v17 = vadd.f32 %v10501_v26, %v17146_v29  ;;  %12303 = vmatprep.subr.bf16.mxu1 %v13932_v20  ;;  %v10526_v45 = vmax.f32 %v10425_v13, %v10514_v9  ;;  %v10511_v18 = vmul.f32 0.2, %v10498_v33 }
 0xa56   : > { %v10503_v55 = vpop.f32.mrf.mxu0  ;;  %v10522_v23 = vmax.f32 %v10496_v25, %v10510_v44 }
 0xa57   : > { %v10527_v37 = vmax.f32 %v10427_v52, %v10515_v47  ;;  %v10516_v28 = vmul.f32 0.2, %v10502_v17  ;;  %v10504_v21 = vadd.f32 %v10503_v55, %v17146_v29  ;;  %v10532_v49 = vpack.c.bf16 %v10526_v45, %v10520_v48 }
 0xa58   : > { %12304 = vmatpush3.bf16.msra.mxu1 %v13934_v57  ;;  %v10523_v22 = vmax.f32 %v10498_v33, %v10511_v18 }
 0xa59   : > { %v10517_v51 = vmul.f32 0.2, %v10504_v21  ;;  %v10533_v35 = vpack.c.bf16 %v10527_v37, %v10521_v62  ;;  %12305 = vmatprep.subr.bf16.mxu1 %v13935_v63  ;;  %v10528_v4 = vmax.f32 %v10502_v17, %v10516_v28 }
 0xa5b   : > { %v10529_v31 = vmax.f32 %v10504_v21, %v10517_v51  ;;  %10993 = vmatprep.mubr.bf16.mxu0 %v10533_v35  ;;  %v10534_v38 = vpack.c.bf16 %v10528_v4, %v10522_v23 }
 0xa5c   : > { %10994 = vmatmul.mubr.bf16.vlgmr.msra.gmra.mxu0 %v10532_v49  ;;  %12306 = vmatpush3.bf16.msra.mxu1 %v13936_v59 }
 0xa5d   : > { %v10535_v24 = vpack.c.bf16 %v10529_v31, %v10523_v22 }
 0xa5f   : > { %11034 = vmatprep.mubr.bf16.mxu1 %v10535_v24 }
 0xa60   : > { %11035 = vmatmul.mubr.bf16.vlgmr.msra.gmra.mxu1 %v10534_v38 }
 0xaff   : > { %v12263_v29 = vpop.f32.mrf.mxu1 }
 0xb01   : > { %v12264_v43 = vpop.f32.mrf.mxu1 }
 0xb02   : > { %v12265_v10 = vadd.f32 %v12264_v43, %v12263_v29 }
 0xb03   : > { %v12266_v2 = vpop.f32.mrf.mxu1 }
 0xb05   : > { %v12267_v34 = vpop.f32.mrf.mxu1 }
 0xb06   : > { %v12268_v7 = vadd.f32 %v12267_v34, %v12266_v2 }
 0xb1c   : > { %v12285_v32 = vpop.f32.mrf.mxu0 }
 0xb1e   : > { %v12286_v6 = vpop.f32.mrf.mxu0 }
 0xb1f   : > { %v12287_v12 = vadd.f32 %v12286_v6, %v12285_v32 }
 0xb20   : > { %v12288_v5 = vpop.f32.mrf.mxu0  ;;  %v12307_v36 = vpop.f32.mrf.mxu1 }
 0xb21   : > { %v10996_v0 = vadd.f32 %v12287_v12, %v12265_v10 }
 0xb22   : > { %v12289_v8 = vpop.f32.mrf.mxu0  ;;  %v12308_v50 = vpop.f32.mrf.mxu1 }
 0xb23   : > { %v12290_v19 = vadd.f32 %v12289_v8, %v12288_v5  ;;  %v12309_v58 = vadd.f32 %v12308_v50, %v12307_v36 }
 0xb24   : > { %v12310_v15 = vpop.f32.mrf.mxu1 }
 0xb25   : > { %v11037_v53 = vadd.f32 %v12309_v58, %v10996_v0  ;;  %v10999_v27 = vadd.f32 %v12290_v19, %v12268_v7 }
 0xb26   : > { %v12311_v30 = vpop.f32.mrf.mxu1 }
 0xb27   : > { %11043 = vst [vmem:[%s456_s11] sm:$0xff] %v11037_v53  ;;  %v12312_v41 = vadd.f32 %v12311_v30, %v12310_v15 }
 0xb29   : > { %v11040_v46 = vadd.f32 %v12312_v41, %v10999_v27 }
 0xb2b   : > { %11044 = vst [vmem:[%s456_s11 + $0x8] sm:$0xff] %v11040_v46 }
 0xb2c   : > { %14160 = shalt.err (!%p14157_p7)
}
 0xb2d   : > { %s14161_s26 = scalar_lea.hbm %s17161_s6, 256  ;;  %s14165_s21 = scalar_lea.hbm %s17214_s10, 512 }
 0xb2e   : > { %p14162_p5 = scmp.ne.s32.totalorder %s17161_s6, %s14161_s26  ;;  %p14166_p12 = scmp.lt.s32.totalorder %s17161_s6, %s17214_s10 }
 0xb2f   : > { %p14167_p3 = scmp.lt.s32.totalorder %s14165_s21, %s14161_s26 }
 0xb30   : > { %p14163_p10 = pnand %p14162_p5, %p17283_p6 }
 0xb31   : > { %p14168_p0 = por %p14167_p3, %p14166_p12 }
 0xb32   : > { %p14164_p11 = pneg %p14163_p10 }
 0xb34   : > { %p14169_p2 = pnand %p14168_p0, %p14164_p11 }
 0xb36   : > { %14172 = shalt.err (!%p14169_p2)
}
 0xb37   : > { %s14255_s27 = smov 128   ;;  %s14256_s18 = smov 8  }
 0xb38   : > { %12342 = dma.vmem_to_hbm [thread:$0]  (%p17283_p6), %s17156_s29, 256, %s17161_s6, %s11046_s30, %s14255_s27, %s14255_s27, %s14256_s18  }
 0xb39 PF: > { %s11074_s4 = sand.u32 1, %s14211_s13   ;;  %p17284_p8 = scmp.ne.s32.totalorder %s17249_s28, 0 }
 0xb3a   : > { %p17285_p9 = scmp.ge.s32.totalorder %s14223_s16, 2  ;;  %s11075_s1 = scalar_lea.sflag [#allocation4], %s11074_s4 }
 0xb3c   : > { %p12368_p13 = pnand %p17285_p9, %p17284_p8 }
 0xb3e   : > { %p12369_p1 = pneg %p12368_p13 }
 0xb40   : > { %14206 = dma.done.wait (%p12369_p1), %s11075_s1, 256  }
 0xb41   : > { %14208 = vsyncadd (%p12369_p1), %s11075_s1, 4294967040  ;;  %p26_p4 = scmp.ge.s32.totalorder %s14408_s24, 4   ;;  %s17286_s13 = smov %s14215_s14 }
 0xb42   : > { %s17287_s14 = smov %s14219_s15  ;;  %s17288_s15 = smov %s14419_s23 }
 0xb43   : > { %s17289_s16 = smov %s14408_s24  ;;  %28 = sbr.rel (!%p26_p4) target bundleno = 14 (0xe), region = 129 }
 0xb48   :  { %11080 = vsyncpa [#allocation3], 1 }
 0xb49   :  { %11082 = vsyncpa [#allocation3 + $0x1], 1 }
 0xb4a   :  { %11083 = vsyncpa [#allocation6], 1 }
 0xb4b   :  { %11084 = vsyncpa [#allocation9], 1 }
 0xb4c   :  { %11085 = vsyncpa [#allocation12], 1 }
 0xb4d   :  { %11086 = vsyncpa [#allocation4], 1 }
 0xb4e   :  { %11088 = vsyncpa [#allocation4 + $0x1], 1 }

</bundles_post_ra>
